<compile_context>
chip_gen: v7x
topology: tpu7x:2x2x1
jax: 0.10.0
libtpu: 0.0.40
codegen_flags: <defaults>
</compile_context>

<pallas_src>
import functools
import numpy as np
import jax
import jax.numpy as jnp
from jax.experimental import pallas as pl
from jax.experimental.pallas import tpu as pltpu


PAD_C = 128   # lane-dense output-channel padding for the conv / head GEMMs


def _round_up(x, m):
    return ((x + m - 1) // m) * m


def _compute_vmem_limit():
    """Generation-aware VMEM budget: ~3/4 of per-core VMEM, capped at 100 MiB.
    v5e/v6e (128 MiB) -> ~96 MiB; v7x (64 MiB/TC) -> ~48 MiB."""
    try:
        cap = int(pltpu.get_tpu_info().vmem_capacity_bytes)
    except Exception:
        cap = 64 * 1024 * 1024
    return int(min(cap * 3 // 4, 100 * 1024 * 1024))


_VMEM_LIMIT = _compute_vmem_limit()


def _choose_tiles(M, tm_max):
    """Pick TM (multiple of 16) and Mp (multiple of TM, no ragged edge block).

    If the whole problem would fit in one M tile but is big enough to split,
    halve TM so the 'parallel' M axis has >= 2 tiles (keeps v7x's second
    TensorCore busy; harmless on single-TC v5e/v6e)."""
    Mp = _round_up(max(M, 16), 16)
    TM = min(tm_max, Mp)
    if Mp <= TM and Mp >= 64:
        TM = _round_up(TM // 2, 16)
    Mp = _round_up(M, TM)
    return TM, Mp


# ----------------------------- Pallas kernels ------------------------------ #
def _gemm_bias_act_kernel(x_ref, w_ref, b_ref, o_ref, *, relu):
    """One (TM, K) x (K, N) GEMM step: y = act(x @ w + b), f32 accumulation,
    f32 epilogue (bias + ReLU), store cast to o_ref.dtype (bf16 for convs)."""
    y = jnp.dot(x_ref[...], w_ref[...], preferred_element_type=jnp.float32)
    y = y + b_ref[...]
    if relu:
        y = jnp.maximum(y, 0.0)
    o_ref[...] = y.astype(o_ref.dtype)


def _fc_heads_kernel(x_ref, wfc_ref, bfc_ref, wh_ref, bh_ref, f_ref, h_ref):
    """Fused FC (3136->512, ReLU) + actor/critic heads (512->A+1, lane-padded).

    The FC weight block index is constant, so the (6272,512) bf16 weight stays
    VMEM-resident across M tiles.  Epilogue math is f32 (v5e has no bf16 VPU);
    only the MXU operands for the head GEMM are re-cast to bf16."""
    y = jnp.dot(x_ref[...], wfc_ref[...], preferred_element_type=jnp.float32)
    y = jnp.maximum(y + bfc_ref[...], 0.0)
    f_ref[...] = y.astype(f_ref.dtype)
    z = jnp.dot(y.astype(jnp.bfloat16), wh_ref[...],
                preferred_element_type=jnp.float32)
    h_ref[...] = (z + bh_ref[...]).astype(h_ref.dtype)


# ------------------------------ kernel wrappers ---------------------------- #
def pallas_gemm(x, w, b, *, relu=False, out_dtype=jnp.float32, tm=512):
    """y = act(x @ w + b).  x:(M,K) bf16, w:(K,N) bf16, b:(N,) f32 -> (M,N).

    K and N must be multiples of 128 (weights are pre-padded at init); M is
    padded here to a whole number of TM tiles so every block is full."""
    M, K = x.shape
    K2, N = w.shape
    assert K == K2 and b.shape[0] == N
    assert N % 128 == 0 and K % 128 == 0, "pre-pad weights to 128-aligned K/N"

    TM, Mp = _choose_tiles(M, tm)
    if Mp != M:
        x = jnp.pad(x, ((0, Mp - M), (0, 0)))
    grid = (Mp // TM,)

    out_itemsize = jnp.dtype(out_dtype).itemsize
    cost = pl.CostEstimate(
        flops=2 * Mp * K * N,
        transcendentals=0,
        bytes_accessed=(Mp * K * x.dtype.itemsize + K * N * w.dtype.itemsize
                        + N * 4 + Mp * N * out_itemsize))

    out = pl.pallas_call(
        functools.partial(_gemm_bias_act_kernel, relu=relu),
        out_shape=jax.ShapeDtypeStruct((Mp, N), out_dtype),
        grid=grid,
        in_specs=[
            pl.BlockSpec((TM, K), lambda i: (i, 0)),
            pl.BlockSpec((K, N), lambda i: (0, 0)),     # weight VMEM-resident
            pl.BlockSpec((1, N), lambda i: (0, 0)),
        ],
        out_specs=pl.BlockSpec((TM, N), lambda i: (i, 0)),
        compiler_params=pltpu.CompilerParams(
            dimension_semantics=("parallel",),
            vmem_limit_bytes=_VMEM_LIMIT),
        cost_estimate=cost,
    )(x, w, b.reshape(1, N))
    return out[:M] if Mp != M else out


def fc_heads(flat, wfc, bfc, wh, bh, *, tm=512):
    """Fused FC + heads.  flat:(M,6272) bf16 -> (feats (M,512) f32,
    head_out (M,128) f32 = [actor logits | critic value | zero pad])."""
    M, K = flat.shape
    Kf, Nf = wfc.shape
    Nf2, Nh = wh.shape
    assert K == Kf and Nf == Nf2 and bfc.shape[0] == Nf and bh.shape[0] == Nh
    assert K % 128 == 0 and Nf % 128 == 0 and Nh % 128 == 0

    TM, Mp = _choose_tiles(M, tm)
    if Mp != M:
        flat = jnp.pad(flat, ((0, Mp - M), (0, 0)))
    grid = (Mp // TM,)

    cost = pl.CostEstimate(
        flops=2 * Mp * K * Nf + 2 * Mp * Nf * Nh,
        transcendentals=0,
        bytes_accessed=(Mp * K * 2 + K * Nf * 2 + Nf * 4 + Nf * Nh * 2 + Nh * 4
                        + Mp * Nf * 4 + Mp * Nh * 4))

    feats, head_out = pl.pallas_call(
        _fc_heads_kernel,
        out_shape=(jax.ShapeDtypeStruct((Mp, Nf), jnp.float32),
                   jax.ShapeDtypeStruct((Mp, Nh), jnp.float32)),
        grid=grid,
        in_specs=[
            pl.BlockSpec((TM, K), lambda i: (i, 0)),
            pl.BlockSpec((K, Nf), lambda i: (0, 0)),    # FC weight resident
            pl.BlockSpec((1, Nf), lambda i: (0, 0)),
            pl.BlockSpec((Nf, Nh), lambda i: (0, 0)),   # head weight resident
            pl.BlockSpec((1, Nh), lambda i: (0, 0)),
        ],
        out_specs=(pl.BlockSpec((TM, Nf), lambda i: (i, 0)),
                   pl.BlockSpec((TM, Nh), lambda i: (i, 0))),
        compiler_params=pltpu.CompilerParams(
            dimension_semantics=("parallel",),
            vmem_limit_bytes=_VMEM_LIMIT),
        cost_estimate=cost,
    )(flat, wfc, bfc.reshape(1, Nf), wh, bh.reshape(1, Nh))
    if Mp != M:
        feats, head_out = feats[:M], head_out[:M]
    return feats, head_out


# ------------------------------- JAX glue ---------------------------------- #
def _im2col_nhwc(x, kh, kw, stride, c_take, k_pad):
    """NHWC (possibly channel-padded) -> (B*OH*OW, k_pad) bf16 patches.
    Columns beyond kh*kw*c_take are zero-padded so K is 128-aligned."""
    B, H, W, _ = x.shape
    OH = (H - kh) // stride + 1
    OW = (W - kw) // stride + 1
    cols = []
    for i in range(kh):
        for j in range(kw):
            cols.append(x[:, i:i + stride * OH:stride,
                          j:j + stride * OW:stride, :c_take])
    cols = jnp.stack(cols, axis=3)                     # (B, OH, OW, KH*KW, C)
    cols = cols.reshape(B * OH * OW, kh * kw * c_take)
    if k_pad > cols.shape[1]:
        cols = jnp.pad(cols, ((0, 0), (0, k_pad - cols.shape[1])))
    return cols, OH, OW


def conv2d_relu(x_nhwc, w_mat, b_vec, *, stride, kh, kw, c_real):
    """Conv2d+ReLU as a patch GEMM.  bf16 in, bf16 out, NHWC with C padded
    to 128 lanes (so the next layer's im2col / flatten needs no transpose)."""
    # TODO(synk): move the patch extraction in-kernel (manual DMA over NHWC
    # rows with memory_space=pl.ANY) to avoid materializing the expanded
    # patch matrix in HBM at large batch.
    B = x_nhwc.shape[0]
    cols, OH, OW = _im2col_nhwc(x_nhwc, kh, kw, stride, c_real, w_mat.shape[0])
    y = pallas_gemm(cols, w_mat, b_vec, relu=True, out_dtype=jnp.bfloat16)
    return y.reshape(B, OH, OW, w_mat.shape[1])


def network(prep, x_nchw):
    """Scale(1/255) -> 3 convs (ReLU) -> Flatten -> Linear+ReLU, with the
    actor/critic heads fused into the FC kernel.  Returns (feats, head_out)."""
    # bf16 cast of raw frames is exact for integer 0-255 pixel values; the
    # 1/255 scale is folded into conv1's (bf16) weights.
    x = jnp.transpose(x_nchw.astype(jnp.bfloat16), (0, 2, 3, 1))  # NCHW->NHWC once
    h = conv2d_relu(x, prep["w1m"], prep["b1p"], stride=4, kh=8, kw=8, c_real=4)
    h = conv2d_relu(h, prep["w2m"], prep["b2p"], stride=2, kh=4, kw=4, c_real=32)
    h = conv2d_relu(h, prep["w3m"], prep["b3p"], stride=1, kh=3, kw=3, c_real=64)
    B = h.shape[0]
    # wfcm rows are permuted to the NHWC flatten order with zero rows for the
    # padded channels, so this flatten is a pure reshape (K = 49*128 = 6272).
    flat = h.reshape(B, -1)                                       # bf16
    return fc_heads(flat, prep["wfcm"], prep["bfc"], prep["whm"], prep["bhp"])


def forward(prep, x_nchw):
    """ActorCritic.forward -> (B, 512) features."""
    return network(prep, x_nchw)[0]


def forward_with_heads(prep, x_nchw, *, action_space):
    feats, head_out = network(prep, x_nchw)
    return feats, head_out[:, :action_space], head_out[:, action_space:action_space + 1]


def act(prep, x_nchw, key, *, action_space, action=None):
    # TODO(synk): Categorical sampling / log_prob / entropy stay in plain JAX
    # (jax.random.categorical / jax.nn.log_softmax); not a kernel op.
    _, logits, values = forward_with_heads(prep, x_nchw, action_space=action_space)
    logp = jax.nn.log_softmax(logits, axis=-1)
    if action is None:
        action = jax.random.categorical(key, logits, axis=-1)
    log_prob = jnp.take_along_axis(logp, action[:, None], axis=-1)[:, 0]
    entropy = -jnp.sum(jnp.exp(logp) * logp, axis=-1)
    return action, log_prob, values, entropy


# --------------------------- parameter init -------------------------------- #
def _orthogonal(key, shape, scale):
    rows = shape[0]
    cols = int(np.prod(shape[1:]))
    a = jax.random.normal(key, (rows, cols), jnp.float32)
    if rows < cols:
        a = a.T
    q, r = jnp.linalg.qr(a)
    q = q * jnp.sign(jnp.diag(r))
    if rows < cols:
        q = q.T
    return (scale * q).reshape(shape).astype(jnp.float32)


def init_params(key, action_space):
    ks = jax.random.split(key, 6)
    s2 = float(np.sqrt(2))
    return {
        "w1": _orthogonal(ks[0], (32, 4, 8, 8), s2),   "b1": jnp.zeros((32,), jnp.float32),
        "w2": _orthogonal(ks[1], (64, 32, 4, 4), s2),  "b2": jnp.zeros((64,), jnp.float32),
        "w3": _orthogonal(ks[2], (64, 64, 3, 3), s2),  "b3": jnp.zeros((64,), jnp.float32),
        "wfc": _orthogonal(ks[3], (512, 3136), s2),    "bfc": jnp.zeros((512,), jnp.float32),
        "wa": _orthogonal(ks[4], (action_space, 512), 0.01), "ba": jnp.zeros((action_space,), jnp.float32),
        "wc": _orthogonal(ks[5], (1, 512), 1.0),       "bc": jnp.zeros((1,), jnp.float32),
    }


def prepare_params(raw, action_space):
    """All weight layout work done once: transpose to (K, N) patch-GEMM layout,
    fold the 1/255 scale into conv1, pad K and N to 128 lanes, permute wfc to
    the NHWC flatten order, fuse actor+critic heads, cast weights to bf16."""
    def conv_mat(w, scale=1.0):
        OC, C, KH, KW = w.shape
        k = KH * KW * C
        m = (w * scale).transpose(2, 3, 1, 0).reshape(k, OC)
        kp = _round_up(k, 128)                                     # 128-aligned K
        m = jnp.pad(m, ((0, kp - k), (0, PAD_C - OC)))             # lane-dense N
        return m.astype(jnp.bfloat16)

    def pad_bias(b):
        return jnp.pad(b, (0, PAD_C - b.shape[0])).astype(jnp.float32)

    # FC: torch column order is (c, y, x) over 64 real channels; our activation
    # is NHWC with C padded to 128.  Build (7*7*128, 512) with zero rows for the
    # padded channels so the flatten needs no transpose/slice and K = 49*128.
    wfc = raw["wfc"].reshape(512, 64, 7, 7).transpose(2, 3, 1, 0)  # (7,7,64,512)
    wfc = jnp.pad(wfc, ((0, 0), (0, 0), (0, PAD_C - 64), (0, 0)))  # (7,7,128,512)
    wfcm = wfc.reshape(7 * 7 * PAD_C, 512).astype(jnp.bfloat16)

    nh = action_space + 1
    whm = jnp.concatenate([raw["wa"].T, raw["wc"].T], axis=1)      # (512, A+1)
    whm = jnp.pad(whm, ((0, 0), (0, PAD_C - nh))).astype(jnp.bfloat16)
    bh = jnp.pad(jnp.concatenate([raw["ba"], raw["bc"]]), (0, PAD_C - nh))

    return {
        "w1m": conv_mat(raw["w1"], scale=1.0 / 255.0), "b1p": pad_bias(raw["b1"]),
        "w2m": conv_mat(raw["w2"]),                    "b2p": pad_bias(raw["b2"]),
        "w3m": conv_mat(raw["w3"]),                    "b3p": pad_bias(raw["b3"]),
        "wfcm": wfcm, "bfc": raw["bfc"].astype(jnp.float32),
        "whm": whm, "bhp": bh.astype(jnp.float32),
    }


# --------------------------- pure-JAX references --------------------------- #
def ref_forward_f32(raw, x):
    """Full-f32 reference (torch semantics, NCHW) for the features."""
    def conv(h, w, b, s):
        y = jax.lax.conv_general_dilated(h, w, (s, s), "VALID",
                                         precision=jax.lax.Precision.HIGHEST)
        return jnp.maximum(y + b[None, :, None, None], 0.0)

    h = x / 255.0
    h = conv(h, raw["w1"], raw["b1"], 4)
    h = conv(h, raw["w2"], raw["b2"], 2)
    h = conv(h, raw["w3"], raw["b3"], 1)
    h = h.reshape(h.shape[0], -1)
    y = jnp.dot(h, raw["wfc"].T, precision=jax.lax.Precision.HIGHEST) + raw["bfc"]
    return jnp.maximum(y, 0.0)


def ref_forward_bf16(raw, x):
    """XLA reference with the kernel's precision policy: bf16 operands and
    bf16 inter-layer activations, f32 accumulation and f32 epilogue."""
    def conv(h, w, b, s, scale=1.0):
        y = jax.lax.conv_general_dilated(
            h.astype(jnp.bfloat16), (w * scale).astype(jnp.bfloat16),
            (s, s), "VALID", preferred_element_type=jnp.float32)
        return jnp.maximum(y + b[None, :, None, None], 0.0).astype(jnp.bfloat16)

    h = conv(x, raw["w1"], raw["b1"], 4, scale=1.0 / 255.0)
    h = conv(h, raw["w2"], raw["b2"], 2)
    h = conv(h, raw["w3"], raw["b3"], 1)
    h = h.reshape(h.shape[0], -1)                                   # bf16
    feats = jnp.maximum(
        jnp.dot(h, raw["wfc"].T.astype(jnp.bfloat16),
                preferred_element_type=jnp.float32) + raw["bfc"], 0.0)
    fb = feats.astype(jnp.bfloat16)
    logits = jnp.dot(fb, raw["wa"].T.astype(jnp.bfloat16),
                     preferred_element_type=jnp.float32) + raw["ba"]
    values = jnp.dot(fb, raw["wc"].T.astype(jnp.bfloat16),
                     preferred_element_type=jnp.float32) + raw["bc"]
    return feats, logits, values


# --------------------------------- main ------------------------------------ #
if __name__ == "__main__":
    key = jax.random.PRNGKey(0)
    kp, kx, ka = jax.random.split(key, 3)
    ACTION_SPACE = 6

    raw = init_params(kp, ACTION_SPACE)
    prep = prepare_params(raw, ACTION_SPACE)

    # ActorCritic expects Atari-style frames: (B, 4, 84, 84) so Flatten -> 3136.
    # Integer-valued pixels make the one-time bf16 cast of the input exact.
    B = 2
    x = jax.random.randint(kx, (B, 4, 84, 84), 0, 256).astype(jnp.float32)

    fwd = jax.jit(functools.partial(forward_with_heads, action_space=ACTION_SPACE))
    feats, logits, values = fwd(prep, x)
    jax.block_until_ready((feats, logits, values))
    assert feats.shape == (B, 512)
    assert logits.shape == (B, ACTION_SPACE) and values.shape == (B, 1)

    # Precision-matched reference (same bf16/f32 policy): only accumulation
    # order differs from the kernel, so the tolerance can stay tight.
    feats_m, logits_m, values_m = ref_forward_bf16(raw, x)
    if not jnp.allclose(feats, feats_m, atol=1e-2, rtol=1e-2):
        raise AssertionError(
            f"bf16-matched feats mismatch, max abs diff = {jnp.max(jnp.abs(feats - feats_m))}")
    if not (jnp.allclose(logits, logits_m, atol=1e-2, rtol=1e-2)
            and jnp.allclose(values, values_m, atol=1e-2, rtol=1e-2)):
        raise AssertionError("bf16-matched head mismatch")

    # Full-f32 reference: sanity bound on the overall mixed-precision error.
    feats_f32 = ref_forward_f32(raw, x)
    rel = jnp.linalg.norm(feats - feats_f32) / (jnp.linalg.norm(feats_f32) + 1e-8)
    if rel > 8e-2:
        raise AssertionError(f"f32 reference rel-norm error too large: {rel}")

    # act() path (Categorical stays in plain JAX).
    act_fn = jax.jit(functools.partial(act, action_space=ACTION_SPACE))
    action, log_prob, vals, entropy = act_fn(prep, x, ka)
    jax.block_until_ready((action, log_prob, vals, entropy))
    assert action.shape == (B,) and log_prob.shape == (B,)
    assert vals.shape == (B, 1) and entropy.shape == (B,)

    print("KERNEL_OK")
</pallas_src>

<mosaic_0001>
module attributes {stable_mosaic.version = 11 : i64} {
  func.func @_gemm_bias_act_kernel(%arg0: i32, %arg1: memref<512x256xbf16, #tpu.memory_space<vmem>>, %arg2: memref<256x128xbf16, #tpu.memory_space<vmem>>, %arg3: memref<1x128xf32, #tpu.memory_space<vmem>>, %arg4: memref<512x128xbf16, #tpu.memory_space<vmem>>) attributes {dimension_semantics = [#tpu.dimension_semantics<parallel>], iteration_bounds = array<i64: 2>, scalar_prefetch = 0 : i64, scratch_operands = 0 : i64, tpu.core_type = #tpu.core_type<tc>, window_params = [{transform_indices = @transform_0, window_bounds = array<i64: 512, 256>}, {pipeline_mode = #tpu.pipeline_mode<synchronous>, transform_indices = @transform_1, window_bounds = array<i64: 256, 128>}, {pipeline_mode = #tpu.pipeline_mode<synchronous>, transform_indices = @transform_2, window_bounds = array<i64: 1, 128>}, {transform_indices = @transform_3, window_bounds = array<i64: 512, 128>}]} {
    %c0 = arith.constant 0 : index
    %c0_0 = arith.constant 0 : index
    %0 = vector.load %arg1[%c0, %c0_0] : memref<512x256xbf16, #tpu.memory_space<vmem>>, vector<512x256xbf16>
    %c0_1 = arith.constant 0 : index
    %c0_2 = arith.constant 0 : index
    %1 = vector.load %arg2[%c0_1, %c0_2] : memref<256x128xbf16, #tpu.memory_space<vmem>>, vector<256x128xbf16>
    %cst = arith.constant dense<0.000000e+00> : vector<512x128xf32>
    %2 = tpu.matmul %0, %1, %cst {dimension_numbers = #tpu.dot_dimension_numbers<[1], [0], [0], [1], [0, 0, 1, 1], [], []>} : vector<512x256xbf16>, vector<256x128xbf16>, vector<512x128xf32> -> vector<512x128xf32>
    %c0_3 = arith.constant 0 : index
    %c0_4 = arith.constant 0 : index
    %3 = vector.load %arg3[%c0_3, %c0_4] : memref<1x128xf32, #tpu.memory_space<vmem>>, vector<1x128xf32>
    %4 = vector.broadcast %3 : vector<1x128xf32> to vector<512x128xf32>
    %5 = arith.addf %2, %4 : vector<512x128xf32>
    %cst_5 = arith.constant 0.000000e+00 : f32
    %6 = vector.broadcast %cst_5 : f32 to vector<512x128xf32>
    %7 = arith.maximumf %5, %6 : vector<512x128xf32>
    %8 = arith.truncf %7 : vector<512x128xf32> to vector<512x128xbf16>
    %c0_6 = arith.constant 0 : index
    %c0_7 = arith.constant 0 : index
    %9 = vector.load %arg4[%c0_6, %c0_7] : memref<512x128xbf16, #tpu.memory_space<vmem>>, vector<512x128xbf16>
    tpu.vector_store %arg4[%c0_6, %c0_7], %8 {strides = array<i32>} : memref<512x128xbf16, #tpu.memory_space<vmem>>, vector<512x128xbf16>,
    return
  }
  func.func @transform_0(%arg0: i32) -> (i32, i32) {
    %c0_i32 = arith.constant 0 : i32
    %c0_i32_0 = arith.constant 0 : i32
    return %arg0, %c0_i32 : i32, i32
  }
  func.func @transform_1(%arg0: i32) -> (i32, i32) {
    %c0_i32 = arith.constant 0 : i32
    %c0_i32_0 = arith.constant 0 : i32
    %c0_i32_1 = arith.constant 0 : i32
    return %c0_i32, %c0_i32_0 : i32, i32
  }
  func.func @transform_2(%arg0: i32) -> (i32, i32) {
    %c0_i32 = arith.constant 0 : i32
    %c0_i32_0 = arith.constant 0 : i32
    %c0_i32_1 = arith.constant 0 : i32
    return %c0_i32, %c0_i32_0 : i32, i32
  }
  func.func @transform_3(%arg0: i32) -> (i32, i32) {
    %c0_i32 = arith.constant 0 : i32
    %c0_i32_0 = arith.constant 0 : i32
    return %arg0, %c0_i32 : i32, i32
  }
}

module attributes {stable_mosaic.version = 11 : i64} {
  func.func @_gemm_bias_act_kernel(%arg0: i32, %arg1: memref<96x512xbf16, #tpu.memory_space<vmem>>, %arg2: memref<512x128xbf16, #tpu.memory_space<vmem>>, %arg3: memref<1x128xf32, #tpu.memory_space<vmem>>, %arg4: memref<96x128xbf16, #tpu.memory_space<vmem>>) attributes {dimension_semantics = [#tpu.dimension_semantics<parallel>], iteration_bounds = array<i64: 2>, scalar_prefetch = 0 : i64, scratch_operands = 0 : i64, tpu.core_type = #tpu.core_type<tc>, window_params = [{transform_indices = @transform_0, window_bounds = array<i64: 96, 512>}, {pipeline_mode = #tpu.pipeline_mode<synchronous>, transform_indices = @transform_1, window_bounds = array<i64: 512, 128>}, {pipeline_mode = #tpu.pipeline_mode<synchronous>, transform_indices = @transform_2, window_bounds = array<i64: 1, 128>}, {transform_indices = @transform_3, window_bounds = array<i64: 96, 128>}]} {
    %c0 = arith.constant 0 : index
    %c0_0 = arith.constant 0 : index
    %0 = vector.load %arg1[%c0, %c0_0] : memref<96x512xbf16, #tpu.memory_space<vmem>>, vector<96x512xbf16>
    %c0_1 = arith.constant 0 : index
    %c0_2 = arith.constant 0 : index
    %1 = vector.load %arg2[%c0_1, %c0_2] : memref<512x128xbf16, #tpu.memory_space<vmem>>, vector<512x128xbf16>
    %cst = arith.constant dense<0.000000e+00> : vector<96x128xf32>
    %2 = tpu.matmul %0, %1, %cst {dimension_numbers = #tpu.dot_dimension_numbers<[1], [0], [0], [1], [0, 0, 1, 1], [], []>} : vector<96x512xbf16>, vector<512x128xbf16>, vector<96x128xf32> -> vector<96x128xf32>
    %c0_3 = arith.constant 0 : index
    %c0_4 = arith.constant 0 : index
    %3 = vector.load %arg3[%c0_3, %c0_4] : memref<1x128xf32, #tpu.memory_space<vmem>>, vector<1x128xf32>
    %4 = vector.broadcast %3 : vector<1x128xf32> to vector<96x128xf32>
    %5 = arith.addf %2, %4 : vector<96x128xf32>
    %cst_5 = arith.constant 0.000000e+00 : f32
    %6 = vector.broadcast %cst_5 : f32 to vector<96x128xf32>
    %7 = arith.maximumf %5, %6 : vector<96x128xf32>
    %8 = arith.truncf %7 : vector<96x128xf32> to vector<96x128xbf16>
    %c0_6 = arith.constant 0 : index
    %c0_7 = arith.constant 0 : index
    %9 = vector.load %arg4[%c0_6, %c0_7] : memref<96x128xbf16, #tpu.memory_space<vmem>>, vector<96x128xbf16>
    tpu.vector_store %arg4[%c0_6, %c0_7], %8 {strides = array<i32>} : memref<96x128xbf16, #tpu.memory_space<vmem>>, vector<96x128xbf16>,
    return
  }
  func.func @transform_0(%arg0: i32) -> (i32, i32) {
    %c0_i32 = arith.constant 0 : i32
    %c0_i32_0 = arith.constant 0 : i32
    return %arg0, %c0_i32 : i32, i32
  }
  func.func @transform_1(%arg0: i32) -> (i32, i32) {
    %c0_i32 = arith.constant 0 : i32
    %c0_i32_0 = arith.constant 0 : i32
    %c0_i32_1 = arith.constant 0 : i32
    return %c0_i32, %c0_i32_0 : i32, i32
  }
  func.func @transform_2(%arg0: i32) -> (i32, i32) {
    %c0_i32 = arith.constant 0 : i32
    %c0_i32_0 = arith.constant 0 : i32
    %c0_i32_1 = arith.constant 0 : i32
    return %c0_i32, %c0_i32_0 : i32, i32
  }
  func.func @transform_3(%arg0: i32) -> (i32, i32) {
    %c0_i32 = arith.constant 0 : i32
    %c0_i32_0 = arith.constant 0 : i32
    return %arg0, %c0_i32 : i32, i32
  }
}

module attributes {stable_mosaic.version = 11 : i64} {
  func.func @_gemm_bias_act_kernel(%arg0: i32, %arg1: memref<64x640xbf16, #tpu.memory_space<vmem>>, %arg2: memref<640x128xbf16, #tpu.memory_space<vmem>>, %arg3: memref<1x128xf32, #tpu.memory_space<vmem>>, %arg4: memref<64x128xbf16, #tpu.memory_space<vmem>>) attributes {dimension_semantics = [#tpu.dimension_semantics<parallel>], iteration_bounds = array<i64: 2>, scalar_prefetch = 0 : i64, scratch_operands = 0 : i64, tpu.core_type = #tpu.core_type<tc>, window_params = [{transform_indices = @transform_0, window_bounds = array<i64: 64, 640>}, {pipeline_mode = #tpu.pipeline_mode<synchronous>, transform_indices = @transform_1, window_bounds = array<i64: 640, 128>}, {pipeline_mode = #tpu.pipeline_mode<synchronous>, transform_indices = @transform_2, window_bounds = array<i64: 1, 128>}, {transform_indices = @transform_3, window_bounds = array<i64: 64, 128>}]} {
    %c0 = arith.constant 0 : index
    %c0_0 = arith.constant 0 : index
    %0 = vector.load %arg1[%c0, %c0_0] : memref<64x640xbf16, #tpu.memory_space<vmem>>, vector<64x640xbf16>
    %c0_1 = arith.constant 0 : index
    %c0_2 = arith.constant 0 : index
    %1 = vector.load %arg2[%c0_1, %c0_2] : memref<640x128xbf16, #tpu.memory_space<vmem>>, vector<640x128xbf16>
    %cst = arith.constant dense<0.000000e+00> : vector<64x128xf32>
    %2 = tpu.matmul %0, %1, %cst {dimension_numbers = #tpu.dot_dimension_numbers<[1], [0], [0], [1], [0, 0, 1, 1], [], []>} : vector<64x640xbf16>, vector<640x128xbf16>, vector<64x128xf32> -> vector<64x128xf32>
    %c0_3 = arith.constant 0 : index
    %c0_4 = arith.constant 0 : index
    %3 = vector.load %arg3[%c0_3, %c0_4] : memref<1x128xf32, #tpu.memory_space<vmem>>, vector<1x128xf32>
    %4 = vector.broadcast %3 : vector<1x128xf32> to vector<64x128xf32>
    %5 = arith.addf %2, %4 : vector<64x128xf32>
    %cst_5 = arith.constant 0.000000e+00 : f32
    %6 = vector.broadcast %cst_5 : f32 to vector<64x128xf32>
    %7 = arith.maximumf %5, %6 : vector<64x128xf32>
    %8 = arith.truncf %7 : vector<64x128xf32> to vector<64x128xbf16>
    %c0_6 = arith.constant 0 : index
    %c0_7 = arith.constant 0 : index
    %9 = vector.load %arg4[%c0_6, %c0_7] : memref<64x128xbf16, #tpu.memory_space<vmem>>, vector<64x128xbf16>
    tpu.vector_store %arg4[%c0_6, %c0_7], %8 {strides = array<i32>} : memref<64x128xbf16, #tpu.memory_space<vmem>>, vector<64x128xbf16>,
    return
  }
  func.func @transform_0(%arg0: i32) -> (i32, i32) {
    %c0_i32 = arith.constant 0 : i32
    %c0_i32_0 = arith.constant 0 : i32
    return %arg0, %c0_i32 : i32, i32
  }
  func.func @transform_1(%arg0: i32) -> (i32, i32) {
    %c0_i32 = arith.constant 0 : i32
    %c0_i32_0 = arith.constant 0 : i32
    %c0_i32_1 = arith.constant 0 : i32
    return %c0_i32, %c0_i32_0 : i32, i32
  }
  func.func @transform_2(%arg0: i32) -> (i32, i32) {
    %c0_i32 = arith.constant 0 : i32
    %c0_i32_0 = arith.constant 0 : i32
    %c0_i32_1 = arith.constant 0 : i32
    return %c0_i32, %c0_i32_0 : i32, i32
  }
  func.func @transform_3(%arg0: i32) -> (i32, i32) {
    %c0_i32 = arith.constant 0 : i32
    %c0_i32_0 = arith.constant 0 : i32
    return %arg0, %c0_i32 : i32, i32
  }
}

module attributes {stable_mosaic.version = 11 : i64} {
  func.func @_fc_heads_kernel(%arg0: i32, %arg1: memref<16x6272xbf16, #tpu.memory_space<vmem>>, %arg2: memref<6272x512xbf16, #tpu.memory_space<vmem>>, %arg3: memref<1x512xf32, #tpu.memory_space<vmem>>, %arg4: memref<512x128xbf16, #tpu.memory_space<vmem>>, %arg5: memref<1x128xf32, #tpu.memory_space<vmem>>, %arg6: memref<16x512xf32, #tpu.memory_space<vmem>>, %arg7: memref<16x128xf32, #tpu.memory_space<vmem>>) attributes {dimension_semantics = [#tpu.dimension_semantics<parallel>], iteration_bounds = array<i64: 1>, scalar_prefetch = 0 : i64, scratch_operands = 0 : i64, tpu.core_type = #tpu.core_type<tc>, window_params = [{transform_indices = @transform_0, window_bounds = array<i64: 16, 6272>}, {pipeline_mode = #tpu.pipeline_mode<synchronous>, transform_indices = @transform_1, window_bounds = array<i64: 6272, 512>}, {pipeline_mode = #tpu.pipeline_mode<synchronous>, transform_indices = @transform_2, window_bounds = array<i64: 1, 512>}, {pipeline_mode = #tpu.pipeline_mode<synchronous>, transform_indices = @transform_3, window_bounds = array<i64: 512, 128>}, {pipeline_mode = #tpu.pipeline_mode<synchronous>, transform_indices = @transform_4, window_bounds = array<i64: 1, 128>}, {transform_indices = @transform_5, window_bounds = array<i64: 16, 512>}, {transform_indices = @transform_6, window_bounds = array<i64: 16, 128>}]} {
    %c0 = arith.constant 0 : index
    %c0_0 = arith.constant 0 : index
    %0 = vector.load %arg1[%c0, %c0_0] : memref<16x6272xbf16, #tpu.memory_space<vmem>>, vector<16x6272xbf16>
    %c0_1 = arith.constant 0 : index
    %c0_2 = arith.constant 0 : index
    %1 = vector.load %arg2[%c0_1, %c0_2] : memref<6272x512xbf16, #tpu.memory_space<vmem>>, vector<6272x512xbf16>
    %cst = arith.constant dense<0.000000e+00> : vector<16x512xf32>
    %2 = tpu.matmul %0, %1, %cst {dimension_numbers = #tpu.dot_dimension_numbers<[1], [0], [0], [1], [0, 0, 1, 1], [], []>} : vector<16x6272xbf16>, vector<6272x512xbf16>, vector<16x512xf32> -> vector<16x512xf32>
    %c0_3 = arith.constant 0 : index
    %c0_4 = arith.constant 0 : index
    %3 = vector.load %arg3[%c0_3, %c0_4] : memref<1x512xf32, #tpu.memory_space<vmem>>, vector<1x512xf32>
    %4 = vector.broadcast %3 : vector<1x512xf32> to vector<16x512xf32>
    %5 = arith.addf %2, %4 : vector<16x512xf32>
    %cst_5 = arith.constant 0.000000e+00 : f32
    %6 = vector.broadcast %cst_5 : f32 to vector<16x512xf32>
    %7 = arith.maximumf %5, %6 : vector<16x512xf32>
    %c0_6 = arith.constant 0 : index
    %c0_7 = arith.constant 0 : index
    %8 = vector.load %arg6[%c0_6, %c0_7] : memref<16x512xf32, #tpu.memory_space<vmem>>, vector<16x512xf32>
    tpu.vector_store %arg6[%c0_6, %c0_7], %7 {strides = array<i32>} : memref<16x512xf32, #tpu.memory_space<vmem>>, vector<16x512xf32>,
    %9 = arith.truncf %7 : vector<16x512xf32> to vector<16x512xbf16>
    %c0_8 = arith.constant 0 : index
    %c0_9 = arith.constant 0 : index
    %10 = vector.load %arg4[%c0_8, %c0_9] : memref<512x128xbf16, #tpu.memory_space<vmem>>, vector<512x128xbf16>
    %cst_10 = arith.constant dense<0.000000e+00> : vector<16x128xf32>
    %11 = tpu.matmul %9, %10, %cst_10 {dimension_numbers = #tpu.dot_dimension_numbers<[1], [0], [0], [1], [0, 0, 1, 1], [], []>} : vector<16x512xbf16>, vector<512x128xbf16>, vector<16x128xf32> -> vector<16x128xf32>
    %c0_11 = arith.constant 0 : index
    %c0_12 = arith.constant 0 : index
    %12 = vector.load %arg5[%c0_11, %c0_12] : memref<1x128xf32, #tpu.memory_space<vmem>>, vector<1x128xf32>
    %13 = vector.broadcast %12 : vector<1x128xf32> to vector<16x128xf32>
    %14 = arith.addf %11, %13 : vector<16x128xf32>
    %c0_13 = arith.constant 0 : index
    %c0_14 = arith.constant 0 : index
    %15 = vector.load %arg7[%c0_13, %c0_14] : memref<16x128xf32, #tpu.memory_space<vmem>>, vector<16x128xf32>
    tpu.vector_store %arg7[%c0_13, %c0_14], %14 {strides = array<i32>} : memref<16x128xf32, #tpu.memory_space<vmem>>, vector<16x128xf32>,
    return
  }
  func.func @transform_0(%arg0: i32) -> (i32, i32) {
    %c0_i32 = arith.constant 0 : i32
    %c0_i32_0 = arith.constant 0 : i32
    return %arg0, %c0_i32 : i32, i32
  }
  func.func @transform_1(%arg0: i32) -> (i32, i32) {
    %c0_i32 = arith.constant 0 : i32
    %c0_i32_0 = arith.constant 0 : i32
    %c0_i32_1 = arith.constant 0 : i32
    return %c0_i32, %c0_i32_0 : i32, i32
  }
  func.func @transform_2(%arg0: i32) -> (i32, i32) {
    %c0_i32 = arith.constant 0 : i32
    %c0_i32_0 = arith.constant 0 : i32
    %c0_i32_1 = arith.constant 0 : i32
    return %c0_i32, %c0_i32_0 : i32, i32
  }
  func.func @transform_3(%arg0: i32) -> (i32, i32) {
    %c0_i32 = arith.constant 0 : i32
    %c0_i32_0 = arith.constant 0 : i32
    %c0_i32_1 = arith.constant 0 : i32
    return %c0_i32, %c0_i32_0 : i32, i32
  }
  func.func @transform_4(%arg0: i32) -> (i32, i32) {
    %c0_i32 = arith.constant 0 : i32
    %c0_i32_0 = arith.constant 0 : i32
    %c0_i32_1 = arith.constant 0 : i32
    return %c0_i32, %c0_i32_0 : i32, i32
  }
  func.func @transform_5(%arg0: i32) -> (i32, i32) {
    %c0_i32 = arith.constant 0 : i32
    %c0_i32_0 = arith.constant 0 : i32
    return %arg0, %c0_i32 : i32, i32
  }
  func.func @transform_6(%arg0: i32) -> (i32, i32) {
    %c0_i32 = arith.constant 0 : i32
    %c0_i32_0 = arith.constant 0 : i32
    return %arg0, %c0_i32 : i32, i32
  }
}

</mosaic_0001>

<bundles_post_ra>
// kernel: forward_with_heads.4
= control target key start
LH: loop header
LB: loop body
LE: loop exit
PB: predicated region body
PF: predicated region fallthrough
CT: control target
= control target key end

     0   :  { %s2021_s12 = smov 0   ;;  %s2291_s0 = inlined_call_operand.vmem [shape: bf16[1024,256], index: 0, kind: input, shape index: {}]   ;;  %s2292_s1 = inlined_call_operand.vmem [shape: bf16[256,128], index: 1, kind: input, shape index: {}]   ;;  %s2293_s2 = inlined_call_operand.vmem [shape: f32[1,128], index: 2, kind: input, shape index: {}]   ;;  %s2294_s3 = inlined_call_operand.vmem [shape: bf16[1024,128], index: 3, kind: output, shape index: {}]  }
   0x1 LB: > { %s1426_s13 = sadd.s32 4294967295, %s1998_s12   ;;  %p1430_p0 = scmp.ge.s32.totalorder %s1998_s12, 1  ;;  %s1998_s12 = sphi %s2021_s12, %s13_s12  }
   0x2   : > { %p139_p1 = scmp.lt.s32.totalorder %s1998_s12, 3 }
   0x4   : > { %p140_p2 = pnand %p1430_p0, %p139_p1 }
   0x5   : > { %v1880_v0 = vld [vmem:[%s2292_s1] sm:$0xff] (!%p140_p2)   ;;  %v2000_v1 = vmov (!%p140_p2), 0   ;;  %s1431_s16 = sshll.u32 (!%p140_p2), %s1426_s13, 6  ;;  %v1881_v2 = vld [vmem:[%s2292_s1 + $0x8] sm:$0xff] (!%p140_p2)   ;;  %v1882_v3 = vld [vmem:[%s2292_s1 + $0x10] sm:$0xff] (!%p140_p2)  }
   0x6   : > { %143 = sbr.rel (%p140_p2) target bundleno = 411 (0x19b), region = 32  ;;  %697 = vmatprep.subr.bf16.mxu0 (!%p140_p2), %v2000_v1  ;;  %1839 = vmatprep.subr.bf16.mxu1 (!%p140_p2), %v2000_v1  ;;  %p165_p3 = scmp.lt.s32.totalorder (!%p140_p2), %s1431_s16, 127  ;;  %v1883_v4 = vld [vmem:[%s2292_s1 + $0x18] sm:$0xff] (!%p140_p2)   ;;  %v1884_v5 = vld [vmem:[%s2292_s1 + $0x20] sm:$0xff] (!%p140_p2)   ;;  %v1885_v7 = vld [vmem:[%s2292_s1 + $0x28] sm:$0xff] (!%p140_p2)  }
   0x7   : > { %698 = vmatpush1.bf16.msra.mxu0 (!%p140_p2), %v1880_v0  ;;  %1855 = vmatpush1.bf16.msra.mxu1 (!%p140_p2), %v1880_v0  ;;  %v1886_v9 = vld [vmem:[%s2292_s1 + $0x30] sm:$0xff] (!%p140_p2)   ;;  %v1887_v10 = vld [vmem:[%s2292_s1 + $0x38] sm:$0xff] (!%p140_p2)   ;;  %v1888_v11 = vld [vmem:[%s2292_s1 + $0x40] sm:$0xff] (!%p140_p2)  }
   0x8   : > { %699 = vmatprep.subr.bf16.mxu0 (!%p140_p2), %v2000_v1  ;;  %1840 = vmatprep.subr.bf16.mxu1 (!%p140_p2), %v2000_v1  ;;  %v1889_v12 = vld [vmem:[%s2292_s1 + $0x48] sm:$0xff] (!%p140_p2)   ;;  %v1890_v13 = vld [vmem:[%s2292_s1 + $0x50] sm:$0xff] (!%p140_p2)   ;;  %v1891_v14 = vld [vmem:[%s2292_s1 + $0x58] sm:$0xff] (!%p140_p2)  }
   0x9   : > { %v1892_v15 = vld [vmem:[%s2292_s1 + $0x60] sm:$0xff] (!%p140_p2)   ;;  %v1893_v16 = vld [vmem:[%s2292_s1 + $0x68] sm:$0xff] (!%p140_p2)   ;;  %v1894_v17 = vld [vmem:[%s2292_s1 + $0x70] sm:$0xff] (!%p140_p2)  }
   0xa   : > { %v1895_v18 = vld [vmem:[%s2292_s1 + $0x78] sm:$0xff] (!%p140_p2)  }
   0xb   : > { %700 = vmatpush1.bf16.msra.mxu0 (!%p140_p2), %v1881_v2  ;;  %1856 = vmatpush1.bf16.msra.mxu1 (!%p140_p2), %v1881_v2 }
   0xc   : > { %701 = vmatprep.subr.bf16.mxu0 (!%p140_p2), %v2000_v1  ;;  %1841 = vmatprep.subr.bf16.mxu1 (!%p140_p2), %v2000_v1 }
   0xd   : > { %s2296_s16 = smov (!%p165_p3, %s1431_s16), 127 }
   0xe   : > { %s1583_s23 = sshll.u32 %s2296_s16, 3  ;;  %s1435_s29 = sshll.u32 %s2296_s16, 2 }
   0xf   : > { %702 = vmatpush1.bf16.msra.mxu0 %v1882_v3  ;;  %1857 = vmatpush1.bf16.msra.mxu1 %v1882_v3  ;;  %s2058_s28 = scalar_lea.vmem %s2291_s0, %s1583_s23  ;;  %s2194_s4 = scalar_lea.vmem %s2294_s3, %s1435_s29 }
  0x10   : > { %703 = vmatprep.subr.bf16.mxu0 %v2000_v1  ;;  %1842 = vmatprep.subr.bf16.mxu1 %v2000_v1  ;;  %v1898_v6 = vld [vmem:[%s2058_s28 + $0x4] ss:$8 sps:$4 sm:$0xff]   ;;  %v1896_v19 = vld [vmem:[%s2058_s28] ss:$8 sps:$4 sm:$0xff]   ;;  %v1902_v21 = vld [vmem:[%s2058_s28 + $0x14] ss:$8 sps:$4 sm:$0xff]  }
  0x11   : > { %v1901_v8 = vld [vmem:[%s2058_s28 + $0x104] ss:$8 sps:$4 sm:$0xff]   ;;  %729 = vmatprep.mubr.bf16.mxu0 %v1898_v6  ;;  %v1899_v20 = vld [vmem:[%s2058_s28 + $0x100] ss:$8 sps:$4 sm:$0xff]   ;;  %v1904_v22 = vld [vmem:[%s2058_s28 + $0x114] ss:$8 sps:$4 sm:$0xff]  }
  0x12   : > { %857 = vmatprep.mubr.bf16.mxu1 %v1901_v8  ;;  %v1906_v23 = vld [vmem:[%s2058_s28 + $0x10] ss:$8 sps:$4 sm:$0xff]   ;;  %v1908_v25 = vld [vmem:[%s2058_s28 + $0x24] ss:$8 sps:$4 sm:$0xff]   ;;  %v1912_v27 = vld [vmem:[%s2058_s28 + $0x20] ss:$8 sps:$4 sm:$0xff]  }
  0x13   : > { %704 = vmatpush1.bf16.msra.mxu0 %v1883_v4  ;;  %1858 = vmatpush1.bf16.msra.mxu1 %v1883_v4  ;;  %v1907_v24 = vld [vmem:[%s2058_s28 + $0x110] ss:$8 sps:$4 sm:$0xff]   ;;  %v1910_v26 = vld [vmem:[%s2058_s28 + $0x124] ss:$8 sps:$4 sm:$0xff]   ;;  %v1913_v28 = vld [vmem:[%s2058_s28 + $0x120] ss:$8 sps:$4 sm:$0xff]  }
  0x14   : > { %705 = vmatprep.subr.bf16.mxu0 %v2000_v1  ;;  %1843 = vmatprep.subr.bf16.mxu1 %v2000_v1  ;;  %v1914_v29 = vld [vmem:[%s2058_s28 + $0x34] ss:$8 sps:$4 sm:$0xff]   ;;  %v1918_v31 = vld [vmem:[%s2058_s28 + $0x30] ss:$8 sps:$4 sm:$0xff]   ;;  %v1920_v33 = vld [vmem:[%s2058_s28 + $0x44] ss:$8 sps:$4 sm:$0xff]  }
  0x15   : > { %v1916_v30 = vld [vmem:[%s2058_s28 + $0x134] ss:$8 sps:$4 sm:$0xff]   ;;  %v1919_v32 = vld [vmem:[%s2058_s28 + $0x130] ss:$8 sps:$4 sm:$0xff]   ;;  %v1922_v34 = vld [vmem:[%s2058_s28 + $0x144] ss:$8 sps:$4 sm:$0xff]  }
  0x16   : > { %v1924_v35 = vld [vmem:[%s2058_s28 + $0x40] ss:$8 sps:$4 sm:$0xff]   ;;  %v1926_v37 = vld [vmem:[%s2058_s28 + $0x54] ss:$8 sps:$4 sm:$0xff]   ;;  %v1930_v39 = vld [vmem:[%s2058_s28 + $0x50] ss:$8 sps:$4 sm:$0xff]  }
  0x17   : > { %706 = vmatpush1.bf16.msra.mxu0 %v1884_v5  ;;  %1859 = vmatpush1.bf16.msra.mxu1 %v1884_v5  ;;  %v1925_v36 = vld [vmem:[%s2058_s28 + $0x140] ss:$8 sps:$4 sm:$0xff]   ;;  %v1928_v38 = vld [vmem:[%s2058_s28 + $0x154] ss:$8 sps:$4 sm:$0xff]   ;;  %v1931_v40 = vld [vmem:[%s2058_s28 + $0x150] ss:$8 sps:$4 sm:$0xff]  }
  0x18   : > { %707 = vmatprep.subr.bf16.mxu0 %v2000_v1  ;;  %1844 = vmatprep.subr.bf16.mxu1 %v2000_v1  ;;  %v1932_v41 = vld [vmem:[%s2058_s28 + $0x64] ss:$8 sps:$4 sm:$0xff]   ;;  %v1936_v43 = vld [vmem:[%s2058_s28 + $0x60] ss:$8 sps:$4 sm:$0xff]   ;;  %v1938_v45 = vld [vmem:[%s2058_s28 + $0x74] ss:$8 sps:$4 sm:$0xff]  }
  0x19   : > { %v1934_v42 = vld [vmem:[%s2058_s28 + $0x164] ss:$8 sps:$4 sm:$0xff]   ;;  %v1937_v44 = vld [vmem:[%s2058_s28 + $0x160] ss:$8 sps:$4 sm:$0xff]   ;;  %v1940_v46 = vld [vmem:[%s2058_s28 + $0x174] ss:$8 sps:$4 sm:$0xff]  }
  0x1a   : > { %v1942_v47 = vld [vmem:[%s2058_s28 + $0x70] ss:$8 sps:$4 sm:$0xff]   ;;  %v1944_v49 = vld [vmem:[%s2058_s28 + $0x84] ss:$8 sps:$4 sm:$0xff]   ;;  %v1948_v51 = vld [vmem:[%s2058_s28 + $0x80] ss:$8 sps:$4 sm:$0xff]  }
  0x1b   : > { %708 = vmatpush1.bf16.msra.mxu0 %v1885_v7  ;;  %1860 = vmatpush1.bf16.msra.mxu1 %v1885_v7  ;;  %v1943_v48 = vld [vmem:[%s2058_s28 + $0x170] ss:$8 sps:$4 sm:$0xff]   ;;  %v1946_v50 = vld [vmem:[%s2058_s28 + $0x184] ss:$8 sps:$4 sm:$0xff]   ;;  %v1949_v52 = vld [vmem:[%s2058_s28 + $0x180] ss:$8 sps:$4 sm:$0xff]  }
  0x1c   : > { %709 = vmatprep.subr.bf16.mxu0 %v2000_v1  ;;  %1845 = vmatprep.subr.bf16.mxu1 %v2000_v1  ;;  %v1950_v53 = vld [vmem:[%s2058_s28 + $0x94] ss:$8 sps:$4 sm:$0xff]   ;;  %v1954_v55 = vld [vmem:[%s2058_s28 + $0x90] ss:$8 sps:$4 sm:$0xff]   ;;  %v1956_v57 = vld [vmem:[%s2058_s28 + $0xa4] ss:$8 sps:$4 sm:$0xff]  }
  0x1d   : > { %v1952_v54 = vld [vmem:[%s2058_s28 + $0x194] ss:$8 sps:$4 sm:$0xff]   ;;  %v1955_v56 = vld [vmem:[%s2058_s28 + $0x190] ss:$8 sps:$4 sm:$0xff]   ;;  %v1958_v58 = vld [vmem:[%s2058_s28 + $0x1a4] ss:$8 sps:$4 sm:$0xff]  }
  0x1e   : > { %v1960_v59 = vld [vmem:[%s2058_s28 + $0xa0] ss:$8 sps:$4 sm:$0xff]   ;;  %v1962_v61 = vld [vmem:[%s2058_s28 + $0xb4] ss:$8 sps:$4 sm:$0xff]   ;;  %v1966_v63 = vld [vmem:[%s2058_s28 + $0xb0] ss:$8 sps:$4 sm:$0xff]  }
  0x1f   : > { %710 = vmatpush1.bf16.msra.mxu0 %v1886_v9  ;;  %1861 = vmatpush1.bf16.msra.mxu1 %v1886_v9  ;;  %v1961_v60 = vld [vmem:[%s2058_s28 + $0x1a0] ss:$8 sps:$4 sm:$0xff]   ;;  %v1964_v62 = vld [vmem:[%s2058_s28 + $0x1b4] ss:$8 sps:$4 sm:$0xff]   ;;  %v1967_v0 = vld [vmem:[%s2058_s28 + $0x1b0] ss:$8 sps:$4 sm:$0xff]  }
  0x20   : > { %711 = vmatprep.subr.bf16.mxu0 %v2000_v1  ;;  %1846 = vmatprep.subr.bf16.mxu1 %v2000_v1  ;;  %v1970_v2 = vld [vmem:[%s2058_s28 + $0x1c4] ss:$8 sps:$4 sm:$0xff]   ;;  %v1972_v3 = vld [vmem:[%s2058_s28 + $0xc0] ss:$8 sps:$4 sm:$0xff]   ;;  %v1974_v5 = vld [vmem:[%s2058_s28 + $0xd4] ss:$8 sps:$4 sm:$0xff]  }
  0x21   : > { %v1973_v4 = vld [vmem:[%s2058_s28 + $0x1c0] ss:$8 sps:$4 sm:$0xff]   ;;  %v1976_v6 = vld [vmem:[%s2058_s28 + $0x1d4] ss:$8 sps:$4 sm:$0xff]   ;;  %v1978_v7 = vld [vmem:[%s2058_s28 + $0xd0] ss:$8 sps:$4 sm:$0xff]  }
  0x22   : > { %v1979_v8 = vld [vmem:[%s2058_s28 + $0x1d0] ss:$8 sps:$4 sm:$0xff]   ;;  %v1980_v9 = vld [vmem:[%s2058_s28 + $0xe4] ss:$8 sps:$4 sm:$0xff]  }
  0x23   : > { %712 = vmatpush1.bf16.msra.mxu0 %v1887_v10  ;;  %1862 = vmatpush1.bf16.msra.mxu1 %v1887_v10  ;;  %v1982_v10 = vld [vmem:[%s2058_s28 + $0x1e4] ss:$8 sps:$4 sm:$0xff]  }
  0x24   : > { %713 = vmatprep.subr.bf16.mxu0 %v2000_v1  ;;  %1847 = vmatprep.subr.bf16.mxu1 %v2000_v1 }
  0x27   : > { %714 = vmatpush1.bf16.msra.mxu0 %v1888_v11  ;;  %1863 = vmatpush1.bf16.msra.mxu1 %v1888_v11  ;;  %v1984_v11 = vld [vmem:[%s2058_s28 + $0xe0] ss:$8 sps:$4 sm:$0xff]  }
  0x28   : > { %715 = vmatprep.subr.bf16.mxu0 %v2000_v1  ;;  %1848 = vmatprep.subr.bf16.mxu1 %v2000_v1 }
  0x2b   : > { %716 = vmatpush1.bf16.msra.mxu0 %v1889_v12  ;;  %1864 = vmatpush1.bf16.msra.mxu1 %v1889_v12  ;;  %v1985_v12 = vld [vmem:[%s2058_s28 + $0x1e0] ss:$8 sps:$4 sm:$0xff]  }
  0x2c   : > { %717 = vmatprep.subr.bf16.mxu0 %v2000_v1  ;;  %1849 = vmatprep.subr.bf16.mxu1 %v2000_v1 }
  0x2f   : > { %718 = vmatpush1.bf16.msra.mxu0 %v1890_v13  ;;  %1865 = vmatpush1.bf16.msra.mxu1 %v1890_v13  ;;  %v1986_v13 = vld [vmem:[%s2058_s28 + $0xf4] ss:$8 sps:$4 sm:$0xff]  }
  0x30   : > { %719 = vmatprep.subr.bf16.mxu0 %v2000_v1  ;;  %1850 = vmatprep.subr.bf16.mxu1 %v2000_v1 }
  0x33   : > { %720 = vmatpush1.bf16.msra.mxu0 %v1891_v14  ;;  %1866 = vmatpush1.bf16.msra.mxu1 %v1891_v14  ;;  %v1988_v14 = vld [vmem:[%s2058_s28 + $0x1f4] ss:$8 sps:$4 sm:$0xff]  }
  0x34   : > { %721 = vmatprep.subr.bf16.mxu0 %v2000_v1  ;;  %1851 = vmatprep.subr.bf16.mxu1 %v2000_v1 }
  0x37   : > { %722 = vmatpush1.bf16.msra.mxu0 %v1892_v15  ;;  %1867 = vmatpush1.bf16.msra.mxu1 %v1892_v15  ;;  %v1990_v15 = vld [vmem:[%s2058_s28 + $0xf0] ss:$8 sps:$4 sm:$0xff]  }
  0x38   : > { %723 = vmatprep.subr.bf16.mxu0 %v2000_v1  ;;  %1852 = vmatprep.subr.bf16.mxu1 %v2000_v1 }
  0x3b   : > { %724 = vmatpush1.bf16.msra.mxu0 %v1893_v16  ;;  %1868 = vmatpush1.bf16.msra.mxu1 %v1893_v16  ;;  %v1991_v16 = vld [vmem:[%s2058_s28 + $0x1f0] ss:$8 sps:$4 sm:$0xff]  }
  0x3c   : > { %725 = vmatprep.subr.bf16.mxu0 %v2000_v1  ;;  %1853 = vmatprep.subr.bf16.mxu1 %v2000_v1 }
  0x3f   : > { %726 = vmatpush1.bf16.msra.mxu0 %v1894_v17  ;;  %1869 = vmatpush1.bf16.msra.mxu1 %v1894_v17  ;;  %v2184_v17 = vld [vmem:[%s2293_s2] ss:$0 sm:$0xff] }
  0x40   : > { %727 = vmatprep.subr.bf16.mxu0 %v2000_v1  ;;  %1854 = vmatprep.subr.bf16.mxu1 %v2000_v1  ;;  %v1968_v1 = vld [vmem:[%s2058_s28 + $0xc4] ss:$8 sps:$4 sm:$0xff]  }
  0x43   : > { %728 = vmatpush1.bf16.msra.mxu0 %v1895_v18  ;;  %1870 = vmatpush1.bf16.msra.mxu1 %v1895_v18 }
  0x46   : > { %730 = vmatmul.mubr.bf16.vlgmr.msra.gmra.mrb[0].mxu0 %v1896_v19  ;;  %858 = vmatmul.mubr.bf16.vlgmr.msra.gmra.mrb[0].mxu1 %v1899_v20 }
  0x47   : > { %737 = vmatprep.mubr.bf16.mxu0 %v1902_v21  ;;  %865 = vmatprep.mubr.bf16.mxu1 %v1904_v22 }
  0x4e   : > { %738 = vmatmul.mubr.bf16.gmra.mrb[4].mxu0 %v1906_v23  ;;  %866 = vmatmul.mubr.bf16.gmra.mrb[4].mxu1 %v1907_v24 }
  0x4f   : > { %745 = vmatprep.mubr.bf16.mxu0 %v1908_v25  ;;  %873 = vmatprep.mubr.bf16.mxu1 %v1910_v26 }
  0x56   : > { %746 = vmatmul.mubr.bf16.gmra.mrb[8].mxu0 %v1912_v27  ;;  %874 = vmatmul.mubr.bf16.gmra.mrb[8].mxu1 %v1913_v28 }
  0x57   : > { %753 = vmatprep.mubr.bf16.mxu0 %v1914_v29  ;;  %881 = vmatprep.mubr.bf16.mxu1 %v1916_v30 }
  0x5e   : > { %754 = vmatmul.mubr.bf16.gmra.mrb[12].mxu0 %v1918_v31  ;;  %882 = vmatmul.mubr.bf16.gmra.mrb[12].mxu1 %v1919_v32 }
  0x5f   : > { %761 = vmatprep.mubr.bf16.mxu0 %v1920_v33  ;;  %889 = vmatprep.mubr.bf16.mxu1 %v1922_v34 }
  0x66   : > { %762 = vmatmul.mubr.bf16.gmra.mrb[16].mxu0 %v1924_v35  ;;  %890 = vmatmul.mubr.bf16.gmra.mrb[16].mxu1 %v1925_v36 }
  0x67   : > { %769 = vmatprep.mubr.bf16.mxu0 %v1926_v37  ;;  %897 = vmatprep.mubr.bf16.mxu1 %v1928_v38 }
  0x6e   : > { %770 = vmatmul.mubr.bf16.gmra.mrb[20].mxu0 %v1930_v39  ;;  %898 = vmatmul.mubr.bf16.gmra.mrb[20].mxu1 %v1931_v40 }
  0x6f   : > { %777 = vmatprep.mubr.bf16.mxu0 %v1932_v41  ;;  %905 = vmatprep.mubr.bf16.mxu1 %v1934_v42 }
  0x76   : > { %778 = vmatmul.mubr.bf16.gmra.mrb[24].mxu0 %v1936_v43  ;;  %906 = vmatmul.mubr.bf16.gmra.mrb[24].mxu1 %v1937_v44 }
  0x77   : > { %785 = vmatprep.mubr.bf16.mxu0 %v1938_v45  ;;  %913 = vmatprep.mubr.bf16.mxu1 %v1940_v46 }
  0x7e   : > { %786 = vmatmul.mubr.bf16.gmra.mrb[28].mxu0 %v1942_v47  ;;  %914 = vmatmul.mubr.bf16.gmra.mrb[28].mxu1 %v1943_v48 }
  0x7f   : > { %793 = vmatprep.mubr.bf16.mxu0 %v1944_v49  ;;  %921 = vmatprep.mubr.bf16.mxu1 %v1946_v50 }
  0x86   : > { %794 = vmatmul.mubr.bf16.gmra.mrb[32].mxu0 %v1948_v51  ;;  %922 = vmatmul.mubr.bf16.gmra.mrb[32].mxu1 %v1949_v52 }
  0x87   : > { %801 = vmatprep.mubr.bf16.mxu0 %v1950_v53  ;;  %929 = vmatprep.mubr.bf16.mxu1 %v1952_v54 }
  0x8e   : > { %802 = vmatmul.mubr.bf16.gmra.mrb[36].mxu0 %v1954_v55  ;;  %930 = vmatmul.mubr.bf16.gmra.mrb[36].mxu1 %v1955_v56 }
  0x8f   : > { %809 = vmatprep.mubr.bf16.mxu0 %v1956_v57  ;;  %937 = vmatprep.mubr.bf16.mxu1 %v1958_v58 }
  0x96   : > { %810 = vmatmul.mubr.bf16.gmra.mrb[40].mxu0 %v1960_v59  ;;  %938 = vmatmul.mubr.bf16.gmra.mrb[40].mxu1 %v1961_v60 }
  0x97   : > { %817 = vmatprep.mubr.bf16.mxu0 %v1962_v61  ;;  %945 = vmatprep.mubr.bf16.mxu1 %v1964_v62 }
  0x9e   : > { %818 = vmatmul.mubr.bf16.gmra.mrb[44].mxu0 %v1966_v63  ;;  %946 = vmatmul.mubr.bf16.gmra.mrb[44].mxu1 %v1967_v0 }
  0x9f   : > { %825 = vmatprep.mubr.bf16.mxu0 %v1968_v1  ;;  %953 = vmatprep.mubr.bf16.mxu1 %v1970_v2 }
  0xa6   : > { %826 = vmatmul.mubr.bf16.gmra.mrb[48].mxu0 %v1972_v3  ;;  %954 = vmatmul.mubr.bf16.gmra.mrb[48].mxu1 %v1973_v4 }
  0xa7   : > { %833 = vmatprep.mubr.bf16.mxu0 %v1974_v5  ;;  %961 = vmatprep.mubr.bf16.mxu1 %v1976_v6 }
  0xae   : > { %834 = vmatmul.mubr.bf16.gmra.mrb[52].mxu0 %v1978_v7  ;;  %962 = vmatmul.mubr.bf16.gmra.mrb[52].mxu1 %v1979_v8 }
  0xaf   : > { %841 = vmatprep.mubr.bf16.mxu0 %v1980_v9  ;;  %969 = vmatprep.mubr.bf16.mxu1 %v1982_v10 }
  0xb6   : > { %842 = vmatmul.mubr.bf16.gmra.mrb[56].mxu0 %v1984_v11  ;;  %970 = vmatmul.mubr.bf16.gmra.mrb[56].mxu1 %v1985_v12 }
  0xb7   : > { %849 = vmatprep.mubr.bf16.mxu0 %v1986_v13  ;;  %977 = vmatprep.mubr.bf16.mxu1 %v1988_v14 }
  0xbe   : > { %850 = vmatmul.mubr.bf16.gmra.mrb[60].mxu0 %v1990_v15  ;;  %978 = vmatmul.mubr.bf16.gmra.mrb[60].mxu1 %v1991_v16 }
 0x119   : > { %v731_v18 = vpop.f32.mrb[0].mxu0  ;;  %v859_v19 = vpop.f32.mrb[0].mxu1 }
 0x11a   : > { %v732_v20 = vadd.f32 %v2184_v17, %v731_v18  ;;  %v860_v21 = vadd.f32 %v2184_v17, %v859_v19  ;;  %v733_v22 = vpop.f32.mrb[1].mxu0  ;;  %v861_v23 = vpop.f32.mrb[1].mxu1 }
 0x11b   : > { %v734_v24 = vpop.f32.mrb[2].mxu0  ;;  %v862_v25 = vpop.f32.mrb[2].mxu1 }
 0x11c   : > { %v735_v26 = vadd.f32 %v2184_v17, %v734_v24  ;;  %v863_v27 = vadd.f32 %v2184_v17, %v862_v25  ;;  %v736_v28 = vpop.f32.mrb[3].mxu0  ;;  %v864_v29 = vpop.f32.mrb[3].mxu1  ;;  %v986_v30 = vmax.f32 %v732_v20, 0.0  ;;  %v1018_v31 = vmax.f32 %v860_v21, 0.0 }
 0x11e   : > { %v987_v32 = vmax.f32 %v735_v26, 0.0  ;;  %v1019_v33 = vmax.f32 %v863_v27, 0.0 }
 0x120   : > { %v1651_v34 = vpack.c.bf16 %v987_v32, %v986_v30  ;;  %v1731_v35 = vpack.c.bf16 %v1019_v33, %v1018_v31 }
 0x121   : > { %v739_v36 = vpop.f32.mrb[4].mxu0  ;;  %v867_v37 = vpop.f32.mrb[4].mxu1 }
 0x122   : > { %1652 = vst [vmem:[%s2194_s4] sm:$0xff] %v1651_v34   ;;  %1823 = vst [vmem:[%s2194_s4 + $0x80] sm:$0xff] %v1731_v35   ;;  %v740_v38 = vadd.f32 %v2184_v17, %v739_v36  ;;  %v868_v39 = vadd.f32 %v2184_v17, %v867_v37  ;;  %v741_v40 = vpop.f32.mrb[5].mxu0  ;;  %v869_v41 = vpop.f32.mrb[5].mxu1 }
 0x123   : > { %v742_v42 = vpop.f32.mrb[6].mxu0  ;;  %v870_v43 = vpop.f32.mrb[6].mxu1 }
 0x124   : > { %v743_v44 = vadd.f32 %v2184_v17, %v742_v42  ;;  %v871_v45 = vadd.f32 %v2184_v17, %v870_v43  ;;  %v744_v46 = vpop.f32.mrb[7].mxu0  ;;  %v872_v47 = vpop.f32.mrb[7].mxu1  ;;  %v988_v48 = vmax.f32 %v740_v38, 0.0  ;;  %v1020_v49 = vmax.f32 %v868_v39, 0.0 }
 0x126   : > { %v989_v50 = vmax.f32 %v743_v44, 0.0  ;;  %v1021_v51 = vmax.f32 %v871_v45, 0.0 }
 0x128   : > { %v1656_v52 = vpack.c.bf16 %v989_v50, %v988_v48  ;;  %v1736_v53 = vpack.c.bf16 %v1021_v51, %v1020_v49 }
 0x129   : > { %v747_v54 = vpop.f32.mrb[8].mxu0  ;;  %v875_v55 = vpop.f32.mrb[8].mxu1 }
 0x12a   : > { %1808 = vst [vmem:[%s2194_s4 + $0x8] sm:$0xff] %v1656_v52   ;;  %1824 = vst [vmem:[%s2194_s4 + $0x88] sm:$0xff] %v1736_v53   ;;  %v748_v56 = vadd.f32 %v2184_v17, %v747_v54  ;;  %v876_v57 = vadd.f32 %v2184_v17, %v875_v55  ;;  %v749_v58 = vpop.f32.mrb[9].mxu0  ;;  %v877_v59 = vpop.f32.mrb[9].mxu1 }
 0x12b   : > { %v750_v60 = vpop.f32.mrb[10].mxu0  ;;  %v878_v61 = vpop.f32.mrb[10].mxu1 }
 0x12c   : > { %v751_v62 = vadd.f32 %v2184_v17, %v750_v60  ;;  %v879_v63 = vadd.f32 %v2184_v17, %v878_v61  ;;  %v752_v0 = vpop.f32.mrb[11].mxu0  ;;  %v880_v1 = vpop.f32.mrb[11].mxu1  ;;  %v990_v2 = vmax.f32 %v748_v56, 0.0  ;;  %v1022_v3 = vmax.f32 %v876_v57, 0.0 }
 0x12e   : > { %v991_v4 = vmax.f32 %v751_v62, 0.0  ;;  %v1023_v5 = vmax.f32 %v879_v63, 0.0 }
 0x130   : > { %v1661_v6 = vpack.c.bf16 %v991_v4, %v990_v2  ;;  %v1741_v7 = vpack.c.bf16 %v1023_v5, %v1022_v3 }
 0x131   : > { %v755_v8 = vpop.f32.mrb[12].mxu0  ;;  %v883_v9 = vpop.f32.mrb[12].mxu1 }
 0x132   : > { %1809 = vst [vmem:[%s2194_s4 + $0x10] sm:$0xff] %v1661_v6   ;;  %1825 = vst [vmem:[%s2194_s4 + $0x90] sm:$0xff] %v1741_v7   ;;  %v756_v10 = vadd.f32 %v2184_v17, %v755_v8  ;;  %v884_v11 = vadd.f32 %v2184_v17, %v883_v9  ;;  %v757_v12 = vpop.f32.mrb[13].mxu0  ;;  %v885_v13 = vpop.f32.mrb[13].mxu1 }
 0x133   : > { %v758_v14 = vpop.f32.mrb[14].mxu0  ;;  %v886_v15 = vpop.f32.mrb[14].mxu1 }
 0x134   : > { %v759_v16 = vadd.f32 %v2184_v17, %v758_v14  ;;  %v887_v18 = vadd.f32 %v2184_v17, %v886_v15  ;;  %v760_v19 = vpop.f32.mrb[15].mxu0  ;;  %v888_v20 = vpop.f32.mrb[15].mxu1  ;;  %v992_v21 = vmax.f32 %v756_v10, 0.0  ;;  %v1024_v22 = vmax.f32 %v884_v11, 0.0 }
 0x136   : > { %v993_v23 = vmax.f32 %v759_v16, 0.0  ;;  %v1025_v24 = vmax.f32 %v887_v18, 0.0 }
 0x138   : > { %v1666_v25 = vpack.c.bf16 %v993_v23, %v992_v21  ;;  %v1746_v26 = vpack.c.bf16 %v1025_v24, %v1024_v22 }
 0x139   : > { %v763_v27 = vpop.f32.mrb[16].mxu0  ;;  %v891_v28 = vpop.f32.mrb[16].mxu1 }
 0x13a   : > { %1810 = vst [vmem:[%s2194_s4 + $0x18] sm:$0xff] %v1666_v25   ;;  %1826 = vst [vmem:[%s2194_s4 + $0x98] sm:$0xff] %v1746_v26   ;;  %v764_v29 = vadd.f32 %v2184_v17, %v763_v27  ;;  %v892_v30 = vadd.f32 %v2184_v17, %v891_v28  ;;  %v765_v31 = vpop.f32.mrb[17].mxu0  ;;  %v893_v32 = vpop.f32.mrb[17].mxu1 }
 0x13b   : > { %v766_v33 = vpop.f32.mrb[18].mxu0  ;;  %v894_v34 = vpop.f32.mrb[18].mxu1 }
 0x13c   : > { %v767_v35 = vadd.f32 %v2184_v17, %v766_v33  ;;  %v895_v36 = vadd.f32 %v2184_v17, %v894_v34  ;;  %v768_v37 = vpop.f32.mrb[19].mxu0  ;;  %v896_v38 = vpop.f32.mrb[19].mxu1  ;;  %v994_v39 = vmax.f32 %v764_v29, 0.0  ;;  %v1026_v40 = vmax.f32 %v892_v30, 0.0 }
 0x13e   : > { %v995_v41 = vmax.f32 %v767_v35, 0.0  ;;  %v1027_v42 = vmax.f32 %v895_v36, 0.0 }
 0x140   : > { %v1671_v43 = vpack.c.bf16 %v995_v41, %v994_v39  ;;  %v1751_v44 = vpack.c.bf16 %v1027_v42, %v1026_v40 }
 0x141   : > { %v771_v45 = vpop.f32.mrb[20].mxu0  ;;  %v899_v46 = vpop.f32.mrb[20].mxu1 }
 0x142   : > { %1811 = vst [vmem:[%s2194_s4 + $0x20] sm:$0xff] %v1671_v43   ;;  %1827 = vst [vmem:[%s2194_s4 + $0xa0] sm:$0xff] %v1751_v44   ;;  %v772_v47 = vadd.f32 %v2184_v17, %v771_v45  ;;  %v900_v48 = vadd.f32 %v2184_v17, %v899_v46  ;;  %v773_v49 = vpop.f32.mrb[21].mxu0  ;;  %v901_v50 = vpop.f32.mrb[21].mxu1 }
 0x143   : > { %v774_v51 = vpop.f32.mrb[22].mxu0  ;;  %v902_v52 = vpop.f32.mrb[22].mxu1 }
 0x144   : > { %v775_v53 = vadd.f32 %v2184_v17, %v774_v51  ;;  %v903_v54 = vadd.f32 %v2184_v17, %v902_v52  ;;  %v776_v55 = vpop.f32.mrb[23].mxu0  ;;  %v904_v56 = vpop.f32.mrb[23].mxu1  ;;  %v996_v57 = vmax.f32 %v772_v47, 0.0  ;;  %v1028_v58 = vmax.f32 %v900_v48, 0.0 }
 0x146   : > { %v997_v59 = vmax.f32 %v775_v53, 0.0  ;;  %v1029_v60 = vmax.f32 %v903_v54, 0.0 }
 0x148   : > { %v1676_v61 = vpack.c.bf16 %v997_v59, %v996_v57  ;;  %v1756_v62 = vpack.c.bf16 %v1029_v60, %v1028_v58 }
 0x149   : > { %v779_v63 = vpop.f32.mrb[24].mxu0  ;;  %v907_v0 = vpop.f32.mrb[24].mxu1 }
 0x14a   : > { %1812 = vst [vmem:[%s2194_s4 + $0x28] sm:$0xff] %v1676_v61   ;;  %1828 = vst [vmem:[%s2194_s4 + $0xa8] sm:$0xff] %v1756_v62   ;;  %v780_v1 = vadd.f32 %v2184_v17, %v779_v63  ;;  %v908_v2 = vadd.f32 %v2184_v17, %v907_v0  ;;  %v781_v3 = vpop.f32.mrb[25].mxu0  ;;  %v909_v4 = vpop.f32.mrb[25].mxu1 }
 0x14b   : > { %v782_v5 = vpop.f32.mrb[26].mxu0  ;;  %v910_v6 = vpop.f32.mrb[26].mxu1 }
 0x14c   : > { %v783_v7 = vadd.f32 %v2184_v17, %v782_v5  ;;  %v911_v8 = vadd.f32 %v2184_v17, %v910_v6  ;;  %v784_v9 = vpop.f32.mrb[27].mxu0  ;;  %v912_v10 = vpop.f32.mrb[27].mxu1  ;;  %v998_v11 = vmax.f32 %v780_v1, 0.0  ;;  %v1030_v12 = vmax.f32 %v908_v2, 0.0 }
 0x14e   : > { %v999_v13 = vmax.f32 %v783_v7, 0.0  ;;  %v1031_v14 = vmax.f32 %v911_v8, 0.0 }
 0x150   : > { %v1681_v15 = vpack.c.bf16 %v999_v13, %v998_v11  ;;  %v1761_v16 = vpack.c.bf16 %v1031_v14, %v1030_v12 }
 0x151   : > { %v787_v18 = vpop.f32.mrb[28].mxu0  ;;  %v915_v19 = vpop.f32.mrb[28].mxu1 }
 0x152   : > { %1813 = vst [vmem:[%s2194_s4 + $0x30] sm:$0xff] %v1681_v15   ;;  %1829 = vst [vmem:[%s2194_s4 + $0xb0] sm:$0xff] %v1761_v16   ;;  %v788_v20 = vadd.f32 %v2184_v17, %v787_v18  ;;  %v916_v21 = vadd.f32 %v2184_v17, %v915_v19  ;;  %v789_v22 = vpop.f32.mrb[29].mxu0  ;;  %v917_v23 = vpop.f32.mrb[29].mxu1 }
 0x153   : > { %v790_v24 = vpop.f32.mrb[30].mxu0  ;;  %v918_v25 = vpop.f32.mrb[30].mxu1 }
 0x154   : > { %v791_v26 = vadd.f32 %v2184_v17, %v790_v24  ;;  %v919_v27 = vadd.f32 %v2184_v17, %v918_v25  ;;  %v792_v28 = vpop.f32.mrb[31].mxu0  ;;  %v920_v29 = vpop.f32.mrb[31].mxu1  ;;  %v1000_v30 = vmax.f32 %v788_v20, 0.0  ;;  %v1032_v31 = vmax.f32 %v916_v21, 0.0 }
 0x156   : > { %v1001_v32 = vmax.f32 %v791_v26, 0.0  ;;  %v1033_v33 = vmax.f32 %v919_v27, 0.0 }
 0x158   : > { %v1686_v34 = vpack.c.bf16 %v1001_v32, %v1000_v30  ;;  %v1766_v35 = vpack.c.bf16 %v1033_v33, %v1032_v31 }
 0x159   : > { %v795_v36 = vpop.f32.mrb[32].mxu0  ;;  %v923_v37 = vpop.f32.mrb[32].mxu1 }
 0x15a   : > { %1814 = vst [vmem:[%s2194_s4 + $0x38] sm:$0xff] %v1686_v34   ;;  %1830 = vst [vmem:[%s2194_s4 + $0xb8] sm:$0xff] %v1766_v35   ;;  %v796_v38 = vadd.f32 %v2184_v17, %v795_v36  ;;  %v924_v39 = vadd.f32 %v2184_v17, %v923_v37  ;;  %v797_v40 = vpop.f32.mrb[33].mxu0  ;;  %v925_v41 = vpop.f32.mrb[33].mxu1 }
 0x15b   : > { %v798_v42 = vpop.f32.mrb[34].mxu0  ;;  %v926_v43 = vpop.f32.mrb[34].mxu1 }
 0x15c   : > { %v799_v44 = vadd.f32 %v2184_v17, %v798_v42  ;;  %v927_v45 = vadd.f32 %v2184_v17, %v926_v43  ;;  %v800_v46 = vpop.f32.mrb[35].mxu0  ;;  %v928_v47 = vpop.f32.mrb[35].mxu1  ;;  %v1002_v48 = vmax.f32 %v796_v38, 0.0  ;;  %v1034_v49 = vmax.f32 %v924_v39, 0.0 }
 0x15e   : > { %v1003_v50 = vmax.f32 %v799_v44, 0.0  ;;  %v1035_v51 = vmax.f32 %v927_v45, 0.0 }
 0x160   : > { %v1691_v52 = vpack.c.bf16 %v1003_v50, %v1002_v48  ;;  %v1771_v53 = vpack.c.bf16 %v1035_v51, %v1034_v49 }
 0x161   : > { %v803_v54 = vpop.f32.mrb[36].mxu0  ;;  %v931_v55 = vpop.f32.mrb[36].mxu1 }
 0x162   : > { %1815 = vst [vmem:[%s2194_s4 + $0x40] sm:$0xff] %v1691_v52   ;;  %1831 = vst [vmem:[%s2194_s4 + $0xc0] sm:$0xff] %v1771_v53   ;;  %v804_v56 = vadd.f32 %v2184_v17, %v803_v54  ;;  %v932_v57 = vadd.f32 %v2184_v17, %v931_v55  ;;  %v805_v58 = vpop.f32.mrb[37].mxu0  ;;  %v933_v59 = vpop.f32.mrb[37].mxu1 }
 0x163   : > { %v806_v60 = vpop.f32.mrb[38].mxu0  ;;  %v934_v61 = vpop.f32.mrb[38].mxu1 }
 0x164   : > { %v807_v62 = vadd.f32 %v2184_v17, %v806_v60  ;;  %v935_v63 = vadd.f32 %v2184_v17, %v934_v61  ;;  %v808_v0 = vpop.f32.mrb[39].mxu0  ;;  %v936_v1 = vpop.f32.mrb[39].mxu1  ;;  %v1004_v2 = vmax.f32 %v804_v56, 0.0  ;;  %v1036_v3 = vmax.f32 %v932_v57, 0.0 }
 0x166   : > { %v1005_v4 = vmax.f32 %v807_v62, 0.0  ;;  %v1037_v5 = vmax.f32 %v935_v63, 0.0 }
 0x168   : > { %v1696_v6 = vpack.c.bf16 %v1005_v4, %v1004_v2  ;;  %v1776_v7 = vpack.c.bf16 %v1037_v5, %v1036_v3 }
 0x169   : > { %v811_v8 = vpop.f32.mrb[40].mxu0  ;;  %v939_v9 = vpop.f32.mrb[40].mxu1 }
 0x16a   : > { %1816 = vst [vmem:[%s2194_s4 + $0x48] sm:$0xff] %v1696_v6   ;;  %1832 = vst [vmem:[%s2194_s4 + $0xc8] sm:$0xff] %v1776_v7   ;;  %v812_v10 = vadd.f32 %v2184_v17, %v811_v8  ;;  %v940_v11 = vadd.f32 %v2184_v17, %v939_v9  ;;  %v813_v12 = vpop.f32.mrb[41].mxu0  ;;  %v941_v13 = vpop.f32.mrb[41].mxu1 }
 0x16b   : > { %v814_v14 = vpop.f32.mrb[42].mxu0  ;;  %v942_v15 = vpop.f32.mrb[42].mxu1 }
 0x16c   : > { %v815_v16 = vadd.f32 %v2184_v17, %v814_v14  ;;  %v943_v18 = vadd.f32 %v2184_v17, %v942_v15  ;;  %v816_v19 = vpop.f32.mrb[43].mxu0  ;;  %v944_v20 = vpop.f32.mrb[43].mxu1  ;;  %v1006_v21 = vmax.f32 %v812_v10, 0.0  ;;  %v1038_v22 = vmax.f32 %v940_v11, 0.0 }
 0x16e   : > { %v1007_v23 = vmax.f32 %v815_v16, 0.0  ;;  %v1039_v24 = vmax.f32 %v943_v18, 0.0 }
 0x170   : > { %v1701_v25 = vpack.c.bf16 %v1007_v23, %v1006_v21  ;;  %v1781_v26 = vpack.c.bf16 %v1039_v24, %v1038_v22 }
 0x171   : > { %v819_v27 = vpop.f32.mrb[44].mxu0  ;;  %v947_v28 = vpop.f32.mrb[44].mxu1 }
 0x172   : > { %1817 = vst [vmem:[%s2194_s4 + $0x50] sm:$0xff] %v1701_v25   ;;  %1833 = vst [vmem:[%s2194_s4 + $0xd0] sm:$0xff] %v1781_v26   ;;  %v820_v29 = vadd.f32 %v2184_v17, %v819_v27  ;;  %v948_v30 = vadd.f32 %v2184_v17, %v947_v28  ;;  %v821_v31 = vpop.f32.mrb[45].mxu0  ;;  %v949_v32 = vpop.f32.mrb[45].mxu1 }
 0x173   : > { %v822_v33 = vpop.f32.mrb[46].mxu0  ;;  %v950_v34 = vpop.f32.mrb[46].mxu1 }
 0x174   : > { %v823_v35 = vadd.f32 %v2184_v17, %v822_v33  ;;  %v951_v36 = vadd.f32 %v2184_v17, %v950_v34  ;;  %v824_v37 = vpop.f32.mrb[47].mxu0  ;;  %v952_v38 = vpop.f32.mrb[47].mxu1  ;;  %v1008_v39 = vmax.f32 %v820_v29, 0.0  ;;  %v1040_v40 = vmax.f32 %v948_v30, 0.0 }
 0x176   : > { %v1009_v41 = vmax.f32 %v823_v35, 0.0  ;;  %v1041_v42 = vmax.f32 %v951_v36, 0.0 }
 0x178   : > { %v1706_v43 = vpack.c.bf16 %v1009_v41, %v1008_v39  ;;  %v1786_v44 = vpack.c.bf16 %v1041_v42, %v1040_v40 }
 0x179   : > { %v827_v45 = vpop.f32.mrb[48].mxu0  ;;  %v955_v46 = vpop.f32.mrb[48].mxu1 }
 0x17a   : > { %1818 = vst [vmem:[%s2194_s4 + $0x58] sm:$0xff] %v1706_v43   ;;  %1834 = vst [vmem:[%s2194_s4 + $0xd8] sm:$0xff] %v1786_v44   ;;  %v828_v47 = vadd.f32 %v2184_v17, %v827_v45  ;;  %v956_v48 = vadd.f32 %v2184_v17, %v955_v46  ;;  %v829_v49 = vpop.f32.mrb[49].mxu0  ;;  %v957_v50 = vpop.f32.mrb[49].mxu1 }
 0x17b   : > { %v830_v51 = vpop.f32.mrb[50].mxu0  ;;  %v958_v52 = vpop.f32.mrb[50].mxu1 }
 0x17c   : > { %v831_v53 = vadd.f32 %v2184_v17, %v830_v51  ;;  %v959_v54 = vadd.f32 %v2184_v17, %v958_v52  ;;  %v832_v55 = vpop.f32.mrb[51].mxu0  ;;  %v960_v56 = vpop.f32.mrb[51].mxu1  ;;  %v1010_v57 = vmax.f32 %v828_v47, 0.0  ;;  %v1042_v58 = vmax.f32 %v956_v48, 0.0 }
 0x17e   : > { %v1011_v59 = vmax.f32 %v831_v53, 0.0  ;;  %v1043_v60 = vmax.f32 %v959_v54, 0.0 }
 0x180   : > { %v1711_v61 = vpack.c.bf16 %v1011_v59, %v1010_v57  ;;  %v1791_v62 = vpack.c.bf16 %v1043_v60, %v1042_v58 }
 0x181   : > { %v835_v63 = vpop.f32.mrb[52].mxu0  ;;  %v963_v0 = vpop.f32.mrb[52].mxu1 }
 0x182   : > { %1819 = vst [vmem:[%s2194_s4 + $0x60] sm:$0xff] %v1711_v61   ;;  %1835 = vst [vmem:[%s2194_s4 + $0xe0] sm:$0xff] %v1791_v62   ;;  %v836_v1 = vadd.f32 %v2184_v17, %v835_v63  ;;  %v964_v2 = vadd.f32 %v2184_v17, %v963_v0  ;;  %v837_v3 = vpop.f32.mrb[53].mxu0  ;;  %v965_v4 = vpop.f32.mrb[53].mxu1 }
 0x183   : > { %v838_v5 = vpop.f32.mrb[54].mxu0  ;;  %v966_v6 = vpop.f32.mrb[54].mxu1 }
 0x184   : > { %v839_v7 = vadd.f32 %v2184_v17, %v838_v5  ;;  %v967_v8 = vadd.f32 %v2184_v17, %v966_v6  ;;  %v840_v9 = vpop.f32.mrb[55].mxu0  ;;  %v968_v10 = vpop.f32.mrb[55].mxu1  ;;  %v1012_v11 = vmax.f32 %v836_v1, 0.0  ;;  %v1044_v12 = vmax.f32 %v964_v2, 0.0 }
 0x186   : > { %v1013_v13 = vmax.f32 %v839_v7, 0.0  ;;  %v1045_v14 = vmax.f32 %v967_v8, 0.0 }
 0x188   : > { %v1716_v15 = vpack.c.bf16 %v1013_v13, %v1012_v11  ;;  %v1796_v16 = vpack.c.bf16 %v1045_v14, %v1044_v12 }
 0x189   : > { %v843_v18 = vpop.f32.mrb[56].mxu0  ;;  %v971_v19 = vpop.f32.mrb[56].mxu1 }
 0x18a   : > { %1820 = vst [vmem:[%s2194_s4 + $0x68] sm:$0xff] %v1716_v15   ;;  %1836 = vst [vmem:[%s2194_s4 + $0xe8] sm:$0xff] %v1796_v16   ;;  %v844_v20 = vadd.f32 %v2184_v17, %v843_v18  ;;  %v972_v21 = vadd.f32 %v2184_v17, %v971_v19  ;;  %v845_v22 = vpop.f32.mrb[57].mxu0  ;;  %v973_v23 = vpop.f32.mrb[57].mxu1 }
 0x18b   : > { %v846_v24 = vpop.f32.mrb[58].mxu0  ;;  %v974_v25 = vpop.f32.mrb[58].mxu1 }
 0x18c   : > { %v847_v26 = vadd.f32 %v2184_v17, %v846_v24  ;;  %v975_v27 = vadd.f32 %v2184_v17, %v974_v25  ;;  %v848_v28 = vpop.f32.mrb[59].mxu0  ;;  %v976_v29 = vpop.f32.mrb[59].mxu1  ;;  %v1014_v30 = vmax.f32 %v844_v20, 0.0  ;;  %v1046_v31 = vmax.f32 %v972_v21, 0.0 }
 0x18e   : > { %v1015_v32 = vmax.f32 %v847_v26, 0.0  ;;  %v1047_v33 = vmax.f32 %v975_v27, 0.0 }
 0x190   : > { %v1721_v34 = vpack.c.bf16 %v1015_v32, %v1014_v30  ;;  %v1801_v35 = vpack.c.bf16 %v1047_v33, %v1046_v31 }
 0x191   : > { %v851_v36 = vpop.f32.mrb[60].mxu0  ;;  %v979_v37 = vpop.f32.mrb[60].mxu1 }
 0x192   : > { %1821 = vst [vmem:[%s2194_s4 + $0x70] sm:$0xff] %v1721_v34   ;;  %1837 = vst [vmem:[%s2194_s4 + $0xf0] sm:$0xff] %v1801_v35   ;;  %v852_v38 = vadd.f32 %v2184_v17, %v851_v36  ;;  %v980_v39 = vadd.f32 %v2184_v17, %v979_v37  ;;  %v853_v40 = vpop.f32.mrb[61].mxu0  ;;  %v981_v41 = vpop.f32.mrb[61].mxu1 }
 0x193   : > { %v854_v42 = vpop.f32.mrb[62].mxu0  ;;  %v982_v43 = vpop.f32.mrb[62].mxu1 }
 0x194   : > { %v855_v44 = vadd.f32 %v2184_v17, %v854_v42  ;;  %v983_v45 = vadd.f32 %v2184_v17, %v982_v43  ;;  %v856_v46 = vpop.f32.mrb[63].mxu0  ;;  %v984_v47 = vpop.f32.mrb[63].mxu1  ;;  %v1016_v48 = vmax.f32 %v852_v38, 0.0  ;;  %v1048_v49 = vmax.f32 %v980_v39, 0.0 }
 0x196   : > { %v1017_v50 = vmax.f32 %v855_v44, 0.0  ;;  %v1049_v51 = vmax.f32 %v983_v45, 0.0 }
 0x198   : > { %v1726_v52 = vpack.c.bf16 %v1017_v50, %v1016_v48  ;;  %v1806_v53 = vpack.c.bf16 %v1049_v51, %v1048_v49 }
 0x19a   : > { %1822 = vst [vmem:[%s2194_s4 + $0x78] sm:$0xff] %v1726_v52   ;;  %1838 = vst [vmem:[%s2194_s4 + $0xf8] sm:$0xff] %v1806_v53  }
 0x19b PF: > { %s13_s12 = sadd.s32 1, %s1998_s12  }
 0x19c   : > { %p10_p4 = scmp.ge.s32.totalorder %s13_s12, 4  }
 0x19e   :  { %12 = sbr.rel (!%p10_p4) target bundleno = 1 (0x1), region = 62 }

// kernel: forward_with_heads.5
= control target key start
LH: loop header
LB: loop body
LE: loop exit
PB: predicated region body
PF: predicated region fallthrough
CT: control target
= control target key end

     0   :  { %s1210_s12 = smov 0   ;;  %s1380_s0 = inlined_call_operand.vmem [shape: bf16[192,512], index: 0, kind: input, shape index: {}]   ;;  %s1381_s1 = inlined_call_operand.vmem [shape: bf16[512,128], index: 1, kind: input, shape index: {}]   ;;  %s1382_s2 = inlined_call_operand.vmem [shape: f32[1,128], index: 2, kind: input, shape index: {}]   ;;  %s1383_s3 = inlined_call_operand.vmem [shape: bf16[192,128], index: 3, kind: output, shape index: {}]  }
   0x1 LB: > { %s875_s13 = sadd.s32 4294967295, %s1188_s12   ;;  %p879_p0 = scmp.ge.s32.totalorder %s1188_s12, 1  ;;  %s1188_s12 = sphi %s1210_s12, %s13_s12  }
   0x2   : > { %p139_p1 = scmp.lt.s32.totalorder %s1188_s12, 3 }
   0x4   : > { %p140_p2 = pnand %p879_p0, %p139_p1 }
   0x5   : > { %v1114_v0 = vld [vmem:[%s1381_s1 + $0x40] sm:$0xff] (!%p140_p2)   ;;  %v1118_v4 = vld [vmem:[%s1381_s1 + $0x48] sm:$0xff] (!%p140_p2)   ;;  %v1122_v8 = vld [vmem:[%s1381_s1 + $0x50] sm:$0xff] (!%p140_p2)   ;;  %s164_s19 = smul.u32 (!%p140_p2), 12, %s875_s13 }
   0x6   : > { %143 = sbr.rel (%p140_p2) target bundleno = 305 (0x131), region = 32  ;;  %v1115_v1 = vld [vmem:[%s1381_s1 + $0xc0] sm:$0xff] (!%p140_p2)   ;;  %1002 = vmatprep.subr.bf16.mxu0 (!%p140_p2), %v1114_v0  ;;  %v1119_v5 = vld [vmem:[%s1381_s1 + $0xc8] sm:$0xff] (!%p140_p2)   ;;  %v1123_v9 = vld [vmem:[%s1381_s1 + $0xd0] sm:$0xff] (!%p140_p2)  }
   0x7   : > { %v1116_v2 = vld [vmem:[%s1381_s1] sm:$0xff] (!%p140_p2)   ;;  %1054 = vmatprep.subr.bf16.mxu1 (!%p140_p2), %v1115_v1  ;;  %v1120_v6 = vld [vmem:[%s1381_s1 + $0x8] sm:$0xff] (!%p140_p2)   ;;  %v1124_v10 = vld [vmem:[%s1381_s1 + $0x10] sm:$0xff] (!%p140_p2)   ;;  %p165_p3 = scmp.lt.s32.totalorder (!%p140_p2), %s164_s19, 23 }
   0x8   : > { %v1117_v3 = vld [vmem:[%s1381_s1 + $0x80] sm:$0xff] (!%p140_p2)   ;;  %1003 = vmatpush3.bf16.msra.mxu0 (!%p140_p2), %v1116_v2  ;;  %v1121_v7 = vld [vmem:[%s1381_s1 + $0x88] sm:$0xff] (!%p140_p2)   ;;  %v1125_v11 = vld [vmem:[%s1381_s1 + $0x90] sm:$0xff] (!%p140_p2)  }
   0x9   : > { %1055 = vmatpush3.bf16.msra.mxu1 (!%p140_p2), %v1117_v3  ;;  %1004 = vmatprep.subr.bf16.mxu0 (!%p140_p2), %v1118_v4  ;;  %v1126_v12 = vld [vmem:[%s1381_s1 + $0x58] sm:$0xff] (!%p140_p2)   ;;  %v1130_v16 = vld [vmem:[%s1381_s1 + $0x60] sm:$0xff] (!%p140_p2)   ;;  %v1134_v20 = vld [vmem:[%s1381_s1 + $0x68] sm:$0xff] (!%p140_p2)  }
   0xa   : > { %1056 = vmatprep.subr.bf16.mxu1 (!%p140_p2), %v1119_v5  ;;  %v1127_v13 = vld [vmem:[%s1381_s1 + $0xd8] sm:$0xff] (!%p140_p2)   ;;  %v1131_v17 = vld [vmem:[%s1381_s1 + $0xe0] sm:$0xff] (!%p140_p2)   ;;  %v1135_v21 = vld [vmem:[%s1381_s1 + $0xe8] sm:$0xff] (!%p140_p2)  }
   0xb   : > { %v1128_v14 = vld [vmem:[%s1381_s1 + $0x18] sm:$0xff] (!%p140_p2)   ;;  %v1132_v18 = vld [vmem:[%s1381_s1 + $0x20] sm:$0xff] (!%p140_p2)   ;;  %v1136_v22 = vld [vmem:[%s1381_s1 + $0x28] sm:$0xff] (!%p140_p2)  }
   0xc   : > { %1005 = vmatpush3.bf16.msra.mxu0 (!%p140_p2), %v1120_v6  ;;  %v1129_v15 = vld [vmem:[%s1381_s1 + $0x98] sm:$0xff] (!%p140_p2)   ;;  %v1133_v19 = vld [vmem:[%s1381_s1 + $0xa0] sm:$0xff] (!%p140_p2)   ;;  %v1137_v23 = vld [vmem:[%s1381_s1 + $0xa8] sm:$0xff] (!%p140_p2)  }
   0xd   : > { %1057 = vmatpush3.bf16.msra.mxu1 %v1121_v7  ;;  %1006 = vmatprep.subr.bf16.mxu0 %v1122_v8  ;;  %s1385_s19 = smov (!%p165_p3, %s164_s19), 23  ;;  %v1138_v24 = vld [vmem:[%s1381_s1 + $0x70] sm:$0xff]   ;;  %v1142_v28 = vld [vmem:[%s1381_s1 + $0x78] sm:$0xff]   ;;  %v1351_v58 = vld [vmem:[%s1382_s2] ss:$0 sm:$0xff] }
   0xe   : > { %1058 = vmatprep.subr.bf16.mxu1 %v1123_v9  ;;  %v1139_v25 = vld [vmem:[%s1381_s1 + $0xf0] sm:$0xff]   ;;  %s954_s18 = sshll.u32 %s1385_s19, 4  ;;  %v1143_v29 = vld [vmem:[%s1381_s1 + $0xf8] sm:$0xff]   ;;  %s882_s7 = sshll.u32 %s1385_s19, 2 }
   0xf   : > { %v1140_v26 = vld [vmem:[%s1381_s1 + $0x30] sm:$0xff]   ;;  %s1316_s13 = scalar_lea.vmem %s1380_s0, %s954_s18  ;;  %v1144_v30 = vld [vmem:[%s1381_s1 + $0x38] sm:$0xff]   ;;  %s1359_s10 = scalar_lea.vmem %s1383_s3, %s882_s7 }
  0x10   : > { %1007 = vmatpush3.bf16.msra.mxu0 %v1124_v10  ;;  %v1141_v27 = vld [vmem:[%s1381_s1 + $0xb0] sm:$0xff]   ;;  %v1145_v31 = vld [vmem:[%s1381_s1 + $0xb8] sm:$0xff]  }
  0x11   : > { %1059 = vmatpush3.bf16.msra.mxu1 %v1125_v11  ;;  %1008 = vmatprep.subr.bf16.mxu0 %v1126_v12  ;;  %v1146_v32 = vld [vmem:[%s1316_s13] ss:$16 sps:$4 sm:$0xff]   ;;  %v1148_v33 = vld [vmem:[%s1316_s13 + $0x4] ss:$16 sps:$4 sm:$0xff]   ;;  %v1149_v34 = vld [vmem:[%s1316_s13 + $0x8] ss:$16 sps:$4 sm:$0xff]  }
  0x12   : > { %1060 = vmatprep.subr.bf16.mxu1 %v1127_v13  ;;  %v1151_v35 = vld [vmem:[%s1316_s13 + $0xc] ss:$16 sps:$4 sm:$0xff]   ;;  %617 = vmatprep.mubr.bf16.mxu0 %v1148_v33  ;;  %v1152_v36 = vld [vmem:[%s1316_s13 + $0x24] ss:$16 sps:$4 sm:$0xff]   ;;  %v1156_v38 = vld [vmem:[%s1316_s13 + $0x20] ss:$16 sps:$4 sm:$0xff]  }
  0x13   : > { %698 = vmatprep.mubr.bf16.mxu1 %v1151_v35  ;;  %v1154_v37 = vld [vmem:[%s1316_s13 + $0x2c] ss:$16 sps:$4 sm:$0xff]   ;;  %v1157_v39 = vld [vmem:[%s1316_s13 + $0x28] ss:$16 sps:$4 sm:$0xff]   ;;  %v1158_v40 = vld [vmem:[%s1316_s13 + $0x44] ss:$16 sps:$4 sm:$0xff]  }
  0x14   : > { %1009 = vmatpush3.bf16.msra.mxu0 %v1128_v14  ;;  %v1160_v41 = vld [vmem:[%s1316_s13 + $0x4c] ss:$16 sps:$4 sm:$0xff]   ;;  %v1162_v42 = vld [vmem:[%s1316_s13 + $0x40] ss:$16 sps:$4 sm:$0xff]   ;;  %v1163_v43 = vld [vmem:[%s1316_s13 + $0x48] ss:$16 sps:$4 sm:$0xff]  }
  0x15   : > { %1061 = vmatpush3.bf16.msra.mxu1 %v1129_v15  ;;  %1010 = vmatprep.subr.bf16.mxu0 %v1130_v16  ;;  %v1164_v44 = vld [vmem:[%s1316_s13 + $0x64] ss:$16 sps:$4 sm:$0xff]   ;;  %v1166_v45 = vld [vmem:[%s1316_s13 + $0x6c] ss:$16 sps:$4 sm:$0xff]   ;;  %v1168_v46 = vld [vmem:[%s1316_s13 + $0x60] ss:$16 sps:$4 sm:$0xff]  }
  0x16   : > { %1062 = vmatprep.subr.bf16.mxu1 %v1131_v17  ;;  %v1169_v47 = vld [vmem:[%s1316_s13 + $0x68] ss:$16 sps:$4 sm:$0xff]   ;;  %v1170_v48 = vld [vmem:[%s1316_s13 + $0x84] ss:$16 sps:$4 sm:$0xff]   ;;  %v1172_v49 = vld [vmem:[%s1316_s13 + $0x8c] ss:$16 sps:$4 sm:$0xff]  }
  0x17   : > { %v1174_v50 = vld [vmem:[%s1316_s13 + $0x80] ss:$16 sps:$4 sm:$0xff]   ;;  %v1175_v51 = vld [vmem:[%s1316_s13 + $0x88] ss:$16 sps:$4 sm:$0xff]   ;;  %v1176_v52 = vld [vmem:[%s1316_s13 + $0xa4] ss:$16 sps:$4 sm:$0xff]  }
  0x18   : > { %1011 = vmatpush3.bf16.msra.mxu0 %v1132_v18  ;;  %v1178_v53 = vld [vmem:[%s1316_s13 + $0xac] ss:$16 sps:$4 sm:$0xff]   ;;  %v1180_v54 = vld [vmem:[%s1316_s13 + $0xa0] ss:$16 sps:$4 sm:$0xff]   ;;  %v1181_v55 = vld [vmem:[%s1316_s13 + $0xa8] ss:$16 sps:$4 sm:$0xff]  }
  0x19   : > { %1063 = vmatpush3.bf16.msra.mxu1 %v1133_v19  ;;  %1012 = vmatprep.subr.bf16.mxu0 %v1134_v20 }
  0x1a   : > { %1064 = vmatprep.subr.bf16.mxu1 %v1135_v21 }
  0x1c   : > { %1013 = vmatpush3.bf16.msra.mxu0 %v1136_v22 }
  0x1d   : > { %1065 = vmatpush3.bf16.msra.mxu1 %v1137_v23  ;;  %1014 = vmatprep.subr.bf16.mxu0 %v1138_v24 }
  0x1e   : > { %1066 = vmatprep.subr.bf16.mxu1 %v1139_v25 }
  0x20   : > { %1015 = vmatpush3.bf16.msra.mxu0 %v1140_v26 }
  0x21   : > { %1067 = vmatpush3.bf16.msra.mxu1 %v1141_v27  ;;  %1016 = vmatprep.subr.bf16.mxu0 %v1142_v28 }
  0x22   : > { %1068 = vmatprep.subr.bf16.mxu1 %v1143_v29 }
  0x24   : > { %1017 = vmatpush3.bf16.msra.mxu0 %v1144_v30 }
  0x25   : > { %1069 = vmatpush3.bf16.msra.mxu1 %v1145_v31 }
  0x27   : > { %618 = vmatmul.mubr.bf16.vlgmr.msra.gmra.mrb[0].mxu0 %v1146_v32 }
  0x28   : > { %699 = vmatmul.mubr.bf16.vlgmr.msra.gmra.mrb[0].mxu1 %v1149_v34  ;;  %625 = vmatprep.mubr.bf16.mxu0 %v1152_v36 }
  0x29   : > { %706 = vmatprep.mubr.bf16.mxu1 %v1154_v37 }
  0x2f   : > { %626 = vmatmul.mubr.bf16.gmra.mrb[4].mxu0 %v1156_v38 }
  0x30   : > { %707 = vmatmul.mubr.bf16.gmra.mrb[4].mxu1 %v1157_v39  ;;  %633 = vmatprep.mubr.bf16.mxu0 %v1158_v40 }
  0x31   : > { %714 = vmatprep.mubr.bf16.mxu1 %v1160_v41 }
  0x37   : > { %634 = vmatmul.mubr.bf16.gmra.mrb[8].mxu0 %v1162_v42 }
  0x38   : > { %715 = vmatmul.mubr.bf16.gmra.mrb[8].mxu1 %v1163_v43  ;;  %641 = vmatprep.mubr.bf16.mxu0 %v1164_v44 }
  0x39   : > { %722 = vmatprep.mubr.bf16.mxu1 %v1166_v45 }
  0x3f   : > { %642 = vmatmul.mubr.bf16.gmra.mrb[12].mxu0 %v1168_v46 }
  0x40   : > { %723 = vmatmul.mubr.bf16.gmra.mrb[12].mxu1 %v1169_v47  ;;  %649 = vmatprep.mubr.bf16.mxu0 %v1170_v48 }
  0x41   : > { %730 = vmatprep.mubr.bf16.mxu1 %v1172_v49 }
  0x47   : > { %650 = vmatmul.mubr.bf16.gmra.mrb[16].mxu0 %v1174_v50 }
  0x48   : > { %731 = vmatmul.mubr.bf16.gmra.mrb[16].mxu1 %v1175_v51  ;;  %657 = vmatprep.mubr.bf16.mxu0 %v1176_v52 }
  0x49   : > { %738 = vmatprep.mubr.bf16.mxu1 %v1178_v53 }
  0x4f   : > { %658 = vmatmul.mubr.bf16.gmra.mrb[20].mxu0 %v1180_v54 }
  0x50   : > { %739 = vmatmul.mubr.bf16.gmra.mrb[20].mxu1 %v1181_v55 }
  0xfa   : > { %v1018_v56 = vpop.f32.mrb[0].mxu0 }
  0xfb   : > { %v1070_v57 = vpop.f32.mrb[0].mxu1  ;;  %v1019_v59 = vpop.f32.mrb[1].mxu0 }
  0xfc   : > { %v1020_v60 = vadd.f32 %v1019_v59, %v1018_v56  ;;  %v1071_v61 = vpop.f32.mrb[1].mxu1  ;;  %v1021_v62 = vpop.f32.mrb[2].mxu0 }
  0xfd   : > { %v1072_v63 = vadd.f32 %v1071_v61, %v1070_v57  ;;  %v1073_v0 = vpop.f32.mrb[2].mxu1  ;;  %v1022_v1 = vpop.f32.mrb[3].mxu0 }
  0xfe   : > { %v620_v2 = vadd.f32 %v1020_v60, %v1351_v58  ;;  %v1023_v3 = vadd.f32 %v1022_v1, %v1021_v62  ;;  %v1074_v4 = vpop.f32.mrb[3].mxu1 }
  0xff   : > { %v1075_v5 = vadd.f32 %v1074_v4, %v1073_v0 }
 0x100   : > { %v701_v6 = vadd.f32 %v1072_v63, %v620_v2  ;;  %v623_v7 = vadd.f32 %v1023_v3, %v1351_v58 }
 0x102   : > { %v704_v8 = vadd.f32 %v1075_v5, %v623_v7  ;;  %v1024_v9 = vpop.f32.mrb[4].mxu0  ;;  %v747_v12 = vmax.f32 %v701_v6, 0.0 }
 0x103   : > { %v1076_v10 = vpop.f32.mrb[4].mxu1  ;;  %v1025_v11 = vpop.f32.mrb[5].mxu0 }
 0x104   : > { %v748_v13 = vmax.f32 %v704_v8, 0.0  ;;  %v1026_v14 = vadd.f32 %v1025_v11, %v1024_v9  ;;  %v1077_v15 = vpop.f32.mrb[5].mxu1  ;;  %v1027_v16 = vpop.f32.mrb[6].mxu0 }
 0x105   : > { %v1078_v17 = vadd.f32 %v1077_v15, %v1076_v10  ;;  %v1079_v18 = vpop.f32.mrb[6].mxu1  ;;  %v1028_v19 = vpop.f32.mrb[7].mxu0 }
 0x106   : > { %v970_v20 = vpack.c.bf16 %v748_v13, %v747_v12  ;;  %v628_v21 = vadd.f32 %v1026_v14, %v1351_v58  ;;  %v1029_v22 = vadd.f32 %v1028_v19, %v1027_v16  ;;  %v1080_v23 = vpop.f32.mrb[7].mxu1 }
 0x107   : > { %v1081_v24 = vadd.f32 %v1080_v23, %v1079_v18 }
 0x108   : > { %971 = vst [vmem:[%s1359_s10] sm:$0xff] %v970_v20   ;;  %v709_v25 = vadd.f32 %v1078_v17, %v628_v21  ;;  %v631_v26 = vadd.f32 %v1029_v22, %v1351_v58 }
 0x10a   : > { %v712_v27 = vadd.f32 %v1081_v24, %v631_v26  ;;  %v1030_v28 = vpop.f32.mrb[8].mxu0  ;;  %v749_v31 = vmax.f32 %v709_v25, 0.0 }
 0x10b   : > { %v1082_v29 = vpop.f32.mrb[8].mxu1  ;;  %v1031_v30 = vpop.f32.mrb[9].mxu0 }
 0x10c   : > { %v750_v32 = vmax.f32 %v712_v27, 0.0  ;;  %v1032_v33 = vadd.f32 %v1031_v30, %v1030_v28  ;;  %v1083_v34 = vpop.f32.mrb[9].mxu1  ;;  %v1033_v35 = vpop.f32.mrb[10].mxu0 }
 0x10d   : > { %v1084_v36 = vadd.f32 %v1083_v34, %v1082_v29  ;;  %v1085_v37 = vpop.f32.mrb[10].mxu1  ;;  %v1034_v38 = vpop.f32.mrb[11].mxu0 }
 0x10e   : > { %v975_v39 = vpack.c.bf16 %v750_v32, %v749_v31  ;;  %v636_v40 = vadd.f32 %v1032_v33, %v1351_v58  ;;  %v1035_v41 = vadd.f32 %v1034_v38, %v1033_v35  ;;  %v1086_v42 = vpop.f32.mrb[11].mxu1 }
 0x10f   : > { %v1087_v43 = vadd.f32 %v1086_v42, %v1085_v37 }
 0x110   : > { %997 = vst [vmem:[%s1359_s10 + $0x8] sm:$0xff] %v975_v39   ;;  %v717_v44 = vadd.f32 %v1084_v36, %v636_v40  ;;  %v639_v45 = vadd.f32 %v1035_v41, %v1351_v58 }
 0x112   : > { %v720_v46 = vadd.f32 %v1087_v43, %v639_v45  ;;  %v1036_v47 = vpop.f32.mrb[12].mxu0  ;;  %v751_v50 = vmax.f32 %v717_v44, 0.0 }
 0x113   : > { %v1088_v48 = vpop.f32.mrb[12].mxu1  ;;  %v1037_v49 = vpop.f32.mrb[13].mxu0 }
 0x114   : > { %v752_v51 = vmax.f32 %v720_v46, 0.0  ;;  %v1038_v52 = vadd.f32 %v1037_v49, %v1036_v47  ;;  %v1089_v53 = vpop.f32.mrb[13].mxu1  ;;  %v1039_v54 = vpop.f32.mrb[14].mxu0 }
 0x115   : > { %v1090_v55 = vadd.f32 %v1089_v53, %v1088_v48  ;;  %v1091_v56 = vpop.f32.mrb[14].mxu1  ;;  %v1040_v57 = vpop.f32.mrb[15].mxu0 }
 0x116   : > { %v980_v59 = vpack.c.bf16 %v752_v51, %v751_v50  ;;  %v644_v60 = vadd.f32 %v1038_v52, %v1351_v58  ;;  %v1041_v61 = vadd.f32 %v1040_v57, %v1039_v54  ;;  %v1092_v62 = vpop.f32.mrb[15].mxu1 }
 0x117   : > { %v1093_v63 = vadd.f32 %v1092_v62, %v1091_v56 }
 0x118   : > { %998 = vst [vmem:[%s1359_s10 + $0x10] sm:$0xff] %v980_v59   ;;  %v725_v0 = vadd.f32 %v1090_v55, %v644_v60  ;;  %v647_v1 = vadd.f32 %v1041_v61, %v1351_v58 }
 0x11a   : > { %v728_v2 = vadd.f32 %v1093_v63, %v647_v1  ;;  %v1042_v3 = vpop.f32.mrb[16].mxu0  ;;  %v753_v6 = vmax.f32 %v725_v0, 0.0 }
 0x11b   : > { %v1094_v4 = vpop.f32.mrb[16].mxu1  ;;  %v1043_v5 = vpop.f32.mrb[17].mxu0 }
 0x11c   : > { %v754_v7 = vmax.f32 %v728_v2, 0.0  ;;  %v1044_v8 = vadd.f32 %v1043_v5, %v1042_v3  ;;  %v1095_v9 = vpop.f32.mrb[17].mxu1  ;;  %v1045_v10 = vpop.f32.mrb[18].mxu0 }
 0x11d   : > { %v1096_v11 = vadd.f32 %v1095_v9, %v1094_v4  ;;  %v1097_v12 = vpop.f32.mrb[18].mxu1  ;;  %v1046_v13 = vpop.f32.mrb[19].mxu0 }
 0x11e   : > { %v985_v14 = vpack.c.bf16 %v754_v7, %v753_v6  ;;  %v652_v15 = vadd.f32 %v1044_v8, %v1351_v58  ;;  %v1047_v16 = vadd.f32 %v1046_v13, %v1045_v10  ;;  %v1098_v17 = vpop.f32.mrb[19].mxu1 }
 0x11f   : > { %v1099_v18 = vadd.f32 %v1098_v17, %v1097_v12 }
 0x120   : > { %999 = vst [vmem:[%s1359_s10 + $0x18] sm:$0xff] %v985_v14   ;;  %v733_v19 = vadd.f32 %v1096_v11, %v652_v15  ;;  %v655_v20 = vadd.f32 %v1047_v16, %v1351_v58 }
 0x122   : > { %v736_v21 = vadd.f32 %v1099_v18, %v655_v20  ;;  %v1048_v22 = vpop.f32.mrb[20].mxu0  ;;  %v755_v25 = vmax.f32 %v733_v19, 0.0 }
 0x123   : > { %v1100_v23 = vpop.f32.mrb[20].mxu1  ;;  %v1049_v24 = vpop.f32.mrb[21].mxu0 }
 0x124   : > { %v756_v26 = vmax.f32 %v736_v21, 0.0  ;;  %v1050_v27 = vadd.f32 %v1049_v24, %v1048_v22  ;;  %v1101_v28 = vpop.f32.mrb[21].mxu1  ;;  %v1051_v29 = vpop.f32.mrb[22].mxu0 }
 0x125   : > { %v1102_v30 = vadd.f32 %v1101_v28, %v1100_v23  ;;  %v1103_v31 = vpop.f32.mrb[22].mxu1  ;;  %v1052_v32 = vpop.f32.mrb[23].mxu0 }
 0x126   : > { %v990_v33 = vpack.c.bf16 %v756_v26, %v755_v25  ;;  %v660_v34 = vadd.f32 %v1050_v27, %v1351_v58  ;;  %v1053_v35 = vadd.f32 %v1052_v32, %v1051_v29  ;;  %v1104_v36 = vpop.f32.mrb[23].mxu1 }
 0x127   : > { %v1105_v37 = vadd.f32 %v1104_v36, %v1103_v31 }
 0x128   : > { %1000 = vst [vmem:[%s1359_s10 + $0x20] sm:$0xff] %v990_v33   ;;  %v741_v38 = vadd.f32 %v1102_v30, %v660_v34  ;;  %v663_v39 = vadd.f32 %v1053_v35, %v1351_v58 }
 0x12a   : > { %v744_v40 = vadd.f32 %v1105_v37, %v663_v39  ;;  %v757_v41 = vmax.f32 %v741_v38, 0.0 }
 0x12c   : > { %v758_v42 = vmax.f32 %v744_v40, 0.0 }
 0x12e   : > { %v995_v43 = vpack.c.bf16 %v758_v42, %v757_v41 }
 0x130   : > { %1001 = vst [vmem:[%s1359_s10 + $0x28] sm:$0xff] %v995_v43  }
 0x131 PF: > { %s13_s12 = sadd.s32 1, %s1188_s12  }
 0x132   : > { %p10_p4 = scmp.ge.s32.totalorder %s13_s12, 4  }
 0x134   :  { %12 = sbr.rel (!%p10_p4) target bundleno = 1 (0x1), region = 62 }

// kernel: forward_with_heads.6
= control target key start
LH: loop header
LB: loop body
LE: loop exit
PB: predicated region body
PF: predicated region fallthrough
CT: control target
= control target key end

     0   :  { %s1280_s12 = smov 0   ;;  %s1448_s0 = inlined_call_operand.vmem [shape: bf16[128,640], index: 0, kind: input, shape index: {}]   ;;  %s1449_s1 = inlined_call_operand.vmem [shape: bf16[640,128], index: 1, kind: input, shape index: {}]   ;;  %s1450_s2 = inlined_call_operand.vmem [shape: f32[1,128], index: 2, kind: input, shape index: {}]   ;;  %s1451_s3 = inlined_call_operand.vmem [shape: bf16[128,128], index: 3, kind: output, shape index: {}]  }
   0x1 LB: > { %s932_s13 = sadd.s32 4294967295, %s1258_s12   ;;  %p936_p0 = scmp.ge.s32.totalorder %s1258_s12, 1  ;;  %s1258_s12 = sphi %s1280_s12, %s13_s12  }
   0x2   : > { %p139_p1 = scmp.lt.s32.totalorder %s1258_s12, 3 }
   0x4   : > { %p140_p2 = pnand %p936_p0, %p139_p1 }
   0x5   : > { %v1184_v0 = vld [vmem:[%s1449_s1 + $0x40] sm:$0xff] (!%p140_p2)   ;;  %v1188_v4 = vld [vmem:[%s1449_s1 + $0x48] sm:$0xff] (!%p140_p2)   ;;  %v1192_v8 = vld [vmem:[%s1449_s1 + $0x50] sm:$0xff] (!%p140_p2)   ;;  %s937_s19 = sshll.u32 (!%p140_p2), %s932_s13, 3 }
   0x6   : > { %143 = sbr.rel (%p140_p2) target bundleno = 295 (0x127), region = 32  ;;  %v1185_v1 = vld [vmem:[%s1449_s1 + $0xc0] sm:$0xff] (!%p140_p2)   ;;  %1043 = vmatprep.subr.bf16.mxu0 (!%p140_p2), %v1184_v0  ;;  %v1189_v5 = vld [vmem:[%s1449_s1 + $0xc8] sm:$0xff] (!%p140_p2)   ;;  %v1193_v9 = vld [vmem:[%s1449_s1 + $0xd0] sm:$0xff] (!%p140_p2)   ;;  %p165_p3 = scmp.lt.s32.totalorder (!%p140_p2), %s937_s19, 15 }
   0x7   : > { %v1186_v2 = vld [vmem:[%s1449_s1] sm:$0xff] (!%p140_p2)   ;;  %1083 = vmatprep.subr.bf16.mxu1 (!%p140_p2), %v1185_v1  ;;  %v1190_v6 = vld [vmem:[%s1449_s1 + $0x8] sm:$0xff] (!%p140_p2)   ;;  %v1194_v10 = vld [vmem:[%s1449_s1 + $0x10] sm:$0xff] (!%p140_p2)  }
   0x8   : > { %v1187_v3 = vld [vmem:[%s1449_s1 + $0x80] sm:$0xff] (!%p140_p2)   ;;  %1044 = vmatpush3.bf16.msra.mxu0 (!%p140_p2), %v1186_v2  ;;  %v1191_v7 = vld [vmem:[%s1449_s1 + $0x88] sm:$0xff] (!%p140_p2)   ;;  %v1195_v11 = vld [vmem:[%s1449_s1 + $0x90] sm:$0xff] (!%p140_p2)  }
   0x9   : > { %1084 = vmatpush3.bf16.msra.mxu1 (!%p140_p2), %v1187_v3  ;;  %1045 = vmatprep.subr.bf16.mxu0 (!%p140_p2), %v1188_v4  ;;  %v1196_v12 = vld [vmem:[%s1449_s1 + $0x58] sm:$0xff] (!%p140_p2)   ;;  %v1200_v16 = vld [vmem:[%s1449_s1 + $0x60] sm:$0xff] (!%p140_p2)   ;;  %v1204_v20 = vld [vmem:[%s1449_s1 + $0x68] sm:$0xff] (!%p140_p2)  }
   0xa   : > { %1085 = vmatprep.subr.bf16.mxu1 (!%p140_p2), %v1189_v5  ;;  %v1197_v13 = vld [vmem:[%s1449_s1 + $0xd8] sm:$0xff] (!%p140_p2)   ;;  %v1201_v17 = vld [vmem:[%s1449_s1 + $0xe0] sm:$0xff] (!%p140_p2)   ;;  %v1205_v21 = vld [vmem:[%s1449_s1 + $0xe8] sm:$0xff] (!%p140_p2)  }
   0xb   : > { %v1198_v14 = vld [vmem:[%s1449_s1 + $0x18] sm:$0xff] (!%p140_p2)   ;;  %v1202_v18 = vld [vmem:[%s1449_s1 + $0x20] sm:$0xff] (!%p140_p2)   ;;  %v1206_v22 = vld [vmem:[%s1449_s1 + $0x28] sm:$0xff] (!%p140_p2)  }
   0xc   : > { %1046 = vmatpush3.bf16.msra.mxu0 (!%p140_p2), %v1190_v6  ;;  %v1199_v15 = vld [vmem:[%s1449_s1 + $0x98] sm:$0xff] (!%p140_p2)   ;;  %v1203_v19 = vld [vmem:[%s1449_s1 + $0xa0] sm:$0xff] (!%p140_p2)   ;;  %v1207_v23 = vld [vmem:[%s1449_s1 + $0xa8] sm:$0xff] (!%p140_p2)  }
   0xd   : > { %1086 = vmatpush3.bf16.msra.mxu1 %v1191_v7  ;;  %1047 = vmatprep.subr.bf16.mxu0 %v1192_v8  ;;  %s1453_s19 = smov (!%p165_p3, %s937_s19), 15  ;;  %v1208_v24 = vld [vmem:[%s1449_s1 + $0x70] sm:$0xff]   ;;  %v1212_v28 = vld [vmem:[%s1449_s1 + $0x78] sm:$0xff]   ;;  %v1222_v36 = vld [vmem:[%s1449_s1 + $0x100] sm:$0xff]  }
   0xe   : > { %1087 = vmatprep.subr.bf16.mxu1 %v1193_v9  ;;  %v1209_v25 = vld [vmem:[%s1449_s1 + $0xf0] sm:$0xff]   ;;  %s1175_s16 = smul.u32 20, %s1453_s19  ;;  %v1213_v29 = vld [vmem:[%s1449_s1 + $0xf8] sm:$0xff]   ;;  %v1223_v37 = vld [vmem:[%s1449_s1 + $0x108] sm:$0xff]   ;;  %s940_s26 = sshll.u32 %s1453_s19, 2 }
   0xf   : > { %v1210_v26 = vld [vmem:[%s1449_s1 + $0x30] sm:$0xff]   ;;  %v1214_v30 = vld [vmem:[%s1449_s1 + $0x38] sm:$0xff]   ;;  %v1238_v46 = vld [vmem:[%s1449_s1 + $0x120] sm:$0xff]   ;;  %s175_s28 = scalar_lea.vmem %s1451_s3, %s940_s26 }
  0x10   : > { %1048 = vmatpush3.bf16.msra.mxu0 %v1194_v10  ;;  %v1211_v27 = vld [vmem:[%s1449_s1 + $0xb0] sm:$0xff]   ;;  %s1386_s13 = scalar_lea.vmem %s1448_s0, %s1175_s16  ;;  %v1215_v31 = vld [vmem:[%s1449_s1 + $0xb8] sm:$0xff]   ;;  %v1239_v51 = vld [vmem:[%s1449_s1 + $0x128] sm:$0xff]  }
  0x11   : > { %1088 = vmatpush3.bf16.msra.mxu1 %v1195_v11  ;;  %1049 = vmatprep.subr.bf16.mxu0 %v1196_v12  ;;  %v1216_v32 = vld [vmem:[%s1386_s13] ss:$20 sps:$4 sm:$0xff]   ;;  %v1218_v33 = vld [vmem:[%s1386_s13 + $0x4] ss:$20 sps:$4 sm:$0xff]   ;;  %v1219_v34 = vld [vmem:[%s1386_s13 + $0x8] ss:$20 sps:$4 sm:$0xff]  }
  0x12   : > { %1089 = vmatprep.subr.bf16.mxu1 %v1197_v13  ;;  %v1221_v35 = vld [vmem:[%s1386_s13 + $0xc] ss:$20 sps:$4 sm:$0xff]   ;;  %665 = vmatprep.mubr.bf16.mxu0 %v1218_v33  ;;  %v1226_v39 = vld [vmem:[%s1386_s13 + $0x34] ss:$20 sps:$4 sm:$0xff]   ;;  %v1229_v42 = vld [vmem:[%s1386_s13 + $0x30] ss:$20 sps:$4 sm:$0xff]  }
  0x13   : > { %730 = vmatprep.mubr.bf16.mxu1 %v1221_v35  ;;  %v1224_v38 = vld [vmem:[%s1386_s13 + $0x2c] ss:$20 sps:$4 sm:$0xff]   ;;  %v1228_v40 = vld [vmem:[%s1386_s13 + $0x28] ss:$20 sps:$4 sm:$0xff]   ;;  %v1230_v41 = vld [vmem:[%s1449_s1 + $0x110] sm:$0xff]  }
  0x14   : > { %1050 = vmatpush3.bf16.msra.mxu0 %v1198_v14  ;;  %v1232_v43 = vld [vmem:[%s1386_s13 + $0x54] ss:$20 sps:$4 sm:$0xff]   ;;  %v1231_v44 = vld [vmem:[%s1449_s1 + $0x118] sm:$0xff]   ;;  %v1236_v47 = vld [vmem:[%s1386_s13 + $0x50] ss:$20 sps:$4 sm:$0xff]  }
  0x15   : > { %1090 = vmatpush3.bf16.msra.mxu1 %v1199_v15  ;;  %1051 = vmatprep.subr.bf16.mxu0 %v1200_v16  ;;  %v1234_v45 = vld [vmem:[%s1386_s13 + $0x5c] ss:$20 sps:$4 sm:$0xff]   ;;  %v1237_v48 = vld [vmem:[%s1386_s13 + $0x58] ss:$20 sps:$4 sm:$0xff]   ;;  %v1245_v54 = vld [vmem:[%s1386_s13 + $0x80] ss:$20 sps:$4 sm:$0xff]  }
  0x16   : > { %1091 = vmatprep.subr.bf16.mxu1 %v1201_v17  ;;  %v1240_v49 = vld [vmem:[%s1386_s13 + $0x7c] ss:$20 sps:$4 sm:$0xff]   ;;  %v1242_v50 = vld [vmem:[%s1386_s13 + $0x84] ss:$20 sps:$4 sm:$0xff]   ;;  %v1249_v56 = vld [vmem:[%s1386_s13 + $0x60] ss:$20 sps:$4 sm:$0xff]  }
  0x17   : > { %v1246_v52 = vld [vmem:[%s1449_s1 + $0x130] sm:$0xff]   ;;  %v1244_v53 = vld [vmem:[%s1386_s13 + $0x78] ss:$20 sps:$4 sm:$0xff]   ;;  %v1251_v59 = vld [vmem:[%s1386_s13 + $0x88] ss:$20 sps:$4 sm:$0xff]  }
  0x18   : > { %1052 = vmatpush3.bf16.msra.mxu0 %v1202_v18  ;;  %v1248_v55 = vld [vmem:[%s1386_s13 + $0x10] ss:$20 sps:$4 sm:$0xff]   ;;  %v1247_v57 = vld [vmem:[%s1449_s1 + $0x138] sm:$0xff]   ;;  %v941_v62 = vld [vmem:[%s1450_s2] ss:$0 sm:$0xff] }
  0x19   : > { %1092 = vmatpush3.bf16.msra.mxu1 %v1203_v19  ;;  %1053 = vmatprep.subr.bf16.mxu0 %v1204_v20  ;;  %v1250_v58 = vld [vmem:[%s1386_s13 + $0x38] ss:$20 sps:$4 sm:$0xff]  }
  0x1a   : > { %1093 = vmatprep.subr.bf16.mxu1 %v1205_v21 }
  0x1c   : > { %1054 = vmatpush3.bf16.msra.mxu0 %v1206_v22 }
  0x1d   : > { %1094 = vmatpush3.bf16.msra.mxu1 %v1207_v23  ;;  %1055 = vmatprep.subr.bf16.mxu0 %v1208_v24 }
  0x1e   : > { %1095 = vmatprep.subr.bf16.mxu1 %v1209_v25 }
  0x20   : > { %1056 = vmatpush3.bf16.msra.mxu0 %v1210_v26 }
  0x21   : > { %1096 = vmatpush3.bf16.msra.mxu1 %v1211_v27  ;;  %1057 = vmatprep.subr.bf16.mxu0 %v1212_v28 }
  0x22   : > { %1097 = vmatprep.subr.bf16.mxu1 %v1213_v29 }
  0x24   : > { %1058 = vmatpush3.bf16.msra.mxu0 %v1214_v30 }
  0x25   : > { %1098 = vmatpush3.bf16.msra.mxu1 %v1215_v31  ;;  %1135 = vmatprep.subr.bf16.mxu0 %v1222_v36 }
  0x26   : > { %1159 = vmatprep.subr.bf16.mxu1 %v1222_v36 }
  0x27   : > { %666 = vmatmul.mubr.bf16.vlgmr.msra.gmra.mrb[0].mxu0 %v1216_v32 }
  0x28   : > { %731 = vmatmul.mubr.bf16.vlgmr.msra.gmra.mrb[0].mxu1 %v1219_v34  ;;  %1136 = vmatpush3.bf16.msra.mxu0 %v1222_v36 }
  0x29   : > { %1167 = vmatpush3.bf16.msra.mxu1 %v1222_v36  ;;  %1137 = vmatprep.subr.bf16.mxu0 %v1223_v37 }
  0x2a   : > { %1160 = vmatprep.subr.bf16.mxu1 %v1223_v37  ;;  %673 = vmatprep.mubr.bf16.mxu0 %v1224_v38 }
  0x2b   : > { %738 = vmatprep.mubr.bf16.mxu1 %v1226_v39 }
  0x2c   : > { %1138 = vmatpush3.bf16.msra.mxu0 %v1223_v37 }
  0x2d   : > { %1168 = vmatpush3.bf16.msra.mxu1 %v1223_v37  ;;  %1139 = vmatprep.subr.bf16.mxu0 %v1230_v41 }
  0x2e   : > { %1161 = vmatprep.subr.bf16.mxu1 %v1230_v41 }
  0x2f   : > { %674 = vmatmul.mubr.bf16.gmra.mrb[4].mxu0 %v1228_v40 }
  0x30   : > { %739 = vmatmul.mubr.bf16.gmra.mrb[4].mxu1 %v1229_v42  ;;  %681 = vmatprep.mubr.bf16.mxu0 %v1232_v43 }
  0x31   : > { %1140 = vmatpush3.bf16.msra.mxu0 %v1230_v41  ;;  %746 = vmatprep.mubr.bf16.mxu1 %v1234_v45 }
  0x32   : > { %1169 = vmatpush3.bf16.msra.mxu1 %v1230_v41  ;;  %1141 = vmatprep.subr.bf16.mxu0 %v1231_v44 }
  0x33   : > { %1162 = vmatprep.subr.bf16.mxu1 %v1231_v44 }
  0x35   : > { %1142 = vmatpush3.bf16.msra.mxu0 %v1231_v44 }
  0x36   : > { %1170 = vmatpush3.bf16.msra.mxu1 %v1231_v44  ;;  %1143 = vmatprep.subr.bf16.mxu0 %v1238_v46 }
  0x37   : > { %682 = vmatmul.mubr.bf16.gmra.mrb[8].mxu0 %v1236_v47  ;;  %1163 = vmatprep.subr.bf16.mxu1 %v1238_v46 }
  0x38   : > { %747 = vmatmul.mubr.bf16.gmra.mrb[8].mxu1 %v1237_v48  ;;  %689 = vmatprep.mubr.bf16.mxu0 %v1240_v49 }
  0x39   : > { %1144 = vmatpush3.bf16.msra.mxu0 %v1238_v46  ;;  %754 = vmatprep.mubr.bf16.mxu1 %v1242_v50 }
  0x3a   : > { %1171 = vmatpush3.bf16.msra.mxu1 %v1238_v46  ;;  %1145 = vmatprep.subr.bf16.mxu0 %v1239_v51 }
  0x3b   : > { %1164 = vmatprep.subr.bf16.mxu1 %v1239_v51 }
  0x3d   : > { %1146 = vmatpush3.bf16.msra.mxu0 %v1239_v51 }
  0x3e   : > { %1172 = vmatpush3.bf16.msra.mxu1 %v1239_v51  ;;  %1147 = vmatprep.subr.bf16.mxu0 %v1246_v52 }
  0x3f   : > { %690 = vmatmul.mubr.bf16.gmra.mrb[12].mxu0 %v1244_v53  ;;  %1165 = vmatprep.subr.bf16.mxu1 %v1246_v52 }
  0x40   : > { %755 = vmatmul.mubr.bf16.gmra.mrb[12].mxu1 %v1245_v54  ;;  %1151 = vmatprep.mubr.bf16.mxu0 %v1248_v55 }
  0x41   : > { %1148 = vmatpush3.bf16.msra.mxu0 %v1246_v52  ;;  %1155 = vmatprep.mubr.bf16.mxu1 %v1249_v56 }
  0x42   : > { %1173 = vmatpush3.bf16.msra.mxu1 %v1246_v52  ;;  %1149 = vmatprep.subr.bf16.mxu0 %v1247_v57 }
  0x43   : > { %1166 = vmatprep.subr.bf16.mxu1 %v1247_v57 }
  0x45   : > { %1150 = vmatpush3.bf16.msra.mxu0 %v1247_v57 }
  0x46   : > { %1174 = vmatpush3.bf16.msra.mxu1 %v1247_v57 }
  0x48   : > { %1152 = vmatmul.mubr.bf16.vlgmr.msra.gmra.mrb[16].mxu0 %v1250_v58 }
  0x49   : > { %1156 = vmatmul.mubr.bf16.vlgmr.msra.gmra.mrb[16].mxu1 %v1251_v59 }
  0xfa   : > { %v1059_v60 = vpop.f32.mrb[0].mxu0 }
  0xfb   : > { %v1099_v61 = vpop.f32.mrb[0].mxu1  ;;  %v1060_v63 = vpop.f32.mrb[1].mxu0 }
  0xfc   : > { %v1061_v0 = vadd.f32 %v1060_v63, %v1059_v60  ;;  %v1100_v1 = vpop.f32.mrb[1].mxu1  ;;  %v1062_v2 = vpop.f32.mrb[2].mxu0 }
  0xfd   : > { %v1101_v3 = vadd.f32 %v1100_v1, %v1099_v61  ;;  %v1102_v4 = vpop.f32.mrb[2].mxu1  ;;  %v1063_v5 = vpop.f32.mrb[3].mxu0 }
  0xfe   : > { %v668_v6 = vadd.f32 %v1061_v0, %v941_v62  ;;  %v1064_v7 = vadd.f32 %v1063_v5, %v1062_v2  ;;  %v1103_v8 = vpop.f32.mrb[3].mxu1 }
  0xff   : > { %v1104_v9 = vadd.f32 %v1103_v8, %v1102_v4 }
 0x100   : > { %v671_v10 = vadd.f32 %v1064_v7, %v941_v62  ;;  %v733_v11 = vadd.f32 %v1101_v3, %v668_v6 }
 0x102   : > { %v1065_v12 = vpop.f32.mrb[4].mxu0  ;;  %v736_v13 = vadd.f32 %v1104_v9, %v671_v10 }
 0x103   : > { %v1105_v14 = vpop.f32.mrb[4].mxu1  ;;  %v1066_v15 = vpop.f32.mrb[5].mxu0 }
 0x104   : > { %v1067_v16 = vadd.f32 %v1066_v15, %v1065_v12  ;;  %v1106_v17 = vpop.f32.mrb[5].mxu1  ;;  %v1068_v18 = vpop.f32.mrb[6].mxu0 }
 0x105   : > { %v1107_v19 = vadd.f32 %v1106_v17, %v1105_v14  ;;  %v1108_v20 = vpop.f32.mrb[6].mxu1  ;;  %v1069_v21 = vpop.f32.mrb[7].mxu0 }
 0x106   : > { %v676_v22 = vadd.f32 %v1067_v16, %v941_v62  ;;  %v1070_v23 = vadd.f32 %v1069_v21, %v1068_v18  ;;  %v1109_v24 = vpop.f32.mrb[7].mxu1 }
 0x107   : > { %v1110_v25 = vadd.f32 %v1109_v24, %v1108_v20 }
 0x108   : > { %v679_v26 = vadd.f32 %v1070_v23, %v941_v62  ;;  %v741_v27 = vadd.f32 %v1107_v19, %v676_v22 }
 0x10a   : > { %v1071_v28 = vpop.f32.mrb[8].mxu0  ;;  %v744_v29 = vadd.f32 %v1110_v25, %v679_v26 }
 0x10b   : > { %v1111_v30 = vpop.f32.mrb[8].mxu1  ;;  %v1072_v31 = vpop.f32.mrb[9].mxu0 }
 0x10c   : > { %v1073_v32 = vadd.f32 %v1072_v31, %v1071_v28  ;;  %v1112_v33 = vpop.f32.mrb[9].mxu1  ;;  %v1074_v34 = vpop.f32.mrb[10].mxu0 }
 0x10d   : > { %v1113_v35 = vadd.f32 %v1112_v33, %v1111_v30  ;;  %v1114_v36 = vpop.f32.mrb[10].mxu1  ;;  %v1075_v37 = vpop.f32.mrb[11].mxu0 }
 0x10e   : > { %v684_v38 = vadd.f32 %v1073_v32, %v941_v62  ;;  %v1076_v39 = vadd.f32 %v1075_v37, %v1074_v34  ;;  %v1115_v40 = vpop.f32.mrb[11].mxu1 }
 0x10f   : > { %v1116_v41 = vadd.f32 %v1115_v40, %v1114_v36 }
 0x110   : > { %v687_v42 = vadd.f32 %v1076_v39, %v941_v62  ;;  %v749_v43 = vadd.f32 %v1113_v35, %v684_v38 }
 0x112   : > { %v1077_v44 = vpop.f32.mrb[12].mxu0  ;;  %v752_v45 = vadd.f32 %v1116_v41, %v687_v42 }
 0x113   : > { %v1117_v46 = vpop.f32.mrb[12].mxu1  ;;  %v1078_v47 = vpop.f32.mrb[13].mxu0 }
 0x114   : > { %v1079_v48 = vadd.f32 %v1078_v47, %v1077_v44  ;;  %v1118_v49 = vpop.f32.mrb[13].mxu1  ;;  %v1080_v50 = vpop.f32.mrb[14].mxu0 }
 0x115   : > { %v1119_v51 = vadd.f32 %v1118_v49, %v1117_v46  ;;  %v1120_v52 = vpop.f32.mrb[14].mxu1  ;;  %v1081_v53 = vpop.f32.mrb[15].mxu0 }
 0x116   : > { %v692_v54 = vadd.f32 %v1079_v48, %v941_v62  ;;  %v1082_v55 = vadd.f32 %v1081_v53, %v1080_v50  ;;  %v1121_v56 = vpop.f32.mrb[15].mxu1 }
 0x117   : > { %v1122_v57 = vadd.f32 %v1121_v56, %v1120_v52 }
 0x118   : > { %v695_v58 = vadd.f32 %v1082_v55, %v941_v62  ;;  %v757_v59 = vadd.f32 %v1119_v51, %v692_v54 }
 0x11a   : > { %v760_v60 = vadd.f32 %v1122_v57, %v695_v58 }
 0x11b   : > { %v1153_v61 = vpop.f32.mrb[16].mxu0 }
 0x11c   : > { %v806_v63 = vadd.f32 %v1153_v61, %v741_v27  ;;  %v1157_v0 = vpop.f32.mrb[16].mxu1  ;;  %v797_v1 = vpop.f32.mrb[17].mxu0 }
 0x11d   : > { %v822_v2 = vadd.f32 %v1157_v0, %v757_v59  ;;  %v798_v3 = vadd.f32 %v797_v1, %v733_v11  ;;  %v813_v4 = vpop.f32.mrb[17].mxu1  ;;  %v1154_v5 = vpop.f32.mrb[18].mxu0 }
 0x11e   : > { %v814_v6 = vadd.f32 %v813_v4, %v749_v43  ;;  %v809_v7 = vadd.f32 %v1154_v5, %v744_v29  ;;  %v1158_v8 = vpop.f32.mrb[18].mxu1  ;;  %v800_v9 = vpop.f32.mrb[19].mxu0  ;;  %v830_v15 = vmax.f32 %v806_v63, 0.0 }
 0x11f   : > { %v825_v10 = vadd.f32 %v1158_v8, %v760_v60  ;;  %v801_v12 = vadd.f32 %v800_v9, %v736_v13  ;;  %v816_v14 = vpop.f32.mrb[19].mxu1  ;;  %v834_v17 = vmax.f32 %v822_v2, 0.0  ;;  %v828_v18 = vmax.f32 %v798_v3, 0.0 }
 0x120   : > { %v831_v62 = vmax.f32 %v809_v7, 0.0  ;;  %v817_v16 = vadd.f32 %v816_v14, %v752_v45  ;;  %v832_v20 = vmax.f32 %v814_v6, 0.0 }
 0x121   : > { %v835_v11 = vmax.f32 %v825_v10, 0.0  ;;  %v829_v19 = vmax.f32 %v801_v12, 0.0 }
 0x122   : > { %v1028_v21 = vpack.c.bf16 %v831_v62, %v830_v15  ;;  %v833_v22 = vmax.f32 %v817_v16, 0.0 }
 0x123   : > { %v1038_v23 = vpack.c.bf16 %v835_v11, %v834_v17  ;;  %v1023_v24 = vpack.c.bf16 %v829_v19, %v828_v18 }
 0x124   : > { %1040 = vst [vmem:[%s175_s28 + $0x8] sm:$0xff] %v1028_v21   ;;  %v1033_v25 = vpack.c.bf16 %v833_v22, %v832_v20 }
 0x125   : > { %1042 = vst [vmem:[%s175_s28 + $0x18] sm:$0xff] %v1038_v23   ;;  %1024 = vst [vmem:[%s175_s28] sm:$0xff] %v1023_v24  }
 0x126   : > { %1041 = vst [vmem:[%s175_s28 + $0x10] sm:$0xff] %v1033_v25  }
 0x127 PF: > { %s13_s12 = sadd.s32 1, %s1258_s12  }
 0x128   : > { %p10_p4 = scmp.ge.s32.totalorder %s13_s12, 4  }
 0x12a   :  { %12 = sbr.rel (!%p10_p4) target bundleno = 1 (0x1), region = 62 }

// kernel: forward_with_heads.7
= control target key start
LH: loop header
LB: loop body
LE: loop exit
PB: predicated region body
PF: predicated region fallthrough
CT: control target
= control target key end

     0   :  { %s21645_s1 = inlined_call_operand.vmem [shape: bf16[6272,512], index: 1, kind: input, shape index: {}]   ;;  %s21646_s0 = inlined_call_operand.vmem [shape: bf16[16,6272], index: 0, kind: input, shape index: {}]   ;;  %s21647_s3 = inlined_call_operand.vmem [shape: bf16[512,128], index: 3, kind: input, shape index: {}]   ;;  %s21648_s2 = inlined_call_operand.vmem [shape: f32[1,512], index: 2, kind: input, shape index: {}]   ;;  %s21649_s5 = inlined_call_operand.vmem [shape: f32[16,512], index: 5, kind: output, shape index: {0}]   ;;  %s21650_s4 = inlined_call_operand.vmem [shape: f32[1,128], index: 4, kind: input, shape index: {}]   ;;  %s21651_s6 = inlined_call_operand.vmem [shape: f32[16,128], index: 6, kind: output, shape index: {1}]  }
   0x1   :  { %v14169_v0 = vld [vmem:[%s21645_s1 + $0x4] ss:$16 sps:$4 sm:$0xff]   ;;  %v14171_v1 = vld [vmem:[%s21645_s1 + $0xc] ss:$16 sps:$4 sm:$0xff]   ;;  %v14173_v2 = vld [vmem:[%s21645_s1] ss:$16 sps:$4 sm:$0xff]  }
   0x2   :  { %9749 = vmatprep.subr.bf16.mxu0 %v14169_v0  ;;  %v14174_v3 = vld [vmem:[%s21645_s1 + $0x8] ss:$16 sps:$4 sm:$0xff]   ;;  %10824 = vmatprep.subr.bf16.mxu1 %v14171_v1  ;;  %v14175_v4 = vld [vmem:[%s21645_s1 + $0x24] ss:$16 sps:$4 sm:$0xff]   ;;  %v14177_v5 = vld [vmem:[%s21645_s1 + $0x2c] ss:$16 sps:$4 sm:$0xff]  }
   0x3   :  { %9750 = vmatpush1.bf16.msra.mxu0 %v14173_v2  ;;  %10825 = vmatpush1.bf16.msra.mxu1 %v14174_v3  ;;  %v14179_v6 = vld [vmem:[%s21645_s1 + $0x20] ss:$16 sps:$4 sm:$0xff]   ;;  %v14180_v7 = vld [vmem:[%s21645_s1 + $0x28] ss:$16 sps:$4 sm:$0xff]   ;;  %v14181_v8 = vld [vmem:[%s21645_s1 + $0x44] ss:$16 sps:$4 sm:$0xff]  }
   0x4   :  { %9751 = vmatprep.subr.bf16.mxu0 %v14175_v4  ;;  %10826 = vmatprep.subr.bf16.mxu1 %v14177_v5  ;;  %v14183_v9 = vld [vmem:[%s21645_s1 + $0x4c] ss:$16 sps:$4 sm:$0xff]   ;;  %v14185_v10 = vld [vmem:[%s21645_s1 + $0x40] ss:$16 sps:$4 sm:$0xff]   ;;  %v14186_v11 = vld [vmem:[%s21645_s1 + $0x48] ss:$16 sps:$4 sm:$0xff]  }
   0x5   :  { %v14187_v12 = vld [vmem:[%s21645_s1 + $0x64] ss:$16 sps:$4 sm:$0xff]   ;;  %v14189_v13 = vld [vmem:[%s21645_s1 + $0x6c] ss:$16 sps:$4 sm:$0xff]   ;;  %v14191_v14 = vld [vmem:[%s21645_s1 + $0x60] ss:$16 sps:$4 sm:$0xff]  }
   0x6   :  { %v14192_v15 = vld [vmem:[%s21645_s1 + $0x68] ss:$16 sps:$4 sm:$0xff]   ;;  %v14193_v16 = vld [vmem:[%s21645_s1 + $0x84] ss:$16 sps:$4 sm:$0xff]   ;;  %v14195_v17 = vld [vmem:[%s21645_s1 + $0x8c] ss:$16 sps:$4 sm:$0xff]  }
   0x7   :  { %9752 = vmatpush1.bf16.msra.mxu0 %v14179_v6  ;;  %10827 = vmatpush1.bf16.msra.mxu1 %v14180_v7  ;;  %v14197_v18 = vld [vmem:[%s21645_s1 + $0x80] ss:$16 sps:$4 sm:$0xff]   ;;  %v14198_v19 = vld [vmem:[%s21645_s1 + $0x88] ss:$16 sps:$4 sm:$0xff]   ;;  %v14199_v20 = vld [vmem:[%s21645_s1 + $0xa4] ss:$16 sps:$4 sm:$0xff]  }
   0x8   :  { %9753 = vmatprep.subr.bf16.mxu0 %v14181_v8  ;;  %10828 = vmatprep.subr.bf16.mxu1 %v14183_v9  ;;  %v14201_v21 = vld [vmem:[%s21645_s1 + $0xac] ss:$16 sps:$4 sm:$0xff]   ;;  %v14203_v22 = vld [vmem:[%s21645_s1 + $0xa0] ss:$16 sps:$4 sm:$0xff]   ;;  %v14204_v23 = vld [vmem:[%s21645_s1 + $0xa8] ss:$16 sps:$4 sm:$0xff]  }
   0x9   :  { %v14205_v24 = vld [vmem:[%s21645_s1 + $0xc4] ss:$16 sps:$4 sm:$0xff]   ;;  %v14207_v25 = vld [vmem:[%s21645_s1 + $0xcc] ss:$16 sps:$4 sm:$0xff]   ;;  %v14209_v26 = vld [vmem:[%s21645_s1 + $0xc0] ss:$16 sps:$4 sm:$0xff]  }
   0xa   :  { %v14210_v27 = vld [vmem:[%s21645_s1 + $0xc8] ss:$16 sps:$4 sm:$0xff]   ;;  %v14211_v28 = vld [vmem:[%s21645_s1 + $0xe4] ss:$16 sps:$4 sm:$0xff]   ;;  %v14213_v29 = vld [vmem:[%s21645_s1 + $0xec] ss:$16 sps:$4 sm:$0xff]  }
   0xb   :  { %9754 = vmatpush1.bf16.msra.mxu0 %v14185_v10  ;;  %10829 = vmatpush1.bf16.msra.mxu1 %v14186_v11  ;;  %v14215_v30 = vld [vmem:[%s21645_s1 + $0xe0] ss:$16 sps:$4 sm:$0xff]   ;;  %v14216_v31 = vld [vmem:[%s21645_s1 + $0xe8] ss:$16 sps:$4 sm:$0xff]   ;;  %v14217_v32 = vld [vmem:[%s21645_s1 + $0x104] ss:$16 sps:$4 sm:$0xff]  }
   0xc   :  { %9755 = vmatprep.subr.bf16.mxu0 %v14187_v12  ;;  %10830 = vmatprep.subr.bf16.mxu1 %v14189_v13  ;;  %v14219_v33 = vld [vmem:[%s21645_s1 + $0x10c] ss:$16 sps:$4 sm:$0xff]   ;;  %v14221_v34 = vld [vmem:[%s21645_s1 + $0x100] ss:$16 sps:$4 sm:$0xff]   ;;  %v14222_v35 = vld [vmem:[%s21645_s1 + $0x108] ss:$16 sps:$4 sm:$0xff]  }
   0xd   :  { %v14223_v36 = vld [vmem:[%s21645_s1 + $0x124] ss:$16 sps:$4 sm:$0xff]   ;;  %v14225_v37 = vld [vmem:[%s21645_s1 + $0x12c] ss:$16 sps:$4 sm:$0xff]   ;;  %v14227_v38 = vld [vmem:[%s21645_s1 + $0x120] ss:$16 sps:$4 sm:$0xff]  }
   0xe   :  { %v14228_v39 = vld [vmem:[%s21645_s1 + $0x128] ss:$16 sps:$4 sm:$0xff]   ;;  %v14229_v40 = vld [vmem:[%s21645_s1 + $0x144] ss:$16 sps:$4 sm:$0xff]   ;;  %v14231_v41 = vld [vmem:[%s21645_s1 + $0x14c] ss:$16 sps:$4 sm:$0xff]  }
   0xf   :  { %9756 = vmatpush1.bf16.msra.mxu0 %v14191_v14  ;;  %10831 = vmatpush1.bf16.msra.mxu1 %v14192_v15  ;;  %v14233_v42 = vld [vmem:[%s21645_s1 + $0x140] ss:$16 sps:$4 sm:$0xff]   ;;  %v14234_v43 = vld [vmem:[%s21645_s1 + $0x148] ss:$16 sps:$4 sm:$0xff]   ;;  %v14235_v44 = vld [vmem:[%s21645_s1 + $0x164] ss:$16 sps:$4 sm:$0xff]  }
  0x10   :  { %9757 = vmatprep.subr.bf16.mxu0 %v14193_v16  ;;  %10832 = vmatprep.subr.bf16.mxu1 %v14195_v17  ;;  %v14237_v45 = vld [vmem:[%s21645_s1 + $0x16c] ss:$16 sps:$4 sm:$0xff]   ;;  %v14239_v46 = vld [vmem:[%s21645_s1 + $0x160] ss:$16 sps:$4 sm:$0xff]   ;;  %v14240_v47 = vld [vmem:[%s21645_s1 + $0x168] ss:$16 sps:$4 sm:$0xff]  }
  0x11   :  { %v14267_v48 = vld [vmem:[%s21646_s0 + $0x4] ss:$196 sps:$4 sm:$0xff]   ;;  %v14243_v50 = vld [vmem:[%s21645_s1 + $0x18c] ss:$16 sps:$4 sm:$0xff]   ;;  %v14245_v51 = vld [vmem:[%s21645_s1 + $0x180] ss:$16 sps:$4 sm:$0xff]  }
  0x12   :  { %v14241_v49 = vld [vmem:[%s21645_s1 + $0x184] ss:$16 sps:$4 sm:$0xff]   ;;  %9781 = vmatprep.mubr.bf16.mxu0 %v14267_v48  ;;  %10856 = vmatprep.mubr.bf16.mxu1 %v14267_v48  ;;  %v14246_v52 = vld [vmem:[%s21645_s1 + $0x188] ss:$16 sps:$4 sm:$0xff]   ;;  %v14249_v54 = vld [vmem:[%s21645_s1 + $0x1ac] ss:$16 sps:$4 sm:$0xff]  }
  0x13   :  { %9758 = vmatpush1.bf16.msra.mxu0 %v14197_v18  ;;  %10833 = vmatpush1.bf16.msra.mxu1 %v14198_v19  ;;  %v14247_v53 = vld [vmem:[%s21645_s1 + $0x1a4] ss:$16 sps:$4 sm:$0xff]   ;;  %v14251_v55 = vld [vmem:[%s21645_s1 + $0x1a0] ss:$16 sps:$4 sm:$0xff]   ;;  %v14252_v56 = vld [vmem:[%s21645_s1 + $0x1a8] ss:$16 sps:$4 sm:$0xff]  }
  0x14   :  { %9759 = vmatprep.subr.bf16.mxu0 %v14199_v20  ;;  %10834 = vmatprep.subr.bf16.mxu1 %v14201_v21  ;;  %v14253_v57 = vld [vmem:[%s21645_s1 + $0x1c4] ss:$16 sps:$4 sm:$0xff]   ;;  %v14255_v58 = vld [vmem:[%s21645_s1 + $0x1cc] ss:$16 sps:$4 sm:$0xff]   ;;  %v14257_v59 = vld [vmem:[%s21645_s1 + $0x1c0] ss:$16 sps:$4 sm:$0xff]  }
  0x15   :  { %v14258_v60 = vld [vmem:[%s21645_s1 + $0x1c8] ss:$16 sps:$4 sm:$0xff]   ;;  %v14259_v61 = vld [vmem:[%s21645_s1 + $0x1e4] ss:$16 sps:$4 sm:$0xff]   ;;  %v14261_v62 = vld [vmem:[%s21645_s1 + $0x1ec] ss:$16 sps:$4 sm:$0xff]  }
  0x16   :  { %v14263_v63 = vld [vmem:[%s21645_s1 + $0x1e0] ss:$16 sps:$4 sm:$0xff]   ;;  %v14264_v0 = vld [vmem:[%s21645_s1 + $0x1e8] ss:$16 sps:$4 sm:$0xff]   ;;  %v14270_v1 = vld [vmem:[%s21645_s1 + $0x204] ss:$16 sps:$4 sm:$0xff]  }
  0x17   :  { %9760 = vmatpush1.bf16.msra.mxu0 %v14203_v22  ;;  %10835 = vmatpush1.bf16.msra.mxu1 %v14204_v23  ;;  %v14273_v2 = vld [vmem:[%s21645_s1 + $0x20c] ss:$16 sps:$4 sm:$0xff]   ;;  %v14265_v3 = vld [vmem:[%s21646_s0] ss:$196 sps:$4 sm:$0xff]   ;;  %v14271_v5 = vld [vmem:[%s21645_s1 + $0x208] ss:$16 sps:$4 sm:$0xff]  }
  0x18   :  { %9761 = vmatprep.subr.bf16.mxu0 %v14205_v24  ;;  %10836 = vmatprep.subr.bf16.mxu1 %v14207_v25  ;;  %v14268_v4 = vld [vmem:[%s21645_s1 + $0x200] ss:$16 sps:$4 sm:$0xff]   ;;  %v14276_v6 = vld [vmem:[%s21645_s1 + $0x224] ss:$16 sps:$4 sm:$0xff]   ;;  %v14279_v7 = vld [vmem:[%s21645_s1 + $0x22c] ss:$16 sps:$4 sm:$0xff]  }
  0x19   :  { %v14274_v8 = vld [vmem:[%s21645_s1 + $0x220] ss:$16 sps:$4 sm:$0xff]   ;;  %v14277_v9 = vld [vmem:[%s21645_s1 + $0x228] ss:$16 sps:$4 sm:$0xff]   ;;  %v14282_v10 = vld [vmem:[%s21645_s1 + $0x244] ss:$16 sps:$4 sm:$0xff]  }
  0x1a   :  { %v14285_v11 = vld [vmem:[%s21645_s1 + $0x24c] ss:$16 sps:$4 sm:$0xff]   ;;  %v14280_v12 = vld [vmem:[%s21645_s1 + $0x240] ss:$16 sps:$4 sm:$0xff]   ;;  %v14283_v13 = vld [vmem:[%s21645_s1 + $0x248] ss:$16 sps:$4 sm:$0xff]  }
  0x1b   :  { %9762 = vmatpush1.bf16.msra.mxu0 %v14209_v26  ;;  %10837 = vmatpush1.bf16.msra.mxu1 %v14210_v27  ;;  %v14288_v14 = vld [vmem:[%s21645_s1 + $0x264] ss:$16 sps:$4 sm:$0xff]   ;;  %v14291_v15 = vld [vmem:[%s21645_s1 + $0x26c] ss:$16 sps:$4 sm:$0xff]   ;;  %v14286_v16 = vld [vmem:[%s21645_s1 + $0x260] ss:$16 sps:$4 sm:$0xff]  }
  0x1c   :  { %9763 = vmatprep.subr.bf16.mxu0 %v14211_v28  ;;  %10838 = vmatprep.subr.bf16.mxu1 %v14213_v29  ;;  %v14289_v17 = vld [vmem:[%s21645_s1 + $0x268] ss:$16 sps:$4 sm:$0xff]   ;;  %v14294_v18 = vld [vmem:[%s21645_s1 + $0x284] ss:$16 sps:$4 sm:$0xff]   ;;  %v14297_v19 = vld [vmem:[%s21645_s1 + $0x28c] ss:$16 sps:$4 sm:$0xff]  }
  0x1d   :  { %v14292_v20 = vld [vmem:[%s21645_s1 + $0x280] ss:$16 sps:$4 sm:$0xff]   ;;  %v14295_v21 = vld [vmem:[%s21645_s1 + $0x288] ss:$16 sps:$4 sm:$0xff]   ;;  %v14300_v22 = vld [vmem:[%s21645_s1 + $0x2a4] ss:$16 sps:$4 sm:$0xff]  }
  0x1e   :  { %v14303_v23 = vld [vmem:[%s21645_s1 + $0x2ac] ss:$16 sps:$4 sm:$0xff]   ;;  %v14298_v24 = vld [vmem:[%s21645_s1 + $0x2a0] ss:$16 sps:$4 sm:$0xff]   ;;  %v14301_v25 = vld [vmem:[%s21645_s1 + $0x2a8] ss:$16 sps:$4 sm:$0xff]  }
  0x1f   :  { %9764 = vmatpush1.bf16.msra.mxu0 %v14215_v30  ;;  %10839 = vmatpush1.bf16.msra.mxu1 %v14216_v31  ;;  %v14306_v26 = vld [vmem:[%s21645_s1 + $0x2c4] ss:$16 sps:$4 sm:$0xff]   ;;  %v14309_v27 = vld [vmem:[%s21645_s1 + $0x2cc] ss:$16 sps:$4 sm:$0xff]   ;;  %v14304_v28 = vld [vmem:[%s21645_s1 + $0x2c0] ss:$16 sps:$4 sm:$0xff]  }
  0x20   :  { %9765 = vmatprep.subr.bf16.mxu0 %v14217_v32  ;;  %10840 = vmatprep.subr.bf16.mxu1 %v14219_v33  ;;  %v14307_v29 = vld [vmem:[%s21645_s1 + $0x2c8] ss:$16 sps:$4 sm:$0xff]   ;;  %v14366_v30 = vld [vmem:[%s21646_s0 + $0xc] ss:$196 sps:$4 sm:$0xff]   ;;  %v14312_v31 = vld [vmem:[%s21645_s1 + $0x2e4] ss:$16 sps:$4 sm:$0xff]  }
  0x21   :  { %v14315_v32 = vld [vmem:[%s21645_s1 + $0x2ec] ss:$16 sps:$4 sm:$0xff]   ;;  %v14310_v33 = vld [vmem:[%s21645_s1 + $0x2e0] ss:$16 sps:$4 sm:$0xff]  }
  0x22   :  { %v14339_v48 = vld [vmem:[%s21645_s1 + $0x36c] ss:$16 sps:$4 sm:$0xff]  }
  0x23   :  { %9766 = vmatpush1.bf16.msra.mxu0 %v14221_v34  ;;  %10841 = vmatpush1.bf16.msra.mxu1 %v14222_v35  ;;  %v14313_v34 = vld [vmem:[%s21645_s1 + $0x2e8] ss:$16 sps:$4 sm:$0xff]   ;;  %v14318_v35 = vld [vmem:[%s21645_s1 + $0x304] ss:$16 sps:$4 sm:$0xff]  }
  0x24   :  { %9767 = vmatprep.subr.bf16.mxu0 %v14223_v36  ;;  %10842 = vmatprep.subr.bf16.mxu1 %v14225_v37  ;;  %v14321_v36 = vld [vmem:[%s21645_s1 + $0x30c] ss:$16 sps:$4 sm:$0xff]   ;;  %v14316_v37 = vld [vmem:[%s21645_s1 + $0x300] ss:$16 sps:$4 sm:$0xff]  }
  0x27   :  { %9768 = vmatpush1.bf16.msra.mxu0 %v14227_v38  ;;  %10843 = vmatpush1.bf16.msra.mxu1 %v14228_v39  ;;  %v14319_v38 = vld [vmem:[%s21645_s1 + $0x308] ss:$16 sps:$4 sm:$0xff]   ;;  %v14324_v39 = vld [vmem:[%s21645_s1 + $0x324] ss:$16 sps:$4 sm:$0xff]  }
  0x28   :  { %9769 = vmatprep.subr.bf16.mxu0 %v14229_v40  ;;  %10844 = vmatprep.subr.bf16.mxu1 %v14231_v41  ;;  %v14327_v40 = vld [vmem:[%s21645_s1 + $0x32c] ss:$16 sps:$4 sm:$0xff]   ;;  %v14322_v41 = vld [vmem:[%s21645_s1 + $0x320] ss:$16 sps:$4 sm:$0xff]  }
  0x2b   :  { %9770 = vmatpush1.bf16.msra.mxu0 %v14233_v42  ;;  %10845 = vmatpush1.bf16.msra.mxu1 %v14234_v43  ;;  %v14325_v42 = vld [vmem:[%s21645_s1 + $0x328] ss:$16 sps:$4 sm:$0xff]   ;;  %v14330_v43 = vld [vmem:[%s21645_s1 + $0x344] ss:$16 sps:$4 sm:$0xff]  }
  0x2c   :  { %9771 = vmatprep.subr.bf16.mxu0 %v14235_v44  ;;  %10846 = vmatprep.subr.bf16.mxu1 %v14237_v45  ;;  %v14333_v44 = vld [vmem:[%s21645_s1 + $0x34c] ss:$16 sps:$4 sm:$0xff]   ;;  %v14328_v45 = vld [vmem:[%s21645_s1 + $0x340] ss:$16 sps:$4 sm:$0xff]  }
  0x2f   :  { %9772 = vmatpush1.bf16.msra.mxu0 %v14239_v46  ;;  %10847 = vmatpush1.bf16.msra.mxu1 %v14240_v47  ;;  %v14331_v46 = vld [vmem:[%s21645_s1 + $0x348] ss:$16 sps:$4 sm:$0xff]   ;;  %v14336_v47 = vld [vmem:[%s21645_s1 + $0x364] ss:$16 sps:$4 sm:$0xff]  }
  0x30   :  { %9773 = vmatprep.subr.bf16.mxu0 %v14241_v49  ;;  %10848 = vmatprep.subr.bf16.mxu1 %v14243_v50  ;;  %v14334_v49 = vld [vmem:[%s21645_s1 + $0x360] ss:$16 sps:$4 sm:$0xff]   ;;  %v14337_v50 = vld [vmem:[%s21645_s1 + $0x368] ss:$16 sps:$4 sm:$0xff]  }
  0x33   :  { %9774 = vmatpush1.bf16.msra.mxu0 %v14245_v51  ;;  %10849 = vmatpush1.bf16.msra.mxu1 %v14246_v52  ;;  %v14342_v51 = vld [vmem:[%s21645_s1 + $0x384] ss:$16 sps:$4 sm:$0xff]   ;;  %v14345_v52 = vld [vmem:[%s21645_s1 + $0x38c] ss:$16 sps:$4 sm:$0xff]  }
  0x34   :  { %9775 = vmatprep.subr.bf16.mxu0 %v14247_v53  ;;  %10850 = vmatprep.subr.bf16.mxu1 %v14249_v54  ;;  %v14340_v53 = vld [vmem:[%s21645_s1 + $0x380] ss:$16 sps:$4 sm:$0xff]   ;;  %v14343_v54 = vld [vmem:[%s21645_s1 + $0x388] ss:$16 sps:$4 sm:$0xff]  }
  0x37   :  { %9776 = vmatpush1.bf16.msra.mxu0 %v14251_v55  ;;  %10851 = vmatpush1.bf16.msra.mxu1 %v14252_v56  ;;  %v14348_v55 = vld [vmem:[%s21645_s1 + $0x3a4] ss:$16 sps:$4 sm:$0xff]   ;;  %v14351_v56 = vld [vmem:[%s21645_s1 + $0x3ac] ss:$16 sps:$4 sm:$0xff]  }
  0x38   :  { %9777 = vmatprep.subr.bf16.mxu0 %v14253_v57  ;;  %10852 = vmatprep.subr.bf16.mxu1 %v14255_v58  ;;  %v14346_v57 = vld [vmem:[%s21645_s1 + $0x3a0] ss:$16 sps:$4 sm:$0xff]   ;;  %v14349_v58 = vld [vmem:[%s21645_s1 + $0x3a8] ss:$16 sps:$4 sm:$0xff]  }
  0x3b   :  { %9778 = vmatpush1.bf16.msra.mxu0 %v14257_v59  ;;  %10853 = vmatpush1.bf16.msra.mxu1 %v14258_v60  ;;  %v14354_v59 = vld [vmem:[%s21645_s1 + $0x3c4] ss:$16 sps:$4 sm:$0xff]   ;;  %v14357_v60 = vld [vmem:[%s21645_s1 + $0x3cc] ss:$16 sps:$4 sm:$0xff]  }
  0x3c   :  { %9779 = vmatprep.subr.bf16.mxu0 %v14259_v61  ;;  %10854 = vmatprep.subr.bf16.mxu1 %v14261_v62  ;;  %v14352_v61 = vld [vmem:[%s21645_s1 + $0x3c0] ss:$16 sps:$4 sm:$0xff]   ;;  %v14355_v62 = vld [vmem:[%s21645_s1 + $0x3c8] ss:$16 sps:$4 sm:$0xff]  }
  0x3f   :  { %9780 = vmatpush1.bf16.msra.mxu0 %v14263_v63  ;;  %10855 = vmatpush1.bf16.msra.mxu1 %v14264_v0  ;;  %v14360_v63 = vld [vmem:[%s21645_s1 + $0x3e4] ss:$16 sps:$4 sm:$0xff]   ;;  %v14363_v0 = vld [vmem:[%s21645_s1 + $0x3ec] ss:$16 sps:$4 sm:$0xff]  }
  0x40   :  { %9792 = vmatprep.subr.bf16.mxu0 %v14270_v1  ;;  %10867 = vmatprep.subr.bf16.mxu1 %v14273_v2  ;;  %v14358_v1 = vld [vmem:[%s21645_s1 + $0x3e0] ss:$16 sps:$4 sm:$0xff]   ;;  %v14361_v2 = vld [vmem:[%s21645_s1 + $0x3e8] ss:$16 sps:$4 sm:$0xff]  }
  0x42   :  { %9782 = vmatmul.mubr.bf16.vlgmr.msra.gmra.mrb[0].mxu0 %v14265_v3  ;;  %10857 = vmatmul.mubr.bf16.vlgmr.msra.gmra.mrb[0].mxu1 %v14265_v3  ;;  %v14369_v3 = vld [vmem:[%s21645_s1 + $0x404] ss:$16 sps:$4 sm:$0xff]  }
  0x43   :  { %9793 = vmatpush1.bf16.msra.mxu0 %v14268_v4  ;;  %10868 = vmatpush1.bf16.msra.mxu1 %v14271_v5  ;;  %v14372_v4 = vld [vmem:[%s21645_s1 + $0x40c] ss:$16 sps:$4 sm:$0xff]  }
  0x44   :  { %9794 = vmatprep.subr.bf16.mxu0 %v14276_v6  ;;  %10869 = vmatprep.subr.bf16.mxu1 %v14279_v7  ;;  %v14364_v5 = vld [vmem:[%s21646_s0 + $0x8] ss:$196 sps:$4 sm:$0xff]   ;;  %v14367_v6 = vld [vmem:[%s21645_s1 + $0x400] ss:$16 sps:$4 sm:$0xff]  }
  0x45   :  { %9824 = vmatprep.mubr.bf16.mxu0 %v14366_v30  ;;  %10899 = vmatprep.mubr.bf16.mxu1 %v14366_v30  ;;  %v14370_v7 = vld [vmem:[%s21645_s1 + $0x408] ss:$16 sps:$4 sm:$0xff]   ;;  %v14408_v30 = vld [vmem:[%s21645_s1 + $0x4cc] ss:$16 sps:$4 sm:$0xff]  }
  0x47   :  { %9795 = vmatpush1.bf16.msra.mxu0 %v14274_v8  ;;  %10870 = vmatpush1.bf16.msra.mxu1 %v14277_v9  ;;  %v14375_v8 = vld [vmem:[%s21645_s1 + $0x424] ss:$16 sps:$4 sm:$0xff]   ;;  %v14378_v9 = vld [vmem:[%s21645_s1 + $0x42c] ss:$16 sps:$4 sm:$0xff]  }
  0x48   :  { %9796 = vmatprep.subr.bf16.mxu0 %v14282_v10  ;;  %10871 = vmatprep.subr.bf16.mxu1 %v14285_v11  ;;  %v14373_v10 = vld [vmem:[%s21645_s1 + $0x420] ss:$16 sps:$4 sm:$0xff]   ;;  %v14376_v11 = vld [vmem:[%s21645_s1 + $0x428] ss:$16 sps:$4 sm:$0xff]  }
  0x4b   :  { %9797 = vmatpush1.bf16.msra.mxu0 %v14280_v12  ;;  %10872 = vmatpush1.bf16.msra.mxu1 %v14283_v13  ;;  %v14465_v12 = vld [vmem:[%s21646_s0 + $0x14] ss:$196 sps:$4 sm:$0xff]  }
  0x4c   :  { %9798 = vmatprep.subr.bf16.mxu0 %v14288_v14  ;;  %10873 = vmatprep.subr.bf16.mxu1 %v14291_v15  ;;  %v14381_v13 = vld [vmem:[%s21645_s1 + $0x444] ss:$16 sps:$4 sm:$0xff]   ;;  %v14384_v14 = vld [vmem:[%s21645_s1 + $0x44c] ss:$16 sps:$4 sm:$0xff]   ;;  %v14379_v15 = vld [vmem:[%s21645_s1 + $0x440] ss:$16 sps:$4 sm:$0xff]  }
  0x4f   :  { %9799 = vmatpush1.bf16.msra.mxu0 %v14286_v16  ;;  %10874 = vmatpush1.bf16.msra.mxu1 %v14289_v17  ;;  %v14382_v16 = vld [vmem:[%s21645_s1 + $0x448] ss:$16 sps:$4 sm:$0xff]   ;;  %v14387_v17 = vld [vmem:[%s21645_s1 + $0x464] ss:$16 sps:$4 sm:$0xff]  }
  0x50   :  { %9800 = vmatprep.subr.bf16.mxu0 %v14294_v18  ;;  %10875 = vmatprep.subr.bf16.mxu1 %v14297_v19  ;;  %v14390_v18 = vld [vmem:[%s21645_s1 + $0x46c] ss:$16 sps:$4 sm:$0xff]   ;;  %v14385_v19 = vld [vmem:[%s21645_s1 + $0x460] ss:$16 sps:$4 sm:$0xff]  }
  0x53   :  { %9801 = vmatpush1.bf16.msra.mxu0 %v14292_v20  ;;  %10876 = vmatpush1.bf16.msra.mxu1 %v14295_v21  ;;  %v14388_v20 = vld [vmem:[%s21645_s1 + $0x468] ss:$16 sps:$4 sm:$0xff]   ;;  %v14393_v21 = vld [vmem:[%s21645_s1 + $0x484] ss:$16 sps:$4 sm:$0xff]  }
  0x54   :  { %9802 = vmatprep.subr.bf16.mxu0 %v14300_v22  ;;  %10877 = vmatprep.subr.bf16.mxu1 %v14303_v23  ;;  %v14396_v22 = vld [vmem:[%s21645_s1 + $0x48c] ss:$16 sps:$4 sm:$0xff]   ;;  %v14391_v23 = vld [vmem:[%s21645_s1 + $0x480] ss:$16 sps:$4 sm:$0xff]  }
  0x57   :  { %9803 = vmatpush1.bf16.msra.mxu0 %v14298_v24  ;;  %10878 = vmatpush1.bf16.msra.mxu1 %v14301_v25  ;;  %v14394_v24 = vld [vmem:[%s21645_s1 + $0x488] ss:$16 sps:$4 sm:$0xff]   ;;  %v14399_v25 = vld [vmem:[%s21645_s1 + $0x4a4] ss:$16 sps:$4 sm:$0xff]  }
  0x58   :  { %9804 = vmatprep.subr.bf16.mxu0 %v14306_v26  ;;  %10879 = vmatprep.subr.bf16.mxu1 %v14309_v27  ;;  %v14402_v26 = vld [vmem:[%s21645_s1 + $0x4ac] ss:$16 sps:$4 sm:$0xff]   ;;  %v14397_v27 = vld [vmem:[%s21645_s1 + $0x4a0] ss:$16 sps:$4 sm:$0xff]  }
  0x5b   :  { %9805 = vmatpush1.bf16.msra.mxu0 %v14304_v28  ;;  %10880 = vmatpush1.bf16.msra.mxu1 %v14307_v29  ;;  %v14400_v28 = vld [vmem:[%s21645_s1 + $0x4a8] ss:$16 sps:$4 sm:$0xff]   ;;  %v14405_v29 = vld [vmem:[%s21645_s1 + $0x4c4] ss:$16 sps:$4 sm:$0xff]  }
  0x5c   :  { %9806 = vmatprep.subr.bf16.mxu0 %v14312_v31  ;;  %10881 = vmatprep.subr.bf16.mxu1 %v14315_v32  ;;  %v14403_v31 = vld [vmem:[%s21645_s1 + $0x4c0] ss:$16 sps:$4 sm:$0xff]   ;;  %v14406_v32 = vld [vmem:[%s21645_s1 + $0x4c8] ss:$16 sps:$4 sm:$0xff]  }
  0x5f   :  { %9807 = vmatpush1.bf16.msra.mxu0 %v14310_v33  ;;  %10882 = vmatpush1.bf16.msra.mxu1 %v14313_v34  ;;  %v14411_v33 = vld [vmem:[%s21645_s1 + $0x4e4] ss:$16 sps:$4 sm:$0xff]   ;;  %v14414_v34 = vld [vmem:[%s21645_s1 + $0x4ec] ss:$16 sps:$4 sm:$0xff]  }
  0x60   :  { %9808 = vmatprep.subr.bf16.mxu0 %v14318_v35  ;;  %10883 = vmatprep.subr.bf16.mxu1 %v14321_v36  ;;  %v14409_v35 = vld [vmem:[%s21645_s1 + $0x4e0] ss:$16 sps:$4 sm:$0xff]   ;;  %v14412_v36 = vld [vmem:[%s21645_s1 + $0x4e8] ss:$16 sps:$4 sm:$0xff]  }
  0x63   :  { %9809 = vmatpush1.bf16.msra.mxu0 %v14316_v37  ;;  %10884 = vmatpush1.bf16.msra.mxu1 %v14319_v38  ;;  %v14417_v37 = vld [vmem:[%s21645_s1 + $0x504] ss:$16 sps:$4 sm:$0xff]   ;;  %v14420_v38 = vld [vmem:[%s21645_s1 + $0x50c] ss:$16 sps:$4 sm:$0xff]  }
  0x64   :  { %9810 = vmatprep.subr.bf16.mxu0 %v14324_v39  ;;  %10885 = vmatprep.subr.bf16.mxu1 %v14327_v40  ;;  %v14415_v39 = vld [vmem:[%s21645_s1 + $0x500] ss:$16 sps:$4 sm:$0xff]   ;;  %v14418_v40 = vld [vmem:[%s21645_s1 + $0x508] ss:$16 sps:$4 sm:$0xff]  }
  0x67   :  { %9811 = vmatpush1.bf16.msra.mxu0 %v14322_v41  ;;  %10886 = vmatpush1.bf16.msra.mxu1 %v14325_v42  ;;  %v14423_v41 = vld [vmem:[%s21645_s1 + $0x524] ss:$16 sps:$4 sm:$0xff]   ;;  %v14426_v42 = vld [vmem:[%s21645_s1 + $0x52c] ss:$16 sps:$4 sm:$0xff]  }
  0x68   :  { %9812 = vmatprep.subr.bf16.mxu0 %v14330_v43  ;;  %10887 = vmatprep.subr.bf16.mxu1 %v14333_v44  ;;  %v14421_v43 = vld [vmem:[%s21645_s1 + $0x520] ss:$16 sps:$4 sm:$0xff]   ;;  %v14424_v44 = vld [vmem:[%s21645_s1 + $0x528] ss:$16 sps:$4 sm:$0xff]  }
  0x6b   :  { %9813 = vmatpush1.bf16.msra.mxu0 %v14328_v45  ;;  %10888 = vmatpush1.bf16.msra.mxu1 %v14331_v46  ;;  %v14429_v45 = vld [vmem:[%s21645_s1 + $0x544] ss:$16 sps:$4 sm:$0xff]   ;;  %v14432_v46 = vld [vmem:[%s21645_s1 + $0x54c] ss:$16 sps:$4 sm:$0xff]  }
  0x6c   :  { %9814 = vmatprep.subr.bf16.mxu0 %v14336_v47  ;;  %10889 = vmatprep.subr.bf16.mxu1 %v14339_v48  ;;  %v14427_v47 = vld [vmem:[%s21645_s1 + $0x540] ss:$16 sps:$4 sm:$0xff]   ;;  %v14430_v48 = vld [vmem:[%s21645_s1 + $0x548] ss:$16 sps:$4 sm:$0xff]  }
  0x6f   :  { %9815 = vmatpush1.bf16.msra.mxu0 %v14334_v49  ;;  %10890 = vmatpush1.bf16.msra.mxu1 %v14337_v50  ;;  %v14435_v49 = vld [vmem:[%s21645_s1 + $0x564] ss:$16 sps:$4 sm:$0xff]   ;;  %v14438_v50 = vld [vmem:[%s21645_s1 + $0x56c] ss:$16 sps:$4 sm:$0xff]  }
  0x70   :  { %9816 = vmatprep.subr.bf16.mxu0 %v14342_v51  ;;  %10891 = vmatprep.subr.bf16.mxu1 %v14345_v52  ;;  %v14433_v51 = vld [vmem:[%s21645_s1 + $0x560] ss:$16 sps:$4 sm:$0xff]   ;;  %v14436_v52 = vld [vmem:[%s21645_s1 + $0x568] ss:$16 sps:$4 sm:$0xff]  }
  0x73   :  { %9817 = vmatpush1.bf16.msra.mxu0 %v14340_v53  ;;  %10892 = vmatpush1.bf16.msra.mxu1 %v14343_v54  ;;  %v14441_v53 = vld [vmem:[%s21645_s1 + $0x584] ss:$16 sps:$4 sm:$0xff]   ;;  %v14444_v54 = vld [vmem:[%s21645_s1 + $0x58c] ss:$16 sps:$4 sm:$0xff]  }
  0x74   :  { %9818 = vmatprep.subr.bf16.mxu0 %v14348_v55  ;;  %10893 = vmatprep.subr.bf16.mxu1 %v14351_v56  ;;  %v14439_v55 = vld [vmem:[%s21645_s1 + $0x580] ss:$16 sps:$4 sm:$0xff]   ;;  %v14442_v56 = vld [vmem:[%s21645_s1 + $0x588] ss:$16 sps:$4 sm:$0xff]  }
  0x77   :  { %9819 = vmatpush1.bf16.msra.mxu0 %v14346_v57  ;;  %10894 = vmatpush1.bf16.msra.mxu1 %v14349_v58  ;;  %v14447_v57 = vld [vmem:[%s21645_s1 + $0x5a4] ss:$16 sps:$4 sm:$0xff]   ;;  %v14450_v58 = vld [vmem:[%s21645_s1 + $0x5ac] ss:$16 sps:$4 sm:$0xff]  }
  0x78   :  { %9820 = vmatprep.subr.bf16.mxu0 %v14354_v59  ;;  %10895 = vmatprep.subr.bf16.mxu1 %v14357_v60  ;;  %v14445_v59 = vld [vmem:[%s21645_s1 + $0x5a0] ss:$16 sps:$4 sm:$0xff]   ;;  %v14448_v60 = vld [vmem:[%s21645_s1 + $0x5a8] ss:$16 sps:$4 sm:$0xff]  }
  0x7b   :  { %9821 = vmatpush1.bf16.msra.mxu0 %v14352_v61  ;;  %10896 = vmatpush1.bf16.msra.mxu1 %v14355_v62  ;;  %v14453_v61 = vld [vmem:[%s21645_s1 + $0x5c4] ss:$16 sps:$4 sm:$0xff]   ;;  %v14456_v62 = vld [vmem:[%s21645_s1 + $0x5cc] ss:$16 sps:$4 sm:$0xff]  }
  0x7c   :  { %9822 = vmatprep.subr.bf16.mxu0 %v14360_v63  ;;  %10897 = vmatprep.subr.bf16.mxu1 %v14363_v0  ;;  %v14451_v63 = vld [vmem:[%s21645_s1 + $0x5c0] ss:$16 sps:$4 sm:$0xff]   ;;  %v14454_v0 = vld [vmem:[%s21645_s1 + $0x5c8] ss:$16 sps:$4 sm:$0xff]  }
  0x7f   :  { %9823 = vmatpush1.bf16.msra.mxu0 %v14358_v1  ;;  %10898 = vmatpush1.bf16.msra.mxu1 %v14361_v2  ;;  %v14459_v1 = vld [vmem:[%s21645_s1 + $0x5e4] ss:$16 sps:$4 sm:$0xff]   ;;  %v14462_v2 = vld [vmem:[%s21645_s1 + $0x5ec] ss:$16 sps:$4 sm:$0xff]  }
  0x80   :  { %9835 = vmatprep.subr.bf16.mxu0 %v14369_v3  ;;  %10910 = vmatprep.subr.bf16.mxu1 %v14372_v4  ;;  %v14457_v3 = vld [vmem:[%s21645_s1 + $0x5e0] ss:$16 sps:$4 sm:$0xff]   ;;  %v14460_v4 = vld [vmem:[%s21645_s1 + $0x5e8] ss:$16 sps:$4 sm:$0xff]  }
  0x82   :  { %9825 = vmatmul.mubr.bf16.vlgmr.msra.gmra.mrb[0].mxu0 %v14364_v5  ;;  %10900 = vmatmul.mubr.bf16.vlgmr.msra.gmra.mrb[0].mxu1 %v14364_v5  ;;  %v14468_v5 = vld [vmem:[%s21645_s1 + $0x604] ss:$16 sps:$4 sm:$0xff]  }
  0x83   :  { %9836 = vmatpush1.bf16.msra.mxu0 %v14367_v6  ;;  %10911 = vmatpush1.bf16.msra.mxu1 %v14370_v7  ;;  %v14471_v6 = vld [vmem:[%s21645_s1 + $0x60c] ss:$16 sps:$4 sm:$0xff]   ;;  %v14463_v7 = vld [vmem:[%s21646_s0 + $0x10] ss:$196 sps:$4 sm:$0xff]  }
  0x84   :  { %9837 = vmatprep.subr.bf16.mxu0 %v14375_v8  ;;  %10912 = vmatprep.subr.bf16.mxu1 %v14378_v9  ;;  %v14466_v8 = vld [vmem:[%s21645_s1 + $0x600] ss:$16 sps:$4 sm:$0xff]   ;;  %v14469_v9 = vld [vmem:[%s21645_s1 + $0x608] ss:$16 sps:$4 sm:$0xff]  }
  0x85   :  { %9867 = vmatprep.mubr.bf16.mxu0 %v14465_v12  ;;  %10942 = vmatprep.mubr.bf16.mxu1 %v14465_v12  ;;  %v14564_v12 = vld [vmem:[%s21646_s0 + $0x1c] ss:$196 sps:$4 sm:$0xff]  }
  0x87   :  { %9838 = vmatpush1.bf16.msra.mxu0 %v14373_v10  ;;  %10913 = vmatpush1.bf16.msra.mxu1 %v14376_v11  ;;  %v14474_v10 = vld [vmem:[%s21645_s1 + $0x624] ss:$16 sps:$4 sm:$0xff]   ;;  %v14477_v11 = vld [vmem:[%s21645_s1 + $0x62c] ss:$16 sps:$4 sm:$0xff]  }
  0x88   :  { %9839 = vmatprep.subr.bf16.mxu0 %v14381_v13  ;;  %10914 = vmatprep.subr.bf16.mxu1 %v14384_v14  ;;  %v14472_v13 = vld [vmem:[%s21645_s1 + $0x620] ss:$16 sps:$4 sm:$0xff]   ;;  %v14475_v14 = vld [vmem:[%s21645_s1 + $0x628] ss:$16 sps:$4 sm:$0xff]  }
  0x8b   :  { %9840 = vmatpush1.bf16.msra.mxu0 %v14379_v15  ;;  %10915 = vmatpush1.bf16.msra.mxu1 %v14382_v16  ;;  %v14480_v15 = vld [vmem:[%s21645_s1 + $0x644] ss:$16 sps:$4 sm:$0xff]   ;;  %v14483_v16 = vld [vmem:[%s21645_s1 + $0x64c] ss:$16 sps:$4 sm:$0xff]  }
  0x8c   :  { %9841 = vmatprep.subr.bf16.mxu0 %v14387_v17  ;;  %10916 = vmatprep.subr.bf16.mxu1 %v14390_v18  ;;  %v14478_v17 = vld [vmem:[%s21645_s1 + $0x640] ss:$16 sps:$4 sm:$0xff]   ;;  %v14481_v18 = vld [vmem:[%s21645_s1 + $0x648] ss:$16 sps:$4 sm:$0xff]  }
  0x8f   :  { %9842 = vmatpush1.bf16.msra.mxu0 %v14385_v19  ;;  %10917 = vmatpush1.bf16.msra.mxu1 %v14388_v20  ;;  %v14486_v19 = vld [vmem:[%s21645_s1 + $0x664] ss:$16 sps:$4 sm:$0xff]   ;;  %v14489_v20 = vld [vmem:[%s21645_s1 + $0x66c] ss:$16 sps:$4 sm:$0xff]  }
  0x90   :  { %9843 = vmatprep.subr.bf16.mxu0 %v14393_v21  ;;  %10918 = vmatprep.subr.bf16.mxu1 %v14396_v22  ;;  %v14484_v21 = vld [vmem:[%s21645_s1 + $0x660] ss:$16 sps:$4 sm:$0xff]   ;;  %v14487_v22 = vld [vmem:[%s21645_s1 + $0x668] ss:$16 sps:$4 sm:$0xff]  }
  0x93   :  { %9844 = vmatpush1.bf16.msra.mxu0 %v14391_v23  ;;  %10919 = vmatpush1.bf16.msra.mxu1 %v14394_v24  ;;  %v14492_v23 = vld [vmem:[%s21645_s1 + $0x684] ss:$16 sps:$4 sm:$0xff]   ;;  %v14495_v24 = vld [vmem:[%s21645_s1 + $0x68c] ss:$16 sps:$4 sm:$0xff]  }
  0x94   :  { %9845 = vmatprep.subr.bf16.mxu0 %v14399_v25  ;;  %10920 = vmatprep.subr.bf16.mxu1 %v14402_v26  ;;  %v14490_v25 = vld [vmem:[%s21645_s1 + $0x680] ss:$16 sps:$4 sm:$0xff]   ;;  %v14493_v26 = vld [vmem:[%s21645_s1 + $0x688] ss:$16 sps:$4 sm:$0xff]  }
  0x97   :  { %9846 = vmatpush1.bf16.msra.mxu0 %v14397_v27  ;;  %10921 = vmatpush1.bf16.msra.mxu1 %v14400_v28  ;;  %v14498_v27 = vld [vmem:[%s21645_s1 + $0x6a4] ss:$16 sps:$4 sm:$0xff]   ;;  %v14501_v28 = vld [vmem:[%s21645_s1 + $0x6ac] ss:$16 sps:$4 sm:$0xff]  }
  0x98   :  { %9847 = vmatprep.subr.bf16.mxu0 %v14405_v29  ;;  %10922 = vmatprep.subr.bf16.mxu1 %v14408_v30  ;;  %v14496_v29 = vld [vmem:[%s21645_s1 + $0x6a0] ss:$16 sps:$4 sm:$0xff]   ;;  %v14499_v30 = vld [vmem:[%s21645_s1 + $0x6a8] ss:$16 sps:$4 sm:$0xff]  }
  0x9b   :  { %9848 = vmatpush1.bf16.msra.mxu0 %v14403_v31  ;;  %10923 = vmatpush1.bf16.msra.mxu1 %v14406_v32  ;;  %v14504_v31 = vld [vmem:[%s21645_s1 + $0x6c4] ss:$16 sps:$4 sm:$0xff]   ;;  %v14507_v32 = vld [vmem:[%s21645_s1 + $0x6cc] ss:$16 sps:$4 sm:$0xff]  }
  0x9c   :  { %9849 = vmatprep.subr.bf16.mxu0 %v14411_v33  ;;  %10924 = vmatprep.subr.bf16.mxu1 %v14414_v34  ;;  %v14502_v33 = vld [vmem:[%s21645_s1 + $0x6c0] ss:$16 sps:$4 sm:$0xff]   ;;  %v14505_v34 = vld [vmem:[%s21645_s1 + $0x6c8] ss:$16 sps:$4 sm:$0xff]  }
  0x9f   :  { %9850 = vmatpush1.bf16.msra.mxu0 %v14409_v35  ;;  %10925 = vmatpush1.bf16.msra.mxu1 %v14412_v36  ;;  %v14510_v35 = vld [vmem:[%s21645_s1 + $0x6e4] ss:$16 sps:$4 sm:$0xff]   ;;  %v14513_v36 = vld [vmem:[%s21645_s1 + $0x6ec] ss:$16 sps:$4 sm:$0xff]  }
  0xa0   :  { %9851 = vmatprep.subr.bf16.mxu0 %v14417_v37  ;;  %10926 = vmatprep.subr.bf16.mxu1 %v14420_v38  ;;  %v14508_v37 = vld [vmem:[%s21645_s1 + $0x6e0] ss:$16 sps:$4 sm:$0xff]   ;;  %v14511_v38 = vld [vmem:[%s21645_s1 + $0x6e8] ss:$16 sps:$4 sm:$0xff]  }
  0xa3   :  { %9852 = vmatpush1.bf16.msra.mxu0 %v14415_v39  ;;  %10927 = vmatpush1.bf16.msra.mxu1 %v14418_v40  ;;  %v14516_v39 = vld [vmem:[%s21645_s1 + $0x704] ss:$16 sps:$4 sm:$0xff]   ;;  %v14519_v40 = vld [vmem:[%s21645_s1 + $0x70c] ss:$16 sps:$4 sm:$0xff]  }
  0xa4   :  { %9853 = vmatprep.subr.bf16.mxu0 %v14423_v41  ;;  %10928 = vmatprep.subr.bf16.mxu1 %v14426_v42  ;;  %v14514_v41 = vld [vmem:[%s21645_s1 + $0x700] ss:$16 sps:$4 sm:$0xff]   ;;  %v14517_v42 = vld [vmem:[%s21645_s1 + $0x708] ss:$16 sps:$4 sm:$0xff]  }
  0xa7   :  { %9854 = vmatpush1.bf16.msra.mxu0 %v14421_v43  ;;  %10929 = vmatpush1.bf16.msra.mxu1 %v14424_v44  ;;  %v14522_v43 = vld [vmem:[%s21645_s1 + $0x724] ss:$16 sps:$4 sm:$0xff]   ;;  %v14525_v44 = vld [vmem:[%s21645_s1 + $0x72c] ss:$16 sps:$4 sm:$0xff]  }
  0xa8   :  { %9855 = vmatprep.subr.bf16.mxu0 %v14429_v45  ;;  %10930 = vmatprep.subr.bf16.mxu1 %v14432_v46  ;;  %v14520_v45 = vld [vmem:[%s21645_s1 + $0x720] ss:$16 sps:$4 sm:$0xff]   ;;  %v14523_v46 = vld [vmem:[%s21645_s1 + $0x728] ss:$16 sps:$4 sm:$0xff]  }
  0xab   :  { %9856 = vmatpush1.bf16.msra.mxu0 %v14427_v47  ;;  %10931 = vmatpush1.bf16.msra.mxu1 %v14430_v48  ;;  %v14528_v47 = vld [vmem:[%s21645_s1 + $0x744] ss:$16 sps:$4 sm:$0xff]   ;;  %v14531_v48 = vld [vmem:[%s21645_s1 + $0x74c] ss:$16 sps:$4 sm:$0xff]  }
  0xac   :  { %9857 = vmatprep.subr.bf16.mxu0 %v14435_v49  ;;  %10932 = vmatprep.subr.bf16.mxu1 %v14438_v50  ;;  %v14526_v49 = vld [vmem:[%s21645_s1 + $0x740] ss:$16 sps:$4 sm:$0xff]   ;;  %v14529_v50 = vld [vmem:[%s21645_s1 + $0x748] ss:$16 sps:$4 sm:$0xff]  }
  0xaf   :  { %9858 = vmatpush1.bf16.msra.mxu0 %v14433_v51  ;;  %10933 = vmatpush1.bf16.msra.mxu1 %v14436_v52  ;;  %v14534_v51 = vld [vmem:[%s21645_s1 + $0x764] ss:$16 sps:$4 sm:$0xff]   ;;  %v14537_v52 = vld [vmem:[%s21645_s1 + $0x76c] ss:$16 sps:$4 sm:$0xff]  }
  0xb0   :  { %9859 = vmatprep.subr.bf16.mxu0 %v14441_v53  ;;  %10934 = vmatprep.subr.bf16.mxu1 %v14444_v54  ;;  %v14532_v53 = vld [vmem:[%s21645_s1 + $0x760] ss:$16 sps:$4 sm:$0xff]   ;;  %v14535_v54 = vld [vmem:[%s21645_s1 + $0x768] ss:$16 sps:$4 sm:$0xff]  }
  0xb3   :  { %9860 = vmatpush1.bf16.msra.mxu0 %v14439_v55  ;;  %10935 = vmatpush1.bf16.msra.mxu1 %v14442_v56  ;;  %v14540_v55 = vld [vmem:[%s21645_s1 + $0x784] ss:$16 sps:$4 sm:$0xff]   ;;  %v14543_v56 = vld [vmem:[%s21645_s1 + $0x78c] ss:$16 sps:$4 sm:$0xff]  }
  0xb4   :  { %9861 = vmatprep.subr.bf16.mxu0 %v14447_v57  ;;  %10936 = vmatprep.subr.bf16.mxu1 %v14450_v58  ;;  %v14538_v57 = vld [vmem:[%s21645_s1 + $0x780] ss:$16 sps:$4 sm:$0xff]   ;;  %v14541_v58 = vld [vmem:[%s21645_s1 + $0x788] ss:$16 sps:$4 sm:$0xff]  }
  0xb7   :  { %9862 = vmatpush1.bf16.msra.mxu0 %v14445_v59  ;;  %10937 = vmatpush1.bf16.msra.mxu1 %v14448_v60  ;;  %v14546_v59 = vld [vmem:[%s21645_s1 + $0x7a4] ss:$16 sps:$4 sm:$0xff]   ;;  %v14549_v60 = vld [vmem:[%s21645_s1 + $0x7ac] ss:$16 sps:$4 sm:$0xff]  }
  0xb8   :  { %9863 = vmatprep.subr.bf16.mxu0 %v14453_v61  ;;  %10938 = vmatprep.subr.bf16.mxu1 %v14456_v62  ;;  %v14544_v61 = vld [vmem:[%s21645_s1 + $0x7a0] ss:$16 sps:$4 sm:$0xff]   ;;  %v14547_v62 = vld [vmem:[%s21645_s1 + $0x7a8] ss:$16 sps:$4 sm:$0xff]  }
  0xbb   :  { %9864 = vmatpush1.bf16.msra.mxu0 %v14451_v63  ;;  %10939 = vmatpush1.bf16.msra.mxu1 %v14454_v0  ;;  %v14552_v63 = vld [vmem:[%s21645_s1 + $0x7c4] ss:$16 sps:$4 sm:$0xff]   ;;  %v14555_v0 = vld [vmem:[%s21645_s1 + $0x7cc] ss:$16 sps:$4 sm:$0xff]  }
  0xbc   :  { %9865 = vmatprep.subr.bf16.mxu0 %v14459_v1  ;;  %10940 = vmatprep.subr.bf16.mxu1 %v14462_v2  ;;  %v14550_v1 = vld [vmem:[%s21645_s1 + $0x7c0] ss:$16 sps:$4 sm:$0xff]   ;;  %v14553_v2 = vld [vmem:[%s21645_s1 + $0x7c8] ss:$16 sps:$4 sm:$0xff]  }
  0xbf   :  { %9866 = vmatpush1.bf16.msra.mxu0 %v14457_v3  ;;  %10941 = vmatpush1.bf16.msra.mxu1 %v14460_v4  ;;  %v14558_v3 = vld [vmem:[%s21645_s1 + $0x7e4] ss:$16 sps:$4 sm:$0xff]   ;;  %v14561_v4 = vld [vmem:[%s21645_s1 + $0x7ec] ss:$16 sps:$4 sm:$0xff]  }
  0xc0   :  { %9878 = vmatprep.subr.bf16.mxu0 %v14468_v5  ;;  %10953 = vmatprep.subr.bf16.mxu1 %v14471_v6  ;;  %v14556_v5 = vld [vmem:[%s21645_s1 + $0x7e0] ss:$16 sps:$4 sm:$0xff]   ;;  %v14559_v6 = vld [vmem:[%s21645_s1 + $0x7e8] ss:$16 sps:$4 sm:$0xff]  }
  0xc2   :  { %9868 = vmatmul.mubr.bf16.vlgmr.msra.gmra.mrb[0].mxu0 %v14463_v7  ;;  %10943 = vmatmul.mubr.bf16.vlgmr.msra.gmra.mrb[0].mxu1 %v14463_v7  ;;  %v14567_v7 = vld [vmem:[%s21645_s1 + $0x804] ss:$16 sps:$4 sm:$0xff]  }
  0xc3   :  { %9879 = vmatpush1.bf16.msra.mxu0 %v14466_v8  ;;  %10954 = vmatpush1.bf16.msra.mxu1 %v14469_v9  ;;  %v14570_v8 = vld [vmem:[%s21645_s1 + $0x80c] ss:$16 sps:$4 sm:$0xff]  }
  0xc4   :  { %9880 = vmatprep.subr.bf16.mxu0 %v14474_v10  ;;  %10955 = vmatprep.subr.bf16.mxu1 %v14477_v11  ;;  %v14562_v9 = vld [vmem:[%s21646_s0 + $0x18] ss:$196 sps:$4 sm:$0xff]   ;;  %v14565_v10 = vld [vmem:[%s21645_s1 + $0x800] ss:$16 sps:$4 sm:$0xff]  }
  0xc5   :  { %9910 = vmatprep.mubr.bf16.mxu0 %v14564_v12  ;;  %10985 = vmatprep.mubr.bf16.mxu1 %v14564_v12  ;;  %v14568_v11 = vld [vmem:[%s21645_s1 + $0x808] ss:$16 sps:$4 sm:$0xff]   ;;  %v14573_v12 = vld [vmem:[%s21645_s1 + $0x824] ss:$16 sps:$4 sm:$0xff]  }
  0xc7   :  { %9881 = vmatpush1.bf16.msra.mxu0 %v14472_v13  ;;  %10956 = vmatpush1.bf16.msra.mxu1 %v14475_v14  ;;  %v14576_v13 = vld [vmem:[%s21645_s1 + $0x82c] ss:$16 sps:$4 sm:$0xff]   ;;  %v14663_v14 = vld [vmem:[%s21646_s0 + $0x24] ss:$196 sps:$4 sm:$0xff]  }
  0xc8   :  { %9882 = vmatprep.subr.bf16.mxu0 %v14480_v15  ;;  %10957 = vmatprep.subr.bf16.mxu1 %v14483_v16  ;;  %v14571_v15 = vld [vmem:[%s21645_s1 + $0x820] ss:$16 sps:$4 sm:$0xff]   ;;  %v14574_v16 = vld [vmem:[%s21645_s1 + $0x828] ss:$16 sps:$4 sm:$0xff]  }
  0xcb   :  { %9883 = vmatpush1.bf16.msra.mxu0 %v14478_v17  ;;  %10958 = vmatpush1.bf16.msra.mxu1 %v14481_v18  ;;  %v14579_v17 = vld [vmem:[%s21645_s1 + $0x844] ss:$16 sps:$4 sm:$0xff]   ;;  %v14582_v18 = vld [vmem:[%s21645_s1 + $0x84c] ss:$16 sps:$4 sm:$0xff]  }
  0xcc   :  { %9884 = vmatprep.subr.bf16.mxu0 %v14486_v19  ;;  %10959 = vmatprep.subr.bf16.mxu1 %v14489_v20  ;;  %v14577_v19 = vld [vmem:[%s21645_s1 + $0x840] ss:$16 sps:$4 sm:$0xff]   ;;  %v14580_v20 = vld [vmem:[%s21645_s1 + $0x848] ss:$16 sps:$4 sm:$0xff]  }
  0xcf   :  { %9885 = vmatpush1.bf16.msra.mxu0 %v14484_v21  ;;  %10960 = vmatpush1.bf16.msra.mxu1 %v14487_v22  ;;  %v14585_v21 = vld [vmem:[%s21645_s1 + $0x864] ss:$16 sps:$4 sm:$0xff]   ;;  %v14588_v22 = vld [vmem:[%s21645_s1 + $0x86c] ss:$16 sps:$4 sm:$0xff]  }
  0xd0   :  { %9886 = vmatprep.subr.bf16.mxu0 %v14492_v23  ;;  %10961 = vmatprep.subr.bf16.mxu1 %v14495_v24  ;;  %v14583_v23 = vld [vmem:[%s21645_s1 + $0x860] ss:$16 sps:$4 sm:$0xff]   ;;  %v14586_v24 = vld [vmem:[%s21645_s1 + $0x868] ss:$16 sps:$4 sm:$0xff]  }
  0xd3   :  { %9887 = vmatpush1.bf16.msra.mxu0 %v14490_v25  ;;  %10962 = vmatpush1.bf16.msra.mxu1 %v14493_v26  ;;  %v14591_v25 = vld [vmem:[%s21645_s1 + $0x884] ss:$16 sps:$4 sm:$0xff]   ;;  %v14594_v26 = vld [vmem:[%s21645_s1 + $0x88c] ss:$16 sps:$4 sm:$0xff]  }
  0xd4   :  { %9888 = vmatprep.subr.bf16.mxu0 %v14498_v27  ;;  %10963 = vmatprep.subr.bf16.mxu1 %v14501_v28  ;;  %v14589_v27 = vld [vmem:[%s21645_s1 + $0x880] ss:$16 sps:$4 sm:$0xff]   ;;  %v14592_v28 = vld [vmem:[%s21645_s1 + $0x888] ss:$16 sps:$4 sm:$0xff]  }
  0xd7   :  { %9889 = vmatpush1.bf16.msra.mxu0 %v14496_v29  ;;  %10964 = vmatpush1.bf16.msra.mxu1 %v14499_v30  ;;  %v14597_v29 = vld [vmem:[%s21645_s1 + $0x8a4] ss:$16 sps:$4 sm:$0xff]   ;;  %v14600_v30 = vld [vmem:[%s21645_s1 + $0x8ac] ss:$16 sps:$4 sm:$0xff]  }
  0xd8   :  { %9890 = vmatprep.subr.bf16.mxu0 %v14504_v31  ;;  %10965 = vmatprep.subr.bf16.mxu1 %v14507_v32  ;;  %v14595_v31 = vld [vmem:[%s21645_s1 + $0x8a0] ss:$16 sps:$4 sm:$0xff]   ;;  %v14598_v32 = vld [vmem:[%s21645_s1 + $0x8a8] ss:$16 sps:$4 sm:$0xff]  }
  0xdb   :  { %9891 = vmatpush1.bf16.msra.mxu0 %v14502_v33  ;;  %10966 = vmatpush1.bf16.msra.mxu1 %v14505_v34  ;;  %v14603_v33 = vld [vmem:[%s21645_s1 + $0x8c4] ss:$16 sps:$4 sm:$0xff]   ;;  %v14606_v34 = vld [vmem:[%s21645_s1 + $0x8cc] ss:$16 sps:$4 sm:$0xff]  }
  0xdc   :  { %9892 = vmatprep.subr.bf16.mxu0 %v14510_v35  ;;  %10967 = vmatprep.subr.bf16.mxu1 %v14513_v36  ;;  %v14601_v35 = vld [vmem:[%s21645_s1 + $0x8c0] ss:$16 sps:$4 sm:$0xff]   ;;  %v14604_v36 = vld [vmem:[%s21645_s1 + $0x8c8] ss:$16 sps:$4 sm:$0xff]  }
  0xdf   :  { %9893 = vmatpush1.bf16.msra.mxu0 %v14508_v37  ;;  %10968 = vmatpush1.bf16.msra.mxu1 %v14511_v38  ;;  %v14609_v37 = vld [vmem:[%s21645_s1 + $0x8e4] ss:$16 sps:$4 sm:$0xff]   ;;  %v14612_v38 = vld [vmem:[%s21645_s1 + $0x8ec] ss:$16 sps:$4 sm:$0xff]  }
  0xe0   :  { %9894 = vmatprep.subr.bf16.mxu0 %v14516_v39  ;;  %10969 = vmatprep.subr.bf16.mxu1 %v14519_v40  ;;  %v14607_v39 = vld [vmem:[%s21645_s1 + $0x8e0] ss:$16 sps:$4 sm:$0xff]   ;;  %v14610_v40 = vld [vmem:[%s21645_s1 + $0x8e8] ss:$16 sps:$4 sm:$0xff]  }
  0xe3   :  { %9895 = vmatpush1.bf16.msra.mxu0 %v14514_v41  ;;  %10970 = vmatpush1.bf16.msra.mxu1 %v14517_v42  ;;  %v14615_v41 = vld [vmem:[%s21645_s1 + $0x904] ss:$16 sps:$4 sm:$0xff]   ;;  %v14618_v42 = vld [vmem:[%s21645_s1 + $0x90c] ss:$16 sps:$4 sm:$0xff]  }
  0xe4   :  { %9896 = vmatprep.subr.bf16.mxu0 %v14522_v43  ;;  %10971 = vmatprep.subr.bf16.mxu1 %v14525_v44  ;;  %v14613_v43 = vld [vmem:[%s21645_s1 + $0x900] ss:$16 sps:$4 sm:$0xff]   ;;  %v14616_v44 = vld [vmem:[%s21645_s1 + $0x908] ss:$16 sps:$4 sm:$0xff]  }
  0xe7   :  { %9897 = vmatpush1.bf16.msra.mxu0 %v14520_v45  ;;  %10972 = vmatpush1.bf16.msra.mxu1 %v14523_v46  ;;  %v14621_v45 = vld [vmem:[%s21645_s1 + $0x924] ss:$16 sps:$4 sm:$0xff]   ;;  %v14624_v46 = vld [vmem:[%s21645_s1 + $0x92c] ss:$16 sps:$4 sm:$0xff]  }
  0xe8   :  { %9898 = vmatprep.subr.bf16.mxu0 %v14528_v47  ;;  %10973 = vmatprep.subr.bf16.mxu1 %v14531_v48  ;;  %v14619_v47 = vld [vmem:[%s21645_s1 + $0x920] ss:$16 sps:$4 sm:$0xff]   ;;  %v14622_v48 = vld [vmem:[%s21645_s1 + $0x928] ss:$16 sps:$4 sm:$0xff]  }
  0xeb   :  { %9899 = vmatpush1.bf16.msra.mxu0 %v14526_v49  ;;  %10974 = vmatpush1.bf16.msra.mxu1 %v14529_v50  ;;  %v14627_v49 = vld [vmem:[%s21645_s1 + $0x944] ss:$16 sps:$4 sm:$0xff]   ;;  %v14630_v50 = vld [vmem:[%s21645_s1 + $0x94c] ss:$16 sps:$4 sm:$0xff]  }
  0xec   :  { %9900 = vmatprep.subr.bf16.mxu0 %v14534_v51  ;;  %10975 = vmatprep.subr.bf16.mxu1 %v14537_v52  ;;  %v14625_v51 = vld [vmem:[%s21645_s1 + $0x940] ss:$16 sps:$4 sm:$0xff]   ;;  %v14628_v52 = vld [vmem:[%s21645_s1 + $0x948] ss:$16 sps:$4 sm:$0xff]  }
  0xef   :  { %9901 = vmatpush1.bf16.msra.mxu0 %v14532_v53  ;;  %10976 = vmatpush1.bf16.msra.mxu1 %v14535_v54  ;;  %v14633_v53 = vld [vmem:[%s21645_s1 + $0x964] ss:$16 sps:$4 sm:$0xff]   ;;  %v14636_v54 = vld [vmem:[%s21645_s1 + $0x96c] ss:$16 sps:$4 sm:$0xff]  }
  0xf0   :  { %9902 = vmatprep.subr.bf16.mxu0 %v14540_v55  ;;  %10977 = vmatprep.subr.bf16.mxu1 %v14543_v56  ;;  %v14631_v55 = vld [vmem:[%s21645_s1 + $0x960] ss:$16 sps:$4 sm:$0xff]   ;;  %v14634_v56 = vld [vmem:[%s21645_s1 + $0x968] ss:$16 sps:$4 sm:$0xff]  }
  0xf3   :  { %9903 = vmatpush1.bf16.msra.mxu0 %v14538_v57  ;;  %10978 = vmatpush1.bf16.msra.mxu1 %v14541_v58  ;;  %v14639_v57 = vld [vmem:[%s21645_s1 + $0x984] ss:$16 sps:$4 sm:$0xff]   ;;  %v14642_v58 = vld [vmem:[%s21645_s1 + $0x98c] ss:$16 sps:$4 sm:$0xff]  }
  0xf4   :  { %9904 = vmatprep.subr.bf16.mxu0 %v14546_v59  ;;  %10979 = vmatprep.subr.bf16.mxu1 %v14549_v60  ;;  %v14637_v59 = vld [vmem:[%s21645_s1 + $0x980] ss:$16 sps:$4 sm:$0xff]   ;;  %v14640_v60 = vld [vmem:[%s21645_s1 + $0x988] ss:$16 sps:$4 sm:$0xff]  }
  0xf7   :  { %9905 = vmatpush1.bf16.msra.mxu0 %v14544_v61  ;;  %10980 = vmatpush1.bf16.msra.mxu1 %v14547_v62  ;;  %v14645_v61 = vld [vmem:[%s21645_s1 + $0x9a4] ss:$16 sps:$4 sm:$0xff]   ;;  %v14648_v62 = vld [vmem:[%s21645_s1 + $0x9ac] ss:$16 sps:$4 sm:$0xff]  }
  0xf8   :  { %9906 = vmatprep.subr.bf16.mxu0 %v14552_v63  ;;  %10981 = vmatprep.subr.bf16.mxu1 %v14555_v0  ;;  %v14643_v63 = vld [vmem:[%s21645_s1 + $0x9a0] ss:$16 sps:$4 sm:$0xff]   ;;  %v14646_v0 = vld [vmem:[%s21645_s1 + $0x9a8] ss:$16 sps:$4 sm:$0xff]  }
  0xfb   :  { %9907 = vmatpush1.bf16.msra.mxu0 %v14550_v1  ;;  %10982 = vmatpush1.bf16.msra.mxu1 %v14553_v2  ;;  %v14651_v1 = vld [vmem:[%s21645_s1 + $0x9c4] ss:$16 sps:$4 sm:$0xff]   ;;  %v14654_v2 = vld [vmem:[%s21645_s1 + $0x9cc] ss:$16 sps:$4 sm:$0xff]  }
  0xfc   :  { %9908 = vmatprep.subr.bf16.mxu0 %v14558_v3  ;;  %10983 = vmatprep.subr.bf16.mxu1 %v14561_v4  ;;  %v14649_v3 = vld [vmem:[%s21645_s1 + $0x9c0] ss:$16 sps:$4 sm:$0xff]   ;;  %v14652_v4 = vld [vmem:[%s21645_s1 + $0x9c8] ss:$16 sps:$4 sm:$0xff]  }
  0xff   :  { %9909 = vmatpush1.bf16.msra.mxu0 %v14556_v5  ;;  %10984 = vmatpush1.bf16.msra.mxu1 %v14559_v6  ;;  %v14657_v5 = vld [vmem:[%s21645_s1 + $0x9e4] ss:$16 sps:$4 sm:$0xff]   ;;  %v14660_v6 = vld [vmem:[%s21645_s1 + $0x9ec] ss:$16 sps:$4 sm:$0xff]  }
 0x100   :  { %9921 = vmatprep.subr.bf16.mxu0 %v14567_v7  ;;  %10996 = vmatprep.subr.bf16.mxu1 %v14570_v8  ;;  %v14655_v7 = vld [vmem:[%s21645_s1 + $0x9e0] ss:$16 sps:$4 sm:$0xff]   ;;  %v14658_v8 = vld [vmem:[%s21645_s1 + $0x9e8] ss:$16 sps:$4 sm:$0xff]  }
 0x102   :  { %9911 = vmatmul.mubr.bf16.vlgmr.msra.gmra.mrb[0].mxu0 %v14562_v9  ;;  %10986 = vmatmul.mubr.bf16.vlgmr.msra.gmra.mrb[0].mxu1 %v14562_v9  ;;  %v14661_v9 = vld [vmem:[%s21646_s0 + $0x20] ss:$196 sps:$4 sm:$0xff]  }
 0x103   :  { %9922 = vmatpush1.bf16.msra.mxu0 %v14565_v10  ;;  %10997 = vmatpush1.bf16.msra.mxu1 %v14568_v11  ;;  %v14666_v10 = vld [vmem:[%s21645_s1 + $0xa04] ss:$16 sps:$4 sm:$0xff]   ;;  %v14669_v11 = vld [vmem:[%s21645_s1 + $0xa0c] ss:$16 sps:$4 sm:$0xff]  }
 0x104   :  { %9923 = vmatprep.subr.bf16.mxu0 %v14573_v12  ;;  %10998 = vmatprep.subr.bf16.mxu1 %v14576_v13  ;;  %v14664_v12 = vld [vmem:[%s21645_s1 + $0xa00] ss:$16 sps:$4 sm:$0xff]   ;;  %v14667_v13 = vld [vmem:[%s21645_s1 + $0xa08] ss:$16 sps:$4 sm:$0xff]  }
 0x105   :  { %9953 = vmatprep.mubr.bf16.mxu0 %v14663_v14  ;;  %11028 = vmatprep.mubr.bf16.mxu1 %v14663_v14  ;;  %v14672_v14 = vld [vmem:[%s21645_s1 + $0xa24] ss:$16 sps:$4 sm:$0xff]  }
 0x107   :  { %9924 = vmatpush1.bf16.msra.mxu0 %v14571_v15  ;;  %10999 = vmatpush1.bf16.msra.mxu1 %v14574_v16  ;;  %v14675_v15 = vld [vmem:[%s21645_s1 + $0xa2c] ss:$16 sps:$4 sm:$0xff]  }
 0x108   :  { %9925 = vmatprep.subr.bf16.mxu0 %v14579_v17  ;;  %11000 = vmatprep.subr.bf16.mxu1 %v14582_v18  ;;  %v14762_v16 = vld [vmem:[%s21646_s0 + $0x2c] ss:$196 sps:$4 sm:$0xff]   ;;  %v14673_v18 = vld [vmem:[%s21645_s1 + $0xa28] ss:$16 sps:$4 sm:$0xff]  }
 0x109   :  { %v14670_v17 = vld [vmem:[%s21645_s1 + $0xa20] ss:$16 sps:$4 sm:$0xff]  }
 0x10b   :  { %9926 = vmatpush1.bf16.msra.mxu0 %v14577_v19  ;;  %11001 = vmatpush1.bf16.msra.mxu1 %v14580_v20  ;;  %v14678_v19 = vld [vmem:[%s21645_s1 + $0xa44] ss:$16 sps:$4 sm:$0xff]   ;;  %v14681_v20 = vld [vmem:[%s21645_s1 + $0xa4c] ss:$16 sps:$4 sm:$0xff]  }
 0x10c   :  { %9927 = vmatprep.subr.bf16.mxu0 %v14585_v21  ;;  %11002 = vmatprep.subr.bf16.mxu1 %v14588_v22  ;;  %v14676_v21 = vld [vmem:[%s21645_s1 + $0xa40] ss:$16 sps:$4 sm:$0xff]   ;;  %v14679_v22 = vld [vmem:[%s21645_s1 + $0xa48] ss:$16 sps:$4 sm:$0xff]  }
 0x10f   :  { %9928 = vmatpush1.bf16.msra.mxu0 %v14583_v23  ;;  %11003 = vmatpush1.bf16.msra.mxu1 %v14586_v24  ;;  %v14684_v23 = vld [vmem:[%s21645_s1 + $0xa64] ss:$16 sps:$4 sm:$0xff]   ;;  %v14687_v24 = vld [vmem:[%s21645_s1 + $0xa6c] ss:$16 sps:$4 sm:$0xff]  }
 0x110   :  { %9929 = vmatprep.subr.bf16.mxu0 %v14591_v25  ;;  %11004 = vmatprep.subr.bf16.mxu1 %v14594_v26  ;;  %v14682_v25 = vld [vmem:[%s21645_s1 + $0xa60] ss:$16 sps:$4 sm:$0xff]   ;;  %v14685_v26 = vld [vmem:[%s21645_s1 + $0xa68] ss:$16 sps:$4 sm:$0xff]  }
 0x113   :  { %9930 = vmatpush1.bf16.msra.mxu0 %v14589_v27  ;;  %11005 = vmatpush1.bf16.msra.mxu1 %v14592_v28  ;;  %v14690_v27 = vld [vmem:[%s21645_s1 + $0xa84] ss:$16 sps:$4 sm:$0xff]   ;;  %v14693_v28 = vld [vmem:[%s21645_s1 + $0xa8c] ss:$16 sps:$4 sm:$0xff]  }
 0x114   :  { %9931 = vmatprep.subr.bf16.mxu0 %v14597_v29  ;;  %11006 = vmatprep.subr.bf16.mxu1 %v14600_v30  ;;  %v14688_v29 = vld [vmem:[%s21645_s1 + $0xa80] ss:$16 sps:$4 sm:$0xff]   ;;  %v14691_v30 = vld [vmem:[%s21645_s1 + $0xa88] ss:$16 sps:$4 sm:$0xff]  }
 0x117   :  { %9932 = vmatpush1.bf16.msra.mxu0 %v14595_v31  ;;  %11007 = vmatpush1.bf16.msra.mxu1 %v14598_v32  ;;  %v14696_v31 = vld [vmem:[%s21645_s1 + $0xaa4] ss:$16 sps:$4 sm:$0xff]   ;;  %v14699_v32 = vld [vmem:[%s21645_s1 + $0xaac] ss:$16 sps:$4 sm:$0xff]  }
 0x118   :  { %9933 = vmatprep.subr.bf16.mxu0 %v14603_v33  ;;  %11008 = vmatprep.subr.bf16.mxu1 %v14606_v34  ;;  %v14694_v33 = vld [vmem:[%s21645_s1 + $0xaa0] ss:$16 sps:$4 sm:$0xff]   ;;  %v14697_v34 = vld [vmem:[%s21645_s1 + $0xaa8] ss:$16 sps:$4 sm:$0xff]  }
 0x11b   :  { %9934 = vmatpush1.bf16.msra.mxu0 %v14601_v35  ;;  %11009 = vmatpush1.bf16.msra.mxu1 %v14604_v36  ;;  %v14702_v35 = vld [vmem:[%s21645_s1 + $0xac4] ss:$16 sps:$4 sm:$0xff]   ;;  %v14705_v36 = vld [vmem:[%s21645_s1 + $0xacc] ss:$16 sps:$4 sm:$0xff]  }
 0x11c   :  { %9935 = vmatprep.subr.bf16.mxu0 %v14609_v37  ;;  %11010 = vmatprep.subr.bf16.mxu1 %v14612_v38  ;;  %v14700_v37 = vld [vmem:[%s21645_s1 + $0xac0] ss:$16 sps:$4 sm:$0xff]   ;;  %v14703_v38 = vld [vmem:[%s21645_s1 + $0xac8] ss:$16 sps:$4 sm:$0xff]  }
 0x11f   :  { %9936 = vmatpush1.bf16.msra.mxu0 %v14607_v39  ;;  %11011 = vmatpush1.bf16.msra.mxu1 %v14610_v40  ;;  %v14708_v39 = vld [vmem:[%s21645_s1 + $0xae4] ss:$16 sps:$4 sm:$0xff]   ;;  %v14711_v40 = vld [vmem:[%s21645_s1 + $0xaec] ss:$16 sps:$4 sm:$0xff]  }
 0x120   :  { %9937 = vmatprep.subr.bf16.mxu0 %v14615_v41  ;;  %11012 = vmatprep.subr.bf16.mxu1 %v14618_v42  ;;  %v14706_v41 = vld [vmem:[%s21645_s1 + $0xae0] ss:$16 sps:$4 sm:$0xff]   ;;  %v14709_v42 = vld [vmem:[%s21645_s1 + $0xae8] ss:$16 sps:$4 sm:$0xff]  }
 0x123   :  { %9938 = vmatpush1.bf16.msra.mxu0 %v14613_v43  ;;  %11013 = vmatpush1.bf16.msra.mxu1 %v14616_v44  ;;  %v14714_v43 = vld [vmem:[%s21645_s1 + $0xb04] ss:$16 sps:$4 sm:$0xff]   ;;  %v14717_v44 = vld [vmem:[%s21645_s1 + $0xb0c] ss:$16 sps:$4 sm:$0xff]  }
 0x124   :  { %9939 = vmatprep.subr.bf16.mxu0 %v14621_v45  ;;  %11014 = vmatprep.subr.bf16.mxu1 %v14624_v46  ;;  %v14712_v45 = vld [vmem:[%s21645_s1 + $0xb00] ss:$16 sps:$4 sm:$0xff]   ;;  %v14715_v46 = vld [vmem:[%s21645_s1 + $0xb08] ss:$16 sps:$4 sm:$0xff]  }
 0x127   :  { %9940 = vmatpush1.bf16.msra.mxu0 %v14619_v47  ;;  %11015 = vmatpush1.bf16.msra.mxu1 %v14622_v48  ;;  %v14720_v47 = vld [vmem:[%s21645_s1 + $0xb24] ss:$16 sps:$4 sm:$0xff]   ;;  %v14723_v48 = vld [vmem:[%s21645_s1 + $0xb2c] ss:$16 sps:$4 sm:$0xff]  }
 0x128   :  { %9941 = vmatprep.subr.bf16.mxu0 %v14627_v49  ;;  %11016 = vmatprep.subr.bf16.mxu1 %v14630_v50  ;;  %v14718_v49 = vld [vmem:[%s21645_s1 + $0xb20] ss:$16 sps:$4 sm:$0xff]   ;;  %v14721_v50 = vld [vmem:[%s21645_s1 + $0xb28] ss:$16 sps:$4 sm:$0xff]  }
 0x12b   :  { %9942 = vmatpush1.bf16.msra.mxu0 %v14625_v51  ;;  %11017 = vmatpush1.bf16.msra.mxu1 %v14628_v52  ;;  %v14726_v51 = vld [vmem:[%s21645_s1 + $0xb44] ss:$16 sps:$4 sm:$0xff]   ;;  %v14729_v52 = vld [vmem:[%s21645_s1 + $0xb4c] ss:$16 sps:$4 sm:$0xff]  }
 0x12c   :  { %9943 = vmatprep.subr.bf16.mxu0 %v14633_v53  ;;  %11018 = vmatprep.subr.bf16.mxu1 %v14636_v54  ;;  %v14724_v53 = vld [vmem:[%s21645_s1 + $0xb40] ss:$16 sps:$4 sm:$0xff]   ;;  %v14727_v54 = vld [vmem:[%s21645_s1 + $0xb48] ss:$16 sps:$4 sm:$0xff]  }
 0x12f   :  { %9944 = vmatpush1.bf16.msra.mxu0 %v14631_v55  ;;  %11019 = vmatpush1.bf16.msra.mxu1 %v14634_v56  ;;  %v14732_v55 = vld [vmem:[%s21645_s1 + $0xb64] ss:$16 sps:$4 sm:$0xff]   ;;  %v14735_v56 = vld [vmem:[%s21645_s1 + $0xb6c] ss:$16 sps:$4 sm:$0xff]  }
 0x130   :  { %9945 = vmatprep.subr.bf16.mxu0 %v14639_v57  ;;  %11020 = vmatprep.subr.bf16.mxu1 %v14642_v58  ;;  %v14730_v57 = vld [vmem:[%s21645_s1 + $0xb60] ss:$16 sps:$4 sm:$0xff]   ;;  %v14733_v58 = vld [vmem:[%s21645_s1 + $0xb68] ss:$16 sps:$4 sm:$0xff]  }
 0x133   :  { %9946 = vmatpush1.bf16.msra.mxu0 %v14637_v59  ;;  %11021 = vmatpush1.bf16.msra.mxu1 %v14640_v60  ;;  %v14738_v59 = vld [vmem:[%s21645_s1 + $0xb84] ss:$16 sps:$4 sm:$0xff]   ;;  %v14741_v60 = vld [vmem:[%s21645_s1 + $0xb8c] ss:$16 sps:$4 sm:$0xff]  }
 0x134   :  { %9947 = vmatprep.subr.bf16.mxu0 %v14645_v61  ;;  %11022 = vmatprep.subr.bf16.mxu1 %v14648_v62  ;;  %v14736_v61 = vld [vmem:[%s21645_s1 + $0xb80] ss:$16 sps:$4 sm:$0xff]   ;;  %v14739_v62 = vld [vmem:[%s21645_s1 + $0xb88] ss:$16 sps:$4 sm:$0xff]  }
 0x137   :  { %9948 = vmatpush1.bf16.msra.mxu0 %v14643_v63  ;;  %11023 = vmatpush1.bf16.msra.mxu1 %v14646_v0  ;;  %v14744_v63 = vld [vmem:[%s21645_s1 + $0xba4] ss:$16 sps:$4 sm:$0xff]   ;;  %v14747_v0 = vld [vmem:[%s21645_s1 + $0xbac] ss:$16 sps:$4 sm:$0xff]  }
 0x138   :  { %9949 = vmatprep.subr.bf16.mxu0 %v14651_v1  ;;  %11024 = vmatprep.subr.bf16.mxu1 %v14654_v2  ;;  %v14742_v1 = vld [vmem:[%s21645_s1 + $0xba0] ss:$16 sps:$4 sm:$0xff]   ;;  %v14745_v2 = vld [vmem:[%s21645_s1 + $0xba8] ss:$16 sps:$4 sm:$0xff]  }
 0x13b   :  { %9950 = vmatpush1.bf16.msra.mxu0 %v14649_v3  ;;  %11025 = vmatpush1.bf16.msra.mxu1 %v14652_v4  ;;  %v14750_v3 = vld [vmem:[%s21645_s1 + $0xbc4] ss:$16 sps:$4 sm:$0xff]   ;;  %v14753_v4 = vld [vmem:[%s21645_s1 + $0xbcc] ss:$16 sps:$4 sm:$0xff]  }
 0x13c   :  { %9951 = vmatprep.subr.bf16.mxu0 %v14657_v5  ;;  %11026 = vmatprep.subr.bf16.mxu1 %v14660_v6  ;;  %v14748_v5 = vld [vmem:[%s21645_s1 + $0xbc0] ss:$16 sps:$4 sm:$0xff]   ;;  %v14751_v6 = vld [vmem:[%s21645_s1 + $0xbc8] ss:$16 sps:$4 sm:$0xff]  }
 0x13f   :  { %9952 = vmatpush1.bf16.msra.mxu0 %v14655_v7  ;;  %11027 = vmatpush1.bf16.msra.mxu1 %v14658_v8  ;;  %v14756_v7 = vld [vmem:[%s21645_s1 + $0xbe4] ss:$16 sps:$4 sm:$0xff]   ;;  %v14759_v8 = vld [vmem:[%s21645_s1 + $0xbec] ss:$16 sps:$4 sm:$0xff]  }
 0x140   :  { %9964 = vmatprep.subr.bf16.mxu0 %v14666_v10  ;;  %11039 = vmatprep.subr.bf16.mxu1 %v14669_v11  ;;  %v14757_v10 = vld [vmem:[%s21645_s1 + $0xbe8] ss:$16 sps:$4 sm:$0xff]  }
 0x141   :  { %v14760_v11 = vld [vmem:[%s21646_s0 + $0x28] ss:$196 sps:$4 sm:$0xff]  }
 0x142   :  { %9954 = vmatmul.mubr.bf16.vlgmr.msra.gmra.mrb[0].mxu0 %v14661_v9  ;;  %11029 = vmatmul.mubr.bf16.vlgmr.msra.gmra.mrb[0].mxu1 %v14661_v9  ;;  %v14754_v9 = vld [vmem:[%s21645_s1 + $0xbe0] ss:$16 sps:$4 sm:$0xff]  }
 0x143   :  { %9965 = vmatpush1.bf16.msra.mxu0 %v14664_v12  ;;  %11040 = vmatpush1.bf16.msra.mxu1 %v14667_v13  ;;  %v14765_v12 = vld [vmem:[%s21645_s1 + $0xc04] ss:$16 sps:$4 sm:$0xff]   ;;  %v14768_v13 = vld [vmem:[%s21645_s1 + $0xc0c] ss:$16 sps:$4 sm:$0xff]  }
 0x144   :  { %9966 = vmatprep.subr.bf16.mxu0 %v14672_v14  ;;  %11041 = vmatprep.subr.bf16.mxu1 %v14675_v15  ;;  %v14763_v14 = vld [vmem:[%s21645_s1 + $0xc00] ss:$16 sps:$4 sm:$0xff]   ;;  %v14766_v15 = vld [vmem:[%s21645_s1 + $0xc08] ss:$16 sps:$4 sm:$0xff]  }
 0x145   :  { %9996 = vmatprep.mubr.bf16.mxu0 %v14762_v16  ;;  %11071 = vmatprep.mubr.bf16.mxu1 %v14762_v16  ;;  %v14771_v16 = vld [vmem:[%s21645_s1 + $0xc24] ss:$16 sps:$4 sm:$0xff]  }
 0x147   :  { %9967 = vmatpush1.bf16.msra.mxu0 %v14670_v17  ;;  %11042 = vmatpush1.bf16.msra.mxu1 %v14673_v18  ;;  %v14774_v17 = vld [vmem:[%s21645_s1 + $0xc2c] ss:$16 sps:$4 sm:$0xff]   ;;  %v14861_v18 = vld [vmem:[%s21646_s0 + $0x34] ss:$196 sps:$4 sm:$0xff]  }
 0x148   :  { %9968 = vmatprep.subr.bf16.mxu0 %v14678_v19  ;;  %11043 = vmatprep.subr.bf16.mxu1 %v14681_v20  ;;  %v14769_v19 = vld [vmem:[%s21645_s1 + $0xc20] ss:$16 sps:$4 sm:$0xff]   ;;  %v14772_v20 = vld [vmem:[%s21645_s1 + $0xc28] ss:$16 sps:$4 sm:$0xff]  }
 0x14b   :  { %9969 = vmatpush1.bf16.msra.mxu0 %v14676_v21  ;;  %11044 = vmatpush1.bf16.msra.mxu1 %v14679_v22  ;;  %v14777_v21 = vld [vmem:[%s21645_s1 + $0xc44] ss:$16 sps:$4 sm:$0xff]   ;;  %v14780_v22 = vld [vmem:[%s21645_s1 + $0xc4c] ss:$16 sps:$4 sm:$0xff]  }
 0x14c   :  { %9970 = vmatprep.subr.bf16.mxu0 %v14684_v23  ;;  %11045 = vmatprep.subr.bf16.mxu1 %v14687_v24  ;;  %v14775_v23 = vld [vmem:[%s21645_s1 + $0xc40] ss:$16 sps:$4 sm:$0xff]   ;;  %v14778_v24 = vld [vmem:[%s21645_s1 + $0xc48] ss:$16 sps:$4 sm:$0xff]  }
 0x14f   :  { %9971 = vmatpush1.bf16.msra.mxu0 %v14682_v25  ;;  %11046 = vmatpush1.bf16.msra.mxu1 %v14685_v26  ;;  %v14783_v25 = vld [vmem:[%s21645_s1 + $0xc64] ss:$16 sps:$4 sm:$0xff]   ;;  %v14786_v26 = vld [vmem:[%s21645_s1 + $0xc6c] ss:$16 sps:$4 sm:$0xff]  }
 0x150   :  { %9972 = vmatprep.subr.bf16.mxu0 %v14690_v27  ;;  %11047 = vmatprep.subr.bf16.mxu1 %v14693_v28  ;;  %v14781_v27 = vld [vmem:[%s21645_s1 + $0xc60] ss:$16 sps:$4 sm:$0xff]   ;;  %v14784_v28 = vld [vmem:[%s21645_s1 + $0xc68] ss:$16 sps:$4 sm:$0xff]  }
 0x153   :  { %9973 = vmatpush1.bf16.msra.mxu0 %v14688_v29  ;;  %11048 = vmatpush1.bf16.msra.mxu1 %v14691_v30  ;;  %v14789_v29 = vld [vmem:[%s21645_s1 + $0xc84] ss:$16 sps:$4 sm:$0xff]   ;;  %v14792_v30 = vld [vmem:[%s21645_s1 + $0xc8c] ss:$16 sps:$4 sm:$0xff]  }
 0x154   :  { %9974 = vmatprep.subr.bf16.mxu0 %v14696_v31  ;;  %11049 = vmatprep.subr.bf16.mxu1 %v14699_v32  ;;  %v14787_v31 = vld [vmem:[%s21645_s1 + $0xc80] ss:$16 sps:$4 sm:$0xff]   ;;  %v14790_v32 = vld [vmem:[%s21645_s1 + $0xc88] ss:$16 sps:$4 sm:$0xff]  }
 0x157   :  { %9975 = vmatpush1.bf16.msra.mxu0 %v14694_v33  ;;  %11050 = vmatpush1.bf16.msra.mxu1 %v14697_v34  ;;  %v14795_v33 = vld [vmem:[%s21645_s1 + $0xca4] ss:$16 sps:$4 sm:$0xff]   ;;  %v14798_v34 = vld [vmem:[%s21645_s1 + $0xcac] ss:$16 sps:$4 sm:$0xff]  }
 0x158   :  { %9976 = vmatprep.subr.bf16.mxu0 %v14702_v35  ;;  %11051 = vmatprep.subr.bf16.mxu1 %v14705_v36  ;;  %v14793_v35 = vld [vmem:[%s21645_s1 + $0xca0] ss:$16 sps:$4 sm:$0xff]   ;;  %v14796_v36 = vld [vmem:[%s21645_s1 + $0xca8] ss:$16 sps:$4 sm:$0xff]  }
 0x15b   :  { %9977 = vmatpush1.bf16.msra.mxu0 %v14700_v37  ;;  %11052 = vmatpush1.bf16.msra.mxu1 %v14703_v38  ;;  %v14801_v37 = vld [vmem:[%s21645_s1 + $0xcc4] ss:$16 sps:$4 sm:$0xff]   ;;  %v14804_v38 = vld [vmem:[%s21645_s1 + $0xccc] ss:$16 sps:$4 sm:$0xff]  }
 0x15c   :  { %9978 = vmatprep.subr.bf16.mxu0 %v14708_v39  ;;  %11053 = vmatprep.subr.bf16.mxu1 %v14711_v40  ;;  %v14799_v39 = vld [vmem:[%s21645_s1 + $0xcc0] ss:$16 sps:$4 sm:$0xff]   ;;  %v14802_v40 = vld [vmem:[%s21645_s1 + $0xcc8] ss:$16 sps:$4 sm:$0xff]  }
 0x15f   :  { %9979 = vmatpush1.bf16.msra.mxu0 %v14706_v41  ;;  %11054 = vmatpush1.bf16.msra.mxu1 %v14709_v42  ;;  %v14807_v41 = vld [vmem:[%s21645_s1 + $0xce4] ss:$16 sps:$4 sm:$0xff]   ;;  %v14810_v42 = vld [vmem:[%s21645_s1 + $0xcec] ss:$16 sps:$4 sm:$0xff]  }
 0x160   :  { %9980 = vmatprep.subr.bf16.mxu0 %v14714_v43  ;;  %11055 = vmatprep.subr.bf16.mxu1 %v14717_v44  ;;  %v14805_v43 = vld [vmem:[%s21645_s1 + $0xce0] ss:$16 sps:$4 sm:$0xff]   ;;  %v14808_v44 = vld [vmem:[%s21645_s1 + $0xce8] ss:$16 sps:$4 sm:$0xff]  }
 0x163   :  { %9981 = vmatpush1.bf16.msra.mxu0 %v14712_v45  ;;  %11056 = vmatpush1.bf16.msra.mxu1 %v14715_v46  ;;  %v14813_v45 = vld [vmem:[%s21645_s1 + $0xd04] ss:$16 sps:$4 sm:$0xff]   ;;  %v14816_v46 = vld [vmem:[%s21645_s1 + $0xd0c] ss:$16 sps:$4 sm:$0xff]  }
 0x164   :  { %9982 = vmatprep.subr.bf16.mxu0 %v14720_v47  ;;  %11057 = vmatprep.subr.bf16.mxu1 %v14723_v48  ;;  %v14811_v47 = vld [vmem:[%s21645_s1 + $0xd00] ss:$16 sps:$4 sm:$0xff]   ;;  %v14814_v48 = vld [vmem:[%s21645_s1 + $0xd08] ss:$16 sps:$4 sm:$0xff]  }
 0x167   :  { %9983 = vmatpush1.bf16.msra.mxu0 %v14718_v49  ;;  %11058 = vmatpush1.bf16.msra.mxu1 %v14721_v50  ;;  %v14819_v49 = vld [vmem:[%s21645_s1 + $0xd24] ss:$16 sps:$4 sm:$0xff]   ;;  %v14822_v50 = vld [vmem:[%s21645_s1 + $0xd2c] ss:$16 sps:$4 sm:$0xff]  }
 0x168   :  { %9984 = vmatprep.subr.bf16.mxu0 %v14726_v51  ;;  %11059 = vmatprep.subr.bf16.mxu1 %v14729_v52  ;;  %v14817_v51 = vld [vmem:[%s21645_s1 + $0xd20] ss:$16 sps:$4 sm:$0xff]   ;;  %v14820_v52 = vld [vmem:[%s21645_s1 + $0xd28] ss:$16 sps:$4 sm:$0xff]  }
 0x16b   :  { %9985 = vmatpush1.bf16.msra.mxu0 %v14724_v53  ;;  %11060 = vmatpush1.bf16.msra.mxu1 %v14727_v54  ;;  %v14825_v53 = vld [vmem:[%s21645_s1 + $0xd44] ss:$16 sps:$4 sm:$0xff]   ;;  %v14828_v54 = vld [vmem:[%s21645_s1 + $0xd4c] ss:$16 sps:$4 sm:$0xff]  }
 0x16c   :  { %9986 = vmatprep.subr.bf16.mxu0 %v14732_v55  ;;  %11061 = vmatprep.subr.bf16.mxu1 %v14735_v56  ;;  %v14823_v55 = vld [vmem:[%s21645_s1 + $0xd40] ss:$16 sps:$4 sm:$0xff]   ;;  %v14826_v56 = vld [vmem:[%s21645_s1 + $0xd48] ss:$16 sps:$4 sm:$0xff]  }
 0x16f   :  { %9987 = vmatpush1.bf16.msra.mxu0 %v14730_v57  ;;  %11062 = vmatpush1.bf16.msra.mxu1 %v14733_v58  ;;  %v14831_v57 = vld [vmem:[%s21645_s1 + $0xd64] ss:$16 sps:$4 sm:$0xff]   ;;  %v14834_v58 = vld [vmem:[%s21645_s1 + $0xd6c] ss:$16 sps:$4 sm:$0xff]  }
 0x170   :  { %9988 = vmatprep.subr.bf16.mxu0 %v14738_v59  ;;  %11063 = vmatprep.subr.bf16.mxu1 %v14741_v60  ;;  %v14829_v59 = vld [vmem:[%s21645_s1 + $0xd60] ss:$16 sps:$4 sm:$0xff]   ;;  %v14832_v60 = vld [vmem:[%s21645_s1 + $0xd68] ss:$16 sps:$4 sm:$0xff]  }
 0x173   :  { %9989 = vmatpush1.bf16.msra.mxu0 %v14736_v61  ;;  %11064 = vmatpush1.bf16.msra.mxu1 %v14739_v62  ;;  %v14837_v61 = vld [vmem:[%s21645_s1 + $0xd84] ss:$16 sps:$4 sm:$0xff]   ;;  %v14840_v62 = vld [vmem:[%s21645_s1 + $0xd8c] ss:$16 sps:$4 sm:$0xff]  }
 0x174   :  { %9990 = vmatprep.subr.bf16.mxu0 %v14744_v63  ;;  %11065 = vmatprep.subr.bf16.mxu1 %v14747_v0  ;;  %v14835_v63 = vld [vmem:[%s21645_s1 + $0xd80] ss:$16 sps:$4 sm:$0xff]   ;;  %v14838_v0 = vld [vmem:[%s21645_s1 + $0xd88] ss:$16 sps:$4 sm:$0xff]  }
 0x177   :  { %9991 = vmatpush1.bf16.msra.mxu0 %v14742_v1  ;;  %11066 = vmatpush1.bf16.msra.mxu1 %v14745_v2  ;;  %v14843_v1 = vld [vmem:[%s21645_s1 + $0xda4] ss:$16 sps:$4 sm:$0xff]   ;;  %v14846_v2 = vld [vmem:[%s21645_s1 + $0xdac] ss:$16 sps:$4 sm:$0xff]  }
 0x178   :  { %9992 = vmatprep.subr.bf16.mxu0 %v14750_v3  ;;  %11067 = vmatprep.subr.bf16.mxu1 %v14753_v4  ;;  %v14841_v3 = vld [vmem:[%s21645_s1 + $0xda0] ss:$16 sps:$4 sm:$0xff]   ;;  %v14844_v4 = vld [vmem:[%s21645_s1 + $0xda8] ss:$16 sps:$4 sm:$0xff]  }
 0x17b   :  { %9993 = vmatpush1.bf16.msra.mxu0 %v14748_v5  ;;  %11068 = vmatpush1.bf16.msra.mxu1 %v14751_v6  ;;  %v14849_v5 = vld [vmem:[%s21645_s1 + $0xdc4] ss:$16 sps:$4 sm:$0xff]   ;;  %v14852_v6 = vld [vmem:[%s21645_s1 + $0xdcc] ss:$16 sps:$4 sm:$0xff]  }
 0x17c   :  { %9994 = vmatprep.subr.bf16.mxu0 %v14756_v7  ;;  %11069 = vmatprep.subr.bf16.mxu1 %v14759_v8  ;;  %v14847_v7 = vld [vmem:[%s21645_s1 + $0xdc0] ss:$16 sps:$4 sm:$0xff]   ;;  %v14850_v8 = vld [vmem:[%s21645_s1 + $0xdc8] ss:$16 sps:$4 sm:$0xff]  }
 0x17f   :  { %9995 = vmatpush1.bf16.msra.mxu0 %v14754_v9  ;;  %11070 = vmatpush1.bf16.msra.mxu1 %v14757_v10  ;;  %v14855_v9 = vld [vmem:[%s21645_s1 + $0xde4] ss:$16 sps:$4 sm:$0xff]   ;;  %v14858_v10 = vld [vmem:[%s21645_s1 + $0xdec] ss:$16 sps:$4 sm:$0xff]  }
 0x180   :  { %10007 = vmatprep.subr.bf16.mxu0 %v14765_v12  ;;  %11082 = vmatprep.subr.bf16.mxu1 %v14768_v13  ;;  %v14856_v12 = vld [vmem:[%s21645_s1 + $0xde8] ss:$16 sps:$4 sm:$0xff]   ;;  %v14859_v13 = vld [vmem:[%s21646_s0 + $0x30] ss:$196 sps:$4 sm:$0xff]  }
 0x182   :  { %9997 = vmatmul.mubr.bf16.vlgmr.msra.gmra.mrb[0].mxu0 %v14760_v11  ;;  %11072 = vmatmul.mubr.bf16.vlgmr.msra.gmra.mrb[0].mxu1 %v14760_v11  ;;  %v14853_v11 = vld [vmem:[%s21645_s1 + $0xde0] ss:$16 sps:$4 sm:$0xff]  }
 0x183   :  { %10008 = vmatpush1.bf16.msra.mxu0 %v14763_v14  ;;  %11083 = vmatpush1.bf16.msra.mxu1 %v14766_v15  ;;  %v14864_v14 = vld [vmem:[%s21645_s1 + $0xe04] ss:$16 sps:$4 sm:$0xff]   ;;  %v14867_v15 = vld [vmem:[%s21645_s1 + $0xe0c] ss:$16 sps:$4 sm:$0xff]  }
 0x184   :  { %10009 = vmatprep.subr.bf16.mxu0 %v14771_v16  ;;  %11084 = vmatprep.subr.bf16.mxu1 %v14774_v17  ;;  %v14862_v16 = vld [vmem:[%s21645_s1 + $0xe00] ss:$16 sps:$4 sm:$0xff]   ;;  %v14865_v17 = vld [vmem:[%s21645_s1 + $0xe08] ss:$16 sps:$4 sm:$0xff]  }
 0x185   :  { %10039 = vmatprep.mubr.bf16.mxu0 %v14861_v18  ;;  %11114 = vmatprep.mubr.bf16.mxu1 %v14861_v18  ;;  %v14870_v18 = vld [vmem:[%s21645_s1 + $0xe24] ss:$16 sps:$4 sm:$0xff]  }
 0x187   :  { %10010 = vmatpush1.bf16.msra.mxu0 %v14769_v19  ;;  %11085 = vmatpush1.bf16.msra.mxu1 %v14772_v20  ;;  %v14873_v19 = vld [vmem:[%s21645_s1 + $0xe2c] ss:$16 sps:$4 sm:$0xff]  }
 0x188   :  { %10011 = vmatprep.subr.bf16.mxu0 %v14777_v21  ;;  %11086 = vmatprep.subr.bf16.mxu1 %v14780_v22  ;;  %v14960_v20 = vld [vmem:[%s21646_s0 + $0x3c] ss:$196 sps:$4 sm:$0xff]   ;;  %v14871_v22 = vld [vmem:[%s21645_s1 + $0xe28] ss:$16 sps:$4 sm:$0xff]  }
 0x189   :  { %v14868_v21 = vld [vmem:[%s21645_s1 + $0xe20] ss:$16 sps:$4 sm:$0xff]  }
 0x18b   :  { %10012 = vmatpush1.bf16.msra.mxu0 %v14775_v23  ;;  %11087 = vmatpush1.bf16.msra.mxu1 %v14778_v24  ;;  %v14876_v23 = vld [vmem:[%s21645_s1 + $0xe44] ss:$16 sps:$4 sm:$0xff]   ;;  %v14879_v24 = vld [vmem:[%s21645_s1 + $0xe4c] ss:$16 sps:$4 sm:$0xff]  }
 0x18c   :  { %10013 = vmatprep.subr.bf16.mxu0 %v14783_v25  ;;  %11088 = vmatprep.subr.bf16.mxu1 %v14786_v26  ;;  %v14874_v25 = vld [vmem:[%s21645_s1 + $0xe40] ss:$16 sps:$4 sm:$0xff]   ;;  %v14877_v26 = vld [vmem:[%s21645_s1 + $0xe48] ss:$16 sps:$4 sm:$0xff]  }
 0x18f   :  { %10014 = vmatpush1.bf16.msra.mxu0 %v14781_v27  ;;  %11089 = vmatpush1.bf16.msra.mxu1 %v14784_v28  ;;  %v14882_v27 = vld [vmem:[%s21645_s1 + $0xe64] ss:$16 sps:$4 sm:$0xff]   ;;  %v14885_v28 = vld [vmem:[%s21645_s1 + $0xe6c] ss:$16 sps:$4 sm:$0xff]  }
 0x190   :  { %10015 = vmatprep.subr.bf16.mxu0 %v14789_v29  ;;  %11090 = vmatprep.subr.bf16.mxu1 %v14792_v30  ;;  %v14880_v29 = vld [vmem:[%s21645_s1 + $0xe60] ss:$16 sps:$4 sm:$0xff]   ;;  %v14883_v30 = vld [vmem:[%s21645_s1 + $0xe68] ss:$16 sps:$4 sm:$0xff]  }
 0x193   :  { %10016 = vmatpush1.bf16.msra.mxu0 %v14787_v31  ;;  %11091 = vmatpush1.bf16.msra.mxu1 %v14790_v32  ;;  %v14888_v31 = vld [vmem:[%s21645_s1 + $0xe84] ss:$16 sps:$4 sm:$0xff]   ;;  %v14891_v32 = vld [vmem:[%s21645_s1 + $0xe8c] ss:$16 sps:$4 sm:$0xff]  }
 0x194   :  { %10017 = vmatprep.subr.bf16.mxu0 %v14795_v33  ;;  %11092 = vmatprep.subr.bf16.mxu1 %v14798_v34  ;;  %v14886_v33 = vld [vmem:[%s21645_s1 + $0xe80] ss:$16 sps:$4 sm:$0xff]   ;;  %v14889_v34 = vld [vmem:[%s21645_s1 + $0xe88] ss:$16 sps:$4 sm:$0xff]  }
 0x197   :  { %10018 = vmatpush1.bf16.msra.mxu0 %v14793_v35  ;;  %11093 = vmatpush1.bf16.msra.mxu1 %v14796_v36  ;;  %v14894_v35 = vld [vmem:[%s21645_s1 + $0xea4] ss:$16 sps:$4 sm:$0xff]   ;;  %v14897_v36 = vld [vmem:[%s21645_s1 + $0xeac] ss:$16 sps:$4 sm:$0xff]  }
 0x198   :  { %10019 = vmatprep.subr.bf16.mxu0 %v14801_v37  ;;  %11094 = vmatprep.subr.bf16.mxu1 %v14804_v38  ;;  %v14892_v37 = vld [vmem:[%s21645_s1 + $0xea0] ss:$16 sps:$4 sm:$0xff]   ;;  %v14895_v38 = vld [vmem:[%s21645_s1 + $0xea8] ss:$16 sps:$4 sm:$0xff]  }
 0x19b   :  { %10020 = vmatpush1.bf16.msra.mxu0 %v14799_v39  ;;  %11095 = vmatpush1.bf16.msra.mxu1 %v14802_v40  ;;  %v14900_v39 = vld [vmem:[%s21645_s1 + $0xec4] ss:$16 sps:$4 sm:$0xff]   ;;  %v14903_v40 = vld [vmem:[%s21645_s1 + $0xecc] ss:$16 sps:$4 sm:$0xff]  }
 0x19c   :  { %10021 = vmatprep.subr.bf16.mxu0 %v14807_v41  ;;  %11096 = vmatprep.subr.bf16.mxu1 %v14810_v42  ;;  %v14898_v41 = vld [vmem:[%s21645_s1 + $0xec0] ss:$16 sps:$4 sm:$0xff]   ;;  %v14901_v42 = vld [vmem:[%s21645_s1 + $0xec8] ss:$16 sps:$4 sm:$0xff]  }
 0x19f   :  { %10022 = vmatpush1.bf16.msra.mxu0 %v14805_v43  ;;  %11097 = vmatpush1.bf16.msra.mxu1 %v14808_v44  ;;  %v14906_v43 = vld [vmem:[%s21645_s1 + $0xee4] ss:$16 sps:$4 sm:$0xff]   ;;  %v14909_v44 = vld [vmem:[%s21645_s1 + $0xeec] ss:$16 sps:$4 sm:$0xff]  }
 0x1a0   :  { %10023 = vmatprep.subr.bf16.mxu0 %v14813_v45  ;;  %11098 = vmatprep.subr.bf16.mxu1 %v14816_v46  ;;  %v14904_v45 = vld [vmem:[%s21645_s1 + $0xee0] ss:$16 sps:$4 sm:$0xff]   ;;  %v14907_v46 = vld [vmem:[%s21645_s1 + $0xee8] ss:$16 sps:$4 sm:$0xff]  }
 0x1a3   :  { %10024 = vmatpush1.bf16.msra.mxu0 %v14811_v47  ;;  %11099 = vmatpush1.bf16.msra.mxu1 %v14814_v48  ;;  %v14912_v47 = vld [vmem:[%s21645_s1 + $0xf04] ss:$16 sps:$4 sm:$0xff]   ;;  %v14915_v48 = vld [vmem:[%s21645_s1 + $0xf0c] ss:$16 sps:$4 sm:$0xff]  }
 0x1a4   :  { %10025 = vmatprep.subr.bf16.mxu0 %v14819_v49  ;;  %11100 = vmatprep.subr.bf16.mxu1 %v14822_v50  ;;  %v14910_v49 = vld [vmem:[%s21645_s1 + $0xf00] ss:$16 sps:$4 sm:$0xff]   ;;  %v14913_v50 = vld [vmem:[%s21645_s1 + $0xf08] ss:$16 sps:$4 sm:$0xff]  }
 0x1a7   :  { %10026 = vmatpush1.bf16.msra.mxu0 %v14817_v51  ;;  %11101 = vmatpush1.bf16.msra.mxu1 %v14820_v52  ;;  %v14918_v51 = vld [vmem:[%s21645_s1 + $0xf24] ss:$16 sps:$4 sm:$0xff]   ;;  %v14921_v52 = vld [vmem:[%s21645_s1 + $0xf2c] ss:$16 sps:$4 sm:$0xff]  }
 0x1a8   :  { %10027 = vmatprep.subr.bf16.mxu0 %v14825_v53  ;;  %11102 = vmatprep.subr.bf16.mxu1 %v14828_v54  ;;  %v14916_v53 = vld [vmem:[%s21645_s1 + $0xf20] ss:$16 sps:$4 sm:$0xff]   ;;  %v14919_v54 = vld [vmem:[%s21645_s1 + $0xf28] ss:$16 sps:$4 sm:$0xff]  }
 0x1ab   :  { %10028 = vmatpush1.bf16.msra.mxu0 %v14823_v55  ;;  %11103 = vmatpush1.bf16.msra.mxu1 %v14826_v56  ;;  %v14924_v55 = vld [vmem:[%s21645_s1 + $0xf44] ss:$16 sps:$4 sm:$0xff]   ;;  %v14927_v56 = vld [vmem:[%s21645_s1 + $0xf4c] ss:$16 sps:$4 sm:$0xff]  }
 0x1ac   :  { %10029 = vmatprep.subr.bf16.mxu0 %v14831_v57  ;;  %11104 = vmatprep.subr.bf16.mxu1 %v14834_v58  ;;  %v14922_v57 = vld [vmem:[%s21645_s1 + $0xf40] ss:$16 sps:$4 sm:$0xff]   ;;  %v14925_v58 = vld [vmem:[%s21645_s1 + $0xf48] ss:$16 sps:$4 sm:$0xff]  }
 0x1af   :  { %10030 = vmatpush1.bf16.msra.mxu0 %v14829_v59  ;;  %11105 = vmatpush1.bf16.msra.mxu1 %v14832_v60  ;;  %v14930_v59 = vld [vmem:[%s21645_s1 + $0xf64] ss:$16 sps:$4 sm:$0xff]   ;;  %v14933_v60 = vld [vmem:[%s21645_s1 + $0xf6c] ss:$16 sps:$4 sm:$0xff]  }
 0x1b0   :  { %10031 = vmatprep.subr.bf16.mxu0 %v14837_v61  ;;  %11106 = vmatprep.subr.bf16.mxu1 %v14840_v62  ;;  %v14928_v61 = vld [vmem:[%s21645_s1 + $0xf60] ss:$16 sps:$4 sm:$0xff]   ;;  %v14931_v62 = vld [vmem:[%s21645_s1 + $0xf68] ss:$16 sps:$4 sm:$0xff]  }
 0x1b3   :  { %10032 = vmatpush1.bf16.msra.mxu0 %v14835_v63  ;;  %11107 = vmatpush1.bf16.msra.mxu1 %v14838_v0  ;;  %v14936_v63 = vld [vmem:[%s21645_s1 + $0xf84] ss:$16 sps:$4 sm:$0xff]   ;;  %v14939_v0 = vld [vmem:[%s21645_s1 + $0xf8c] ss:$16 sps:$4 sm:$0xff]  }
 0x1b4   :  { %10033 = vmatprep.subr.bf16.mxu0 %v14843_v1  ;;  %11108 = vmatprep.subr.bf16.mxu1 %v14846_v2  ;;  %v14934_v1 = vld [vmem:[%s21645_s1 + $0xf80] ss:$16 sps:$4 sm:$0xff]   ;;  %v14937_v2 = vld [vmem:[%s21645_s1 + $0xf88] ss:$16 sps:$4 sm:$0xff]  }
 0x1b7   :  { %10034 = vmatpush1.bf16.msra.mxu0 %v14841_v3  ;;  %11109 = vmatpush1.bf16.msra.mxu1 %v14844_v4  ;;  %v14942_v3 = vld [vmem:[%s21645_s1 + $0xfa4] ss:$16 sps:$4 sm:$0xff]   ;;  %v14945_v4 = vld [vmem:[%s21645_s1 + $0xfac] ss:$16 sps:$4 sm:$0xff]  }
 0x1b8   :  { %10035 = vmatprep.subr.bf16.mxu0 %v14849_v5  ;;  %11110 = vmatprep.subr.bf16.mxu1 %v14852_v6  ;;  %v14940_v5 = vld [vmem:[%s21645_s1 + $0xfa0] ss:$16 sps:$4 sm:$0xff]   ;;  %v14943_v6 = vld [vmem:[%s21645_s1 + $0xfa8] ss:$16 sps:$4 sm:$0xff]  }
 0x1bb   :  { %10036 = vmatpush1.bf16.msra.mxu0 %v14847_v7  ;;  %11111 = vmatpush1.bf16.msra.mxu1 %v14850_v8  ;;  %v14948_v7 = vld [vmem:[%s21645_s1 + $0xfc4] ss:$16 sps:$4 sm:$0xff]   ;;  %v14951_v8 = vld [vmem:[%s21645_s1 + $0xfcc] ss:$16 sps:$4 sm:$0xff]  }
 0x1bc   :  { %10037 = vmatprep.subr.bf16.mxu0 %v14855_v9  ;;  %11112 = vmatprep.subr.bf16.mxu1 %v14858_v10  ;;  %v14946_v9 = vld [vmem:[%s21645_s1 + $0xfc0] ss:$16 sps:$4 sm:$0xff]   ;;  %v14949_v10 = vld [vmem:[%s21645_s1 + $0xfc8] ss:$16 sps:$4 sm:$0xff]  }
 0x1bf   :  { %10038 = vmatpush1.bf16.msra.mxu0 %v14853_v11  ;;  %11113 = vmatpush1.bf16.msra.mxu1 %v14856_v12  ;;  %v14954_v11 = vld [vmem:[%s21645_s1 + $0xfe4] ss:$16 sps:$4 sm:$0xff]   ;;  %v14957_v12 = vld [vmem:[%s21645_s1 + $0xfec] ss:$16 sps:$4 sm:$0xff]  }
 0x1c0   :  { %10050 = vmatprep.subr.bf16.mxu0 %v14864_v14  ;;  %11125 = vmatprep.subr.bf16.mxu1 %v14867_v15  ;;  %v14955_v14 = vld [vmem:[%s21645_s1 + $0xfe8] ss:$16 sps:$4 sm:$0xff]  }
 0x1c1   :  { %v14958_v15 = vld [vmem:[%s21646_s0 + $0x38] ss:$196 sps:$4 sm:$0xff]  }
 0x1c2   :  { %10040 = vmatmul.mubr.bf16.vlgmr.msra.gmra.mrb[0].mxu0 %v14859_v13  ;;  %11115 = vmatmul.mubr.bf16.vlgmr.msra.gmra.mrb[0].mxu1 %v14859_v13  ;;  %v14952_v13 = vld [vmem:[%s21645_s1 + $0xfe0] ss:$16 sps:$4 sm:$0xff]  }
 0x1c3   :  { %10051 = vmatpush1.bf16.msra.mxu0 %v14862_v16  ;;  %11126 = vmatpush1.bf16.msra.mxu1 %v14865_v17  ;;  %v14963_v16 = vld [vmem:[%s21645_s1 + $0x1004] ss:$16 sps:$4 sm:$0xff]   ;;  %v14966_v17 = vld [vmem:[%s21645_s1 + $0x100c] ss:$16 sps:$4 sm:$0xff]  }
 0x1c4   :  { %10052 = vmatprep.subr.bf16.mxu0 %v14870_v18  ;;  %11127 = vmatprep.subr.bf16.mxu1 %v14873_v19  ;;  %v14961_v18 = vld [vmem:[%s21645_s1 + $0x1000] ss:$16 sps:$4 sm:$0xff]   ;;  %v14964_v19 = vld [vmem:[%s21645_s1 + $0x1008] ss:$16 sps:$4 sm:$0xff]  }
 0x1c5   :  { %10082 = vmatprep.mubr.bf16.mxu0 %v14960_v20  ;;  %11157 = vmatprep.mubr.bf16.mxu1 %v14960_v20  ;;  %v14969_v20 = vld [vmem:[%s21645_s1 + $0x1024] ss:$16 sps:$4 sm:$0xff]  }
 0x1c7   :  { %10053 = vmatpush1.bf16.msra.mxu0 %v14868_v21  ;;  %11128 = vmatpush1.bf16.msra.mxu1 %v14871_v22  ;;  %v14972_v21 = vld [vmem:[%s21645_s1 + $0x102c] ss:$16 sps:$4 sm:$0xff]   ;;  %v15059_v22 = vld [vmem:[%s21646_s0 + $0x44] ss:$196 sps:$4 sm:$0xff]  }
 0x1c8   :  { %10054 = vmatprep.subr.bf16.mxu0 %v14876_v23  ;;  %11129 = vmatprep.subr.bf16.mxu1 %v14879_v24  ;;  %v14967_v23 = vld [vmem:[%s21645_s1 + $0x1020] ss:$16 sps:$4 sm:$0xff]   ;;  %v14970_v24 = vld [vmem:[%s21645_s1 + $0x1028] ss:$16 sps:$4 sm:$0xff]  }
 0x1cb   :  { %10055 = vmatpush1.bf16.msra.mxu0 %v14874_v25  ;;  %11130 = vmatpush1.bf16.msra.mxu1 %v14877_v26  ;;  %v14975_v25 = vld [vmem:[%s21645_s1 + $0x1044] ss:$16 sps:$4 sm:$0xff]   ;;  %v14978_v26 = vld [vmem:[%s21645_s1 + $0x104c] ss:$16 sps:$4 sm:$0xff]  }
 0x1cc   :  { %10056 = vmatprep.subr.bf16.mxu0 %v14882_v27  ;;  %11131 = vmatprep.subr.bf16.mxu1 %v14885_v28  ;;  %v14973_v27 = vld [vmem:[%s21645_s1 + $0x1040] ss:$16 sps:$4 sm:$0xff]   ;;  %v14976_v28 = vld [vmem:[%s21645_s1 + $0x1048] ss:$16 sps:$4 sm:$0xff]  }
 0x1cf   :  { %10057 = vmatpush1.bf16.msra.mxu0 %v14880_v29  ;;  %11132 = vmatpush1.bf16.msra.mxu1 %v14883_v30  ;;  %v14981_v29 = vld [vmem:[%s21645_s1 + $0x1064] ss:$16 sps:$4 sm:$0xff]   ;;  %v14984_v30 = vld [vmem:[%s21645_s1 + $0x106c] ss:$16 sps:$4 sm:$0xff]  }
 0x1d0   :  { %10058 = vmatprep.subr.bf16.mxu0 %v14888_v31  ;;  %11133 = vmatprep.subr.bf16.mxu1 %v14891_v32  ;;  %v14979_v31 = vld [vmem:[%s21645_s1 + $0x1060] ss:$16 sps:$4 sm:$0xff]   ;;  %v14982_v32 = vld [vmem:[%s21645_s1 + $0x1068] ss:$16 sps:$4 sm:$0xff]  }
 0x1d3   :  { %10059 = vmatpush1.bf16.msra.mxu0 %v14886_v33  ;;  %11134 = vmatpush1.bf16.msra.mxu1 %v14889_v34  ;;  %v14987_v33 = vld [vmem:[%s21645_s1 + $0x1084] ss:$16 sps:$4 sm:$0xff]   ;;  %v14990_v34 = vld [vmem:[%s21645_s1 + $0x108c] ss:$16 sps:$4 sm:$0xff]  }
 0x1d4   :  { %10060 = vmatprep.subr.bf16.mxu0 %v14894_v35  ;;  %11135 = vmatprep.subr.bf16.mxu1 %v14897_v36  ;;  %v14985_v35 = vld [vmem:[%s21645_s1 + $0x1080] ss:$16 sps:$4 sm:$0xff]   ;;  %v14988_v36 = vld [vmem:[%s21645_s1 + $0x1088] ss:$16 sps:$4 sm:$0xff]  }
 0x1d7   :  { %10061 = vmatpush1.bf16.msra.mxu0 %v14892_v37  ;;  %11136 = vmatpush1.bf16.msra.mxu1 %v14895_v38  ;;  %v14993_v37 = vld [vmem:[%s21645_s1 + $0x10a4] ss:$16 sps:$4 sm:$0xff]   ;;  %v14996_v38 = vld [vmem:[%s21645_s1 + $0x10ac] ss:$16 sps:$4 sm:$0xff]  }
 0x1d8   :  { %10062 = vmatprep.subr.bf16.mxu0 %v14900_v39  ;;  %11137 = vmatprep.subr.bf16.mxu1 %v14903_v40  ;;  %v14991_v39 = vld [vmem:[%s21645_s1 + $0x10a0] ss:$16 sps:$4 sm:$0xff]   ;;  %v14994_v40 = vld [vmem:[%s21645_s1 + $0x10a8] ss:$16 sps:$4 sm:$0xff]  }
 0x1db   :  { %10063 = vmatpush1.bf16.msra.mxu0 %v14898_v41  ;;  %11138 = vmatpush1.bf16.msra.mxu1 %v14901_v42  ;;  %v14999_v41 = vld [vmem:[%s21645_s1 + $0x10c4] ss:$16 sps:$4 sm:$0xff]   ;;  %v15002_v42 = vld [vmem:[%s21645_s1 + $0x10cc] ss:$16 sps:$4 sm:$0xff]  }
 0x1dc   :  { %10064 = vmatprep.subr.bf16.mxu0 %v14906_v43  ;;  %11139 = vmatprep.subr.bf16.mxu1 %v14909_v44  ;;  %v14997_v43 = vld [vmem:[%s21645_s1 + $0x10c0] ss:$16 sps:$4 sm:$0xff]   ;;  %v15000_v44 = vld [vmem:[%s21645_s1 + $0x10c8] ss:$16 sps:$4 sm:$0xff]  }
 0x1df   :  { %10065 = vmatpush1.bf16.msra.mxu0 %v14904_v45  ;;  %11140 = vmatpush1.bf16.msra.mxu1 %v14907_v46  ;;  %v15005_v45 = vld [vmem:[%s21645_s1 + $0x10e4] ss:$16 sps:$4 sm:$0xff]   ;;  %v15008_v46 = vld [vmem:[%s21645_s1 + $0x10ec] ss:$16 sps:$4 sm:$0xff]  }
 0x1e0   :  { %10066 = vmatprep.subr.bf16.mxu0 %v14912_v47  ;;  %11141 = vmatprep.subr.bf16.mxu1 %v14915_v48  ;;  %v15003_v47 = vld [vmem:[%s21645_s1 + $0x10e0] ss:$16 sps:$4 sm:$0xff]   ;;  %v15006_v48 = vld [vmem:[%s21645_s1 + $0x10e8] ss:$16 sps:$4 sm:$0xff]  }
 0x1e3   :  { %10067 = vmatpush1.bf16.msra.mxu0 %v14910_v49  ;;  %11142 = vmatpush1.bf16.msra.mxu1 %v14913_v50  ;;  %v15011_v49 = vld [vmem:[%s21645_s1 + $0x1104] ss:$16 sps:$4 sm:$0xff]   ;;  %v15014_v50 = vld [vmem:[%s21645_s1 + $0x110c] ss:$16 sps:$4 sm:$0xff]  }
 0x1e4   :  { %10068 = vmatprep.subr.bf16.mxu0 %v14918_v51  ;;  %11143 = vmatprep.subr.bf16.mxu1 %v14921_v52  ;;  %v15009_v51 = vld [vmem:[%s21645_s1 + $0x1100] ss:$16 sps:$4 sm:$0xff]   ;;  %v15012_v52 = vld [vmem:[%s21645_s1 + $0x1108] ss:$16 sps:$4 sm:$0xff]  }
 0x1e7   :  { %10069 = vmatpush1.bf16.msra.mxu0 %v14916_v53  ;;  %11144 = vmatpush1.bf16.msra.mxu1 %v14919_v54  ;;  %v15017_v53 = vld [vmem:[%s21645_s1 + $0x1124] ss:$16 sps:$4 sm:$0xff]   ;;  %v15020_v54 = vld [vmem:[%s21645_s1 + $0x112c] ss:$16 sps:$4 sm:$0xff]  }
 0x1e8   :  { %10070 = vmatprep.subr.bf16.mxu0 %v14924_v55  ;;  %11145 = vmatprep.subr.bf16.mxu1 %v14927_v56  ;;  %v15015_v55 = vld [vmem:[%s21645_s1 + $0x1120] ss:$16 sps:$4 sm:$0xff]   ;;  %v15018_v56 = vld [vmem:[%s21645_s1 + $0x1128] ss:$16 sps:$4 sm:$0xff]  }
 0x1eb   :  { %10071 = vmatpush1.bf16.msra.mxu0 %v14922_v57  ;;  %11146 = vmatpush1.bf16.msra.mxu1 %v14925_v58  ;;  %v15023_v57 = vld [vmem:[%s21645_s1 + $0x1144] ss:$16 sps:$4 sm:$0xff]   ;;  %v15026_v58 = vld [vmem:[%s21645_s1 + $0x114c] ss:$16 sps:$4 sm:$0xff]  }
 0x1ec   :  { %10072 = vmatprep.subr.bf16.mxu0 %v14930_v59  ;;  %11147 = vmatprep.subr.bf16.mxu1 %v14933_v60  ;;  %v15021_v59 = vld [vmem:[%s21645_s1 + $0x1140] ss:$16 sps:$4 sm:$0xff]   ;;  %v15024_v60 = vld [vmem:[%s21645_s1 + $0x1148] ss:$16 sps:$4 sm:$0xff]  }
 0x1ef   :  { %10073 = vmatpush1.bf16.msra.mxu0 %v14928_v61  ;;  %11148 = vmatpush1.bf16.msra.mxu1 %v14931_v62  ;;  %v15029_v61 = vld [vmem:[%s21645_s1 + $0x1164] ss:$16 sps:$4 sm:$0xff]   ;;  %v15032_v62 = vld [vmem:[%s21645_s1 + $0x116c] ss:$16 sps:$4 sm:$0xff]  }
 0x1f0   :  { %10074 = vmatprep.subr.bf16.mxu0 %v14936_v63  ;;  %11149 = vmatprep.subr.bf16.mxu1 %v14939_v0  ;;  %v15027_v63 = vld [vmem:[%s21645_s1 + $0x1160] ss:$16 sps:$4 sm:$0xff]   ;;  %v15030_v0 = vld [vmem:[%s21645_s1 + $0x1168] ss:$16 sps:$4 sm:$0xff]  }
 0x1f3   :  { %10075 = vmatpush1.bf16.msra.mxu0 %v14934_v1  ;;  %11150 = vmatpush1.bf16.msra.mxu1 %v14937_v2  ;;  %v15035_v1 = vld [vmem:[%s21645_s1 + $0x1184] ss:$16 sps:$4 sm:$0xff]   ;;  %v15038_v2 = vld [vmem:[%s21645_s1 + $0x118c] ss:$16 sps:$4 sm:$0xff]  }
 0x1f4   :  { %10076 = vmatprep.subr.bf16.mxu0 %v14942_v3  ;;  %11151 = vmatprep.subr.bf16.mxu1 %v14945_v4  ;;  %v15033_v3 = vld [vmem:[%s21645_s1 + $0x1180] ss:$16 sps:$4 sm:$0xff]   ;;  %v15036_v4 = vld [vmem:[%s21645_s1 + $0x1188] ss:$16 sps:$4 sm:$0xff]  }
 0x1f7   :  { %10077 = vmatpush1.bf16.msra.mxu0 %v14940_v5  ;;  %11152 = vmatpush1.bf16.msra.mxu1 %v14943_v6  ;;  %v15041_v5 = vld [vmem:[%s21645_s1 + $0x11a4] ss:$16 sps:$4 sm:$0xff]   ;;  %v15044_v6 = vld [vmem:[%s21645_s1 + $0x11ac] ss:$16 sps:$4 sm:$0xff]  }
 0x1f8   :  { %10078 = vmatprep.subr.bf16.mxu0 %v14948_v7  ;;  %11153 = vmatprep.subr.bf16.mxu1 %v14951_v8  ;;  %v15039_v7 = vld [vmem:[%s21645_s1 + $0x11a0] ss:$16 sps:$4 sm:$0xff]   ;;  %v15042_v8 = vld [vmem:[%s21645_s1 + $0x11a8] ss:$16 sps:$4 sm:$0xff]  }
 0x1fb   :  { %10079 = vmatpush1.bf16.msra.mxu0 %v14946_v9  ;;  %11154 = vmatpush1.bf16.msra.mxu1 %v14949_v10  ;;  %v15047_v9 = vld [vmem:[%s21645_s1 + $0x11c4] ss:$16 sps:$4 sm:$0xff]   ;;  %v15050_v10 = vld [vmem:[%s21645_s1 + $0x11cc] ss:$16 sps:$4 sm:$0xff]  }
 0x1fc   :  { %10080 = vmatprep.subr.bf16.mxu0 %v14954_v11  ;;  %11155 = vmatprep.subr.bf16.mxu1 %v14957_v12  ;;  %v15045_v11 = vld [vmem:[%s21645_s1 + $0x11c0] ss:$16 sps:$4 sm:$0xff]   ;;  %v15048_v12 = vld [vmem:[%s21645_s1 + $0x11c8] ss:$16 sps:$4 sm:$0xff]  }
 0x1ff   :  { %10081 = vmatpush1.bf16.msra.mxu0 %v14952_v13  ;;  %11156 = vmatpush1.bf16.msra.mxu1 %v14955_v14  ;;  %v15053_v13 = vld [vmem:[%s21645_s1 + $0x11e4] ss:$16 sps:$4 sm:$0xff]   ;;  %v15056_v14 = vld [vmem:[%s21645_s1 + $0x11ec] ss:$16 sps:$4 sm:$0xff]  }
 0x200   :  { %10093 = vmatprep.subr.bf16.mxu0 %v14963_v16  ;;  %11168 = vmatprep.subr.bf16.mxu1 %v14966_v17  ;;  %v15054_v16 = vld [vmem:[%s21645_s1 + $0x11e8] ss:$16 sps:$4 sm:$0xff]   ;;  %v15057_v17 = vld [vmem:[%s21646_s0 + $0x40] ss:$196 sps:$4 sm:$0xff]  }
 0x202   :  { %10083 = vmatmul.mubr.bf16.vlgmr.msra.gmra.mrb[0].mxu0 %v14958_v15  ;;  %11158 = vmatmul.mubr.bf16.vlgmr.msra.gmra.mrb[0].mxu1 %v14958_v15  ;;  %v15051_v15 = vld [vmem:[%s21645_s1 + $0x11e0] ss:$16 sps:$4 sm:$0xff]  }
 0x203   :  { %10094 = vmatpush1.bf16.msra.mxu0 %v14961_v18  ;;  %11169 = vmatpush1.bf16.msra.mxu1 %v14964_v19  ;;  %v15062_v18 = vld [vmem:[%s21645_s1 + $0x1204] ss:$16 sps:$4 sm:$0xff]   ;;  %v15065_v19 = vld [vmem:[%s21645_s1 + $0x120c] ss:$16 sps:$4 sm:$0xff]  }
 0x204   :  { %10095 = vmatprep.subr.bf16.mxu0 %v14969_v20  ;;  %11170 = vmatprep.subr.bf16.mxu1 %v14972_v21  ;;  %v15060_v20 = vld [vmem:[%s21645_s1 + $0x1200] ss:$16 sps:$4 sm:$0xff]   ;;  %v15063_v21 = vld [vmem:[%s21645_s1 + $0x1208] ss:$16 sps:$4 sm:$0xff]  }
 0x205   :  { %10125 = vmatprep.mubr.bf16.mxu0 %v15059_v22  ;;  %11200 = vmatprep.mubr.bf16.mxu1 %v15059_v22  ;;  %v15068_v22 = vld [vmem:[%s21645_s1 + $0x1224] ss:$16 sps:$4 sm:$0xff]  }
 0x207   :  { %10096 = vmatpush1.bf16.msra.mxu0 %v14967_v23  ;;  %11171 = vmatpush1.bf16.msra.mxu1 %v14970_v24  ;;  %v15071_v23 = vld [vmem:[%s21645_s1 + $0x122c] ss:$16 sps:$4 sm:$0xff]  }
 0x208   :  { %10097 = vmatprep.subr.bf16.mxu0 %v14975_v25  ;;  %11172 = vmatprep.subr.bf16.mxu1 %v14978_v26  ;;  %v15158_v24 = vld [vmem:[%s21646_s0 + $0x4c] ss:$196 sps:$4 sm:$0xff]   ;;  %v15069_v26 = vld [vmem:[%s21645_s1 + $0x1228] ss:$16 sps:$4 sm:$0xff]  }
 0x209   :  { %v15066_v25 = vld [vmem:[%s21645_s1 + $0x1220] ss:$16 sps:$4 sm:$0xff]  }
 0x20b   :  { %10098 = vmatpush1.bf16.msra.mxu0 %v14973_v27  ;;  %11173 = vmatpush1.bf16.msra.mxu1 %v14976_v28  ;;  %v15074_v27 = vld [vmem:[%s21645_s1 + $0x1244] ss:$16 sps:$4 sm:$0xff]   ;;  %v15077_v28 = vld [vmem:[%s21645_s1 + $0x124c] ss:$16 sps:$4 sm:$0xff]  }
 0x20c   :  { %10099 = vmatprep.subr.bf16.mxu0 %v14981_v29  ;;  %11174 = vmatprep.subr.bf16.mxu1 %v14984_v30  ;;  %v15072_v29 = vld [vmem:[%s21645_s1 + $0x1240] ss:$16 sps:$4 sm:$0xff]   ;;  %v15075_v30 = vld [vmem:[%s21645_s1 + $0x1248] ss:$16 sps:$4 sm:$0xff]  }
 0x20f   :  { %10100 = vmatpush1.bf16.msra.mxu0 %v14979_v31  ;;  %11175 = vmatpush1.bf16.msra.mxu1 %v14982_v32  ;;  %v15080_v31 = vld [vmem:[%s21645_s1 + $0x1264] ss:$16 sps:$4 sm:$0xff]   ;;  %v15083_v32 = vld [vmem:[%s21645_s1 + $0x126c] ss:$16 sps:$4 sm:$0xff]  }
 0x210   :  { %10101 = vmatprep.subr.bf16.mxu0 %v14987_v33  ;;  %11176 = vmatprep.subr.bf16.mxu1 %v14990_v34  ;;  %v15078_v33 = vld [vmem:[%s21645_s1 + $0x1260] ss:$16 sps:$4 sm:$0xff]   ;;  %v15081_v34 = vld [vmem:[%s21645_s1 + $0x1268] ss:$16 sps:$4 sm:$0xff]  }
 0x213   :  { %10102 = vmatpush1.bf16.msra.mxu0 %v14985_v35  ;;  %11177 = vmatpush1.bf16.msra.mxu1 %v14988_v36  ;;  %v15086_v35 = vld [vmem:[%s21645_s1 + $0x1284] ss:$16 sps:$4 sm:$0xff]   ;;  %v15089_v36 = vld [vmem:[%s21645_s1 + $0x128c] ss:$16 sps:$4 sm:$0xff]  }
 0x214   :  { %10103 = vmatprep.subr.bf16.mxu0 %v14993_v37  ;;  %11178 = vmatprep.subr.bf16.mxu1 %v14996_v38  ;;  %v15084_v37 = vld [vmem:[%s21645_s1 + $0x1280] ss:$16 sps:$4 sm:$0xff]   ;;  %v15087_v38 = vld [vmem:[%s21645_s1 + $0x1288] ss:$16 sps:$4 sm:$0xff]  }
 0x217   :  { %10104 = vmatpush1.bf16.msra.mxu0 %v14991_v39  ;;  %11179 = vmatpush1.bf16.msra.mxu1 %v14994_v40  ;;  %v15092_v39 = vld [vmem:[%s21645_s1 + $0x12a4] ss:$16 sps:$4 sm:$0xff]   ;;  %v15095_v40 = vld [vmem:[%s21645_s1 + $0x12ac] ss:$16 sps:$4 sm:$0xff]  }
 0x218   :  { %10105 = vmatprep.subr.bf16.mxu0 %v14999_v41  ;;  %11180 = vmatprep.subr.bf16.mxu1 %v15002_v42  ;;  %v15090_v41 = vld [vmem:[%s21645_s1 + $0x12a0] ss:$16 sps:$4 sm:$0xff]   ;;  %v15093_v42 = vld [vmem:[%s21645_s1 + $0x12a8] ss:$16 sps:$4 sm:$0xff]  }
 0x21b   :  { %10106 = vmatpush1.bf16.msra.mxu0 %v14997_v43  ;;  %11181 = vmatpush1.bf16.msra.mxu1 %v15000_v44  ;;  %v15098_v43 = vld [vmem:[%s21645_s1 + $0x12c4] ss:$16 sps:$4 sm:$0xff]   ;;  %v15101_v44 = vld [vmem:[%s21645_s1 + $0x12cc] ss:$16 sps:$4 sm:$0xff]  }
 0x21c   :  { %10107 = vmatprep.subr.bf16.mxu0 %v15005_v45  ;;  %11182 = vmatprep.subr.bf16.mxu1 %v15008_v46  ;;  %v15096_v45 = vld [vmem:[%s21645_s1 + $0x12c0] ss:$16 sps:$4 sm:$0xff]   ;;  %v15099_v46 = vld [vmem:[%s21645_s1 + $0x12c8] ss:$16 sps:$4 sm:$0xff]  }
 0x21f   :  { %10108 = vmatpush1.bf16.msra.mxu0 %v15003_v47  ;;  %11183 = vmatpush1.bf16.msra.mxu1 %v15006_v48  ;;  %v15104_v47 = vld [vmem:[%s21645_s1 + $0x12e4] ss:$16 sps:$4 sm:$0xff]   ;;  %v15107_v48 = vld [vmem:[%s21645_s1 + $0x12ec] ss:$16 sps:$4 sm:$0xff]  }
 0x220   :  { %10109 = vmatprep.subr.bf16.mxu0 %v15011_v49  ;;  %11184 = vmatprep.subr.bf16.mxu1 %v15014_v50  ;;  %v15102_v49 = vld [vmem:[%s21645_s1 + $0x12e0] ss:$16 sps:$4 sm:$0xff]   ;;  %v15105_v50 = vld [vmem:[%s21645_s1 + $0x12e8] ss:$16 sps:$4 sm:$0xff]  }
 0x223   :  { %10110 = vmatpush1.bf16.msra.mxu0 %v15009_v51  ;;  %11185 = vmatpush1.bf16.msra.mxu1 %v15012_v52  ;;  %v15110_v51 = vld [vmem:[%s21645_s1 + $0x1304] ss:$16 sps:$4 sm:$0xff]   ;;  %v15113_v52 = vld [vmem:[%s21645_s1 + $0x130c] ss:$16 sps:$4 sm:$0xff]  }
 0x224   :  { %10111 = vmatprep.subr.bf16.mxu0 %v15017_v53  ;;  %11186 = vmatprep.subr.bf16.mxu1 %v15020_v54  ;;  %v15108_v53 = vld [vmem:[%s21645_s1 + $0x1300] ss:$16 sps:$4 sm:$0xff]   ;;  %v15111_v54 = vld [vmem:[%s21645_s1 + $0x1308] ss:$16 sps:$4 sm:$0xff]  }
 0x227   :  { %10112 = vmatpush1.bf16.msra.mxu0 %v15015_v55  ;;  %11187 = vmatpush1.bf16.msra.mxu1 %v15018_v56  ;;  %v15116_v55 = vld [vmem:[%s21645_s1 + $0x1324] ss:$16 sps:$4 sm:$0xff]   ;;  %v15119_v56 = vld [vmem:[%s21645_s1 + $0x132c] ss:$16 sps:$4 sm:$0xff]  }
 0x228   :  { %10113 = vmatprep.subr.bf16.mxu0 %v15023_v57  ;;  %11188 = vmatprep.subr.bf16.mxu1 %v15026_v58  ;;  %v15114_v57 = vld [vmem:[%s21645_s1 + $0x1320] ss:$16 sps:$4 sm:$0xff]   ;;  %v15117_v58 = vld [vmem:[%s21645_s1 + $0x1328] ss:$16 sps:$4 sm:$0xff]  }
 0x22b   :  { %10114 = vmatpush1.bf16.msra.mxu0 %v15021_v59  ;;  %11189 = vmatpush1.bf16.msra.mxu1 %v15024_v60  ;;  %v15122_v59 = vld [vmem:[%s21645_s1 + $0x1344] ss:$16 sps:$4 sm:$0xff]   ;;  %v15125_v60 = vld [vmem:[%s21645_s1 + $0x134c] ss:$16 sps:$4 sm:$0xff]  }
 0x22c   :  { %10115 = vmatprep.subr.bf16.mxu0 %v15029_v61  ;;  %11190 = vmatprep.subr.bf16.mxu1 %v15032_v62  ;;  %v15120_v61 = vld [vmem:[%s21645_s1 + $0x1340] ss:$16 sps:$4 sm:$0xff]   ;;  %v15123_v62 = vld [vmem:[%s21645_s1 + $0x1348] ss:$16 sps:$4 sm:$0xff]  }
 0x22f   :  { %10116 = vmatpush1.bf16.msra.mxu0 %v15027_v63  ;;  %11191 = vmatpush1.bf16.msra.mxu1 %v15030_v0  ;;  %v15128_v63 = vld [vmem:[%s21645_s1 + $0x1364] ss:$16 sps:$4 sm:$0xff]   ;;  %v15131_v0 = vld [vmem:[%s21645_s1 + $0x136c] ss:$16 sps:$4 sm:$0xff]  }
 0x230   :  { %10117 = vmatprep.subr.bf16.mxu0 %v15035_v1  ;;  %11192 = vmatprep.subr.bf16.mxu1 %v15038_v2  ;;  %v15126_v1 = vld [vmem:[%s21645_s1 + $0x1360] ss:$16 sps:$4 sm:$0xff]   ;;  %v15129_v2 = vld [vmem:[%s21645_s1 + $0x1368] ss:$16 sps:$4 sm:$0xff]  }
 0x233   :  { %10118 = vmatpush1.bf16.msra.mxu0 %v15033_v3  ;;  %11193 = vmatpush1.bf16.msra.mxu1 %v15036_v4  ;;  %v15134_v3 = vld [vmem:[%s21645_s1 + $0x1384] ss:$16 sps:$4 sm:$0xff]   ;;  %v15137_v4 = vld [vmem:[%s21645_s1 + $0x138c] ss:$16 sps:$4 sm:$0xff]  }
 0x234   :  { %10119 = vmatprep.subr.bf16.mxu0 %v15041_v5  ;;  %11194 = vmatprep.subr.bf16.mxu1 %v15044_v6  ;;  %v15132_v5 = vld [vmem:[%s21645_s1 + $0x1380] ss:$16 sps:$4 sm:$0xff]   ;;  %v15135_v6 = vld [vmem:[%s21645_s1 + $0x1388] ss:$16 sps:$4 sm:$0xff]  }
 0x237   :  { %10120 = vmatpush1.bf16.msra.mxu0 %v15039_v7  ;;  %11195 = vmatpush1.bf16.msra.mxu1 %v15042_v8  ;;  %v15140_v7 = vld [vmem:[%s21645_s1 + $0x13a4] ss:$16 sps:$4 sm:$0xff]   ;;  %v15143_v8 = vld [vmem:[%s21645_s1 + $0x13ac] ss:$16 sps:$4 sm:$0xff]  }
 0x238   :  { %10121 = vmatprep.subr.bf16.mxu0 %v15047_v9  ;;  %11196 = vmatprep.subr.bf16.mxu1 %v15050_v10  ;;  %v15138_v9 = vld [vmem:[%s21645_s1 + $0x13a0] ss:$16 sps:$4 sm:$0xff]   ;;  %v15141_v10 = vld [vmem:[%s21645_s1 + $0x13a8] ss:$16 sps:$4 sm:$0xff]  }
 0x23b   :  { %10122 = vmatpush1.bf16.msra.mxu0 %v15045_v11  ;;  %11197 = vmatpush1.bf16.msra.mxu1 %v15048_v12  ;;  %v15146_v11 = vld [vmem:[%s21645_s1 + $0x13c4] ss:$16 sps:$4 sm:$0xff]   ;;  %v15149_v12 = vld [vmem:[%s21645_s1 + $0x13cc] ss:$16 sps:$4 sm:$0xff]  }
 0x23c   :  { %10123 = vmatprep.subr.bf16.mxu0 %v15053_v13  ;;  %11198 = vmatprep.subr.bf16.mxu1 %v15056_v14  ;;  %v15144_v13 = vld [vmem:[%s21645_s1 + $0x13c0] ss:$16 sps:$4 sm:$0xff]   ;;  %v15147_v14 = vld [vmem:[%s21645_s1 + $0x13c8] ss:$16 sps:$4 sm:$0xff]  }
 0x23f   :  { %10124 = vmatpush1.bf16.msra.mxu0 %v15051_v15  ;;  %11199 = vmatpush1.bf16.msra.mxu1 %v15054_v16  ;;  %v15152_v15 = vld [vmem:[%s21645_s1 + $0x13e4] ss:$16 sps:$4 sm:$0xff]   ;;  %v15155_v16 = vld [vmem:[%s21645_s1 + $0x13ec] ss:$16 sps:$4 sm:$0xff]  }
 0x240   :  { %10136 = vmatprep.subr.bf16.mxu0 %v15062_v18  ;;  %11211 = vmatprep.subr.bf16.mxu1 %v15065_v19  ;;  %v15153_v18 = vld [vmem:[%s21645_s1 + $0x13e8] ss:$16 sps:$4 sm:$0xff]  }
 0x241   :  { %v15156_v19 = vld [vmem:[%s21646_s0 + $0x48] ss:$196 sps:$4 sm:$0xff]  }
 0x242   :  { %10126 = vmatmul.mubr.bf16.vlgmr.msra.gmra.mrb[0].mxu0 %v15057_v17  ;;  %11201 = vmatmul.mubr.bf16.vlgmr.msra.gmra.mrb[0].mxu1 %v15057_v17  ;;  %v15150_v17 = vld [vmem:[%s21645_s1 + $0x13e0] ss:$16 sps:$4 sm:$0xff]  }
 0x243   :  { %10137 = vmatpush1.bf16.msra.mxu0 %v15060_v20  ;;  %11212 = vmatpush1.bf16.msra.mxu1 %v15063_v21  ;;  %v15161_v20 = vld [vmem:[%s21645_s1 + $0x1404] ss:$16 sps:$4 sm:$0xff]   ;;  %v15164_v21 = vld [vmem:[%s21645_s1 + $0x140c] ss:$16 sps:$4 sm:$0xff]  }
 0x244   :  { %10138 = vmatprep.subr.bf16.mxu0 %v15068_v22  ;;  %11213 = vmatprep.subr.bf16.mxu1 %v15071_v23  ;;  %v15159_v22 = vld [vmem:[%s21645_s1 + $0x1400] ss:$16 sps:$4 sm:$0xff]   ;;  %v15162_v23 = vld [vmem:[%s21645_s1 + $0x1408] ss:$16 sps:$4 sm:$0xff]  }
 0x245   :  { %10168 = vmatprep.mubr.bf16.mxu0 %v15158_v24  ;;  %11243 = vmatprep.mubr.bf16.mxu1 %v15158_v24  ;;  %v15167_v24 = vld [vmem:[%s21645_s1 + $0x1424] ss:$16 sps:$4 sm:$0xff]  }
 0x247   :  { %10139 = vmatpush1.bf16.msra.mxu0 %v15066_v25  ;;  %11214 = vmatpush1.bf16.msra.mxu1 %v15069_v26  ;;  %v15170_v25 = vld [vmem:[%s21645_s1 + $0x142c] ss:$16 sps:$4 sm:$0xff]   ;;  %v15257_v26 = vld [vmem:[%s21646_s0 + $0x54] ss:$196 sps:$4 sm:$0xff]  }
 0x248   :  { %10140 = vmatprep.subr.bf16.mxu0 %v15074_v27  ;;  %11215 = vmatprep.subr.bf16.mxu1 %v15077_v28  ;;  %v15165_v27 = vld [vmem:[%s21645_s1 + $0x1420] ss:$16 sps:$4 sm:$0xff]   ;;  %v15168_v28 = vld [vmem:[%s21645_s1 + $0x1428] ss:$16 sps:$4 sm:$0xff]  }
 0x24b   :  { %10141 = vmatpush1.bf16.msra.mxu0 %v15072_v29  ;;  %11216 = vmatpush1.bf16.msra.mxu1 %v15075_v30  ;;  %v15173_v29 = vld [vmem:[%s21645_s1 + $0x1444] ss:$16 sps:$4 sm:$0xff]   ;;  %v15176_v30 = vld [vmem:[%s21645_s1 + $0x144c] ss:$16 sps:$4 sm:$0xff]  }
 0x24c   :  { %10142 = vmatprep.subr.bf16.mxu0 %v15080_v31  ;;  %11217 = vmatprep.subr.bf16.mxu1 %v15083_v32  ;;  %v15171_v31 = vld [vmem:[%s21645_s1 + $0x1440] ss:$16 sps:$4 sm:$0xff]   ;;  %v15174_v32 = vld [vmem:[%s21645_s1 + $0x1448] ss:$16 sps:$4 sm:$0xff]  }
 0x24f   :  { %10143 = vmatpush1.bf16.msra.mxu0 %v15078_v33  ;;  %11218 = vmatpush1.bf16.msra.mxu1 %v15081_v34  ;;  %v15179_v33 = vld [vmem:[%s21645_s1 + $0x1464] ss:$16 sps:$4 sm:$0xff]   ;;  %v15182_v34 = vld [vmem:[%s21645_s1 + $0x146c] ss:$16 sps:$4 sm:$0xff]  }
 0x250   :  { %10144 = vmatprep.subr.bf16.mxu0 %v15086_v35  ;;  %11219 = vmatprep.subr.bf16.mxu1 %v15089_v36  ;;  %v15177_v35 = vld [vmem:[%s21645_s1 + $0x1460] ss:$16 sps:$4 sm:$0xff]   ;;  %v15180_v36 = vld [vmem:[%s21645_s1 + $0x1468] ss:$16 sps:$4 sm:$0xff]  }
 0x253   :  { %10145 = vmatpush1.bf16.msra.mxu0 %v15084_v37  ;;  %11220 = vmatpush1.bf16.msra.mxu1 %v15087_v38  ;;  %v15185_v37 = vld [vmem:[%s21645_s1 + $0x1484] ss:$16 sps:$4 sm:$0xff]   ;;  %v15188_v38 = vld [vmem:[%s21645_s1 + $0x148c] ss:$16 sps:$4 sm:$0xff]  }
 0x254   :  { %10146 = vmatprep.subr.bf16.mxu0 %v15092_v39  ;;  %11221 = vmatprep.subr.bf16.mxu1 %v15095_v40  ;;  %v15183_v39 = vld [vmem:[%s21645_s1 + $0x1480] ss:$16 sps:$4 sm:$0xff]   ;;  %v15186_v40 = vld [vmem:[%s21645_s1 + $0x1488] ss:$16 sps:$4 sm:$0xff]  }
 0x257   :  { %10147 = vmatpush1.bf16.msra.mxu0 %v15090_v41  ;;  %11222 = vmatpush1.bf16.msra.mxu1 %v15093_v42  ;;  %v15191_v41 = vld [vmem:[%s21645_s1 + $0x14a4] ss:$16 sps:$4 sm:$0xff]   ;;  %v15194_v42 = vld [vmem:[%s21645_s1 + $0x14ac] ss:$16 sps:$4 sm:$0xff]  }
 0x258   :  { %10148 = vmatprep.subr.bf16.mxu0 %v15098_v43  ;;  %11223 = vmatprep.subr.bf16.mxu1 %v15101_v44  ;;  %v15189_v43 = vld [vmem:[%s21645_s1 + $0x14a0] ss:$16 sps:$4 sm:$0xff]   ;;  %v15192_v44 = vld [vmem:[%s21645_s1 + $0x14a8] ss:$16 sps:$4 sm:$0xff]  }
 0x25b   :  { %10149 = vmatpush1.bf16.msra.mxu0 %v15096_v45  ;;  %11224 = vmatpush1.bf16.msra.mxu1 %v15099_v46  ;;  %v15197_v45 = vld [vmem:[%s21645_s1 + $0x14c4] ss:$16 sps:$4 sm:$0xff]   ;;  %v15200_v46 = vld [vmem:[%s21645_s1 + $0x14cc] ss:$16 sps:$4 sm:$0xff]  }
 0x25c   :  { %10150 = vmatprep.subr.bf16.mxu0 %v15104_v47  ;;  %11225 = vmatprep.subr.bf16.mxu1 %v15107_v48  ;;  %v15195_v47 = vld [vmem:[%s21645_s1 + $0x14c0] ss:$16 sps:$4 sm:$0xff]   ;;  %v15198_v48 = vld [vmem:[%s21645_s1 + $0x14c8] ss:$16 sps:$4 sm:$0xff]  }
 0x25f   :  { %10151 = vmatpush1.bf16.msra.mxu0 %v15102_v49  ;;  %11226 = vmatpush1.bf16.msra.mxu1 %v15105_v50  ;;  %v15203_v49 = vld [vmem:[%s21645_s1 + $0x14e4] ss:$16 sps:$4 sm:$0xff]   ;;  %v15206_v50 = vld [vmem:[%s21645_s1 + $0x14ec] ss:$16 sps:$4 sm:$0xff]  }
 0x260   :  { %10152 = vmatprep.subr.bf16.mxu0 %v15110_v51  ;;  %11227 = vmatprep.subr.bf16.mxu1 %v15113_v52  ;;  %v15201_v51 = vld [vmem:[%s21645_s1 + $0x14e0] ss:$16 sps:$4 sm:$0xff]   ;;  %v15204_v52 = vld [vmem:[%s21645_s1 + $0x14e8] ss:$16 sps:$4 sm:$0xff]  }
 0x263   :  { %10153 = vmatpush1.bf16.msra.mxu0 %v15108_v53  ;;  %11228 = vmatpush1.bf16.msra.mxu1 %v15111_v54  ;;  %v15209_v53 = vld [vmem:[%s21645_s1 + $0x1504] ss:$16 sps:$4 sm:$0xff]   ;;  %v15212_v54 = vld [vmem:[%s21645_s1 + $0x150c] ss:$16 sps:$4 sm:$0xff]  }
 0x264   :  { %10154 = vmatprep.subr.bf16.mxu0 %v15116_v55  ;;  %11229 = vmatprep.subr.bf16.mxu1 %v15119_v56  ;;  %v15207_v55 = vld [vmem:[%s21645_s1 + $0x1500] ss:$16 sps:$4 sm:$0xff]   ;;  %v15210_v56 = vld [vmem:[%s21645_s1 + $0x1508] ss:$16 sps:$4 sm:$0xff]  }
 0x267   :  { %10155 = vmatpush1.bf16.msra.mxu0 %v15114_v57  ;;  %11230 = vmatpush1.bf16.msra.mxu1 %v15117_v58  ;;  %v15215_v57 = vld [vmem:[%s21645_s1 + $0x1524] ss:$16 sps:$4 sm:$0xff]   ;;  %v15218_v58 = vld [vmem:[%s21645_s1 + $0x152c] ss:$16 sps:$4 sm:$0xff]  }
 0x268   :  { %10156 = vmatprep.subr.bf16.mxu0 %v15122_v59  ;;  %11231 = vmatprep.subr.bf16.mxu1 %v15125_v60  ;;  %v15213_v59 = vld [vmem:[%s21645_s1 + $0x1520] ss:$16 sps:$4 sm:$0xff]   ;;  %v15216_v60 = vld [vmem:[%s21645_s1 + $0x1528] ss:$16 sps:$4 sm:$0xff]  }
 0x26b   :  { %10157 = vmatpush1.bf16.msra.mxu0 %v15120_v61  ;;  %11232 = vmatpush1.bf16.msra.mxu1 %v15123_v62  ;;  %v15221_v61 = vld [vmem:[%s21645_s1 + $0x1544] ss:$16 sps:$4 sm:$0xff]   ;;  %v15224_v62 = vld [vmem:[%s21645_s1 + $0x154c] ss:$16 sps:$4 sm:$0xff]  }
 0x26c   :  { %10158 = vmatprep.subr.bf16.mxu0 %v15128_v63  ;;  %11233 = vmatprep.subr.bf16.mxu1 %v15131_v0  ;;  %v15219_v63 = vld [vmem:[%s21645_s1 + $0x1540] ss:$16 sps:$4 sm:$0xff]   ;;  %v15222_v0 = vld [vmem:[%s21645_s1 + $0x1548] ss:$16 sps:$4 sm:$0xff]  }
 0x26f   :  { %10159 = vmatpush1.bf16.msra.mxu0 %v15126_v1  ;;  %11234 = vmatpush1.bf16.msra.mxu1 %v15129_v2  ;;  %v15227_v1 = vld [vmem:[%s21645_s1 + $0x1564] ss:$16 sps:$4 sm:$0xff]   ;;  %v15230_v2 = vld [vmem:[%s21645_s1 + $0x156c] ss:$16 sps:$4 sm:$0xff]  }
 0x270   :  { %10160 = vmatprep.subr.bf16.mxu0 %v15134_v3  ;;  %11235 = vmatprep.subr.bf16.mxu1 %v15137_v4  ;;  %v15225_v3 = vld [vmem:[%s21645_s1 + $0x1560] ss:$16 sps:$4 sm:$0xff]   ;;  %v15228_v4 = vld [vmem:[%s21645_s1 + $0x1568] ss:$16 sps:$4 sm:$0xff]  }
 0x273   :  { %10161 = vmatpush1.bf16.msra.mxu0 %v15132_v5  ;;  %11236 = vmatpush1.bf16.msra.mxu1 %v15135_v6  ;;  %v15233_v5 = vld [vmem:[%s21645_s1 + $0x1584] ss:$16 sps:$4 sm:$0xff]   ;;  %v15236_v6 = vld [vmem:[%s21645_s1 + $0x158c] ss:$16 sps:$4 sm:$0xff]  }
 0x274   :  { %10162 = vmatprep.subr.bf16.mxu0 %v15140_v7  ;;  %11237 = vmatprep.subr.bf16.mxu1 %v15143_v8  ;;  %v15231_v7 = vld [vmem:[%s21645_s1 + $0x1580] ss:$16 sps:$4 sm:$0xff]   ;;  %v15234_v8 = vld [vmem:[%s21645_s1 + $0x1588] ss:$16 sps:$4 sm:$0xff]  }
 0x277   :  { %10163 = vmatpush1.bf16.msra.mxu0 %v15138_v9  ;;  %11238 = vmatpush1.bf16.msra.mxu1 %v15141_v10  ;;  %v15239_v9 = vld [vmem:[%s21645_s1 + $0x15a4] ss:$16 sps:$4 sm:$0xff]   ;;  %v15242_v10 = vld [vmem:[%s21645_s1 + $0x15ac] ss:$16 sps:$4 sm:$0xff]  }
 0x278   :  { %10164 = vmatprep.subr.bf16.mxu0 %v15146_v11  ;;  %11239 = vmatprep.subr.bf16.mxu1 %v15149_v12  ;;  %v15237_v11 = vld [vmem:[%s21645_s1 + $0x15a0] ss:$16 sps:$4 sm:$0xff]   ;;  %v15240_v12 = vld [vmem:[%s21645_s1 + $0x15a8] ss:$16 sps:$4 sm:$0xff]  }
 0x27b   :  { %10165 = vmatpush1.bf16.msra.mxu0 %v15144_v13  ;;  %11240 = vmatpush1.bf16.msra.mxu1 %v15147_v14  ;;  %v15245_v13 = vld [vmem:[%s21645_s1 + $0x15c4] ss:$16 sps:$4 sm:$0xff]   ;;  %v15248_v14 = vld [vmem:[%s21645_s1 + $0x15cc] ss:$16 sps:$4 sm:$0xff]  }
 0x27c   :  { %10166 = vmatprep.subr.bf16.mxu0 %v15152_v15  ;;  %11241 = vmatprep.subr.bf16.mxu1 %v15155_v16  ;;  %v15243_v15 = vld [vmem:[%s21645_s1 + $0x15c0] ss:$16 sps:$4 sm:$0xff]   ;;  %v15246_v16 = vld [vmem:[%s21645_s1 + $0x15c8] ss:$16 sps:$4 sm:$0xff]  }
 0x27f   :  { %10167 = vmatpush1.bf16.msra.mxu0 %v15150_v17  ;;  %11242 = vmatpush1.bf16.msra.mxu1 %v15153_v18  ;;  %v15251_v17 = vld [vmem:[%s21645_s1 + $0x15e4] ss:$16 sps:$4 sm:$0xff]   ;;  %v15254_v18 = vld [vmem:[%s21645_s1 + $0x15ec] ss:$16 sps:$4 sm:$0xff]  }
 0x280   :  { %10179 = vmatprep.subr.bf16.mxu0 %v15161_v20  ;;  %11254 = vmatprep.subr.bf16.mxu1 %v15164_v21  ;;  %v15252_v20 = vld [vmem:[%s21645_s1 + $0x15e8] ss:$16 sps:$4 sm:$0xff]   ;;  %v15255_v21 = vld [vmem:[%s21646_s0 + $0x50] ss:$196 sps:$4 sm:$0xff]  }
 0x282   :  { %10169 = vmatmul.mubr.bf16.vlgmr.msra.gmra.mrb[0].mxu0 %v15156_v19  ;;  %11244 = vmatmul.mubr.bf16.vlgmr.msra.gmra.mrb[0].mxu1 %v15156_v19  ;;  %v15249_v19 = vld [vmem:[%s21645_s1 + $0x15e0] ss:$16 sps:$4 sm:$0xff]  }
 0x283   :  { %10180 = vmatpush1.bf16.msra.mxu0 %v15159_v22  ;;  %11255 = vmatpush1.bf16.msra.mxu1 %v15162_v23  ;;  %v15260_v22 = vld [vmem:[%s21645_s1 + $0x1604] ss:$16 sps:$4 sm:$0xff]   ;;  %v15263_v23 = vld [vmem:[%s21645_s1 + $0x160c] ss:$16 sps:$4 sm:$0xff]  }
 0x284   :  { %10181 = vmatprep.subr.bf16.mxu0 %v15167_v24  ;;  %11256 = vmatprep.subr.bf16.mxu1 %v15170_v25  ;;  %v15258_v24 = vld [vmem:[%s21645_s1 + $0x1600] ss:$16 sps:$4 sm:$0xff]   ;;  %v15261_v25 = vld [vmem:[%s21645_s1 + $0x1608] ss:$16 sps:$4 sm:$0xff]  }
 0x285   :  { %10211 = vmatprep.mubr.bf16.mxu0 %v15257_v26  ;;  %11286 = vmatprep.mubr.bf16.mxu1 %v15257_v26  ;;  %v15266_v26 = vld [vmem:[%s21645_s1 + $0x1624] ss:$16 sps:$4 sm:$0xff]  }
 0x287   :  { %10182 = vmatpush1.bf16.msra.mxu0 %v15165_v27  ;;  %11257 = vmatpush1.bf16.msra.mxu1 %v15168_v28  ;;  %v15269_v27 = vld [vmem:[%s21645_s1 + $0x162c] ss:$16 sps:$4 sm:$0xff]  }
 0x288   :  { %10183 = vmatprep.subr.bf16.mxu0 %v15173_v29  ;;  %11258 = vmatprep.subr.bf16.mxu1 %v15176_v30  ;;  %v15356_v28 = vld [vmem:[%s21646_s0 + $0x5c] ss:$196 sps:$4 sm:$0xff]   ;;  %v15267_v30 = vld [vmem:[%s21645_s1 + $0x1628] ss:$16 sps:$4 sm:$0xff]  }
 0x289   :  { %v15264_v29 = vld [vmem:[%s21645_s1 + $0x1620] ss:$16 sps:$4 sm:$0xff]  }
 0x28b   :  { %10184 = vmatpush1.bf16.msra.mxu0 %v15171_v31  ;;  %11259 = vmatpush1.bf16.msra.mxu1 %v15174_v32  ;;  %v15272_v31 = vld [vmem:[%s21645_s1 + $0x1644] ss:$16 sps:$4 sm:$0xff]   ;;  %v15275_v32 = vld [vmem:[%s21645_s1 + $0x164c] ss:$16 sps:$4 sm:$0xff]  }
 0x28c   :  { %10185 = vmatprep.subr.bf16.mxu0 %v15179_v33  ;;  %11260 = vmatprep.subr.bf16.mxu1 %v15182_v34  ;;  %v15270_v33 = vld [vmem:[%s21645_s1 + $0x1640] ss:$16 sps:$4 sm:$0xff]   ;;  %v15273_v34 = vld [vmem:[%s21645_s1 + $0x1648] ss:$16 sps:$4 sm:$0xff]  }
 0x28f   :  { %10186 = vmatpush1.bf16.msra.mxu0 %v15177_v35  ;;  %11261 = vmatpush1.bf16.msra.mxu1 %v15180_v36  ;;  %v15278_v35 = vld [vmem:[%s21645_s1 + $0x1664] ss:$16 sps:$4 sm:$0xff]   ;;  %v15281_v36 = vld [vmem:[%s21645_s1 + $0x166c] ss:$16 sps:$4 sm:$0xff]  }
 0x290   :  { %10187 = vmatprep.subr.bf16.mxu0 %v15185_v37  ;;  %11262 = vmatprep.subr.bf16.mxu1 %v15188_v38  ;;  %v15276_v37 = vld [vmem:[%s21645_s1 + $0x1660] ss:$16 sps:$4 sm:$0xff]   ;;  %v15279_v38 = vld [vmem:[%s21645_s1 + $0x1668] ss:$16 sps:$4 sm:$0xff]  }
 0x293   :  { %10188 = vmatpush1.bf16.msra.mxu0 %v15183_v39  ;;  %11263 = vmatpush1.bf16.msra.mxu1 %v15186_v40  ;;  %v15284_v39 = vld [vmem:[%s21645_s1 + $0x1684] ss:$16 sps:$4 sm:$0xff]   ;;  %v15287_v40 = vld [vmem:[%s21645_s1 + $0x168c] ss:$16 sps:$4 sm:$0xff]  }
 0x294   :  { %10189 = vmatprep.subr.bf16.mxu0 %v15191_v41  ;;  %11264 = vmatprep.subr.bf16.mxu1 %v15194_v42  ;;  %v15282_v41 = vld [vmem:[%s21645_s1 + $0x1680] ss:$16 sps:$4 sm:$0xff]   ;;  %v15285_v42 = vld [vmem:[%s21645_s1 + $0x1688] ss:$16 sps:$4 sm:$0xff]  }
 0x297   :  { %10190 = vmatpush1.bf16.msra.mxu0 %v15189_v43  ;;  %11265 = vmatpush1.bf16.msra.mxu1 %v15192_v44  ;;  %v15290_v43 = vld [vmem:[%s21645_s1 + $0x16a4] ss:$16 sps:$4 sm:$0xff]   ;;  %v15293_v44 = vld [vmem:[%s21645_s1 + $0x16ac] ss:$16 sps:$4 sm:$0xff]  }
 0x298   :  { %10191 = vmatprep.subr.bf16.mxu0 %v15197_v45  ;;  %11266 = vmatprep.subr.bf16.mxu1 %v15200_v46  ;;  %v15288_v45 = vld [vmem:[%s21645_s1 + $0x16a0] ss:$16 sps:$4 sm:$0xff]   ;;  %v15291_v46 = vld [vmem:[%s21645_s1 + $0x16a8] ss:$16 sps:$4 sm:$0xff]  }
 0x29b   :  { %10192 = vmatpush1.bf16.msra.mxu0 %v15195_v47  ;;  %11267 = vmatpush1.bf16.msra.mxu1 %v15198_v48  ;;  %v15296_v47 = vld [vmem:[%s21645_s1 + $0x16c4] ss:$16 sps:$4 sm:$0xff]   ;;  %v15299_v48 = vld [vmem:[%s21645_s1 + $0x16cc] ss:$16 sps:$4 sm:$0xff]  }
 0x29c   :  { %10193 = vmatprep.subr.bf16.mxu0 %v15203_v49  ;;  %11268 = vmatprep.subr.bf16.mxu1 %v15206_v50  ;;  %v15294_v49 = vld [vmem:[%s21645_s1 + $0x16c0] ss:$16 sps:$4 sm:$0xff]   ;;  %v15297_v50 = vld [vmem:[%s21645_s1 + $0x16c8] ss:$16 sps:$4 sm:$0xff]  }
 0x29f   :  { %10194 = vmatpush1.bf16.msra.mxu0 %v15201_v51  ;;  %11269 = vmatpush1.bf16.msra.mxu1 %v15204_v52  ;;  %v15302_v51 = vld [vmem:[%s21645_s1 + $0x16e4] ss:$16 sps:$4 sm:$0xff]   ;;  %v15305_v52 = vld [vmem:[%s21645_s1 + $0x16ec] ss:$16 sps:$4 sm:$0xff]  }
 0x2a0   :  { %10195 = vmatprep.subr.bf16.mxu0 %v15209_v53  ;;  %11270 = vmatprep.subr.bf16.mxu1 %v15212_v54  ;;  %v15300_v53 = vld [vmem:[%s21645_s1 + $0x16e0] ss:$16 sps:$4 sm:$0xff]   ;;  %v15303_v54 = vld [vmem:[%s21645_s1 + $0x16e8] ss:$16 sps:$4 sm:$0xff]  }
 0x2a3   :  { %10196 = vmatpush1.bf16.msra.mxu0 %v15207_v55  ;;  %11271 = vmatpush1.bf16.msra.mxu1 %v15210_v56  ;;  %v15308_v55 = vld [vmem:[%s21645_s1 + $0x1704] ss:$16 sps:$4 sm:$0xff]   ;;  %v15311_v56 = vld [vmem:[%s21645_s1 + $0x170c] ss:$16 sps:$4 sm:$0xff]  }
 0x2a4   :  { %10197 = vmatprep.subr.bf16.mxu0 %v15215_v57  ;;  %11272 = vmatprep.subr.bf16.mxu1 %v15218_v58  ;;  %v15306_v57 = vld [vmem:[%s21645_s1 + $0x1700] ss:$16 sps:$4 sm:$0xff]   ;;  %v15309_v58 = vld [vmem:[%s21645_s1 + $0x1708] ss:$16 sps:$4 sm:$0xff]  }
 0x2a7   :  { %10198 = vmatpush1.bf16.msra.mxu0 %v15213_v59  ;;  %11273 = vmatpush1.bf16.msra.mxu1 %v15216_v60  ;;  %v15314_v59 = vld [vmem:[%s21645_s1 + $0x1724] ss:$16 sps:$4 sm:$0xff]   ;;  %v15317_v60 = vld [vmem:[%s21645_s1 + $0x172c] ss:$16 sps:$4 sm:$0xff]  }
 0x2a8   :  { %10199 = vmatprep.subr.bf16.mxu0 %v15221_v61  ;;  %11274 = vmatprep.subr.bf16.mxu1 %v15224_v62  ;;  %v15312_v61 = vld [vmem:[%s21645_s1 + $0x1720] ss:$16 sps:$4 sm:$0xff]   ;;  %v15315_v62 = vld [vmem:[%s21645_s1 + $0x1728] ss:$16 sps:$4 sm:$0xff]  }
 0x2ab   :  { %10200 = vmatpush1.bf16.msra.mxu0 %v15219_v63  ;;  %11275 = vmatpush1.bf16.msra.mxu1 %v15222_v0  ;;  %v15320_v63 = vld [vmem:[%s21645_s1 + $0x1744] ss:$16 sps:$4 sm:$0xff]   ;;  %v15323_v0 = vld [vmem:[%s21645_s1 + $0x174c] ss:$16 sps:$4 sm:$0xff]  }
 0x2ac   :  { %10201 = vmatprep.subr.bf16.mxu0 %v15227_v1  ;;  %11276 = vmatprep.subr.bf16.mxu1 %v15230_v2  ;;  %v15318_v1 = vld [vmem:[%s21645_s1 + $0x1740] ss:$16 sps:$4 sm:$0xff]   ;;  %v15321_v2 = vld [vmem:[%s21645_s1 + $0x1748] ss:$16 sps:$4 sm:$0xff]  }
 0x2af   :  { %10202 = vmatpush1.bf16.msra.mxu0 %v15225_v3  ;;  %11277 = vmatpush1.bf16.msra.mxu1 %v15228_v4  ;;  %v15326_v3 = vld [vmem:[%s21645_s1 + $0x1764] ss:$16 sps:$4 sm:$0xff]   ;;  %v15329_v4 = vld [vmem:[%s21645_s1 + $0x176c] ss:$16 sps:$4 sm:$0xff]  }
 0x2b0   :  { %10203 = vmatprep.subr.bf16.mxu0 %v15233_v5  ;;  %11278 = vmatprep.subr.bf16.mxu1 %v15236_v6  ;;  %v15324_v5 = vld [vmem:[%s21645_s1 + $0x1760] ss:$16 sps:$4 sm:$0xff]   ;;  %v15327_v6 = vld [vmem:[%s21645_s1 + $0x1768] ss:$16 sps:$4 sm:$0xff]  }
 0x2b3   :  { %10204 = vmatpush1.bf16.msra.mxu0 %v15231_v7  ;;  %11279 = vmatpush1.bf16.msra.mxu1 %v15234_v8  ;;  %v15332_v7 = vld [vmem:[%s21645_s1 + $0x1784] ss:$16 sps:$4 sm:$0xff]   ;;  %v15335_v8 = vld [vmem:[%s21645_s1 + $0x178c] ss:$16 sps:$4 sm:$0xff]  }
 0x2b4   :  { %10205 = vmatprep.subr.bf16.mxu0 %v15239_v9  ;;  %11280 = vmatprep.subr.bf16.mxu1 %v15242_v10  ;;  %v15330_v9 = vld [vmem:[%s21645_s1 + $0x1780] ss:$16 sps:$4 sm:$0xff]   ;;  %v15333_v10 = vld [vmem:[%s21645_s1 + $0x1788] ss:$16 sps:$4 sm:$0xff]  }
 0x2b7   :  { %10206 = vmatpush1.bf16.msra.mxu0 %v15237_v11  ;;  %11281 = vmatpush1.bf16.msra.mxu1 %v15240_v12  ;;  %v15338_v11 = vld [vmem:[%s21645_s1 + $0x17a4] ss:$16 sps:$4 sm:$0xff]   ;;  %v15341_v12 = vld [vmem:[%s21645_s1 + $0x17ac] ss:$16 sps:$4 sm:$0xff]  }
 0x2b8   :  { %10207 = vmatprep.subr.bf16.mxu0 %v15245_v13  ;;  %11282 = vmatprep.subr.bf16.mxu1 %v15248_v14  ;;  %v15336_v13 = vld [vmem:[%s21645_s1 + $0x17a0] ss:$16 sps:$4 sm:$0xff]   ;;  %v15339_v14 = vld [vmem:[%s21645_s1 + $0x17a8] ss:$16 sps:$4 sm:$0xff]  }
 0x2bb   :  { %10208 = vmatpush1.bf16.msra.mxu0 %v15243_v15  ;;  %11283 = vmatpush1.bf16.msra.mxu1 %v15246_v16  ;;  %v15344_v15 = vld [vmem:[%s21645_s1 + $0x17c4] ss:$16 sps:$4 sm:$0xff]   ;;  %v15347_v16 = vld [vmem:[%s21645_s1 + $0x17cc] ss:$16 sps:$4 sm:$0xff]  }
 0x2bc   :  { %10209 = vmatprep.subr.bf16.mxu0 %v15251_v17  ;;  %11284 = vmatprep.subr.bf16.mxu1 %v15254_v18  ;;  %v15342_v17 = vld [vmem:[%s21645_s1 + $0x17c0] ss:$16 sps:$4 sm:$0xff]   ;;  %v15345_v18 = vld [vmem:[%s21645_s1 + $0x17c8] ss:$16 sps:$4 sm:$0xff]  }
 0x2bf   :  { %10210 = vmatpush1.bf16.msra.mxu0 %v15249_v19  ;;  %11285 = vmatpush1.bf16.msra.mxu1 %v15252_v20  ;;  %v15350_v19 = vld [vmem:[%s21645_s1 + $0x17e4] ss:$16 sps:$4 sm:$0xff]   ;;  %v15353_v20 = vld [vmem:[%s21645_s1 + $0x17ec] ss:$16 sps:$4 sm:$0xff]  }
 0x2c0   :  { %10222 = vmatprep.subr.bf16.mxu0 %v15260_v22  ;;  %11297 = vmatprep.subr.bf16.mxu1 %v15263_v23  ;;  %v15351_v22 = vld [vmem:[%s21645_s1 + $0x17e8] ss:$16 sps:$4 sm:$0xff]  }
 0x2c1   :  { %v15354_v23 = vld [vmem:[%s21646_s0 + $0x58] ss:$196 sps:$4 sm:$0xff]  }
 0x2c2   :  { %10212 = vmatmul.mubr.bf16.vlgmr.msra.gmra.mrb[0].mxu0 %v15255_v21  ;;  %11287 = vmatmul.mubr.bf16.vlgmr.msra.gmra.mrb[0].mxu1 %v15255_v21  ;;  %v15348_v21 = vld [vmem:[%s21645_s1 + $0x17e0] ss:$16 sps:$4 sm:$0xff]  }
 0x2c3   :  { %10223 = vmatpush1.bf16.msra.mxu0 %v15258_v24  ;;  %11298 = vmatpush1.bf16.msra.mxu1 %v15261_v25  ;;  %v15359_v24 = vld [vmem:[%s21645_s1 + $0x1804] ss:$16 sps:$4 sm:$0xff]   ;;  %v15362_v25 = vld [vmem:[%s21645_s1 + $0x180c] ss:$16 sps:$4 sm:$0xff]  }
 0x2c4   :  { %10224 = vmatprep.subr.bf16.mxu0 %v15266_v26  ;;  %11299 = vmatprep.subr.bf16.mxu1 %v15269_v27  ;;  %v15357_v26 = vld [vmem:[%s21645_s1 + $0x1800] ss:$16 sps:$4 sm:$0xff]   ;;  %v15360_v27 = vld [vmem:[%s21645_s1 + $0x1808] ss:$16 sps:$4 sm:$0xff]  }
 0x2c5   :  { %10254 = vmatprep.mubr.bf16.mxu0 %v15356_v28  ;;  %11329 = vmatprep.mubr.bf16.mxu1 %v15356_v28  ;;  %v15365_v28 = vld [vmem:[%s21645_s1 + $0x1824] ss:$16 sps:$4 sm:$0xff]  }
 0x2c7   :  { %10225 = vmatpush1.bf16.msra.mxu0 %v15264_v29  ;;  %11300 = vmatpush1.bf16.msra.mxu1 %v15267_v30  ;;  %v15368_v29 = vld [vmem:[%s21645_s1 + $0x182c] ss:$16 sps:$4 sm:$0xff]   ;;  %v15455_v30 = vld [vmem:[%s21646_s0 + $0x64] ss:$196 sps:$4 sm:$0xff]  }
 0x2c8   :  { %10226 = vmatprep.subr.bf16.mxu0 %v15272_v31  ;;  %11301 = vmatprep.subr.bf16.mxu1 %v15275_v32  ;;  %v15363_v31 = vld [vmem:[%s21645_s1 + $0x1820] ss:$16 sps:$4 sm:$0xff]   ;;  %v15366_v32 = vld [vmem:[%s21645_s1 + $0x1828] ss:$16 sps:$4 sm:$0xff]  }
 0x2cb   :  { %10227 = vmatpush1.bf16.msra.mxu0 %v15270_v33  ;;  %11302 = vmatpush1.bf16.msra.mxu1 %v15273_v34  ;;  %v15371_v33 = vld [vmem:[%s21645_s1 + $0x1844] ss:$16 sps:$4 sm:$0xff]   ;;  %v15374_v34 = vld [vmem:[%s21645_s1 + $0x184c] ss:$16 sps:$4 sm:$0xff]  }
 0x2cc   :  { %10228 = vmatprep.subr.bf16.mxu0 %v15278_v35  ;;  %11303 = vmatprep.subr.bf16.mxu1 %v15281_v36  ;;  %v15369_v35 = vld [vmem:[%s21645_s1 + $0x1840] ss:$16 sps:$4 sm:$0xff]   ;;  %v15372_v36 = vld [vmem:[%s21645_s1 + $0x1848] ss:$16 sps:$4 sm:$0xff]  }
 0x2cf   :  { %10229 = vmatpush1.bf16.msra.mxu0 %v15276_v37  ;;  %11304 = vmatpush1.bf16.msra.mxu1 %v15279_v38  ;;  %v15377_v37 = vld [vmem:[%s21645_s1 + $0x1864] ss:$16 sps:$4 sm:$0xff]   ;;  %v15380_v38 = vld [vmem:[%s21645_s1 + $0x186c] ss:$16 sps:$4 sm:$0xff]  }
 0x2d0   :  { %10230 = vmatprep.subr.bf16.mxu0 %v15284_v39  ;;  %11305 = vmatprep.subr.bf16.mxu1 %v15287_v40  ;;  %v15375_v39 = vld [vmem:[%s21645_s1 + $0x1860] ss:$16 sps:$4 sm:$0xff]   ;;  %v15378_v40 = vld [vmem:[%s21645_s1 + $0x1868] ss:$16 sps:$4 sm:$0xff]  }
 0x2d3   :  { %10231 = vmatpush1.bf16.msra.mxu0 %v15282_v41  ;;  %11306 = vmatpush1.bf16.msra.mxu1 %v15285_v42  ;;  %v15383_v41 = vld [vmem:[%s21645_s1 + $0x1884] ss:$16 sps:$4 sm:$0xff]   ;;  %v15386_v42 = vld [vmem:[%s21645_s1 + $0x188c] ss:$16 sps:$4 sm:$0xff]  }
 0x2d4   :  { %10232 = vmatprep.subr.bf16.mxu0 %v15290_v43  ;;  %11307 = vmatprep.subr.bf16.mxu1 %v15293_v44  ;;  %v15381_v43 = vld [vmem:[%s21645_s1 + $0x1880] ss:$16 sps:$4 sm:$0xff]   ;;  %v15384_v44 = vld [vmem:[%s21645_s1 + $0x1888] ss:$16 sps:$4 sm:$0xff]  }
 0x2d7   :  { %10233 = vmatpush1.bf16.msra.mxu0 %v15288_v45  ;;  %11308 = vmatpush1.bf16.msra.mxu1 %v15291_v46  ;;  %v15389_v45 = vld [vmem:[%s21645_s1 + $0x18a4] ss:$16 sps:$4 sm:$0xff]   ;;  %v15392_v46 = vld [vmem:[%s21645_s1 + $0x18ac] ss:$16 sps:$4 sm:$0xff]  }
 0x2d8   :  { %10234 = vmatprep.subr.bf16.mxu0 %v15296_v47  ;;  %11309 = vmatprep.subr.bf16.mxu1 %v15299_v48  ;;  %v15387_v47 = vld [vmem:[%s21645_s1 + $0x18a0] ss:$16 sps:$4 sm:$0xff]   ;;  %v15390_v48 = vld [vmem:[%s21645_s1 + $0x18a8] ss:$16 sps:$4 sm:$0xff]  }
 0x2db   :  { %10235 = vmatpush1.bf16.msra.mxu0 %v15294_v49  ;;  %11310 = vmatpush1.bf16.msra.mxu1 %v15297_v50  ;;  %v15395_v49 = vld [vmem:[%s21645_s1 + $0x18c4] ss:$16 sps:$4 sm:$0xff]   ;;  %v15398_v50 = vld [vmem:[%s21645_s1 + $0x18cc] ss:$16 sps:$4 sm:$0xff]  }
 0x2dc   :  { %10236 = vmatprep.subr.bf16.mxu0 %v15302_v51  ;;  %11311 = vmatprep.subr.bf16.mxu1 %v15305_v52  ;;  %v15393_v51 = vld [vmem:[%s21645_s1 + $0x18c0] ss:$16 sps:$4 sm:$0xff]   ;;  %v15396_v52 = vld [vmem:[%s21645_s1 + $0x18c8] ss:$16 sps:$4 sm:$0xff]  }
 0x2df   :  { %10237 = vmatpush1.bf16.msra.mxu0 %v15300_v53  ;;  %11312 = vmatpush1.bf16.msra.mxu1 %v15303_v54  ;;  %v15401_v53 = vld [vmem:[%s21645_s1 + $0x18e4] ss:$16 sps:$4 sm:$0xff]   ;;  %v15404_v54 = vld [vmem:[%s21645_s1 + $0x18ec] ss:$16 sps:$4 sm:$0xff]  }
 0x2e0   :  { %10238 = vmatprep.subr.bf16.mxu0 %v15308_v55  ;;  %11313 = vmatprep.subr.bf16.mxu1 %v15311_v56  ;;  %v15399_v55 = vld [vmem:[%s21645_s1 + $0x18e0] ss:$16 sps:$4 sm:$0xff]   ;;  %v15402_v56 = vld [vmem:[%s21645_s1 + $0x18e8] ss:$16 sps:$4 sm:$0xff]  }
 0x2e3   :  { %10239 = vmatpush1.bf16.msra.mxu0 %v15306_v57  ;;  %11314 = vmatpush1.bf16.msra.mxu1 %v15309_v58  ;;  %v15407_v57 = vld [vmem:[%s21645_s1 + $0x1904] ss:$16 sps:$4 sm:$0xff]   ;;  %v15410_v58 = vld [vmem:[%s21645_s1 + $0x190c] ss:$16 sps:$4 sm:$0xff]  }
 0x2e4   :  { %10240 = vmatprep.subr.bf16.mxu0 %v15314_v59  ;;  %11315 = vmatprep.subr.bf16.mxu1 %v15317_v60  ;;  %v15405_v59 = vld [vmem:[%s21645_s1 + $0x1900] ss:$16 sps:$4 sm:$0xff]   ;;  %v15408_v60 = vld [vmem:[%s21645_s1 + $0x1908] ss:$16 sps:$4 sm:$0xff]  }
 0x2e7   :  { %10241 = vmatpush1.bf16.msra.mxu0 %v15312_v61  ;;  %11316 = vmatpush1.bf16.msra.mxu1 %v15315_v62  ;;  %v15413_v61 = vld [vmem:[%s21645_s1 + $0x1924] ss:$16 sps:$4 sm:$0xff]   ;;  %v15416_v62 = vld [vmem:[%s21645_s1 + $0x192c] ss:$16 sps:$4 sm:$0xff]  }
 0x2e8   :  { %10242 = vmatprep.subr.bf16.mxu0 %v15320_v63  ;;  %11317 = vmatprep.subr.bf16.mxu1 %v15323_v0  ;;  %v15411_v63 = vld [vmem:[%s21645_s1 + $0x1920] ss:$16 sps:$4 sm:$0xff]   ;;  %v15414_v0 = vld [vmem:[%s21645_s1 + $0x1928] ss:$16 sps:$4 sm:$0xff]  }
 0x2eb   :  { %10243 = vmatpush1.bf16.msra.mxu0 %v15318_v1  ;;  %11318 = vmatpush1.bf16.msra.mxu1 %v15321_v2  ;;  %v15419_v1 = vld [vmem:[%s21645_s1 + $0x1944] ss:$16 sps:$4 sm:$0xff]   ;;  %v15422_v2 = vld [vmem:[%s21645_s1 + $0x194c] ss:$16 sps:$4 sm:$0xff]  }
 0x2ec   :  { %10244 = vmatprep.subr.bf16.mxu0 %v15326_v3  ;;  %11319 = vmatprep.subr.bf16.mxu1 %v15329_v4  ;;  %v15417_v3 = vld [vmem:[%s21645_s1 + $0x1940] ss:$16 sps:$4 sm:$0xff]   ;;  %v15420_v4 = vld [vmem:[%s21645_s1 + $0x1948] ss:$16 sps:$4 sm:$0xff]  }
 0x2ef   :  { %10245 = vmatpush1.bf16.msra.mxu0 %v15324_v5  ;;  %11320 = vmatpush1.bf16.msra.mxu1 %v15327_v6  ;;  %v15425_v5 = vld [vmem:[%s21645_s1 + $0x1964] ss:$16 sps:$4 sm:$0xff]   ;;  %v15428_v6 = vld [vmem:[%s21645_s1 + $0x196c] ss:$16 sps:$4 sm:$0xff]  }
 0x2f0   :  { %10246 = vmatprep.subr.bf16.mxu0 %v15332_v7  ;;  %11321 = vmatprep.subr.bf16.mxu1 %v15335_v8  ;;  %v15423_v7 = vld [vmem:[%s21645_s1 + $0x1960] ss:$16 sps:$4 sm:$0xff]   ;;  %v15426_v8 = vld [vmem:[%s21645_s1 + $0x1968] ss:$16 sps:$4 sm:$0xff]  }
 0x2f3   :  { %10247 = vmatpush1.bf16.msra.mxu0 %v15330_v9  ;;  %11322 = vmatpush1.bf16.msra.mxu1 %v15333_v10  ;;  %v15431_v9 = vld [vmem:[%s21645_s1 + $0x1984] ss:$16 sps:$4 sm:$0xff]   ;;  %v15434_v10 = vld [vmem:[%s21645_s1 + $0x198c] ss:$16 sps:$4 sm:$0xff]  }
 0x2f4   :  { %10248 = vmatprep.subr.bf16.mxu0 %v15338_v11  ;;  %11323 = vmatprep.subr.bf16.mxu1 %v15341_v12  ;;  %v15429_v11 = vld [vmem:[%s21645_s1 + $0x1980] ss:$16 sps:$4 sm:$0xff]   ;;  %v15432_v12 = vld [vmem:[%s21645_s1 + $0x1988] ss:$16 sps:$4 sm:$0xff]  }
 0x2f7   :  { %10249 = vmatpush1.bf16.msra.mxu0 %v15336_v13  ;;  %11324 = vmatpush1.bf16.msra.mxu1 %v15339_v14  ;;  %v15437_v13 = vld [vmem:[%s21645_s1 + $0x19a4] ss:$16 sps:$4 sm:$0xff]   ;;  %v15440_v14 = vld [vmem:[%s21645_s1 + $0x19ac] ss:$16 sps:$4 sm:$0xff]  }
 0x2f8   :  { %10250 = vmatprep.subr.bf16.mxu0 %v15344_v15  ;;  %11325 = vmatprep.subr.bf16.mxu1 %v15347_v16  ;;  %v15435_v15 = vld [vmem:[%s21645_s1 + $0x19a0] ss:$16 sps:$4 sm:$0xff]   ;;  %v15438_v16 = vld [vmem:[%s21645_s1 + $0x19a8] ss:$16 sps:$4 sm:$0xff]  }
 0x2fb   :  { %10251 = vmatpush1.bf16.msra.mxu0 %v15342_v17  ;;  %11326 = vmatpush1.bf16.msra.mxu1 %v15345_v18  ;;  %v15443_v17 = vld [vmem:[%s21645_s1 + $0x19c4] ss:$16 sps:$4 sm:$0xff]   ;;  %v15446_v18 = vld [vmem:[%s21645_s1 + $0x19cc] ss:$16 sps:$4 sm:$0xff]  }
 0x2fc   :  { %10252 = vmatprep.subr.bf16.mxu0 %v15350_v19  ;;  %11327 = vmatprep.subr.bf16.mxu1 %v15353_v20  ;;  %v15441_v19 = vld [vmem:[%s21645_s1 + $0x19c0] ss:$16 sps:$4 sm:$0xff]   ;;  %v15444_v20 = vld [vmem:[%s21645_s1 + $0x19c8] ss:$16 sps:$4 sm:$0xff]  }
 0x2ff   :  { %10253 = vmatpush1.bf16.msra.mxu0 %v15348_v21  ;;  %11328 = vmatpush1.bf16.msra.mxu1 %v15351_v22  ;;  %v15449_v21 = vld [vmem:[%s21645_s1 + $0x19e4] ss:$16 sps:$4 sm:$0xff]   ;;  %v15452_v22 = vld [vmem:[%s21645_s1 + $0x19ec] ss:$16 sps:$4 sm:$0xff]  }
 0x300   :  { %10265 = vmatprep.subr.bf16.mxu0 %v15359_v24  ;;  %11340 = vmatprep.subr.bf16.mxu1 %v15362_v25  ;;  %v15450_v24 = vld [vmem:[%s21645_s1 + $0x19e8] ss:$16 sps:$4 sm:$0xff]   ;;  %v15453_v25 = vld [vmem:[%s21646_s0 + $0x60] ss:$196 sps:$4 sm:$0xff]  }
 0x302   :  { %10255 = vmatmul.mubr.bf16.vlgmr.msra.gmra.mrb[0].mxu0 %v15354_v23  ;;  %11330 = vmatmul.mubr.bf16.vlgmr.msra.gmra.mrb[0].mxu1 %v15354_v23  ;;  %v15447_v23 = vld [vmem:[%s21645_s1 + $0x19e0] ss:$16 sps:$4 sm:$0xff]  }
 0x303   :  { %10266 = vmatpush1.bf16.msra.mxu0 %v15357_v26  ;;  %11341 = vmatpush1.bf16.msra.mxu1 %v15360_v27  ;;  %v15458_v26 = vld [vmem:[%s21645_s1 + $0x1a04] ss:$16 sps:$4 sm:$0xff]   ;;  %v15461_v27 = vld [vmem:[%s21645_s1 + $0x1a0c] ss:$16 sps:$4 sm:$0xff]  }
 0x304   :  { %10267 = vmatprep.subr.bf16.mxu0 %v15365_v28  ;;  %11342 = vmatprep.subr.bf16.mxu1 %v15368_v29  ;;  %v15456_v28 = vld [vmem:[%s21645_s1 + $0x1a00] ss:$16 sps:$4 sm:$0xff]   ;;  %v15459_v29 = vld [vmem:[%s21645_s1 + $0x1a08] ss:$16 sps:$4 sm:$0xff]  }
 0x305   :  { %10297 = vmatprep.mubr.bf16.mxu0 %v15455_v30  ;;  %11372 = vmatprep.mubr.bf16.mxu1 %v15455_v30  ;;  %v15464_v30 = vld [vmem:[%s21645_s1 + $0x1a24] ss:$16 sps:$4 sm:$0xff]  }
 0x307   :  { %10268 = vmatpush1.bf16.msra.mxu0 %v15363_v31  ;;  %11343 = vmatpush1.bf16.msra.mxu1 %v15366_v32  ;;  %v15467_v31 = vld [vmem:[%s21645_s1 + $0x1a2c] ss:$16 sps:$4 sm:$0xff]  }
 0x308   :  { %10269 = vmatprep.subr.bf16.mxu0 %v15371_v33  ;;  %11344 = vmatprep.subr.bf16.mxu1 %v15374_v34  ;;  %v15554_v32 = vld [vmem:[%s21646_s0 + $0x6c] ss:$196 sps:$4 sm:$0xff]   ;;  %v15465_v34 = vld [vmem:[%s21645_s1 + $0x1a28] ss:$16 sps:$4 sm:$0xff]  }
 0x309   :  { %v15462_v33 = vld [vmem:[%s21645_s1 + $0x1a20] ss:$16 sps:$4 sm:$0xff]  }
 0x30b   :  { %10270 = vmatpush1.bf16.msra.mxu0 %v15369_v35  ;;  %11345 = vmatpush1.bf16.msra.mxu1 %v15372_v36  ;;  %v15470_v35 = vld [vmem:[%s21645_s1 + $0x1a44] ss:$16 sps:$4 sm:$0xff]   ;;  %v15473_v36 = vld [vmem:[%s21645_s1 + $0x1a4c] ss:$16 sps:$4 sm:$0xff]  }
 0x30c   :  { %10271 = vmatprep.subr.bf16.mxu0 %v15377_v37  ;;  %11346 = vmatprep.subr.bf16.mxu1 %v15380_v38  ;;  %v15468_v37 = vld [vmem:[%s21645_s1 + $0x1a40] ss:$16 sps:$4 sm:$0xff]   ;;  %v15471_v38 = vld [vmem:[%s21645_s1 + $0x1a48] ss:$16 sps:$4 sm:$0xff]  }
 0x30f   :  { %10272 = vmatpush1.bf16.msra.mxu0 %v15375_v39  ;;  %11347 = vmatpush1.bf16.msra.mxu1 %v15378_v40  ;;  %v15476_v39 = vld [vmem:[%s21645_s1 + $0x1a64] ss:$16 sps:$4 sm:$0xff]   ;;  %v15479_v40 = vld [vmem:[%s21645_s1 + $0x1a6c] ss:$16 sps:$4 sm:$0xff]  }
 0x310   :  { %10273 = vmatprep.subr.bf16.mxu0 %v15383_v41  ;;  %11348 = vmatprep.subr.bf16.mxu1 %v15386_v42  ;;  %v15474_v41 = vld [vmem:[%s21645_s1 + $0x1a60] ss:$16 sps:$4 sm:$0xff]   ;;  %v15477_v42 = vld [vmem:[%s21645_s1 + $0x1a68] ss:$16 sps:$4 sm:$0xff]  }
 0x313   :  { %10274 = vmatpush1.bf16.msra.mxu0 %v15381_v43  ;;  %11349 = vmatpush1.bf16.msra.mxu1 %v15384_v44  ;;  %v15482_v43 = vld [vmem:[%s21645_s1 + $0x1a84] ss:$16 sps:$4 sm:$0xff]   ;;  %v15485_v44 = vld [vmem:[%s21645_s1 + $0x1a8c] ss:$16 sps:$4 sm:$0xff]  }
 0x314   :  { %10275 = vmatprep.subr.bf16.mxu0 %v15389_v45  ;;  %11350 = vmatprep.subr.bf16.mxu1 %v15392_v46  ;;  %v15480_v45 = vld [vmem:[%s21645_s1 + $0x1a80] ss:$16 sps:$4 sm:$0xff]   ;;  %v15483_v46 = vld [vmem:[%s21645_s1 + $0x1a88] ss:$16 sps:$4 sm:$0xff]  }
 0x317   :  { %10276 = vmatpush1.bf16.msra.mxu0 %v15387_v47  ;;  %11351 = vmatpush1.bf16.msra.mxu1 %v15390_v48  ;;  %v15488_v47 = vld [vmem:[%s21645_s1 + $0x1aa4] ss:$16 sps:$4 sm:$0xff]   ;;  %v15491_v48 = vld [vmem:[%s21645_s1 + $0x1aac] ss:$16 sps:$4 sm:$0xff]  }
 0x318   :  { %10277 = vmatprep.subr.bf16.mxu0 %v15395_v49  ;;  %11352 = vmatprep.subr.bf16.mxu1 %v15398_v50  ;;  %v15486_v49 = vld [vmem:[%s21645_s1 + $0x1aa0] ss:$16 sps:$4 sm:$0xff]   ;;  %v15489_v50 = vld [vmem:[%s21645_s1 + $0x1aa8] ss:$16 sps:$4 sm:$0xff]  }
 0x31b   :  { %10278 = vmatpush1.bf16.msra.mxu0 %v15393_v51  ;;  %11353 = vmatpush1.bf16.msra.mxu1 %v15396_v52  ;;  %v15494_v51 = vld [vmem:[%s21645_s1 + $0x1ac4] ss:$16 sps:$4 sm:$0xff]   ;;  %v15497_v52 = vld [vmem:[%s21645_s1 + $0x1acc] ss:$16 sps:$4 sm:$0xff]  }
 0x31c   :  { %10279 = vmatprep.subr.bf16.mxu0 %v15401_v53  ;;  %11354 = vmatprep.subr.bf16.mxu1 %v15404_v54  ;;  %v15492_v53 = vld [vmem:[%s21645_s1 + $0x1ac0] ss:$16 sps:$4 sm:$0xff]   ;;  %v15495_v54 = vld [vmem:[%s21645_s1 + $0x1ac8] ss:$16 sps:$4 sm:$0xff]  }
 0x31f   :  { %10280 = vmatpush1.bf16.msra.mxu0 %v15399_v55  ;;  %11355 = vmatpush1.bf16.msra.mxu1 %v15402_v56  ;;  %v15500_v55 = vld [vmem:[%s21645_s1 + $0x1ae4] ss:$16 sps:$4 sm:$0xff]   ;;  %v15503_v56 = vld [vmem:[%s21645_s1 + $0x1aec] ss:$16 sps:$4 sm:$0xff]  }
 0x320   :  { %10281 = vmatprep.subr.bf16.mxu0 %v15407_v57  ;;  %11356 = vmatprep.subr.bf16.mxu1 %v15410_v58  ;;  %v15498_v57 = vld [vmem:[%s21645_s1 + $0x1ae0] ss:$16 sps:$4 sm:$0xff]   ;;  %v15501_v58 = vld [vmem:[%s21645_s1 + $0x1ae8] ss:$16 sps:$4 sm:$0xff]  }
 0x323   :  { %10282 = vmatpush1.bf16.msra.mxu0 %v15405_v59  ;;  %11357 = vmatpush1.bf16.msra.mxu1 %v15408_v60  ;;  %v15506_v59 = vld [vmem:[%s21645_s1 + $0x1b04] ss:$16 sps:$4 sm:$0xff]   ;;  %v15509_v60 = vld [vmem:[%s21645_s1 + $0x1b0c] ss:$16 sps:$4 sm:$0xff]  }
 0x324   :  { %10283 = vmatprep.subr.bf16.mxu0 %v15413_v61  ;;  %11358 = vmatprep.subr.bf16.mxu1 %v15416_v62  ;;  %v15504_v61 = vld [vmem:[%s21645_s1 + $0x1b00] ss:$16 sps:$4 sm:$0xff]   ;;  %v15507_v62 = vld [vmem:[%s21645_s1 + $0x1b08] ss:$16 sps:$4 sm:$0xff]  }
 0x327   :  { %10284 = vmatpush1.bf16.msra.mxu0 %v15411_v63  ;;  %11359 = vmatpush1.bf16.msra.mxu1 %v15414_v0  ;;  %v15512_v63 = vld [vmem:[%s21645_s1 + $0x1b24] ss:$16 sps:$4 sm:$0xff]   ;;  %v15515_v0 = vld [vmem:[%s21645_s1 + $0x1b2c] ss:$16 sps:$4 sm:$0xff]  }
 0x328   :  { %10285 = vmatprep.subr.bf16.mxu0 %v15419_v1  ;;  %11360 = vmatprep.subr.bf16.mxu1 %v15422_v2  ;;  %v15510_v1 = vld [vmem:[%s21645_s1 + $0x1b20] ss:$16 sps:$4 sm:$0xff]   ;;  %v15513_v2 = vld [vmem:[%s21645_s1 + $0x1b28] ss:$16 sps:$4 sm:$0xff]  }
 0x32b   :  { %10286 = vmatpush1.bf16.msra.mxu0 %v15417_v3  ;;  %11361 = vmatpush1.bf16.msra.mxu1 %v15420_v4  ;;  %v15518_v3 = vld [vmem:[%s21645_s1 + $0x1b44] ss:$16 sps:$4 sm:$0xff]   ;;  %v15521_v4 = vld [vmem:[%s21645_s1 + $0x1b4c] ss:$16 sps:$4 sm:$0xff]  }
 0x32c   :  { %10287 = vmatprep.subr.bf16.mxu0 %v15425_v5  ;;  %11362 = vmatprep.subr.bf16.mxu1 %v15428_v6  ;;  %v15516_v5 = vld [vmem:[%s21645_s1 + $0x1b40] ss:$16 sps:$4 sm:$0xff]   ;;  %v15519_v6 = vld [vmem:[%s21645_s1 + $0x1b48] ss:$16 sps:$4 sm:$0xff]  }
 0x32f   :  { %10288 = vmatpush1.bf16.msra.mxu0 %v15423_v7  ;;  %11363 = vmatpush1.bf16.msra.mxu1 %v15426_v8  ;;  %v15524_v7 = vld [vmem:[%s21645_s1 + $0x1b64] ss:$16 sps:$4 sm:$0xff]   ;;  %v15527_v8 = vld [vmem:[%s21645_s1 + $0x1b6c] ss:$16 sps:$4 sm:$0xff]  }
 0x330   :  { %10289 = vmatprep.subr.bf16.mxu0 %v15431_v9  ;;  %11364 = vmatprep.subr.bf16.mxu1 %v15434_v10  ;;  %v15522_v9 = vld [vmem:[%s21645_s1 + $0x1b60] ss:$16 sps:$4 sm:$0xff]   ;;  %v15525_v10 = vld [vmem:[%s21645_s1 + $0x1b68] ss:$16 sps:$4 sm:$0xff]  }
 0x333   :  { %10290 = vmatpush1.bf16.msra.mxu0 %v15429_v11  ;;  %11365 = vmatpush1.bf16.msra.mxu1 %v15432_v12  ;;  %v15530_v11 = vld [vmem:[%s21645_s1 + $0x1b84] ss:$16 sps:$4 sm:$0xff]   ;;  %v15533_v12 = vld [vmem:[%s21645_s1 + $0x1b8c] ss:$16 sps:$4 sm:$0xff]  }
 0x334   :  { %10291 = vmatprep.subr.bf16.mxu0 %v15437_v13  ;;  %11366 = vmatprep.subr.bf16.mxu1 %v15440_v14  ;;  %v15528_v13 = vld [vmem:[%s21645_s1 + $0x1b80] ss:$16 sps:$4 sm:$0xff]   ;;  %v15531_v14 = vld [vmem:[%s21645_s1 + $0x1b88] ss:$16 sps:$4 sm:$0xff]  }
 0x337   :  { %10292 = vmatpush1.bf16.msra.mxu0 %v15435_v15  ;;  %11367 = vmatpush1.bf16.msra.mxu1 %v15438_v16  ;;  %v15536_v15 = vld [vmem:[%s21645_s1 + $0x1ba4] ss:$16 sps:$4 sm:$0xff]   ;;  %v15539_v16 = vld [vmem:[%s21645_s1 + $0x1bac] ss:$16 sps:$4 sm:$0xff]  }
 0x338   :  { %10293 = vmatprep.subr.bf16.mxu0 %v15443_v17  ;;  %11368 = vmatprep.subr.bf16.mxu1 %v15446_v18  ;;  %v15534_v17 = vld [vmem:[%s21645_s1 + $0x1ba0] ss:$16 sps:$4 sm:$0xff]   ;;  %v15537_v18 = vld [vmem:[%s21645_s1 + $0x1ba8] ss:$16 sps:$4 sm:$0xff]  }
 0x33b   :  { %10294 = vmatpush1.bf16.msra.mxu0 %v15441_v19  ;;  %11369 = vmatpush1.bf16.msra.mxu1 %v15444_v20  ;;  %v15542_v19 = vld [vmem:[%s21645_s1 + $0x1bc4] ss:$16 sps:$4 sm:$0xff]   ;;  %v15545_v20 = vld [vmem:[%s21645_s1 + $0x1bcc] ss:$16 sps:$4 sm:$0xff]  }
 0x33c   :  { %10295 = vmatprep.subr.bf16.mxu0 %v15449_v21  ;;  %11370 = vmatprep.subr.bf16.mxu1 %v15452_v22  ;;  %v15540_v21 = vld [vmem:[%s21645_s1 + $0x1bc0] ss:$16 sps:$4 sm:$0xff]   ;;  %v15543_v22 = vld [vmem:[%s21645_s1 + $0x1bc8] ss:$16 sps:$4 sm:$0xff]  }
 0x33f   :  { %10296 = vmatpush1.bf16.msra.mxu0 %v15447_v23  ;;  %11371 = vmatpush1.bf16.msra.mxu1 %v15450_v24  ;;  %v15548_v23 = vld [vmem:[%s21645_s1 + $0x1be4] ss:$16 sps:$4 sm:$0xff]   ;;  %v15551_v24 = vld [vmem:[%s21645_s1 + $0x1bec] ss:$16 sps:$4 sm:$0xff]  }
 0x340   :  { %10308 = vmatprep.subr.bf16.mxu0 %v15458_v26  ;;  %11383 = vmatprep.subr.bf16.mxu1 %v15461_v27  ;;  %v15549_v26 = vld [vmem:[%s21645_s1 + $0x1be8] ss:$16 sps:$4 sm:$0xff]   ;;  %v15557_v27 = vld [vmem:[%s21645_s1 + $0x1c04] ss:$16 sps:$4 sm:$0xff]  }
 0x342   :  { %10298 = vmatmul.mubr.bf16.vlgmr.msra.gmra.mrb[0].mxu0 %v15453_v25  ;;  %11373 = vmatmul.mubr.bf16.vlgmr.msra.gmra.mrb[0].mxu1 %v15453_v25  ;;  %v15546_v25 = vld [vmem:[%s21645_s1 + $0x1be0] ss:$16 sps:$4 sm:$0xff]  }
 0x343   :  { %10309 = vmatpush1.bf16.msra.mxu0 %v15456_v28  ;;  %11384 = vmatpush1.bf16.msra.mxu1 %v15459_v29  ;;  %v15560_v28 = vld [vmem:[%s21645_s1 + $0x1c0c] ss:$16 sps:$4 sm:$0xff]  }
 0x344   :  { %10310 = vmatprep.subr.bf16.mxu0 %v15464_v30  ;;  %11385 = vmatprep.subr.bf16.mxu1 %v15467_v31  ;;  %v15552_v29 = vld [vmem:[%s21646_s0 + $0x68] ss:$196 sps:$4 sm:$0xff]   ;;  %v15555_v30 = vld [vmem:[%s21645_s1 + $0x1c00] ss:$16 sps:$4 sm:$0xff]  }
 0x345   :  { %10340 = vmatprep.mubr.bf16.mxu0 %v15554_v32  ;;  %11415 = vmatprep.mubr.bf16.mxu1 %v15554_v32  ;;  %v15558_v31 = vld [vmem:[%s21645_s1 + $0x1c08] ss:$16 sps:$4 sm:$0xff]   ;;  %v15563_v32 = vld [vmem:[%s21645_s1 + $0x1c24] ss:$16 sps:$4 sm:$0xff]  }
 0x347   :  { %10311 = vmatpush1.bf16.msra.mxu0 %v15462_v33  ;;  %11386 = vmatpush1.bf16.msra.mxu1 %v15465_v34  ;;  %v15566_v33 = vld [vmem:[%s21645_s1 + $0x1c2c] ss:$16 sps:$4 sm:$0xff]   ;;  %v15653_v34 = vld [vmem:[%s21646_s0 + $0x74] ss:$196 sps:$4 sm:$0xff]  }
 0x348   :  { %10312 = vmatprep.subr.bf16.mxu0 %v15470_v35  ;;  %11387 = vmatprep.subr.bf16.mxu1 %v15473_v36  ;;  %v15561_v35 = vld [vmem:[%s21645_s1 + $0x1c20] ss:$16 sps:$4 sm:$0xff]   ;;  %v15564_v36 = vld [vmem:[%s21645_s1 + $0x1c28] ss:$16 sps:$4 sm:$0xff]  }
 0x34b   :  { %10313 = vmatpush1.bf16.msra.mxu0 %v15468_v37  ;;  %11388 = vmatpush1.bf16.msra.mxu1 %v15471_v38  ;;  %v15569_v37 = vld [vmem:[%s21645_s1 + $0x1c44] ss:$16 sps:$4 sm:$0xff]   ;;  %v15572_v38 = vld [vmem:[%s21645_s1 + $0x1c4c] ss:$16 sps:$4 sm:$0xff]  }
 0x34c   :  { %10314 = vmatprep.subr.bf16.mxu0 %v15476_v39  ;;  %11389 = vmatprep.subr.bf16.mxu1 %v15479_v40  ;;  %v15567_v39 = vld [vmem:[%s21645_s1 + $0x1c40] ss:$16 sps:$4 sm:$0xff]   ;;  %v15570_v40 = vld [vmem:[%s21645_s1 + $0x1c48] ss:$16 sps:$4 sm:$0xff]  }
 0x34f   :  { %10315 = vmatpush1.bf16.msra.mxu0 %v15474_v41  ;;  %11390 = vmatpush1.bf16.msra.mxu1 %v15477_v42  ;;  %v15575_v41 = vld [vmem:[%s21645_s1 + $0x1c64] ss:$16 sps:$4 sm:$0xff]   ;;  %v15578_v42 = vld [vmem:[%s21645_s1 + $0x1c6c] ss:$16 sps:$4 sm:$0xff]  }
 0x350   :  { %10316 = vmatprep.subr.bf16.mxu0 %v15482_v43  ;;  %11391 = vmatprep.subr.bf16.mxu1 %v15485_v44  ;;  %v15573_v43 = vld [vmem:[%s21645_s1 + $0x1c60] ss:$16 sps:$4 sm:$0xff]   ;;  %v15576_v44 = vld [vmem:[%s21645_s1 + $0x1c68] ss:$16 sps:$4 sm:$0xff]  }
 0x353   :  { %10317 = vmatpush1.bf16.msra.mxu0 %v15480_v45  ;;  %11392 = vmatpush1.bf16.msra.mxu1 %v15483_v46  ;;  %v15581_v45 = vld [vmem:[%s21645_s1 + $0x1c84] ss:$16 sps:$4 sm:$0xff]   ;;  %v15584_v46 = vld [vmem:[%s21645_s1 + $0x1c8c] ss:$16 sps:$4 sm:$0xff]  }
 0x354   :  { %10318 = vmatprep.subr.bf16.mxu0 %v15488_v47  ;;  %11393 = vmatprep.subr.bf16.mxu1 %v15491_v48  ;;  %v15579_v47 = vld [vmem:[%s21645_s1 + $0x1c80] ss:$16 sps:$4 sm:$0xff]   ;;  %v15582_v48 = vld [vmem:[%s21645_s1 + $0x1c88] ss:$16 sps:$4 sm:$0xff]  }
 0x357   :  { %10319 = vmatpush1.bf16.msra.mxu0 %v15486_v49  ;;  %11394 = vmatpush1.bf16.msra.mxu1 %v15489_v50  ;;  %v15587_v49 = vld [vmem:[%s21645_s1 + $0x1ca4] ss:$16 sps:$4 sm:$0xff]   ;;  %v15590_v50 = vld [vmem:[%s21645_s1 + $0x1cac] ss:$16 sps:$4 sm:$0xff]  }
 0x358   :  { %10320 = vmatprep.subr.bf16.mxu0 %v15494_v51  ;;  %11395 = vmatprep.subr.bf16.mxu1 %v15497_v52  ;;  %v15585_v51 = vld [vmem:[%s21645_s1 + $0x1ca0] ss:$16 sps:$4 sm:$0xff]   ;;  %v15588_v52 = vld [vmem:[%s21645_s1 + $0x1ca8] ss:$16 sps:$4 sm:$0xff]  }
 0x35b   :  { %10321 = vmatpush1.bf16.msra.mxu0 %v15492_v53  ;;  %11396 = vmatpush1.bf16.msra.mxu1 %v15495_v54  ;;  %v15593_v53 = vld [vmem:[%s21645_s1 + $0x1cc4] ss:$16 sps:$4 sm:$0xff]   ;;  %v15596_v54 = vld [vmem:[%s21645_s1 + $0x1ccc] ss:$16 sps:$4 sm:$0xff]  }
 0x35c   :  { %10322 = vmatprep.subr.bf16.mxu0 %v15500_v55  ;;  %11397 = vmatprep.subr.bf16.mxu1 %v15503_v56  ;;  %v15591_v55 = vld [vmem:[%s21645_s1 + $0x1cc0] ss:$16 sps:$4 sm:$0xff]   ;;  %v15594_v56 = vld [vmem:[%s21645_s1 + $0x1cc8] ss:$16 sps:$4 sm:$0xff]  }
 0x35f   :  { %10323 = vmatpush1.bf16.msra.mxu0 %v15498_v57  ;;  %11398 = vmatpush1.bf16.msra.mxu1 %v15501_v58  ;;  %v15599_v57 = vld [vmem:[%s21645_s1 + $0x1ce4] ss:$16 sps:$4 sm:$0xff]   ;;  %v15602_v58 = vld [vmem:[%s21645_s1 + $0x1cec] ss:$16 sps:$4 sm:$0xff]  }
 0x360   :  { %10324 = vmatprep.subr.bf16.mxu0 %v15506_v59  ;;  %11399 = vmatprep.subr.bf16.mxu1 %v15509_v60  ;;  %v15597_v59 = vld [vmem:[%s21645_s1 + $0x1ce0] ss:$16 sps:$4 sm:$0xff]   ;;  %v15600_v60 = vld [vmem:[%s21645_s1 + $0x1ce8] ss:$16 sps:$4 sm:$0xff]  }
 0x363   :  { %10325 = vmatpush1.bf16.msra.mxu0 %v15504_v61  ;;  %11400 = vmatpush1.bf16.msra.mxu1 %v15507_v62  ;;  %v15605_v61 = vld [vmem:[%s21645_s1 + $0x1d04] ss:$16 sps:$4 sm:$0xff]   ;;  %v15608_v62 = vld [vmem:[%s21645_s1 + $0x1d0c] ss:$16 sps:$4 sm:$0xff]  }
 0x364   :  { %10326 = vmatprep.subr.bf16.mxu0 %v15512_v63  ;;  %11401 = vmatprep.subr.bf16.mxu1 %v15515_v0  ;;  %v15603_v63 = vld [vmem:[%s21645_s1 + $0x1d00] ss:$16 sps:$4 sm:$0xff]   ;;  %v15606_v0 = vld [vmem:[%s21645_s1 + $0x1d08] ss:$16 sps:$4 sm:$0xff]  }
 0x367   :  { %10327 = vmatpush1.bf16.msra.mxu0 %v15510_v1  ;;  %11402 = vmatpush1.bf16.msra.mxu1 %v15513_v2  ;;  %v15611_v1 = vld [vmem:[%s21645_s1 + $0x1d24] ss:$16 sps:$4 sm:$0xff]   ;;  %v15614_v2 = vld [vmem:[%s21645_s1 + $0x1d2c] ss:$16 sps:$4 sm:$0xff]  }
 0x368   :  { %10328 = vmatprep.subr.bf16.mxu0 %v15518_v3  ;;  %11403 = vmatprep.subr.bf16.mxu1 %v15521_v4  ;;  %v15609_v3 = vld [vmem:[%s21645_s1 + $0x1d20] ss:$16 sps:$4 sm:$0xff]   ;;  %v15612_v4 = vld [vmem:[%s21645_s1 + $0x1d28] ss:$16 sps:$4 sm:$0xff]  }
 0x36b   :  { %10329 = vmatpush1.bf16.msra.mxu0 %v15516_v5  ;;  %11404 = vmatpush1.bf16.msra.mxu1 %v15519_v6  ;;  %v15617_v5 = vld [vmem:[%s21645_s1 + $0x1d44] ss:$16 sps:$4 sm:$0xff]   ;;  %v15620_v6 = vld [vmem:[%s21645_s1 + $0x1d4c] ss:$16 sps:$4 sm:$0xff]  }
 0x36c   :  { %10330 = vmatprep.subr.bf16.mxu0 %v15524_v7  ;;  %11405 = vmatprep.subr.bf16.mxu1 %v15527_v8  ;;  %v15615_v7 = vld [vmem:[%s21645_s1 + $0x1d40] ss:$16 sps:$4 sm:$0xff]   ;;  %v15618_v8 = vld [vmem:[%s21645_s1 + $0x1d48] ss:$16 sps:$4 sm:$0xff]  }
 0x36f   :  { %10331 = vmatpush1.bf16.msra.mxu0 %v15522_v9  ;;  %11406 = vmatpush1.bf16.msra.mxu1 %v15525_v10  ;;  %v15623_v9 = vld [vmem:[%s21645_s1 + $0x1d64] ss:$16 sps:$4 sm:$0xff]   ;;  %v15626_v10 = vld [vmem:[%s21645_s1 + $0x1d6c] ss:$16 sps:$4 sm:$0xff]  }
 0x370   :  { %10332 = vmatprep.subr.bf16.mxu0 %v15530_v11  ;;  %11407 = vmatprep.subr.bf16.mxu1 %v15533_v12  ;;  %v15621_v11 = vld [vmem:[%s21645_s1 + $0x1d60] ss:$16 sps:$4 sm:$0xff]   ;;  %v15624_v12 = vld [vmem:[%s21645_s1 + $0x1d68] ss:$16 sps:$4 sm:$0xff]  }
 0x373   :  { %10333 = vmatpush1.bf16.msra.mxu0 %v15528_v13  ;;  %11408 = vmatpush1.bf16.msra.mxu1 %v15531_v14  ;;  %v15629_v13 = vld [vmem:[%s21645_s1 + $0x1d84] ss:$16 sps:$4 sm:$0xff]   ;;  %v15632_v14 = vld [vmem:[%s21645_s1 + $0x1d8c] ss:$16 sps:$4 sm:$0xff]  }
 0x374   :  { %10334 = vmatprep.subr.bf16.mxu0 %v15536_v15  ;;  %11409 = vmatprep.subr.bf16.mxu1 %v15539_v16  ;;  %v15627_v15 = vld [vmem:[%s21645_s1 + $0x1d80] ss:$16 sps:$4 sm:$0xff]   ;;  %v15630_v16 = vld [vmem:[%s21645_s1 + $0x1d88] ss:$16 sps:$4 sm:$0xff]  }
 0x377   :  { %10335 = vmatpush1.bf16.msra.mxu0 %v15534_v17  ;;  %11410 = vmatpush1.bf16.msra.mxu1 %v15537_v18  ;;  %v15635_v17 = vld [vmem:[%s21645_s1 + $0x1da4] ss:$16 sps:$4 sm:$0xff]   ;;  %v15638_v18 = vld [vmem:[%s21645_s1 + $0x1dac] ss:$16 sps:$4 sm:$0xff]  }
 0x378   :  { %10336 = vmatprep.subr.bf16.mxu0 %v15542_v19  ;;  %11411 = vmatprep.subr.bf16.mxu1 %v15545_v20  ;;  %v15633_v19 = vld [vmem:[%s21645_s1 + $0x1da0] ss:$16 sps:$4 sm:$0xff]   ;;  %v15636_v20 = vld [vmem:[%s21645_s1 + $0x1da8] ss:$16 sps:$4 sm:$0xff]  }
 0x37b   :  { %10337 = vmatpush1.bf16.msra.mxu0 %v15540_v21  ;;  %11412 = vmatpush1.bf16.msra.mxu1 %v15543_v22  ;;  %v15641_v21 = vld [vmem:[%s21645_s1 + $0x1dc4] ss:$16 sps:$4 sm:$0xff]   ;;  %v15644_v22 = vld [vmem:[%s21645_s1 + $0x1dcc] ss:$16 sps:$4 sm:$0xff]  }
 0x37c   :  { %10338 = vmatprep.subr.bf16.mxu0 %v15548_v23  ;;  %11413 = vmatprep.subr.bf16.mxu1 %v15551_v24  ;;  %v15639_v23 = vld [vmem:[%s21645_s1 + $0x1dc0] ss:$16 sps:$4 sm:$0xff]   ;;  %v15642_v24 = vld [vmem:[%s21645_s1 + $0x1dc8] ss:$16 sps:$4 sm:$0xff]  }
 0x37f   :  { %10339 = vmatpush1.bf16.msra.mxu0 %v15546_v25  ;;  %11414 = vmatpush1.bf16.msra.mxu1 %v15549_v26  ;;  %v15647_v25 = vld [vmem:[%s21645_s1 + $0x1de4] ss:$16 sps:$4 sm:$0xff]   ;;  %v15650_v26 = vld [vmem:[%s21645_s1 + $0x1dec] ss:$16 sps:$4 sm:$0xff]  }
 0x380   :  { %10351 = vmatprep.subr.bf16.mxu0 %v15557_v27  ;;  %11426 = vmatprep.subr.bf16.mxu1 %v15560_v28  ;;  %v15645_v27 = vld [vmem:[%s21645_s1 + $0x1de0] ss:$16 sps:$4 sm:$0xff]   ;;  %v15648_v28 = vld [vmem:[%s21645_s1 + $0x1de8] ss:$16 sps:$4 sm:$0xff]  }
 0x382   :  { %10341 = vmatmul.mubr.bf16.vlgmr.msra.gmra.mrb[0].mxu0 %v15552_v29  ;;  %11416 = vmatmul.mubr.bf16.vlgmr.msra.gmra.mrb[0].mxu1 %v15552_v29  ;;  %v15656_v29 = vld [vmem:[%s21645_s1 + $0x1e04] ss:$16 sps:$4 sm:$0xff]  }
 0x383   :  { %10352 = vmatpush1.bf16.msra.mxu0 %v15555_v30  ;;  %11427 = vmatpush1.bf16.msra.mxu1 %v15558_v31  ;;  %v15659_v30 = vld [vmem:[%s21645_s1 + $0x1e0c] ss:$16 sps:$4 sm:$0xff]   ;;  %v15651_v31 = vld [vmem:[%s21646_s0 + $0x70] ss:$196 sps:$4 sm:$0xff]  }
 0x384   :  { %10353 = vmatprep.subr.bf16.mxu0 %v15563_v32  ;;  %11428 = vmatprep.subr.bf16.mxu1 %v15566_v33  ;;  %v15654_v32 = vld [vmem:[%s21645_s1 + $0x1e00] ss:$16 sps:$4 sm:$0xff]   ;;  %v15657_v33 = vld [vmem:[%s21645_s1 + $0x1e08] ss:$16 sps:$4 sm:$0xff]  }
 0x385   :  { %10383 = vmatprep.mubr.bf16.mxu0 %v15653_v34  ;;  %11458 = vmatprep.mubr.bf16.mxu1 %v15653_v34  ;;  %v15662_v34 = vld [vmem:[%s21645_s1 + $0x1e24] ss:$16 sps:$4 sm:$0xff]  }
 0x387   :  { %10354 = vmatpush1.bf16.msra.mxu0 %v15561_v35  ;;  %11429 = vmatpush1.bf16.msra.mxu1 %v15564_v36  ;;  %v15665_v35 = vld [vmem:[%s21645_s1 + $0x1e2c] ss:$16 sps:$4 sm:$0xff]  }
 0x388   :  { %10355 = vmatprep.subr.bf16.mxu0 %v15569_v37  ;;  %11430 = vmatprep.subr.bf16.mxu1 %v15572_v38  ;;  %v15752_v36 = vld [vmem:[%s21646_s0 + $0x7c] ss:$196 sps:$4 sm:$0xff]   ;;  %v15663_v38 = vld [vmem:[%s21645_s1 + $0x1e28] ss:$16 sps:$4 sm:$0xff]  }
 0x389   :  { %v15660_v37 = vld [vmem:[%s21645_s1 + $0x1e20] ss:$16 sps:$4 sm:$0xff]  }
 0x38b   :  { %10356 = vmatpush1.bf16.msra.mxu0 %v15567_v39  ;;  %11431 = vmatpush1.bf16.msra.mxu1 %v15570_v40  ;;  %v15668_v39 = vld [vmem:[%s21645_s1 + $0x1e44] ss:$16 sps:$4 sm:$0xff]   ;;  %v15671_v40 = vld [vmem:[%s21645_s1 + $0x1e4c] ss:$16 sps:$4 sm:$0xff]  }
 0x38c   :  { %10357 = vmatprep.subr.bf16.mxu0 %v15575_v41  ;;  %11432 = vmatprep.subr.bf16.mxu1 %v15578_v42  ;;  %v15666_v41 = vld [vmem:[%s21645_s1 + $0x1e40] ss:$16 sps:$4 sm:$0xff]   ;;  %v15669_v42 = vld [vmem:[%s21645_s1 + $0x1e48] ss:$16 sps:$4 sm:$0xff]  }
 0x38f   :  { %10358 = vmatpush1.bf16.msra.mxu0 %v15573_v43  ;;  %11433 = vmatpush1.bf16.msra.mxu1 %v15576_v44  ;;  %v15674_v43 = vld [vmem:[%s21645_s1 + $0x1e64] ss:$16 sps:$4 sm:$0xff]   ;;  %v15677_v44 = vld [vmem:[%s21645_s1 + $0x1e6c] ss:$16 sps:$4 sm:$0xff]  }
 0x390   :  { %10359 = vmatprep.subr.bf16.mxu0 %v15581_v45  ;;  %11434 = vmatprep.subr.bf16.mxu1 %v15584_v46  ;;  %v15672_v45 = vld [vmem:[%s21645_s1 + $0x1e60] ss:$16 sps:$4 sm:$0xff]   ;;  %v15675_v46 = vld [vmem:[%s21645_s1 + $0x1e68] ss:$16 sps:$4 sm:$0xff]  }
 0x393   :  { %10360 = vmatpush1.bf16.msra.mxu0 %v15579_v47  ;;  %11435 = vmatpush1.bf16.msra.mxu1 %v15582_v48  ;;  %v15680_v47 = vld [vmem:[%s21645_s1 + $0x1e84] ss:$16 sps:$4 sm:$0xff]   ;;  %v15683_v48 = vld [vmem:[%s21645_s1 + $0x1e8c] ss:$16 sps:$4 sm:$0xff]  }
 0x394   :  { %10361 = vmatprep.subr.bf16.mxu0 %v15587_v49  ;;  %11436 = vmatprep.subr.bf16.mxu1 %v15590_v50  ;;  %v15678_v49 = vld [vmem:[%s21645_s1 + $0x1e80] ss:$16 sps:$4 sm:$0xff]   ;;  %v15681_v50 = vld [vmem:[%s21645_s1 + $0x1e88] ss:$16 sps:$4 sm:$0xff]  }
 0x397   :  { %10362 = vmatpush1.bf16.msra.mxu0 %v15585_v51  ;;  %11437 = vmatpush1.bf16.msra.mxu1 %v15588_v52  ;;  %v15686_v51 = vld [vmem:[%s21645_s1 + $0x1ea4] ss:$16 sps:$4 sm:$0xff]   ;;  %v15689_v52 = vld [vmem:[%s21645_s1 + $0x1eac] ss:$16 sps:$4 sm:$0xff]  }
 0x398   :  { %10363 = vmatprep.subr.bf16.mxu0 %v15593_v53  ;;  %11438 = vmatprep.subr.bf16.mxu1 %v15596_v54  ;;  %v15684_v53 = vld [vmem:[%s21645_s1 + $0x1ea0] ss:$16 sps:$4 sm:$0xff]   ;;  %v15687_v54 = vld [vmem:[%s21645_s1 + $0x1ea8] ss:$16 sps:$4 sm:$0xff]  }
 0x39b   :  { %10364 = vmatpush1.bf16.msra.mxu0 %v15591_v55  ;;  %11439 = vmatpush1.bf16.msra.mxu1 %v15594_v56  ;;  %v15692_v55 = vld [vmem:[%s21645_s1 + $0x1ec4] ss:$16 sps:$4 sm:$0xff]   ;;  %v15695_v56 = vld [vmem:[%s21645_s1 + $0x1ecc] ss:$16 sps:$4 sm:$0xff]  }
 0x39c   :  { %10365 = vmatprep.subr.bf16.mxu0 %v15599_v57  ;;  %11440 = vmatprep.subr.bf16.mxu1 %v15602_v58  ;;  %v15690_v57 = vld [vmem:[%s21645_s1 + $0x1ec0] ss:$16 sps:$4 sm:$0xff]   ;;  %v15693_v58 = vld [vmem:[%s21645_s1 + $0x1ec8] ss:$16 sps:$4 sm:$0xff]  }
 0x39f   :  { %10366 = vmatpush1.bf16.msra.mxu0 %v15597_v59  ;;  %11441 = vmatpush1.bf16.msra.mxu1 %v15600_v60  ;;  %v15698_v59 = vld [vmem:[%s21645_s1 + $0x1ee4] ss:$16 sps:$4 sm:$0xff]   ;;  %v15701_v60 = vld [vmem:[%s21645_s1 + $0x1eec] ss:$16 sps:$4 sm:$0xff]  }
 0x3a0   :  { %10367 = vmatprep.subr.bf16.mxu0 %v15605_v61  ;;  %11442 = vmatprep.subr.bf16.mxu1 %v15608_v62  ;;  %v15696_v61 = vld [vmem:[%s21645_s1 + $0x1ee0] ss:$16 sps:$4 sm:$0xff]   ;;  %v15699_v62 = vld [vmem:[%s21645_s1 + $0x1ee8] ss:$16 sps:$4 sm:$0xff]  }
 0x3a3   :  { %10368 = vmatpush1.bf16.msra.mxu0 %v15603_v63  ;;  %11443 = vmatpush1.bf16.msra.mxu1 %v15606_v0  ;;  %v15704_v63 = vld [vmem:[%s21645_s1 + $0x1f04] ss:$16 sps:$4 sm:$0xff]   ;;  %v15707_v0 = vld [vmem:[%s21645_s1 + $0x1f0c] ss:$16 sps:$4 sm:$0xff]  }
 0x3a4   :  { %10369 = vmatprep.subr.bf16.mxu0 %v15611_v1  ;;  %11444 = vmatprep.subr.bf16.mxu1 %v15614_v2  ;;  %v15702_v1 = vld [vmem:[%s21645_s1 + $0x1f00] ss:$16 sps:$4 sm:$0xff]   ;;  %v15705_v2 = vld [vmem:[%s21645_s1 + $0x1f08] ss:$16 sps:$4 sm:$0xff]  }
 0x3a7   :  { %10370 = vmatpush1.bf16.msra.mxu0 %v15609_v3  ;;  %11445 = vmatpush1.bf16.msra.mxu1 %v15612_v4  ;;  %v15710_v3 = vld [vmem:[%s21645_s1 + $0x1f24] ss:$16 sps:$4 sm:$0xff]   ;;  %v15713_v4 = vld [vmem:[%s21645_s1 + $0x1f2c] ss:$16 sps:$4 sm:$0xff]  }
 0x3a8   :  { %10371 = vmatprep.subr.bf16.mxu0 %v15617_v5  ;;  %11446 = vmatprep.subr.bf16.mxu1 %v15620_v6  ;;  %v15708_v5 = vld [vmem:[%s21645_s1 + $0x1f20] ss:$16 sps:$4 sm:$0xff]   ;;  %v15711_v6 = vld [vmem:[%s21645_s1 + $0x1f28] ss:$16 sps:$4 sm:$0xff]  }
 0x3ab   :  { %10372 = vmatpush1.bf16.msra.mxu0 %v15615_v7  ;;  %11447 = vmatpush1.bf16.msra.mxu1 %v15618_v8  ;;  %v15716_v7 = vld [vmem:[%s21645_s1 + $0x1f44] ss:$16 sps:$4 sm:$0xff]   ;;  %v15719_v8 = vld [vmem:[%s21645_s1 + $0x1f4c] ss:$16 sps:$4 sm:$0xff]  }
 0x3ac   :  { %10373 = vmatprep.subr.bf16.mxu0 %v15623_v9  ;;  %11448 = vmatprep.subr.bf16.mxu1 %v15626_v10  ;;  %v15714_v9 = vld [vmem:[%s21645_s1 + $0x1f40] ss:$16 sps:$4 sm:$0xff]   ;;  %v15717_v10 = vld [vmem:[%s21645_s1 + $0x1f48] ss:$16 sps:$4 sm:$0xff]  }
 0x3af   :  { %10374 = vmatpush1.bf16.msra.mxu0 %v15621_v11  ;;  %11449 = vmatpush1.bf16.msra.mxu1 %v15624_v12  ;;  %v15722_v11 = vld [vmem:[%s21645_s1 + $0x1f64] ss:$16 sps:$4 sm:$0xff]   ;;  %v15725_v12 = vld [vmem:[%s21645_s1 + $0x1f6c] ss:$16 sps:$4 sm:$0xff]  }
 0x3b0   :  { %10375 = vmatprep.subr.bf16.mxu0 %v15629_v13  ;;  %11450 = vmatprep.subr.bf16.mxu1 %v15632_v14  ;;  %v15720_v13 = vld [vmem:[%s21645_s1 + $0x1f60] ss:$16 sps:$4 sm:$0xff]   ;;  %v15723_v14 = vld [vmem:[%s21645_s1 + $0x1f68] ss:$16 sps:$4 sm:$0xff]  }
 0x3b3   :  { %10376 = vmatpush1.bf16.msra.mxu0 %v15627_v15  ;;  %11451 = vmatpush1.bf16.msra.mxu1 %v15630_v16  ;;  %v15728_v15 = vld [vmem:[%s21645_s1 + $0x1f84] ss:$16 sps:$4 sm:$0xff]   ;;  %v15731_v16 = vld [vmem:[%s21645_s1 + $0x1f8c] ss:$16 sps:$4 sm:$0xff]  }
 0x3b4   :  { %10377 = vmatprep.subr.bf16.mxu0 %v15635_v17  ;;  %11452 = vmatprep.subr.bf16.mxu1 %v15638_v18  ;;  %v15726_v17 = vld [vmem:[%s21645_s1 + $0x1f80] ss:$16 sps:$4 sm:$0xff]   ;;  %v15729_v18 = vld [vmem:[%s21645_s1 + $0x1f88] ss:$16 sps:$4 sm:$0xff]  }
 0x3b7   :  { %10378 = vmatpush1.bf16.msra.mxu0 %v15633_v19  ;;  %11453 = vmatpush1.bf16.msra.mxu1 %v15636_v20  ;;  %v15734_v19 = vld [vmem:[%s21645_s1 + $0x1fa4] ss:$16 sps:$4 sm:$0xff]   ;;  %v15737_v20 = vld [vmem:[%s21645_s1 + $0x1fac] ss:$16 sps:$4 sm:$0xff]  }
 0x3b8   :  { %10379 = vmatprep.subr.bf16.mxu0 %v15641_v21  ;;  %11454 = vmatprep.subr.bf16.mxu1 %v15644_v22  ;;  %v15732_v21 = vld [vmem:[%s21645_s1 + $0x1fa0] ss:$16 sps:$4 sm:$0xff]   ;;  %v15735_v22 = vld [vmem:[%s21645_s1 + $0x1fa8] ss:$16 sps:$4 sm:$0xff]  }
 0x3bb   :  { %10380 = vmatpush1.bf16.msra.mxu0 %v15639_v23  ;;  %11455 = vmatpush1.bf16.msra.mxu1 %v15642_v24  ;;  %v15740_v23 = vld [vmem:[%s21645_s1 + $0x1fc4] ss:$16 sps:$4 sm:$0xff]   ;;  %v15743_v24 = vld [vmem:[%s21645_s1 + $0x1fcc] ss:$16 sps:$4 sm:$0xff]  }
 0x3bc   :  { %10381 = vmatprep.subr.bf16.mxu0 %v15647_v25  ;;  %11456 = vmatprep.subr.bf16.mxu1 %v15650_v26  ;;  %v15738_v25 = vld [vmem:[%s21645_s1 + $0x1fc0] ss:$16 sps:$4 sm:$0xff]   ;;  %v15741_v26 = vld [vmem:[%s21645_s1 + $0x1fc8] ss:$16 sps:$4 sm:$0xff]  }
 0x3bf   :  { %10382 = vmatpush1.bf16.msra.mxu0 %v15645_v27  ;;  %11457 = vmatpush1.bf16.msra.mxu1 %v15648_v28  ;;  %v15746_v27 = vld [vmem:[%s21645_s1 + $0x1fe4] ss:$16 sps:$4 sm:$0xff]   ;;  %v15749_v28 = vld [vmem:[%s21645_s1 + $0x1fec] ss:$16 sps:$4 sm:$0xff]  }
 0x3c0   :  { %10394 = vmatprep.subr.bf16.mxu0 %v15656_v29  ;;  %11469 = vmatprep.subr.bf16.mxu1 %v15659_v30  ;;  %v15744_v29 = vld [vmem:[%s21645_s1 + $0x1fe0] ss:$16 sps:$4 sm:$0xff]   ;;  %v15747_v30 = vld [vmem:[%s21645_s1 + $0x1fe8] ss:$16 sps:$4 sm:$0xff]  }
 0x3c2   :  { %10384 = vmatmul.mubr.bf16.vlgmr.msra.gmra.mrb[0].mxu0 %v15651_v31  ;;  %11459 = vmatmul.mubr.bf16.vlgmr.msra.gmra.mrb[0].mxu1 %v15651_v31  ;;  %v15755_v31 = vld [vmem:[%s21645_s1 + $0x2004] ss:$16 sps:$4 sm:$0xff]  }
 0x3c3   :  { %10395 = vmatpush1.bf16.msra.mxu0 %v15654_v32  ;;  %11470 = vmatpush1.bf16.msra.mxu1 %v15657_v33  ;;  %v15758_v32 = vld [vmem:[%s21645_s1 + $0x200c] ss:$16 sps:$4 sm:$0xff]  }
 0x3c4   :  { %10396 = vmatprep.subr.bf16.mxu0 %v15662_v34  ;;  %11471 = vmatprep.subr.bf16.mxu1 %v15665_v35  ;;  %v15750_v33 = vld [vmem:[%s21646_s0 + $0x78] ss:$196 sps:$4 sm:$0xff]   ;;  %v15753_v34 = vld [vmem:[%s21645_s1 + $0x2000] ss:$16 sps:$4 sm:$0xff]  }
 0x3c5   :  { %10426 = vmatprep.mubr.bf16.mxu0 %v15752_v36  ;;  %11501 = vmatprep.mubr.bf16.mxu1 %v15752_v36  ;;  %v15756_v35 = vld [vmem:[%s21645_s1 + $0x2008] ss:$16 sps:$4 sm:$0xff]   ;;  %v15761_v36 = vld [vmem:[%s21645_s1 + $0x2024] ss:$16 sps:$4 sm:$0xff]  }
 0x3c7   :  { %10397 = vmatpush1.bf16.msra.mxu0 %v15660_v37  ;;  %11472 = vmatpush1.bf16.msra.mxu1 %v15663_v38  ;;  %v15764_v37 = vld [vmem:[%s21645_s1 + $0x202c] ss:$16 sps:$4 sm:$0xff]   ;;  %v15851_v38 = vld [vmem:[%s21646_s0 + $0x84] ss:$196 sps:$4 sm:$0xff]  }
 0x3c8   :  { %10398 = vmatprep.subr.bf16.mxu0 %v15668_v39  ;;  %11473 = vmatprep.subr.bf16.mxu1 %v15671_v40  ;;  %v15759_v39 = vld [vmem:[%s21645_s1 + $0x2020] ss:$16 sps:$4 sm:$0xff]   ;;  %v15762_v40 = vld [vmem:[%s21645_s1 + $0x2028] ss:$16 sps:$4 sm:$0xff]  }
 0x3cb   :  { %10399 = vmatpush1.bf16.msra.mxu0 %v15666_v41  ;;  %11474 = vmatpush1.bf16.msra.mxu1 %v15669_v42  ;;  %v15767_v41 = vld [vmem:[%s21645_s1 + $0x2044] ss:$16 sps:$4 sm:$0xff]   ;;  %v15770_v42 = vld [vmem:[%s21645_s1 + $0x204c] ss:$16 sps:$4 sm:$0xff]  }
 0x3cc   :  { %10400 = vmatprep.subr.bf16.mxu0 %v15674_v43  ;;  %11475 = vmatprep.subr.bf16.mxu1 %v15677_v44  ;;  %v15765_v43 = vld [vmem:[%s21645_s1 + $0x2040] ss:$16 sps:$4 sm:$0xff]   ;;  %v15768_v44 = vld [vmem:[%s21645_s1 + $0x2048] ss:$16 sps:$4 sm:$0xff]  }
 0x3cf   :  { %10401 = vmatpush1.bf16.msra.mxu0 %v15672_v45  ;;  %11476 = vmatpush1.bf16.msra.mxu1 %v15675_v46  ;;  %v15773_v45 = vld [vmem:[%s21645_s1 + $0x2064] ss:$16 sps:$4 sm:$0xff]   ;;  %v15776_v46 = vld [vmem:[%s21645_s1 + $0x206c] ss:$16 sps:$4 sm:$0xff]  }
 0x3d0   :  { %10402 = vmatprep.subr.bf16.mxu0 %v15680_v47  ;;  %11477 = vmatprep.subr.bf16.mxu1 %v15683_v48  ;;  %v15771_v47 = vld [vmem:[%s21645_s1 + $0x2060] ss:$16 sps:$4 sm:$0xff]   ;;  %v15774_v48 = vld [vmem:[%s21645_s1 + $0x2068] ss:$16 sps:$4 sm:$0xff]  }
 0x3d3   :  { %10403 = vmatpush1.bf16.msra.mxu0 %v15678_v49  ;;  %11478 = vmatpush1.bf16.msra.mxu1 %v15681_v50  ;;  %v15779_v49 = vld [vmem:[%s21645_s1 + $0x2084] ss:$16 sps:$4 sm:$0xff]   ;;  %v15782_v50 = vld [vmem:[%s21645_s1 + $0x208c] ss:$16 sps:$4 sm:$0xff]  }
 0x3d4   :  { %10404 = vmatprep.subr.bf16.mxu0 %v15686_v51  ;;  %11479 = vmatprep.subr.bf16.mxu1 %v15689_v52  ;;  %v15777_v51 = vld [vmem:[%s21645_s1 + $0x2080] ss:$16 sps:$4 sm:$0xff]   ;;  %v15780_v52 = vld [vmem:[%s21645_s1 + $0x2088] ss:$16 sps:$4 sm:$0xff]  }
 0x3d7   :  { %10405 = vmatpush1.bf16.msra.mxu0 %v15684_v53  ;;  %11480 = vmatpush1.bf16.msra.mxu1 %v15687_v54  ;;  %v15785_v53 = vld [vmem:[%s21645_s1 + $0x20a4] ss:$16 sps:$4 sm:$0xff]   ;;  %v15788_v54 = vld [vmem:[%s21645_s1 + $0x20ac] ss:$16 sps:$4 sm:$0xff]  }
 0x3d8   :  { %10406 = vmatprep.subr.bf16.mxu0 %v15692_v55  ;;  %11481 = vmatprep.subr.bf16.mxu1 %v15695_v56  ;;  %v15783_v55 = vld [vmem:[%s21645_s1 + $0x20a0] ss:$16 sps:$4 sm:$0xff]   ;;  %v15786_v56 = vld [vmem:[%s21645_s1 + $0x20a8] ss:$16 sps:$4 sm:$0xff]  }
 0x3db   :  { %10407 = vmatpush1.bf16.msra.mxu0 %v15690_v57  ;;  %11482 = vmatpush1.bf16.msra.mxu1 %v15693_v58  ;;  %v15791_v57 = vld [vmem:[%s21645_s1 + $0x20c4] ss:$16 sps:$4 sm:$0xff]   ;;  %v15794_v58 = vld [vmem:[%s21645_s1 + $0x20cc] ss:$16 sps:$4 sm:$0xff]  }
 0x3dc   :  { %10408 = vmatprep.subr.bf16.mxu0 %v15698_v59  ;;  %11483 = vmatprep.subr.bf16.mxu1 %v15701_v60  ;;  %v15789_v59 = vld [vmem:[%s21645_s1 + $0x20c0] ss:$16 sps:$4 sm:$0xff]   ;;  %v15792_v60 = vld [vmem:[%s21645_s1 + $0x20c8] ss:$16 sps:$4 sm:$0xff]  }
 0x3df   :  { %10409 = vmatpush1.bf16.msra.mxu0 %v15696_v61  ;;  %11484 = vmatpush1.bf16.msra.mxu1 %v15699_v62  ;;  %v15797_v61 = vld [vmem:[%s21645_s1 + $0x20e4] ss:$16 sps:$4 sm:$0xff]   ;;  %v15800_v62 = vld [vmem:[%s21645_s1 + $0x20ec] ss:$16 sps:$4 sm:$0xff]  }
 0x3e0   :  { %10410 = vmatprep.subr.bf16.mxu0 %v15704_v63  ;;  %11485 = vmatprep.subr.bf16.mxu1 %v15707_v0  ;;  %v15795_v63 = vld [vmem:[%s21645_s1 + $0x20e0] ss:$16 sps:$4 sm:$0xff]   ;;  %v15798_v0 = vld [vmem:[%s21645_s1 + $0x20e8] ss:$16 sps:$4 sm:$0xff]  }
 0x3e3   :  { %10411 = vmatpush1.bf16.msra.mxu0 %v15702_v1  ;;  %11486 = vmatpush1.bf16.msra.mxu1 %v15705_v2  ;;  %v15803_v1 = vld [vmem:[%s21645_s1 + $0x2104] ss:$16 sps:$4 sm:$0xff]   ;;  %v15806_v2 = vld [vmem:[%s21645_s1 + $0x210c] ss:$16 sps:$4 sm:$0xff]  }
 0x3e4   :  { %10412 = vmatprep.subr.bf16.mxu0 %v15710_v3  ;;  %11487 = vmatprep.subr.bf16.mxu1 %v15713_v4  ;;  %v15801_v3 = vld [vmem:[%s21645_s1 + $0x2100] ss:$16 sps:$4 sm:$0xff]   ;;  %v15804_v4 = vld [vmem:[%s21645_s1 + $0x2108] ss:$16 sps:$4 sm:$0xff]  }
 0x3e7   :  { %10413 = vmatpush1.bf16.msra.mxu0 %v15708_v5  ;;  %11488 = vmatpush1.bf16.msra.mxu1 %v15711_v6  ;;  %v15809_v5 = vld [vmem:[%s21645_s1 + $0x2124] ss:$16 sps:$4 sm:$0xff]   ;;  %v15812_v6 = vld [vmem:[%s21645_s1 + $0x212c] ss:$16 sps:$4 sm:$0xff]  }
 0x3e8   :  { %10414 = vmatprep.subr.bf16.mxu0 %v15716_v7  ;;  %11489 = vmatprep.subr.bf16.mxu1 %v15719_v8  ;;  %v15807_v7 = vld [vmem:[%s21645_s1 + $0x2120] ss:$16 sps:$4 sm:$0xff]   ;;  %v15810_v8 = vld [vmem:[%s21645_s1 + $0x2128] ss:$16 sps:$4 sm:$0xff]  }
 0x3eb   :  { %10415 = vmatpush1.bf16.msra.mxu0 %v15714_v9  ;;  %11490 = vmatpush1.bf16.msra.mxu1 %v15717_v10  ;;  %v15815_v9 = vld [vmem:[%s21645_s1 + $0x2144] ss:$16 sps:$4 sm:$0xff]   ;;  %v15818_v10 = vld [vmem:[%s21645_s1 + $0x214c] ss:$16 sps:$4 sm:$0xff]  }
 0x3ec   :  { %10416 = vmatprep.subr.bf16.mxu0 %v15722_v11  ;;  %11491 = vmatprep.subr.bf16.mxu1 %v15725_v12  ;;  %v15813_v11 = vld [vmem:[%s21645_s1 + $0x2140] ss:$16 sps:$4 sm:$0xff]   ;;  %v15816_v12 = vld [vmem:[%s21645_s1 + $0x2148] ss:$16 sps:$4 sm:$0xff]  }
 0x3ef   :  { %10417 = vmatpush1.bf16.msra.mxu0 %v15720_v13  ;;  %11492 = vmatpush1.bf16.msra.mxu1 %v15723_v14  ;;  %v15821_v13 = vld [vmem:[%s21645_s1 + $0x2164] ss:$16 sps:$4 sm:$0xff]   ;;  %v15824_v14 = vld [vmem:[%s21645_s1 + $0x216c] ss:$16 sps:$4 sm:$0xff]  }
 0x3f0   :  { %10418 = vmatprep.subr.bf16.mxu0 %v15728_v15  ;;  %11493 = vmatprep.subr.bf16.mxu1 %v15731_v16  ;;  %v15819_v15 = vld [vmem:[%s21645_s1 + $0x2160] ss:$16 sps:$4 sm:$0xff]   ;;  %v15822_v16 = vld [vmem:[%s21645_s1 + $0x2168] ss:$16 sps:$4 sm:$0xff]  }
 0x3f3   :  { %10419 = vmatpush1.bf16.msra.mxu0 %v15726_v17  ;;  %11494 = vmatpush1.bf16.msra.mxu1 %v15729_v18  ;;  %v15827_v17 = vld [vmem:[%s21645_s1 + $0x2184] ss:$16 sps:$4 sm:$0xff]   ;;  %v15830_v18 = vld [vmem:[%s21645_s1 + $0x218c] ss:$16 sps:$4 sm:$0xff]  }
 0x3f4   :  { %10420 = vmatprep.subr.bf16.mxu0 %v15734_v19  ;;  %11495 = vmatprep.subr.bf16.mxu1 %v15737_v20  ;;  %v15825_v19 = vld [vmem:[%s21645_s1 + $0x2180] ss:$16 sps:$4 sm:$0xff]   ;;  %v15828_v20 = vld [vmem:[%s21645_s1 + $0x2188] ss:$16 sps:$4 sm:$0xff]  }
 0x3f7   :  { %10421 = vmatpush1.bf16.msra.mxu0 %v15732_v21  ;;  %11496 = vmatpush1.bf16.msra.mxu1 %v15735_v22  ;;  %v15833_v21 = vld [vmem:[%s21645_s1 + $0x21a4] ss:$16 sps:$4 sm:$0xff]   ;;  %v15836_v22 = vld [vmem:[%s21645_s1 + $0x21ac] ss:$16 sps:$4 sm:$0xff]  }
 0x3f8   :  { %10422 = vmatprep.subr.bf16.mxu0 %v15740_v23  ;;  %11497 = vmatprep.subr.bf16.mxu1 %v15743_v24  ;;  %v15831_v23 = vld [vmem:[%s21645_s1 + $0x21a0] ss:$16 sps:$4 sm:$0xff]   ;;  %v15834_v24 = vld [vmem:[%s21645_s1 + $0x21a8] ss:$16 sps:$4 sm:$0xff]  }
 0x3fb   :  { %10423 = vmatpush1.bf16.msra.mxu0 %v15738_v25  ;;  %11498 = vmatpush1.bf16.msra.mxu1 %v15741_v26  ;;  %v15839_v25 = vld [vmem:[%s21645_s1 + $0x21c4] ss:$16 sps:$4 sm:$0xff]   ;;  %v15842_v26 = vld [vmem:[%s21645_s1 + $0x21cc] ss:$16 sps:$4 sm:$0xff]  }
 0x3fc   :  { %10424 = vmatprep.subr.bf16.mxu0 %v15746_v27  ;;  %11499 = vmatprep.subr.bf16.mxu1 %v15749_v28  ;;  %v15837_v27 = vld [vmem:[%s21645_s1 + $0x21c0] ss:$16 sps:$4 sm:$0xff]   ;;  %v15840_v28 = vld [vmem:[%s21645_s1 + $0x21c8] ss:$16 sps:$4 sm:$0xff]  }
 0x3ff   :  { %10425 = vmatpush1.bf16.msra.mxu0 %v15744_v29  ;;  %11500 = vmatpush1.bf16.msra.mxu1 %v15747_v30  ;;  %v15845_v29 = vld [vmem:[%s21645_s1 + $0x21e4] ss:$16 sps:$4 sm:$0xff]   ;;  %v15848_v30 = vld [vmem:[%s21645_s1 + $0x21ec] ss:$16 sps:$4 sm:$0xff]  }
 0x400   :  { %10437 = vmatprep.subr.bf16.mxu0 %v15755_v31  ;;  %11512 = vmatprep.subr.bf16.mxu1 %v15758_v32  ;;  %v15843_v31 = vld [vmem:[%s21645_s1 + $0x21e0] ss:$16 sps:$4 sm:$0xff]   ;;  %v15846_v32 = vld [vmem:[%s21645_s1 + $0x21e8] ss:$16 sps:$4 sm:$0xff]  }
 0x402   :  { %10427 = vmatmul.mubr.bf16.vlgmr.msra.gmra.mrb[0].mxu0 %v15750_v33  ;;  %11502 = vmatmul.mubr.bf16.vlgmr.msra.gmra.mrb[0].mxu1 %v15750_v33  ;;  %v15854_v33 = vld [vmem:[%s21645_s1 + $0x2204] ss:$16 sps:$4 sm:$0xff]  }
 0x403   :  { %10438 = vmatpush1.bf16.msra.mxu0 %v15753_v34  ;;  %11513 = vmatpush1.bf16.msra.mxu1 %v15756_v35  ;;  %v15857_v34 = vld [vmem:[%s21645_s1 + $0x220c] ss:$16 sps:$4 sm:$0xff]   ;;  %v15849_v35 = vld [vmem:[%s21646_s0 + $0x80] ss:$196 sps:$4 sm:$0xff]  }
 0x404   :  { %10439 = vmatprep.subr.bf16.mxu0 %v15761_v36  ;;  %11514 = vmatprep.subr.bf16.mxu1 %v15764_v37  ;;  %v15852_v36 = vld [vmem:[%s21645_s1 + $0x2200] ss:$16 sps:$4 sm:$0xff]   ;;  %v15855_v37 = vld [vmem:[%s21645_s1 + $0x2208] ss:$16 sps:$4 sm:$0xff]  }
 0x405   :  { %10469 = vmatprep.mubr.bf16.mxu0 %v15851_v38  ;;  %11544 = vmatprep.mubr.bf16.mxu1 %v15851_v38  ;;  %v15860_v38 = vld [vmem:[%s21645_s1 + $0x2224] ss:$16 sps:$4 sm:$0xff]  }
 0x407   :  { %10440 = vmatpush1.bf16.msra.mxu0 %v15759_v39  ;;  %11515 = vmatpush1.bf16.msra.mxu1 %v15762_v40  ;;  %v15863_v39 = vld [vmem:[%s21645_s1 + $0x222c] ss:$16 sps:$4 sm:$0xff]  }
 0x408   :  { %10441 = vmatprep.subr.bf16.mxu0 %v15767_v41  ;;  %11516 = vmatprep.subr.bf16.mxu1 %v15770_v42  ;;  %v15950_v40 = vld [vmem:[%s21646_s0 + $0x8c] ss:$196 sps:$4 sm:$0xff]   ;;  %v15861_v42 = vld [vmem:[%s21645_s1 + $0x2228] ss:$16 sps:$4 sm:$0xff]  }
 0x409   :  { %v15858_v41 = vld [vmem:[%s21645_s1 + $0x2220] ss:$16 sps:$4 sm:$0xff]  }
 0x40b   :  { %10442 = vmatpush1.bf16.msra.mxu0 %v15765_v43  ;;  %11517 = vmatpush1.bf16.msra.mxu1 %v15768_v44  ;;  %v15866_v43 = vld [vmem:[%s21645_s1 + $0x2244] ss:$16 sps:$4 sm:$0xff]   ;;  %v15869_v44 = vld [vmem:[%s21645_s1 + $0x224c] ss:$16 sps:$4 sm:$0xff]  }
 0x40c   :  { %10443 = vmatprep.subr.bf16.mxu0 %v15773_v45  ;;  %11518 = vmatprep.subr.bf16.mxu1 %v15776_v46  ;;  %v15864_v45 = vld [vmem:[%s21645_s1 + $0x2240] ss:$16 sps:$4 sm:$0xff]   ;;  %v15867_v46 = vld [vmem:[%s21645_s1 + $0x2248] ss:$16 sps:$4 sm:$0xff]  }
 0x40f   :  { %10444 = vmatpush1.bf16.msra.mxu0 %v15771_v47  ;;  %11519 = vmatpush1.bf16.msra.mxu1 %v15774_v48  ;;  %v15872_v47 = vld [vmem:[%s21645_s1 + $0x2264] ss:$16 sps:$4 sm:$0xff]   ;;  %v15875_v48 = vld [vmem:[%s21645_s1 + $0x226c] ss:$16 sps:$4 sm:$0xff]  }
 0x410   :  { %10445 = vmatprep.subr.bf16.mxu0 %v15779_v49  ;;  %11520 = vmatprep.subr.bf16.mxu1 %v15782_v50  ;;  %v15870_v49 = vld [vmem:[%s21645_s1 + $0x2260] ss:$16 sps:$4 sm:$0xff]   ;;  %v15873_v50 = vld [vmem:[%s21645_s1 + $0x2268] ss:$16 sps:$4 sm:$0xff]  }
 0x413   :  { %10446 = vmatpush1.bf16.msra.mxu0 %v15777_v51  ;;  %11521 = vmatpush1.bf16.msra.mxu1 %v15780_v52  ;;  %v15878_v51 = vld [vmem:[%s21645_s1 + $0x2284] ss:$16 sps:$4 sm:$0xff]   ;;  %v15881_v52 = vld [vmem:[%s21645_s1 + $0x228c] ss:$16 sps:$4 sm:$0xff]  }
 0x414   :  { %10447 = vmatprep.subr.bf16.mxu0 %v15785_v53  ;;  %11522 = vmatprep.subr.bf16.mxu1 %v15788_v54  ;;  %v15876_v53 = vld [vmem:[%s21645_s1 + $0x2280] ss:$16 sps:$4 sm:$0xff]   ;;  %v15879_v54 = vld [vmem:[%s21645_s1 + $0x2288] ss:$16 sps:$4 sm:$0xff]  }
 0x417   :  { %10448 = vmatpush1.bf16.msra.mxu0 %v15783_v55  ;;  %11523 = vmatpush1.bf16.msra.mxu1 %v15786_v56  ;;  %v15884_v55 = vld [vmem:[%s21645_s1 + $0x22a4] ss:$16 sps:$4 sm:$0xff]   ;;  %v15887_v56 = vld [vmem:[%s21645_s1 + $0x22ac] ss:$16 sps:$4 sm:$0xff]  }
 0x418   :  { %10449 = vmatprep.subr.bf16.mxu0 %v15791_v57  ;;  %11524 = vmatprep.subr.bf16.mxu1 %v15794_v58  ;;  %v15882_v57 = vld [vmem:[%s21645_s1 + $0x22a0] ss:$16 sps:$4 sm:$0xff]   ;;  %v15885_v58 = vld [vmem:[%s21645_s1 + $0x22a8] ss:$16 sps:$4 sm:$0xff]  }
 0x41b   :  { %10450 = vmatpush1.bf16.msra.mxu0 %v15789_v59  ;;  %11525 = vmatpush1.bf16.msra.mxu1 %v15792_v60  ;;  %v15890_v59 = vld [vmem:[%s21645_s1 + $0x22c4] ss:$16 sps:$4 sm:$0xff]   ;;  %v15893_v60 = vld [vmem:[%s21645_s1 + $0x22cc] ss:$16 sps:$4 sm:$0xff]  }
 0x41c   :  { %10451 = vmatprep.subr.bf16.mxu0 %v15797_v61  ;;  %11526 = vmatprep.subr.bf16.mxu1 %v15800_v62  ;;  %v15888_v61 = vld [vmem:[%s21645_s1 + $0x22c0] ss:$16 sps:$4 sm:$0xff]   ;;  %v15891_v62 = vld [vmem:[%s21645_s1 + $0x22c8] ss:$16 sps:$4 sm:$0xff]  }
 0x41f   :  { %10452 = vmatpush1.bf16.msra.mxu0 %v15795_v63  ;;  %11527 = vmatpush1.bf16.msra.mxu1 %v15798_v0  ;;  %v15896_v63 = vld [vmem:[%s21645_s1 + $0x22e4] ss:$16 sps:$4 sm:$0xff]   ;;  %v15899_v0 = vld [vmem:[%s21645_s1 + $0x22ec] ss:$16 sps:$4 sm:$0xff]  }
 0x420   :  { %10453 = vmatprep.subr.bf16.mxu0 %v15803_v1  ;;  %11528 = vmatprep.subr.bf16.mxu1 %v15806_v2  ;;  %v15894_v1 = vld [vmem:[%s21645_s1 + $0x22e0] ss:$16 sps:$4 sm:$0xff]   ;;  %v15897_v2 = vld [vmem:[%s21645_s1 + $0x22e8] ss:$16 sps:$4 sm:$0xff]  }
 0x423   :  { %10454 = vmatpush1.bf16.msra.mxu0 %v15801_v3  ;;  %11529 = vmatpush1.bf16.msra.mxu1 %v15804_v4  ;;  %v15902_v3 = vld [vmem:[%s21645_s1 + $0x2304] ss:$16 sps:$4 sm:$0xff]   ;;  %v15905_v4 = vld [vmem:[%s21645_s1 + $0x230c] ss:$16 sps:$4 sm:$0xff]  }
 0x424   :  { %10455 = vmatprep.subr.bf16.mxu0 %v15809_v5  ;;  %11530 = vmatprep.subr.bf16.mxu1 %v15812_v6  ;;  %v15900_v5 = vld [vmem:[%s21645_s1 + $0x2300] ss:$16 sps:$4 sm:$0xff]   ;;  %v15903_v6 = vld [vmem:[%s21645_s1 + $0x2308] ss:$16 sps:$4 sm:$0xff]  }
 0x427   :  { %10456 = vmatpush1.bf16.msra.mxu0 %v15807_v7  ;;  %11531 = vmatpush1.bf16.msra.mxu1 %v15810_v8  ;;  %v15908_v7 = vld [vmem:[%s21645_s1 + $0x2324] ss:$16 sps:$4 sm:$0xff]   ;;  %v15911_v8 = vld [vmem:[%s21645_s1 + $0x232c] ss:$16 sps:$4 sm:$0xff]  }
 0x428   :  { %10457 = vmatprep.subr.bf16.mxu0 %v15815_v9  ;;  %11532 = vmatprep.subr.bf16.mxu1 %v15818_v10  ;;  %v15906_v9 = vld [vmem:[%s21645_s1 + $0x2320] ss:$16 sps:$4 sm:$0xff]   ;;  %v15909_v10 = vld [vmem:[%s21645_s1 + $0x2328] ss:$16 sps:$4 sm:$0xff]  }
 0x42b   :  { %10458 = vmatpush1.bf16.msra.mxu0 %v15813_v11  ;;  %11533 = vmatpush1.bf16.msra.mxu1 %v15816_v12  ;;  %v15914_v11 = vld [vmem:[%s21645_s1 + $0x2344] ss:$16 sps:$4 sm:$0xff]   ;;  %v15917_v12 = vld [vmem:[%s21645_s1 + $0x234c] ss:$16 sps:$4 sm:$0xff]  }
 0x42c   :  { %10459 = vmatprep.subr.bf16.mxu0 %v15821_v13  ;;  %11534 = vmatprep.subr.bf16.mxu1 %v15824_v14  ;;  %v15912_v13 = vld [vmem:[%s21645_s1 + $0x2340] ss:$16 sps:$4 sm:$0xff]   ;;  %v15915_v14 = vld [vmem:[%s21645_s1 + $0x2348] ss:$16 sps:$4 sm:$0xff]  }
 0x42f   :  { %10460 = vmatpush1.bf16.msra.mxu0 %v15819_v15  ;;  %11535 = vmatpush1.bf16.msra.mxu1 %v15822_v16  ;;  %v15920_v15 = vld [vmem:[%s21645_s1 + $0x2364] ss:$16 sps:$4 sm:$0xff]   ;;  %v15923_v16 = vld [vmem:[%s21645_s1 + $0x236c] ss:$16 sps:$4 sm:$0xff]  }
 0x430   :  { %10461 = vmatprep.subr.bf16.mxu0 %v15827_v17  ;;  %11536 = vmatprep.subr.bf16.mxu1 %v15830_v18  ;;  %v15918_v17 = vld [vmem:[%s21645_s1 + $0x2360] ss:$16 sps:$4 sm:$0xff]   ;;  %v15921_v18 = vld [vmem:[%s21645_s1 + $0x2368] ss:$16 sps:$4 sm:$0xff]  }
 0x433   :  { %10462 = vmatpush1.bf16.msra.mxu0 %v15825_v19  ;;  %11537 = vmatpush1.bf16.msra.mxu1 %v15828_v20  ;;  %v15926_v19 = vld [vmem:[%s21645_s1 + $0x2384] ss:$16 sps:$4 sm:$0xff]   ;;  %v15929_v20 = vld [vmem:[%s21645_s1 + $0x238c] ss:$16 sps:$4 sm:$0xff]  }
 0x434   :  { %10463 = vmatprep.subr.bf16.mxu0 %v15833_v21  ;;  %11538 = vmatprep.subr.bf16.mxu1 %v15836_v22  ;;  %v15924_v21 = vld [vmem:[%s21645_s1 + $0x2380] ss:$16 sps:$4 sm:$0xff]   ;;  %v15927_v22 = vld [vmem:[%s21645_s1 + $0x2388] ss:$16 sps:$4 sm:$0xff]  }
 0x437   :  { %10464 = vmatpush1.bf16.msra.mxu0 %v15831_v23  ;;  %11539 = vmatpush1.bf16.msra.mxu1 %v15834_v24  ;;  %v15932_v23 = vld [vmem:[%s21645_s1 + $0x23a4] ss:$16 sps:$4 sm:$0xff]   ;;  %v15935_v24 = vld [vmem:[%s21645_s1 + $0x23ac] ss:$16 sps:$4 sm:$0xff]  }
 0x438   :  { %10465 = vmatprep.subr.bf16.mxu0 %v15839_v25  ;;  %11540 = vmatprep.subr.bf16.mxu1 %v15842_v26  ;;  %v15930_v25 = vld [vmem:[%s21645_s1 + $0x23a0] ss:$16 sps:$4 sm:$0xff]   ;;  %v15933_v26 = vld [vmem:[%s21645_s1 + $0x23a8] ss:$16 sps:$4 sm:$0xff]  }
 0x43b   :  { %10466 = vmatpush1.bf16.msra.mxu0 %v15837_v27  ;;  %11541 = vmatpush1.bf16.msra.mxu1 %v15840_v28  ;;  %v15938_v27 = vld [vmem:[%s21645_s1 + $0x23c4] ss:$16 sps:$4 sm:$0xff]   ;;  %v15941_v28 = vld [vmem:[%s21645_s1 + $0x23cc] ss:$16 sps:$4 sm:$0xff]  }
 0x43c   :  { %10467 = vmatprep.subr.bf16.mxu0 %v15845_v29  ;;  %11542 = vmatprep.subr.bf16.mxu1 %v15848_v30  ;;  %v15936_v29 = vld [vmem:[%s21645_s1 + $0x23c0] ss:$16 sps:$4 sm:$0xff]   ;;  %v15939_v30 = vld [vmem:[%s21645_s1 + $0x23c8] ss:$16 sps:$4 sm:$0xff]  }
 0x43f   :  { %10468 = vmatpush1.bf16.msra.mxu0 %v15843_v31  ;;  %11543 = vmatpush1.bf16.msra.mxu1 %v15846_v32  ;;  %v15944_v31 = vld [vmem:[%s21645_s1 + $0x23e4] ss:$16 sps:$4 sm:$0xff]   ;;  %v15947_v32 = vld [vmem:[%s21645_s1 + $0x23ec] ss:$16 sps:$4 sm:$0xff]  }
 0x440   :  { %10480 = vmatprep.subr.bf16.mxu0 %v15854_v33  ;;  %11555 = vmatprep.subr.bf16.mxu1 %v15857_v34  ;;  %v15942_v33 = vld [vmem:[%s21645_s1 + $0x23e0] ss:$16 sps:$4 sm:$0xff]   ;;  %v15945_v34 = vld [vmem:[%s21645_s1 + $0x23e8] ss:$16 sps:$4 sm:$0xff]  }
 0x442   :  { %10470 = vmatmul.mubr.bf16.vlgmr.msra.gmra.mrb[0].mxu0 %v15849_v35  ;;  %11545 = vmatmul.mubr.bf16.vlgmr.msra.gmra.mrb[0].mxu1 %v15849_v35  ;;  %v15953_v35 = vld [vmem:[%s21645_s1 + $0x2404] ss:$16 sps:$4 sm:$0xff]  }
 0x443   :  { %10481 = vmatpush1.bf16.msra.mxu0 %v15852_v36  ;;  %11556 = vmatpush1.bf16.msra.mxu1 %v15855_v37  ;;  %v15956_v36 = vld [vmem:[%s21645_s1 + $0x240c] ss:$16 sps:$4 sm:$0xff]  }
 0x444   :  { %10482 = vmatprep.subr.bf16.mxu0 %v15860_v38  ;;  %11557 = vmatprep.subr.bf16.mxu1 %v15863_v39  ;;  %v15948_v37 = vld [vmem:[%s21646_s0 + $0x88] ss:$196 sps:$4 sm:$0xff]   ;;  %v15951_v38 = vld [vmem:[%s21645_s1 + $0x2400] ss:$16 sps:$4 sm:$0xff]  }
 0x445   :  { %10512 = vmatprep.mubr.bf16.mxu0 %v15950_v40  ;;  %11587 = vmatprep.mubr.bf16.mxu1 %v15950_v40  ;;  %v15954_v39 = vld [vmem:[%s21645_s1 + $0x2408] ss:$16 sps:$4 sm:$0xff]   ;;  %v15959_v40 = vld [vmem:[%s21645_s1 + $0x2424] ss:$16 sps:$4 sm:$0xff]  }
 0x447   :  { %10483 = vmatpush1.bf16.msra.mxu0 %v15858_v41  ;;  %11558 = vmatpush1.bf16.msra.mxu1 %v15861_v42  ;;  %v15962_v41 = vld [vmem:[%s21645_s1 + $0x242c] ss:$16 sps:$4 sm:$0xff]   ;;  %v16049_v42 = vld [vmem:[%s21646_s0 + $0x94] ss:$196 sps:$4 sm:$0xff]  }
 0x448   :  { %10484 = vmatprep.subr.bf16.mxu0 %v15866_v43  ;;  %11559 = vmatprep.subr.bf16.mxu1 %v15869_v44  ;;  %v15957_v43 = vld [vmem:[%s21645_s1 + $0x2420] ss:$16 sps:$4 sm:$0xff]   ;;  %v15960_v44 = vld [vmem:[%s21645_s1 + $0x2428] ss:$16 sps:$4 sm:$0xff]  }
 0x44b   :  { %10485 = vmatpush1.bf16.msra.mxu0 %v15864_v45  ;;  %11560 = vmatpush1.bf16.msra.mxu1 %v15867_v46  ;;  %v15965_v45 = vld [vmem:[%s21645_s1 + $0x2444] ss:$16 sps:$4 sm:$0xff]   ;;  %v15968_v46 = vld [vmem:[%s21645_s1 + $0x244c] ss:$16 sps:$4 sm:$0xff]  }
 0x44c   :  { %10486 = vmatprep.subr.bf16.mxu0 %v15872_v47  ;;  %11561 = vmatprep.subr.bf16.mxu1 %v15875_v48  ;;  %v15963_v47 = vld [vmem:[%s21645_s1 + $0x2440] ss:$16 sps:$4 sm:$0xff]   ;;  %v15966_v48 = vld [vmem:[%s21645_s1 + $0x2448] ss:$16 sps:$4 sm:$0xff]  }
 0x44f   :  { %10487 = vmatpush1.bf16.msra.mxu0 %v15870_v49  ;;  %11562 = vmatpush1.bf16.msra.mxu1 %v15873_v50  ;;  %v15971_v49 = vld [vmem:[%s21645_s1 + $0x2464] ss:$16 sps:$4 sm:$0xff]   ;;  %v15974_v50 = vld [vmem:[%s21645_s1 + $0x246c] ss:$16 sps:$4 sm:$0xff]  }
 0x450   :  { %10488 = vmatprep.subr.bf16.mxu0 %v15878_v51  ;;  %11563 = vmatprep.subr.bf16.mxu1 %v15881_v52  ;;  %v15969_v51 = vld [vmem:[%s21645_s1 + $0x2460] ss:$16 sps:$4 sm:$0xff]   ;;  %v15972_v52 = vld [vmem:[%s21645_s1 + $0x2468] ss:$16 sps:$4 sm:$0xff]  }
 0x453   :  { %10489 = vmatpush1.bf16.msra.mxu0 %v15876_v53  ;;  %11564 = vmatpush1.bf16.msra.mxu1 %v15879_v54  ;;  %v15977_v53 = vld [vmem:[%s21645_s1 + $0x2484] ss:$16 sps:$4 sm:$0xff]   ;;  %v15980_v54 = vld [vmem:[%s21645_s1 + $0x248c] ss:$16 sps:$4 sm:$0xff]  }
 0x454   :  { %10490 = vmatprep.subr.bf16.mxu0 %v15884_v55  ;;  %11565 = vmatprep.subr.bf16.mxu1 %v15887_v56  ;;  %v15975_v55 = vld [vmem:[%s21645_s1 + $0x2480] ss:$16 sps:$4 sm:$0xff]   ;;  %v15978_v56 = vld [vmem:[%s21645_s1 + $0x2488] ss:$16 sps:$4 sm:$0xff]  }
 0x457   :  { %10491 = vmatpush1.bf16.msra.mxu0 %v15882_v57  ;;  %11566 = vmatpush1.bf16.msra.mxu1 %v15885_v58  ;;  %v15983_v57 = vld [vmem:[%s21645_s1 + $0x24a4] ss:$16 sps:$4 sm:$0xff]   ;;  %v15986_v58 = vld [vmem:[%s21645_s1 + $0x24ac] ss:$16 sps:$4 sm:$0xff]  }
 0x458   :  { %10492 = vmatprep.subr.bf16.mxu0 %v15890_v59  ;;  %11567 = vmatprep.subr.bf16.mxu1 %v15893_v60  ;;  %v15981_v59 = vld [vmem:[%s21645_s1 + $0x24a0] ss:$16 sps:$4 sm:$0xff]   ;;  %v15984_v60 = vld [vmem:[%s21645_s1 + $0x24a8] ss:$16 sps:$4 sm:$0xff]  }
 0x45b   :  { %10493 = vmatpush1.bf16.msra.mxu0 %v15888_v61  ;;  %11568 = vmatpush1.bf16.msra.mxu1 %v15891_v62  ;;  %v15989_v61 = vld [vmem:[%s21645_s1 + $0x24c4] ss:$16 sps:$4 sm:$0xff]   ;;  %v15992_v62 = vld [vmem:[%s21645_s1 + $0x24cc] ss:$16 sps:$4 sm:$0xff]  }
 0x45c   :  { %10494 = vmatprep.subr.bf16.mxu0 %v15896_v63  ;;  %11569 = vmatprep.subr.bf16.mxu1 %v15899_v0  ;;  %v15987_v63 = vld [vmem:[%s21645_s1 + $0x24c0] ss:$16 sps:$4 sm:$0xff]   ;;  %v15990_v0 = vld [vmem:[%s21645_s1 + $0x24c8] ss:$16 sps:$4 sm:$0xff]  }
 0x45f   :  { %10495 = vmatpush1.bf16.msra.mxu0 %v15894_v1  ;;  %11570 = vmatpush1.bf16.msra.mxu1 %v15897_v2  ;;  %v15995_v1 = vld [vmem:[%s21645_s1 + $0x24e4] ss:$16 sps:$4 sm:$0xff]   ;;  %v15998_v2 = vld [vmem:[%s21645_s1 + $0x24ec] ss:$16 sps:$4 sm:$0xff]  }
 0x460   :  { %10496 = vmatprep.subr.bf16.mxu0 %v15902_v3  ;;  %11571 = vmatprep.subr.bf16.mxu1 %v15905_v4  ;;  %v15993_v3 = vld [vmem:[%s21645_s1 + $0x24e0] ss:$16 sps:$4 sm:$0xff]   ;;  %v15996_v4 = vld [vmem:[%s21645_s1 + $0x24e8] ss:$16 sps:$4 sm:$0xff]  }
 0x463   :  { %10497 = vmatpush1.bf16.msra.mxu0 %v15900_v5  ;;  %11572 = vmatpush1.bf16.msra.mxu1 %v15903_v6  ;;  %v16001_v5 = vld [vmem:[%s21645_s1 + $0x2504] ss:$16 sps:$4 sm:$0xff]   ;;  %v16004_v6 = vld [vmem:[%s21645_s1 + $0x250c] ss:$16 sps:$4 sm:$0xff]  }
 0x464   :  { %10498 = vmatprep.subr.bf16.mxu0 %v15908_v7  ;;  %11573 = vmatprep.subr.bf16.mxu1 %v15911_v8  ;;  %v15999_v7 = vld [vmem:[%s21645_s1 + $0x2500] ss:$16 sps:$4 sm:$0xff]   ;;  %v16002_v8 = vld [vmem:[%s21645_s1 + $0x2508] ss:$16 sps:$4 sm:$0xff]  }
 0x467   :  { %10499 = vmatpush1.bf16.msra.mxu0 %v15906_v9  ;;  %11574 = vmatpush1.bf16.msra.mxu1 %v15909_v10  ;;  %v16007_v9 = vld [vmem:[%s21645_s1 + $0x2524] ss:$16 sps:$4 sm:$0xff]   ;;  %v16010_v10 = vld [vmem:[%s21645_s1 + $0x252c] ss:$16 sps:$4 sm:$0xff]  }
 0x468   :  { %10500 = vmatprep.subr.bf16.mxu0 %v15914_v11  ;;  %11575 = vmatprep.subr.bf16.mxu1 %v15917_v12  ;;  %v16005_v11 = vld [vmem:[%s21645_s1 + $0x2520] ss:$16 sps:$4 sm:$0xff]   ;;  %v16008_v12 = vld [vmem:[%s21645_s1 + $0x2528] ss:$16 sps:$4 sm:$0xff]  }
 0x46b   :  { %10501 = vmatpush1.bf16.msra.mxu0 %v15912_v13  ;;  %11576 = vmatpush1.bf16.msra.mxu1 %v15915_v14  ;;  %v16013_v13 = vld [vmem:[%s21645_s1 + $0x2544] ss:$16 sps:$4 sm:$0xff]   ;;  %v16016_v14 = vld [vmem:[%s21645_s1 + $0x254c] ss:$16 sps:$4 sm:$0xff]  }
 0x46c   :  { %10502 = vmatprep.subr.bf16.mxu0 %v15920_v15  ;;  %11577 = vmatprep.subr.bf16.mxu1 %v15923_v16  ;;  %v16011_v15 = vld [vmem:[%s21645_s1 + $0x2540] ss:$16 sps:$4 sm:$0xff]   ;;  %v16014_v16 = vld [vmem:[%s21645_s1 + $0x2548] ss:$16 sps:$4 sm:$0xff]  }
 0x46f   :  { %10503 = vmatpush1.bf16.msra.mxu0 %v15918_v17  ;;  %11578 = vmatpush1.bf16.msra.mxu1 %v15921_v18  ;;  %v16019_v17 = vld [vmem:[%s21645_s1 + $0x2564] ss:$16 sps:$4 sm:$0xff]   ;;  %v16022_v18 = vld [vmem:[%s21645_s1 + $0x256c] ss:$16 sps:$4 sm:$0xff]  }
 0x470   :  { %10504 = vmatprep.subr.bf16.mxu0 %v15926_v19  ;;  %11579 = vmatprep.subr.bf16.mxu1 %v15929_v20  ;;  %v16017_v19 = vld [vmem:[%s21645_s1 + $0x2560] ss:$16 sps:$4 sm:$0xff]   ;;  %v16020_v20 = vld [vmem:[%s21645_s1 + $0x2568] ss:$16 sps:$4 sm:$0xff]  }
 0x473   :  { %10505 = vmatpush1.bf16.msra.mxu0 %v15924_v21  ;;  %11580 = vmatpush1.bf16.msra.mxu1 %v15927_v22  ;;  %v16025_v21 = vld [vmem:[%s21645_s1 + $0x2584] ss:$16 sps:$4 sm:$0xff]   ;;  %v16028_v22 = vld [vmem:[%s21645_s1 + $0x258c] ss:$16 sps:$4 sm:$0xff]  }
 0x474   :  { %10506 = vmatprep.subr.bf16.mxu0 %v15932_v23  ;;  %11581 = vmatprep.subr.bf16.mxu1 %v15935_v24  ;;  %v16023_v23 = vld [vmem:[%s21645_s1 + $0x2580] ss:$16 sps:$4 sm:$0xff]   ;;  %v16026_v24 = vld [vmem:[%s21645_s1 + $0x2588] ss:$16 sps:$4 sm:$0xff]  }
 0x477   :  { %10507 = vmatpush1.bf16.msra.mxu0 %v15930_v25  ;;  %11582 = vmatpush1.bf16.msra.mxu1 %v15933_v26  ;;  %v16031_v25 = vld [vmem:[%s21645_s1 + $0x25a4] ss:$16 sps:$4 sm:$0xff]   ;;  %v16034_v26 = vld [vmem:[%s21645_s1 + $0x25ac] ss:$16 sps:$4 sm:$0xff]  }
 0x478   :  { %10508 = vmatprep.subr.bf16.mxu0 %v15938_v27  ;;  %11583 = vmatprep.subr.bf16.mxu1 %v15941_v28  ;;  %v16029_v27 = vld [vmem:[%s21645_s1 + $0x25a0] ss:$16 sps:$4 sm:$0xff]   ;;  %v16032_v28 = vld [vmem:[%s21645_s1 + $0x25a8] ss:$16 sps:$4 sm:$0xff]  }
 0x47b   :  { %10509 = vmatpush1.bf16.msra.mxu0 %v15936_v29  ;;  %11584 = vmatpush1.bf16.msra.mxu1 %v15939_v30  ;;  %v16037_v29 = vld [vmem:[%s21645_s1 + $0x25c4] ss:$16 sps:$4 sm:$0xff]   ;;  %v16040_v30 = vld [vmem:[%s21645_s1 + $0x25cc] ss:$16 sps:$4 sm:$0xff]  }
 0x47c   :  { %10510 = vmatprep.subr.bf16.mxu0 %v15944_v31  ;;  %11585 = vmatprep.subr.bf16.mxu1 %v15947_v32  ;;  %v16035_v31 = vld [vmem:[%s21645_s1 + $0x25c0] ss:$16 sps:$4 sm:$0xff]   ;;  %v16038_v32 = vld [vmem:[%s21645_s1 + $0x25c8] ss:$16 sps:$4 sm:$0xff]  }
 0x47f   :  { %10511 = vmatpush1.bf16.msra.mxu0 %v15942_v33  ;;  %11586 = vmatpush1.bf16.msra.mxu1 %v15945_v34  ;;  %v16043_v33 = vld [vmem:[%s21645_s1 + $0x25e4] ss:$16 sps:$4 sm:$0xff]   ;;  %v16046_v34 = vld [vmem:[%s21645_s1 + $0x25ec] ss:$16 sps:$4 sm:$0xff]  }
 0x480   :  { %10523 = vmatprep.subr.bf16.mxu0 %v15953_v35  ;;  %11598 = vmatprep.subr.bf16.mxu1 %v15956_v36  ;;  %v16041_v35 = vld [vmem:[%s21645_s1 + $0x25e0] ss:$16 sps:$4 sm:$0xff]   ;;  %v16044_v36 = vld [vmem:[%s21645_s1 + $0x25e8] ss:$16 sps:$4 sm:$0xff]  }
 0x482   :  { %10513 = vmatmul.mubr.bf16.vlgmr.msra.gmra.mrb[0].mxu0 %v15948_v37  ;;  %11588 = vmatmul.mubr.bf16.vlgmr.msra.gmra.mrb[0].mxu1 %v15948_v37  ;;  %v16052_v37 = vld [vmem:[%s21645_s1 + $0x2604] ss:$16 sps:$4 sm:$0xff]  }
 0x483   :  { %10524 = vmatpush1.bf16.msra.mxu0 %v15951_v38  ;;  %11599 = vmatpush1.bf16.msra.mxu1 %v15954_v39  ;;  %v16055_v38 = vld [vmem:[%s21645_s1 + $0x260c] ss:$16 sps:$4 sm:$0xff]   ;;  %v16047_v39 = vld [vmem:[%s21646_s0 + $0x90] ss:$196 sps:$4 sm:$0xff]  }
 0x484   :  { %10525 = vmatprep.subr.bf16.mxu0 %v15959_v40  ;;  %11600 = vmatprep.subr.bf16.mxu1 %v15962_v41  ;;  %v16050_v40 = vld [vmem:[%s21645_s1 + $0x2600] ss:$16 sps:$4 sm:$0xff]   ;;  %v16053_v41 = vld [vmem:[%s21645_s1 + $0x2608] ss:$16 sps:$4 sm:$0xff]  }
 0x485   :  { %10555 = vmatprep.mubr.bf16.mxu0 %v16049_v42  ;;  %11630 = vmatprep.mubr.bf16.mxu1 %v16049_v42  ;;  %v16058_v42 = vld [vmem:[%s21645_s1 + $0x2624] ss:$16 sps:$4 sm:$0xff]  }
 0x487   :  { %10526 = vmatpush1.bf16.msra.mxu0 %v15957_v43  ;;  %11601 = vmatpush1.bf16.msra.mxu1 %v15960_v44  ;;  %v16061_v43 = vld [vmem:[%s21645_s1 + $0x262c] ss:$16 sps:$4 sm:$0xff]  }
 0x488   :  { %10527 = vmatprep.subr.bf16.mxu0 %v15965_v45  ;;  %11602 = vmatprep.subr.bf16.mxu1 %v15968_v46  ;;  %v16148_v44 = vld [vmem:[%s21646_s0 + $0x9c] ss:$196 sps:$4 sm:$0xff]   ;;  %v16059_v46 = vld [vmem:[%s21645_s1 + $0x2628] ss:$16 sps:$4 sm:$0xff]  }
 0x489   :  { %v16056_v45 = vld [vmem:[%s21645_s1 + $0x2620] ss:$16 sps:$4 sm:$0xff]  }
 0x48b   :  { %10528 = vmatpush1.bf16.msra.mxu0 %v15963_v47  ;;  %11603 = vmatpush1.bf16.msra.mxu1 %v15966_v48  ;;  %v16064_v47 = vld [vmem:[%s21645_s1 + $0x2644] ss:$16 sps:$4 sm:$0xff]   ;;  %v16067_v48 = vld [vmem:[%s21645_s1 + $0x264c] ss:$16 sps:$4 sm:$0xff]  }
 0x48c   :  { %10529 = vmatprep.subr.bf16.mxu0 %v15971_v49  ;;  %11604 = vmatprep.subr.bf16.mxu1 %v15974_v50  ;;  %v16062_v49 = vld [vmem:[%s21645_s1 + $0x2640] ss:$16 sps:$4 sm:$0xff]   ;;  %v16065_v50 = vld [vmem:[%s21645_s1 + $0x2648] ss:$16 sps:$4 sm:$0xff]  }
 0x48f   :  { %10530 = vmatpush1.bf16.msra.mxu0 %v15969_v51  ;;  %11605 = vmatpush1.bf16.msra.mxu1 %v15972_v52  ;;  %v16070_v51 = vld [vmem:[%s21645_s1 + $0x2664] ss:$16 sps:$4 sm:$0xff]   ;;  %v16073_v52 = vld [vmem:[%s21645_s1 + $0x266c] ss:$16 sps:$4 sm:$0xff]  }
 0x490   :  { %10531 = vmatprep.subr.bf16.mxu0 %v15977_v53  ;;  %11606 = vmatprep.subr.bf16.mxu1 %v15980_v54  ;;  %v16068_v53 = vld [vmem:[%s21645_s1 + $0x2660] ss:$16 sps:$4 sm:$0xff]   ;;  %v16071_v54 = vld [vmem:[%s21645_s1 + $0x2668] ss:$16 sps:$4 sm:$0xff]  }
 0x493   :  { %10532 = vmatpush1.bf16.msra.mxu0 %v15975_v55  ;;  %11607 = vmatpush1.bf16.msra.mxu1 %v15978_v56  ;;  %v16076_v55 = vld [vmem:[%s21645_s1 + $0x2684] ss:$16 sps:$4 sm:$0xff]   ;;  %v16079_v56 = vld [vmem:[%s21645_s1 + $0x268c] ss:$16 sps:$4 sm:$0xff]  }
 0x494   :  { %10533 = vmatprep.subr.bf16.mxu0 %v15983_v57  ;;  %11608 = vmatprep.subr.bf16.mxu1 %v15986_v58  ;;  %v16074_v57 = vld [vmem:[%s21645_s1 + $0x2680] ss:$16 sps:$4 sm:$0xff]   ;;  %v16077_v58 = vld [vmem:[%s21645_s1 + $0x2688] ss:$16 sps:$4 sm:$0xff]  }
 0x497   :  { %10534 = vmatpush1.bf16.msra.mxu0 %v15981_v59  ;;  %11609 = vmatpush1.bf16.msra.mxu1 %v15984_v60  ;;  %v16082_v59 = vld [vmem:[%s21645_s1 + $0x26a4] ss:$16 sps:$4 sm:$0xff]   ;;  %v16085_v60 = vld [vmem:[%s21645_s1 + $0x26ac] ss:$16 sps:$4 sm:$0xff]  }
 0x498   :  { %10535 = vmatprep.subr.bf16.mxu0 %v15989_v61  ;;  %11610 = vmatprep.subr.bf16.mxu1 %v15992_v62  ;;  %v16080_v61 = vld [vmem:[%s21645_s1 + $0x26a0] ss:$16 sps:$4 sm:$0xff]   ;;  %v16083_v62 = vld [vmem:[%s21645_s1 + $0x26a8] ss:$16 sps:$4 sm:$0xff]  }
 0x49b   :  { %10536 = vmatpush1.bf16.msra.mxu0 %v15987_v63  ;;  %11611 = vmatpush1.bf16.msra.mxu1 %v15990_v0  ;;  %v16088_v63 = vld [vmem:[%s21645_s1 + $0x26c4] ss:$16 sps:$4 sm:$0xff]   ;;  %v16091_v0 = vld [vmem:[%s21645_s1 + $0x26cc] ss:$16 sps:$4 sm:$0xff]  }
 0x49c   :  { %10537 = vmatprep.subr.bf16.mxu0 %v15995_v1  ;;  %11612 = vmatprep.subr.bf16.mxu1 %v15998_v2  ;;  %v16086_v1 = vld [vmem:[%s21645_s1 + $0x26c0] ss:$16 sps:$4 sm:$0xff]   ;;  %v16089_v2 = vld [vmem:[%s21645_s1 + $0x26c8] ss:$16 sps:$4 sm:$0xff]  }
 0x49f   :  { %10538 = vmatpush1.bf16.msra.mxu0 %v15993_v3  ;;  %11613 = vmatpush1.bf16.msra.mxu1 %v15996_v4  ;;  %v16094_v3 = vld [vmem:[%s21645_s1 + $0x26e4] ss:$16 sps:$4 sm:$0xff]   ;;  %v16097_v4 = vld [vmem:[%s21645_s1 + $0x26ec] ss:$16 sps:$4 sm:$0xff]  }
 0x4a0   :  { %10539 = vmatprep.subr.bf16.mxu0 %v16001_v5  ;;  %11614 = vmatprep.subr.bf16.mxu1 %v16004_v6  ;;  %v16092_v5 = vld [vmem:[%s21645_s1 + $0x26e0] ss:$16 sps:$4 sm:$0xff]   ;;  %v16095_v6 = vld [vmem:[%s21645_s1 + $0x26e8] ss:$16 sps:$4 sm:$0xff]  }
 0x4a3   :  { %10540 = vmatpush1.bf16.msra.mxu0 %v15999_v7  ;;  %11615 = vmatpush1.bf16.msra.mxu1 %v16002_v8  ;;  %v16100_v7 = vld [vmem:[%s21645_s1 + $0x2704] ss:$16 sps:$4 sm:$0xff]   ;;  %v16103_v8 = vld [vmem:[%s21645_s1 + $0x270c] ss:$16 sps:$4 sm:$0xff]  }
 0x4a4   :  { %10541 = vmatprep.subr.bf16.mxu0 %v16007_v9  ;;  %11616 = vmatprep.subr.bf16.mxu1 %v16010_v10  ;;  %v16098_v9 = vld [vmem:[%s21645_s1 + $0x2700] ss:$16 sps:$4 sm:$0xff]   ;;  %v16101_v10 = vld [vmem:[%s21645_s1 + $0x2708] ss:$16 sps:$4 sm:$0xff]  }
 0x4a7   :  { %10542 = vmatpush1.bf16.msra.mxu0 %v16005_v11  ;;  %11617 = vmatpush1.bf16.msra.mxu1 %v16008_v12  ;;  %v16106_v11 = vld [vmem:[%s21645_s1 + $0x2724] ss:$16 sps:$4 sm:$0xff]   ;;  %v16109_v12 = vld [vmem:[%s21645_s1 + $0x272c] ss:$16 sps:$4 sm:$0xff]  }
 0x4a8   :  { %10543 = vmatprep.subr.bf16.mxu0 %v16013_v13  ;;  %11618 = vmatprep.subr.bf16.mxu1 %v16016_v14  ;;  %v16104_v13 = vld [vmem:[%s21645_s1 + $0x2720] ss:$16 sps:$4 sm:$0xff]   ;;  %v16107_v14 = vld [vmem:[%s21645_s1 + $0x2728] ss:$16 sps:$4 sm:$0xff]  }
 0x4ab   :  { %10544 = vmatpush1.bf16.msra.mxu0 %v16011_v15  ;;  %11619 = vmatpush1.bf16.msra.mxu1 %v16014_v16  ;;  %v16112_v15 = vld [vmem:[%s21645_s1 + $0x2744] ss:$16 sps:$4 sm:$0xff]   ;;  %v16115_v16 = vld [vmem:[%s21645_s1 + $0x274c] ss:$16 sps:$4 sm:$0xff]  }
 0x4ac   :  { %10545 = vmatprep.subr.bf16.mxu0 %v16019_v17  ;;  %11620 = vmatprep.subr.bf16.mxu1 %v16022_v18  ;;  %v16110_v17 = vld [vmem:[%s21645_s1 + $0x2740] ss:$16 sps:$4 sm:$0xff]   ;;  %v16113_v18 = vld [vmem:[%s21645_s1 + $0x2748] ss:$16 sps:$4 sm:$0xff]  }
 0x4af   :  { %10546 = vmatpush1.bf16.msra.mxu0 %v16017_v19  ;;  %11621 = vmatpush1.bf16.msra.mxu1 %v16020_v20  ;;  %v16118_v19 = vld [vmem:[%s21645_s1 + $0x2764] ss:$16 sps:$4 sm:$0xff]   ;;  %v16121_v20 = vld [vmem:[%s21645_s1 + $0x276c] ss:$16 sps:$4 sm:$0xff]  }
 0x4b0   :  { %10547 = vmatprep.subr.bf16.mxu0 %v16025_v21  ;;  %11622 = vmatprep.subr.bf16.mxu1 %v16028_v22  ;;  %v16116_v21 = vld [vmem:[%s21645_s1 + $0x2760] ss:$16 sps:$4 sm:$0xff]   ;;  %v16119_v22 = vld [vmem:[%s21645_s1 + $0x2768] ss:$16 sps:$4 sm:$0xff]  }
 0x4b3   :  { %10548 = vmatpush1.bf16.msra.mxu0 %v16023_v23  ;;  %11623 = vmatpush1.bf16.msra.mxu1 %v16026_v24  ;;  %v16124_v23 = vld [vmem:[%s21645_s1 + $0x2784] ss:$16 sps:$4 sm:$0xff]   ;;  %v16127_v24 = vld [vmem:[%s21645_s1 + $0x278c] ss:$16 sps:$4 sm:$0xff]  }
 0x4b4   :  { %10549 = vmatprep.subr.bf16.mxu0 %v16031_v25  ;;  %11624 = vmatprep.subr.bf16.mxu1 %v16034_v26  ;;  %v16122_v25 = vld [vmem:[%s21645_s1 + $0x2780] ss:$16 sps:$4 sm:$0xff]   ;;  %v16125_v26 = vld [vmem:[%s21645_s1 + $0x2788] ss:$16 sps:$4 sm:$0xff]  }
 0x4b7   :  { %10550 = vmatpush1.bf16.msra.mxu0 %v16029_v27  ;;  %11625 = vmatpush1.bf16.msra.mxu1 %v16032_v28  ;;  %v16130_v27 = vld [vmem:[%s21645_s1 + $0x27a4] ss:$16 sps:$4 sm:$0xff]   ;;  %v16133_v28 = vld [vmem:[%s21645_s1 + $0x27ac] ss:$16 sps:$4 sm:$0xff]  }
 0x4b8   :  { %10551 = vmatprep.subr.bf16.mxu0 %v16037_v29  ;;  %11626 = vmatprep.subr.bf16.mxu1 %v16040_v30  ;;  %v16128_v29 = vld [vmem:[%s21645_s1 + $0x27a0] ss:$16 sps:$4 sm:$0xff]   ;;  %v16131_v30 = vld [vmem:[%s21645_s1 + $0x27a8] ss:$16 sps:$4 sm:$0xff]  }
 0x4bb   :  { %10552 = vmatpush1.bf16.msra.mxu0 %v16035_v31  ;;  %11627 = vmatpush1.bf16.msra.mxu1 %v16038_v32  ;;  %v16136_v31 = vld [vmem:[%s21645_s1 + $0x27c4] ss:$16 sps:$4 sm:$0xff]   ;;  %v16139_v32 = vld [vmem:[%s21645_s1 + $0x27cc] ss:$16 sps:$4 sm:$0xff]  }
 0x4bc   :  { %10553 = vmatprep.subr.bf16.mxu0 %v16043_v33  ;;  %11628 = vmatprep.subr.bf16.mxu1 %v16046_v34  ;;  %v16134_v33 = vld [vmem:[%s21645_s1 + $0x27c0] ss:$16 sps:$4 sm:$0xff]   ;;  %v16137_v34 = vld [vmem:[%s21645_s1 + $0x27c8] ss:$16 sps:$4 sm:$0xff]  }
 0x4bf   :  { %10554 = vmatpush1.bf16.msra.mxu0 %v16041_v35  ;;  %11629 = vmatpush1.bf16.msra.mxu1 %v16044_v36  ;;  %v16142_v35 = vld [vmem:[%s21645_s1 + $0x27e4] ss:$16 sps:$4 sm:$0xff]   ;;  %v16145_v36 = vld [vmem:[%s21645_s1 + $0x27ec] ss:$16 sps:$4 sm:$0xff]  }
 0x4c0   :  { %10566 = vmatprep.subr.bf16.mxu0 %v16052_v37  ;;  %11641 = vmatprep.subr.bf16.mxu1 %v16055_v38  ;;  %v16140_v37 = vld [vmem:[%s21645_s1 + $0x27e0] ss:$16 sps:$4 sm:$0xff]   ;;  %v16143_v38 = vld [vmem:[%s21645_s1 + $0x27e8] ss:$16 sps:$4 sm:$0xff]  }
 0x4c2   :  { %10556 = vmatmul.mubr.bf16.vlgmr.msra.gmra.mrb[0].mxu0 %v16047_v39  ;;  %11631 = vmatmul.mubr.bf16.vlgmr.msra.gmra.mrb[0].mxu1 %v16047_v39  ;;  %v16151_v39 = vld [vmem:[%s21645_s1 + $0x2804] ss:$16 sps:$4 sm:$0xff]  }
 0x4c3   :  { %10567 = vmatpush1.bf16.msra.mxu0 %v16050_v40  ;;  %11642 = vmatpush1.bf16.msra.mxu1 %v16053_v41  ;;  %v16154_v40 = vld [vmem:[%s21645_s1 + $0x280c] ss:$16 sps:$4 sm:$0xff]  }
 0x4c4   :  { %10568 = vmatprep.subr.bf16.mxu0 %v16058_v42  ;;  %11643 = vmatprep.subr.bf16.mxu1 %v16061_v43  ;;  %v16146_v41 = vld [vmem:[%s21646_s0 + $0x98] ss:$196 sps:$4 sm:$0xff]   ;;  %v16149_v42 = vld [vmem:[%s21645_s1 + $0x2800] ss:$16 sps:$4 sm:$0xff]  }
 0x4c5   :  { %10598 = vmatprep.mubr.bf16.mxu0 %v16148_v44  ;;  %11673 = vmatprep.mubr.bf16.mxu1 %v16148_v44  ;;  %v16152_v43 = vld [vmem:[%s21645_s1 + $0x2808] ss:$16 sps:$4 sm:$0xff]   ;;  %v16157_v44 = vld [vmem:[%s21645_s1 + $0x2824] ss:$16 sps:$4 sm:$0xff]  }
 0x4c7   :  { %10569 = vmatpush1.bf16.msra.mxu0 %v16056_v45  ;;  %11644 = vmatpush1.bf16.msra.mxu1 %v16059_v46  ;;  %v16160_v45 = vld [vmem:[%s21645_s1 + $0x282c] ss:$16 sps:$4 sm:$0xff]   ;;  %v16247_v46 = vld [vmem:[%s21646_s0 + $0xa4] ss:$196 sps:$4 sm:$0xff]  }
 0x4c8   :  { %10570 = vmatprep.subr.bf16.mxu0 %v16064_v47  ;;  %11645 = vmatprep.subr.bf16.mxu1 %v16067_v48  ;;  %v16155_v47 = vld [vmem:[%s21645_s1 + $0x2820] ss:$16 sps:$4 sm:$0xff]   ;;  %v16158_v48 = vld [vmem:[%s21645_s1 + $0x2828] ss:$16 sps:$4 sm:$0xff]  }
 0x4cb   :  { %10571 = vmatpush1.bf16.msra.mxu0 %v16062_v49  ;;  %11646 = vmatpush1.bf16.msra.mxu1 %v16065_v50  ;;  %v16163_v49 = vld [vmem:[%s21645_s1 + $0x2844] ss:$16 sps:$4 sm:$0xff]   ;;  %v16166_v50 = vld [vmem:[%s21645_s1 + $0x284c] ss:$16 sps:$4 sm:$0xff]  }
 0x4cc   :  { %10572 = vmatprep.subr.bf16.mxu0 %v16070_v51  ;;  %11647 = vmatprep.subr.bf16.mxu1 %v16073_v52  ;;  %v16161_v51 = vld [vmem:[%s21645_s1 + $0x2840] ss:$16 sps:$4 sm:$0xff]   ;;  %v16164_v52 = vld [vmem:[%s21645_s1 + $0x2848] ss:$16 sps:$4 sm:$0xff]  }
 0x4cf   :  { %10573 = vmatpush1.bf16.msra.mxu0 %v16068_v53  ;;  %11648 = vmatpush1.bf16.msra.mxu1 %v16071_v54  ;;  %v16169_v53 = vld [vmem:[%s21645_s1 + $0x2864] ss:$16 sps:$4 sm:$0xff]   ;;  %v16172_v54 = vld [vmem:[%s21645_s1 + $0x286c] ss:$16 sps:$4 sm:$0xff]  }
 0x4d0   :  { %10574 = vmatprep.subr.bf16.mxu0 %v16076_v55  ;;  %11649 = vmatprep.subr.bf16.mxu1 %v16079_v56  ;;  %v16167_v55 = vld [vmem:[%s21645_s1 + $0x2860] ss:$16 sps:$4 sm:$0xff]   ;;  %v16170_v56 = vld [vmem:[%s21645_s1 + $0x2868] ss:$16 sps:$4 sm:$0xff]  }
 0x4d3   :  { %10575 = vmatpush1.bf16.msra.mxu0 %v16074_v57  ;;  %11650 = vmatpush1.bf16.msra.mxu1 %v16077_v58  ;;  %v16175_v57 = vld [vmem:[%s21645_s1 + $0x2884] ss:$16 sps:$4 sm:$0xff]   ;;  %v16178_v58 = vld [vmem:[%s21645_s1 + $0x288c] ss:$16 sps:$4 sm:$0xff]  }
 0x4d4   :  { %10576 = vmatprep.subr.bf16.mxu0 %v16082_v59  ;;  %11651 = vmatprep.subr.bf16.mxu1 %v16085_v60  ;;  %v16173_v59 = vld [vmem:[%s21645_s1 + $0x2880] ss:$16 sps:$4 sm:$0xff]   ;;  %v16176_v60 = vld [vmem:[%s21645_s1 + $0x2888] ss:$16 sps:$4 sm:$0xff]  }
 0x4d7   :  { %10577 = vmatpush1.bf16.msra.mxu0 %v16080_v61  ;;  %11652 = vmatpush1.bf16.msra.mxu1 %v16083_v62  ;;  %v16181_v61 = vld [vmem:[%s21645_s1 + $0x28a4] ss:$16 sps:$4 sm:$0xff]   ;;  %v16184_v62 = vld [vmem:[%s21645_s1 + $0x28ac] ss:$16 sps:$4 sm:$0xff]  }
 0x4d8   :  { %10578 = vmatprep.subr.bf16.mxu0 %v16088_v63  ;;  %11653 = vmatprep.subr.bf16.mxu1 %v16091_v0  ;;  %v16179_v63 = vld [vmem:[%s21645_s1 + $0x28a0] ss:$16 sps:$4 sm:$0xff]   ;;  %v16182_v0 = vld [vmem:[%s21645_s1 + $0x28a8] ss:$16 sps:$4 sm:$0xff]  }
 0x4db   :  { %10579 = vmatpush1.bf16.msra.mxu0 %v16086_v1  ;;  %11654 = vmatpush1.bf16.msra.mxu1 %v16089_v2  ;;  %v16187_v1 = vld [vmem:[%s21645_s1 + $0x28c4] ss:$16 sps:$4 sm:$0xff]   ;;  %v16190_v2 = vld [vmem:[%s21645_s1 + $0x28cc] ss:$16 sps:$4 sm:$0xff]  }
 0x4dc   :  { %10580 = vmatprep.subr.bf16.mxu0 %v16094_v3  ;;  %11655 = vmatprep.subr.bf16.mxu1 %v16097_v4  ;;  %v16185_v3 = vld [vmem:[%s21645_s1 + $0x28c0] ss:$16 sps:$4 sm:$0xff]   ;;  %v16188_v4 = vld [vmem:[%s21645_s1 + $0x28c8] ss:$16 sps:$4 sm:$0xff]  }
 0x4df   :  { %10581 = vmatpush1.bf16.msra.mxu0 %v16092_v5  ;;  %11656 = vmatpush1.bf16.msra.mxu1 %v16095_v6  ;;  %v16193_v5 = vld [vmem:[%s21645_s1 + $0x28e4] ss:$16 sps:$4 sm:$0xff]   ;;  %v16196_v6 = vld [vmem:[%s21645_s1 + $0x28ec] ss:$16 sps:$4 sm:$0xff]  }
 0x4e0   :  { %10582 = vmatprep.subr.bf16.mxu0 %v16100_v7  ;;  %11657 = vmatprep.subr.bf16.mxu1 %v16103_v8  ;;  %v16191_v7 = vld [vmem:[%s21645_s1 + $0x28e0] ss:$16 sps:$4 sm:$0xff]   ;;  %v16194_v8 = vld [vmem:[%s21645_s1 + $0x28e8] ss:$16 sps:$4 sm:$0xff]  }
 0x4e3   :  { %10583 = vmatpush1.bf16.msra.mxu0 %v16098_v9  ;;  %11658 = vmatpush1.bf16.msra.mxu1 %v16101_v10  ;;  %v16199_v9 = vld [vmem:[%s21645_s1 + $0x2904] ss:$16 sps:$4 sm:$0xff]   ;;  %v16202_v10 = vld [vmem:[%s21645_s1 + $0x290c] ss:$16 sps:$4 sm:$0xff]  }
 0x4e4   :  { %10584 = vmatprep.subr.bf16.mxu0 %v16106_v11  ;;  %11659 = vmatprep.subr.bf16.mxu1 %v16109_v12  ;;  %v16197_v11 = vld [vmem:[%s21645_s1 + $0x2900] ss:$16 sps:$4 sm:$0xff]   ;;  %v16200_v12 = vld [vmem:[%s21645_s1 + $0x2908] ss:$16 sps:$4 sm:$0xff]  }
 0x4e7   :  { %10585 = vmatpush1.bf16.msra.mxu0 %v16104_v13  ;;  %11660 = vmatpush1.bf16.msra.mxu1 %v16107_v14  ;;  %v16205_v13 = vld [vmem:[%s21645_s1 + $0x2924] ss:$16 sps:$4 sm:$0xff]   ;;  %v16208_v14 = vld [vmem:[%s21645_s1 + $0x292c] ss:$16 sps:$4 sm:$0xff]  }
 0x4e8   :  { %10586 = vmatprep.subr.bf16.mxu0 %v16112_v15  ;;  %11661 = vmatprep.subr.bf16.mxu1 %v16115_v16  ;;  %v16203_v15 = vld [vmem:[%s21645_s1 + $0x2920] ss:$16 sps:$4 sm:$0xff]   ;;  %v16206_v16 = vld [vmem:[%s21645_s1 + $0x2928] ss:$16 sps:$4 sm:$0xff]  }
 0x4eb   :  { %10587 = vmatpush1.bf16.msra.mxu0 %v16110_v17  ;;  %11662 = vmatpush1.bf16.msra.mxu1 %v16113_v18  ;;  %v16211_v17 = vld [vmem:[%s21645_s1 + $0x2944] ss:$16 sps:$4 sm:$0xff]   ;;  %v16214_v18 = vld [vmem:[%s21645_s1 + $0x294c] ss:$16 sps:$4 sm:$0xff]  }
 0x4ec   :  { %10588 = vmatprep.subr.bf16.mxu0 %v16118_v19  ;;  %11663 = vmatprep.subr.bf16.mxu1 %v16121_v20  ;;  %v16209_v19 = vld [vmem:[%s21645_s1 + $0x2940] ss:$16 sps:$4 sm:$0xff]   ;;  %v16212_v20 = vld [vmem:[%s21645_s1 + $0x2948] ss:$16 sps:$4 sm:$0xff]  }
 0x4ef   :  { %10589 = vmatpush1.bf16.msra.mxu0 %v16116_v21  ;;  %11664 = vmatpush1.bf16.msra.mxu1 %v16119_v22  ;;  %v16217_v21 = vld [vmem:[%s21645_s1 + $0x2964] ss:$16 sps:$4 sm:$0xff]   ;;  %v16220_v22 = vld [vmem:[%s21645_s1 + $0x296c] ss:$16 sps:$4 sm:$0xff]  }
 0x4f0   :  { %10590 = vmatprep.subr.bf16.mxu0 %v16124_v23  ;;  %11665 = vmatprep.subr.bf16.mxu1 %v16127_v24  ;;  %v16215_v23 = vld [vmem:[%s21645_s1 + $0x2960] ss:$16 sps:$4 sm:$0xff]   ;;  %v16218_v24 = vld [vmem:[%s21645_s1 + $0x2968] ss:$16 sps:$4 sm:$0xff]  }
 0x4f3   :  { %10591 = vmatpush1.bf16.msra.mxu0 %v16122_v25  ;;  %11666 = vmatpush1.bf16.msra.mxu1 %v16125_v26  ;;  %v16223_v25 = vld [vmem:[%s21645_s1 + $0x2984] ss:$16 sps:$4 sm:$0xff]   ;;  %v16226_v26 = vld [vmem:[%s21645_s1 + $0x298c] ss:$16 sps:$4 sm:$0xff]  }
 0x4f4   :  { %10592 = vmatprep.subr.bf16.mxu0 %v16130_v27  ;;  %11667 = vmatprep.subr.bf16.mxu1 %v16133_v28  ;;  %v16221_v27 = vld [vmem:[%s21645_s1 + $0x2980] ss:$16 sps:$4 sm:$0xff]   ;;  %v16224_v28 = vld [vmem:[%s21645_s1 + $0x2988] ss:$16 sps:$4 sm:$0xff]  }
 0x4f7   :  { %10593 = vmatpush1.bf16.msra.mxu0 %v16128_v29  ;;  %11668 = vmatpush1.bf16.msra.mxu1 %v16131_v30  ;;  %v16229_v29 = vld [vmem:[%s21645_s1 + $0x29a4] ss:$16 sps:$4 sm:$0xff]   ;;  %v16232_v30 = vld [vmem:[%s21645_s1 + $0x29ac] ss:$16 sps:$4 sm:$0xff]  }
 0x4f8   :  { %10594 = vmatprep.subr.bf16.mxu0 %v16136_v31  ;;  %11669 = vmatprep.subr.bf16.mxu1 %v16139_v32  ;;  %v16227_v31 = vld [vmem:[%s21645_s1 + $0x29a0] ss:$16 sps:$4 sm:$0xff]   ;;  %v16230_v32 = vld [vmem:[%s21645_s1 + $0x29a8] ss:$16 sps:$4 sm:$0xff]  }
 0x4fb   :  { %10595 = vmatpush1.bf16.msra.mxu0 %v16134_v33  ;;  %11670 = vmatpush1.bf16.msra.mxu1 %v16137_v34  ;;  %v16235_v33 = vld [vmem:[%s21645_s1 + $0x29c4] ss:$16 sps:$4 sm:$0xff]   ;;  %v16238_v34 = vld [vmem:[%s21645_s1 + $0x29cc] ss:$16 sps:$4 sm:$0xff]  }
 0x4fc   :  { %10596 = vmatprep.subr.bf16.mxu0 %v16142_v35  ;;  %11671 = vmatprep.subr.bf16.mxu1 %v16145_v36  ;;  %v16233_v35 = vld [vmem:[%s21645_s1 + $0x29c0] ss:$16 sps:$4 sm:$0xff]   ;;  %v16236_v36 = vld [vmem:[%s21645_s1 + $0x29c8] ss:$16 sps:$4 sm:$0xff]  }
 0x4ff   :  { %10597 = vmatpush1.bf16.msra.mxu0 %v16140_v37  ;;  %11672 = vmatpush1.bf16.msra.mxu1 %v16143_v38  ;;  %v16241_v37 = vld [vmem:[%s21645_s1 + $0x29e4] ss:$16 sps:$4 sm:$0xff]   ;;  %v16244_v38 = vld [vmem:[%s21645_s1 + $0x29ec] ss:$16 sps:$4 sm:$0xff]  }
 0x500   :  { %10609 = vmatprep.subr.bf16.mxu0 %v16151_v39  ;;  %11684 = vmatprep.subr.bf16.mxu1 %v16154_v40  ;;  %v16239_v39 = vld [vmem:[%s21645_s1 + $0x29e0] ss:$16 sps:$4 sm:$0xff]   ;;  %v16242_v40 = vld [vmem:[%s21645_s1 + $0x29e8] ss:$16 sps:$4 sm:$0xff]  }
 0x502   :  { %10599 = vmatmul.mubr.bf16.vlgmr.msra.gmra.mrb[0].mxu0 %v16146_v41  ;;  %11674 = vmatmul.mubr.bf16.vlgmr.msra.gmra.mrb[0].mxu1 %v16146_v41  ;;  %v16250_v41 = vld [vmem:[%s21645_s1 + $0x2a04] ss:$16 sps:$4 sm:$0xff]  }
 0x503   :  { %10610 = vmatpush1.bf16.msra.mxu0 %v16149_v42  ;;  %11685 = vmatpush1.bf16.msra.mxu1 %v16152_v43  ;;  %v16253_v42 = vld [vmem:[%s21645_s1 + $0x2a0c] ss:$16 sps:$4 sm:$0xff]   ;;  %v16245_v43 = vld [vmem:[%s21646_s0 + $0xa0] ss:$196 sps:$4 sm:$0xff]  }
 0x504   :  { %10611 = vmatprep.subr.bf16.mxu0 %v16157_v44  ;;  %11686 = vmatprep.subr.bf16.mxu1 %v16160_v45  ;;  %v16248_v44 = vld [vmem:[%s21645_s1 + $0x2a00] ss:$16 sps:$4 sm:$0xff]   ;;  %v16251_v45 = vld [vmem:[%s21645_s1 + $0x2a08] ss:$16 sps:$4 sm:$0xff]  }
 0x505   :  { %10641 = vmatprep.mubr.bf16.mxu0 %v16247_v46  ;;  %11716 = vmatprep.mubr.bf16.mxu1 %v16247_v46  ;;  %v16256_v46 = vld [vmem:[%s21645_s1 + $0x2a24] ss:$16 sps:$4 sm:$0xff]  }
 0x507   :  { %10612 = vmatpush1.bf16.msra.mxu0 %v16155_v47  ;;  %11687 = vmatpush1.bf16.msra.mxu1 %v16158_v48  ;;  %v16259_v47 = vld [vmem:[%s21645_s1 + $0x2a2c] ss:$16 sps:$4 sm:$0xff]  }
 0x508   :  { %10613 = vmatprep.subr.bf16.mxu0 %v16163_v49  ;;  %11688 = vmatprep.subr.bf16.mxu1 %v16166_v50  ;;  %v16346_v48 = vld [vmem:[%s21646_s0 + $0xac] ss:$196 sps:$4 sm:$0xff]   ;;  %v16257_v50 = vld [vmem:[%s21645_s1 + $0x2a28] ss:$16 sps:$4 sm:$0xff]  }
 0x509   :  { %v16254_v49 = vld [vmem:[%s21645_s1 + $0x2a20] ss:$16 sps:$4 sm:$0xff]  }
 0x50b   :  { %10614 = vmatpush1.bf16.msra.mxu0 %v16161_v51  ;;  %11689 = vmatpush1.bf16.msra.mxu1 %v16164_v52  ;;  %v16262_v51 = vld [vmem:[%s21645_s1 + $0x2a44] ss:$16 sps:$4 sm:$0xff]   ;;  %v16265_v52 = vld [vmem:[%s21645_s1 + $0x2a4c] ss:$16 sps:$4 sm:$0xff]  }
 0x50c   :  { %10615 = vmatprep.subr.bf16.mxu0 %v16169_v53  ;;  %11690 = vmatprep.subr.bf16.mxu1 %v16172_v54  ;;  %v16260_v53 = vld [vmem:[%s21645_s1 + $0x2a40] ss:$16 sps:$4 sm:$0xff]   ;;  %v16263_v54 = vld [vmem:[%s21645_s1 + $0x2a48] ss:$16 sps:$4 sm:$0xff]  }
 0x50f   :  { %10616 = vmatpush1.bf16.msra.mxu0 %v16167_v55  ;;  %11691 = vmatpush1.bf16.msra.mxu1 %v16170_v56  ;;  %v16268_v55 = vld [vmem:[%s21645_s1 + $0x2a64] ss:$16 sps:$4 sm:$0xff]   ;;  %v16271_v56 = vld [vmem:[%s21645_s1 + $0x2a6c] ss:$16 sps:$4 sm:$0xff]  }
 0x510   :  { %10617 = vmatprep.subr.bf16.mxu0 %v16175_v57  ;;  %11692 = vmatprep.subr.bf16.mxu1 %v16178_v58  ;;  %v16266_v57 = vld [vmem:[%s21645_s1 + $0x2a60] ss:$16 sps:$4 sm:$0xff]   ;;  %v16269_v58 = vld [vmem:[%s21645_s1 + $0x2a68] ss:$16 sps:$4 sm:$0xff]  }
 0x513   :  { %10618 = vmatpush1.bf16.msra.mxu0 %v16173_v59  ;;  %11693 = vmatpush1.bf16.msra.mxu1 %v16176_v60  ;;  %v16274_v59 = vld [vmem:[%s21645_s1 + $0x2a84] ss:$16 sps:$4 sm:$0xff]   ;;  %v16277_v60 = vld [vmem:[%s21645_s1 + $0x2a8c] ss:$16 sps:$4 sm:$0xff]  }
 0x514   :  { %10619 = vmatprep.subr.bf16.mxu0 %v16181_v61  ;;  %11694 = vmatprep.subr.bf16.mxu1 %v16184_v62  ;;  %v16272_v61 = vld [vmem:[%s21645_s1 + $0x2a80] ss:$16 sps:$4 sm:$0xff]   ;;  %v16275_v62 = vld [vmem:[%s21645_s1 + $0x2a88] ss:$16 sps:$4 sm:$0xff]  }
 0x517   :  { %10620 = vmatpush1.bf16.msra.mxu0 %v16179_v63  ;;  %11695 = vmatpush1.bf16.msra.mxu1 %v16182_v0  ;;  %v16280_v63 = vld [vmem:[%s21645_s1 + $0x2aa4] ss:$16 sps:$4 sm:$0xff]   ;;  %v16283_v0 = vld [vmem:[%s21645_s1 + $0x2aac] ss:$16 sps:$4 sm:$0xff]  }
 0x518   :  { %10621 = vmatprep.subr.bf16.mxu0 %v16187_v1  ;;  %11696 = vmatprep.subr.bf16.mxu1 %v16190_v2  ;;  %v16278_v1 = vld [vmem:[%s21645_s1 + $0x2aa0] ss:$16 sps:$4 sm:$0xff]   ;;  %v16281_v2 = vld [vmem:[%s21645_s1 + $0x2aa8] ss:$16 sps:$4 sm:$0xff]  }
 0x51b   :  { %10622 = vmatpush1.bf16.msra.mxu0 %v16185_v3  ;;  %11697 = vmatpush1.bf16.msra.mxu1 %v16188_v4  ;;  %v16286_v3 = vld [vmem:[%s21645_s1 + $0x2ac4] ss:$16 sps:$4 sm:$0xff]   ;;  %v16289_v4 = vld [vmem:[%s21645_s1 + $0x2acc] ss:$16 sps:$4 sm:$0xff]  }
 0x51c   :  { %10623 = vmatprep.subr.bf16.mxu0 %v16193_v5  ;;  %11698 = vmatprep.subr.bf16.mxu1 %v16196_v6  ;;  %v16284_v5 = vld [vmem:[%s21645_s1 + $0x2ac0] ss:$16 sps:$4 sm:$0xff]   ;;  %v16287_v6 = vld [vmem:[%s21645_s1 + $0x2ac8] ss:$16 sps:$4 sm:$0xff]  }
 0x51f   :  { %10624 = vmatpush1.bf16.msra.mxu0 %v16191_v7  ;;  %11699 = vmatpush1.bf16.msra.mxu1 %v16194_v8  ;;  %v16292_v7 = vld [vmem:[%s21645_s1 + $0x2ae4] ss:$16 sps:$4 sm:$0xff]   ;;  %v16295_v8 = vld [vmem:[%s21645_s1 + $0x2aec] ss:$16 sps:$4 sm:$0xff]  }
 0x520   :  { %10625 = vmatprep.subr.bf16.mxu0 %v16199_v9  ;;  %11700 = vmatprep.subr.bf16.mxu1 %v16202_v10  ;;  %v16290_v9 = vld [vmem:[%s21645_s1 + $0x2ae0] ss:$16 sps:$4 sm:$0xff]   ;;  %v16293_v10 = vld [vmem:[%s21645_s1 + $0x2ae8] ss:$16 sps:$4 sm:$0xff]  }
 0x523   :  { %10626 = vmatpush1.bf16.msra.mxu0 %v16197_v11  ;;  %11701 = vmatpush1.bf16.msra.mxu1 %v16200_v12  ;;  %v16298_v11 = vld [vmem:[%s21645_s1 + $0x2b04] ss:$16 sps:$4 sm:$0xff]   ;;  %v16301_v12 = vld [vmem:[%s21645_s1 + $0x2b0c] ss:$16 sps:$4 sm:$0xff]  }
 0x524   :  { %10627 = vmatprep.subr.bf16.mxu0 %v16205_v13  ;;  %11702 = vmatprep.subr.bf16.mxu1 %v16208_v14  ;;  %v16296_v13 = vld [vmem:[%s21645_s1 + $0x2b00] ss:$16 sps:$4 sm:$0xff]   ;;  %v16299_v14 = vld [vmem:[%s21645_s1 + $0x2b08] ss:$16 sps:$4 sm:$0xff]  }
 0x527   :  { %10628 = vmatpush1.bf16.msra.mxu0 %v16203_v15  ;;  %11703 = vmatpush1.bf16.msra.mxu1 %v16206_v16  ;;  %v16304_v15 = vld [vmem:[%s21645_s1 + $0x2b24] ss:$16 sps:$4 sm:$0xff]   ;;  %v16307_v16 = vld [vmem:[%s21645_s1 + $0x2b2c] ss:$16 sps:$4 sm:$0xff]  }
 0x528   :  { %10629 = vmatprep.subr.bf16.mxu0 %v16211_v17  ;;  %11704 = vmatprep.subr.bf16.mxu1 %v16214_v18  ;;  %v16302_v17 = vld [vmem:[%s21645_s1 + $0x2b20] ss:$16 sps:$4 sm:$0xff]   ;;  %v16305_v18 = vld [vmem:[%s21645_s1 + $0x2b28] ss:$16 sps:$4 sm:$0xff]  }
 0x52b   :  { %10630 = vmatpush1.bf16.msra.mxu0 %v16209_v19  ;;  %11705 = vmatpush1.bf16.msra.mxu1 %v16212_v20  ;;  %v16310_v19 = vld [vmem:[%s21645_s1 + $0x2b44] ss:$16 sps:$4 sm:$0xff]   ;;  %v16313_v20 = vld [vmem:[%s21645_s1 + $0x2b4c] ss:$16 sps:$4 sm:$0xff]  }
 0x52c   :  { %10631 = vmatprep.subr.bf16.mxu0 %v16217_v21  ;;  %11706 = vmatprep.subr.bf16.mxu1 %v16220_v22  ;;  %v16308_v21 = vld [vmem:[%s21645_s1 + $0x2b40] ss:$16 sps:$4 sm:$0xff]   ;;  %v16311_v22 = vld [vmem:[%s21645_s1 + $0x2b48] ss:$16 sps:$4 sm:$0xff]  }
 0x52f   :  { %10632 = vmatpush1.bf16.msra.mxu0 %v16215_v23  ;;  %11707 = vmatpush1.bf16.msra.mxu1 %v16218_v24  ;;  %v16316_v23 = vld [vmem:[%s21645_s1 + $0x2b64] ss:$16 sps:$4 sm:$0xff]   ;;  %v16319_v24 = vld [vmem:[%s21645_s1 + $0x2b6c] ss:$16 sps:$4 sm:$0xff]  }
 0x530   :  { %10633 = vmatprep.subr.bf16.mxu0 %v16223_v25  ;;  %11708 = vmatprep.subr.bf16.mxu1 %v16226_v26  ;;  %v16314_v25 = vld [vmem:[%s21645_s1 + $0x2b60] ss:$16 sps:$4 sm:$0xff]   ;;  %v16317_v26 = vld [vmem:[%s21645_s1 + $0x2b68] ss:$16 sps:$4 sm:$0xff]  }
 0x533   :  { %10634 = vmatpush1.bf16.msra.mxu0 %v16221_v27  ;;  %11709 = vmatpush1.bf16.msra.mxu1 %v16224_v28  ;;  %v16322_v27 = vld [vmem:[%s21645_s1 + $0x2b84] ss:$16 sps:$4 sm:$0xff]   ;;  %v16325_v28 = vld [vmem:[%s21645_s1 + $0x2b8c] ss:$16 sps:$4 sm:$0xff]  }
 0x534   :  { %10635 = vmatprep.subr.bf16.mxu0 %v16229_v29  ;;  %11710 = vmatprep.subr.bf16.mxu1 %v16232_v30  ;;  %v16320_v29 = vld [vmem:[%s21645_s1 + $0x2b80] ss:$16 sps:$4 sm:$0xff]   ;;  %v16323_v30 = vld [vmem:[%s21645_s1 + $0x2b88] ss:$16 sps:$4 sm:$0xff]  }
 0x537   :  { %10636 = vmatpush1.bf16.msra.mxu0 %v16227_v31  ;;  %11711 = vmatpush1.bf16.msra.mxu1 %v16230_v32  ;;  %v16328_v31 = vld [vmem:[%s21645_s1 + $0x2ba4] ss:$16 sps:$4 sm:$0xff]   ;;  %v16331_v32 = vld [vmem:[%s21645_s1 + $0x2bac] ss:$16 sps:$4 sm:$0xff]  }
 0x538   :  { %10637 = vmatprep.subr.bf16.mxu0 %v16235_v33  ;;  %11712 = vmatprep.subr.bf16.mxu1 %v16238_v34  ;;  %v16326_v33 = vld [vmem:[%s21645_s1 + $0x2ba0] ss:$16 sps:$4 sm:$0xff]   ;;  %v16329_v34 = vld [vmem:[%s21645_s1 + $0x2ba8] ss:$16 sps:$4 sm:$0xff]  }
 0x53b   :  { %10638 = vmatpush1.bf16.msra.mxu0 %v16233_v35  ;;  %11713 = vmatpush1.bf16.msra.mxu1 %v16236_v36  ;;  %v16334_v35 = vld [vmem:[%s21645_s1 + $0x2bc4] ss:$16 sps:$4 sm:$0xff]   ;;  %v16337_v36 = vld [vmem:[%s21645_s1 + $0x2bcc] ss:$16 sps:$4 sm:$0xff]  }
 0x53c   :  { %10639 = vmatprep.subr.bf16.mxu0 %v16241_v37  ;;  %11714 = vmatprep.subr.bf16.mxu1 %v16244_v38  ;;  %v16332_v37 = vld [vmem:[%s21645_s1 + $0x2bc0] ss:$16 sps:$4 sm:$0xff]   ;;  %v16335_v38 = vld [vmem:[%s21645_s1 + $0x2bc8] ss:$16 sps:$4 sm:$0xff]  }
 0x53f   :  { %10640 = vmatpush1.bf16.msra.mxu0 %v16239_v39  ;;  %11715 = vmatpush1.bf16.msra.mxu1 %v16242_v40  ;;  %v16340_v39 = vld [vmem:[%s21645_s1 + $0x2be4] ss:$16 sps:$4 sm:$0xff]   ;;  %v16343_v40 = vld [vmem:[%s21645_s1 + $0x2bec] ss:$16 sps:$4 sm:$0xff]  }
 0x540   :  { %10652 = vmatprep.subr.bf16.mxu0 %v16250_v41  ;;  %11727 = vmatprep.subr.bf16.mxu1 %v16253_v42  ;;  %v16338_v41 = vld [vmem:[%s21645_s1 + $0x2be0] ss:$16 sps:$4 sm:$0xff]   ;;  %v16341_v42 = vld [vmem:[%s21645_s1 + $0x2be8] ss:$16 sps:$4 sm:$0xff]  }
 0x542   :  { %10642 = vmatmul.mubr.bf16.vlgmr.msra.gmra.mrb[0].mxu0 %v16245_v43  ;;  %11717 = vmatmul.mubr.bf16.vlgmr.msra.gmra.mrb[0].mxu1 %v16245_v43  ;;  %v16349_v43 = vld [vmem:[%s21645_s1 + $0x2c04] ss:$16 sps:$4 sm:$0xff]  }
 0x543   :  { %10653 = vmatpush1.bf16.msra.mxu0 %v16248_v44  ;;  %11728 = vmatpush1.bf16.msra.mxu1 %v16251_v45  ;;  %v16352_v44 = vld [vmem:[%s21645_s1 + $0x2c0c] ss:$16 sps:$4 sm:$0xff]  }
 0x544   :  { %10654 = vmatprep.subr.bf16.mxu0 %v16256_v46  ;;  %11729 = vmatprep.subr.bf16.mxu1 %v16259_v47  ;;  %v16344_v45 = vld [vmem:[%s21646_s0 + $0xa8] ss:$196 sps:$4 sm:$0xff]   ;;  %v16347_v46 = vld [vmem:[%s21645_s1 + $0x2c00] ss:$16 sps:$4 sm:$0xff]  }
 0x545   :  { %10684 = vmatprep.mubr.bf16.mxu0 %v16346_v48  ;;  %11759 = vmatprep.mubr.bf16.mxu1 %v16346_v48  ;;  %v16350_v47 = vld [vmem:[%s21645_s1 + $0x2c08] ss:$16 sps:$4 sm:$0xff]   ;;  %v16355_v48 = vld [vmem:[%s21645_s1 + $0x2c24] ss:$16 sps:$4 sm:$0xff]  }
 0x547   :  { %10655 = vmatpush1.bf16.msra.mxu0 %v16254_v49  ;;  %11730 = vmatpush1.bf16.msra.mxu1 %v16257_v50  ;;  %v16358_v49 = vld [vmem:[%s21645_s1 + $0x2c2c] ss:$16 sps:$4 sm:$0xff]   ;;  %v16445_v50 = vld [vmem:[%s21646_s0 + $0xb4] ss:$196 sps:$4 sm:$0xff]  }
 0x548   :  { %10656 = vmatprep.subr.bf16.mxu0 %v16262_v51  ;;  %11731 = vmatprep.subr.bf16.mxu1 %v16265_v52  ;;  %v16353_v51 = vld [vmem:[%s21645_s1 + $0x2c20] ss:$16 sps:$4 sm:$0xff]   ;;  %v16356_v52 = vld [vmem:[%s21645_s1 + $0x2c28] ss:$16 sps:$4 sm:$0xff]  }
 0x54b   :  { %10657 = vmatpush1.bf16.msra.mxu0 %v16260_v53  ;;  %11732 = vmatpush1.bf16.msra.mxu1 %v16263_v54  ;;  %v16361_v53 = vld [vmem:[%s21645_s1 + $0x2c44] ss:$16 sps:$4 sm:$0xff]   ;;  %v16364_v54 = vld [vmem:[%s21645_s1 + $0x2c4c] ss:$16 sps:$4 sm:$0xff]  }
 0x54c   :  { %10658 = vmatprep.subr.bf16.mxu0 %v16268_v55  ;;  %11733 = vmatprep.subr.bf16.mxu1 %v16271_v56  ;;  %v16359_v55 = vld [vmem:[%s21645_s1 + $0x2c40] ss:$16 sps:$4 sm:$0xff]   ;;  %v16362_v56 = vld [vmem:[%s21645_s1 + $0x2c48] ss:$16 sps:$4 sm:$0xff]  }
 0x54f   :  { %10659 = vmatpush1.bf16.msra.mxu0 %v16266_v57  ;;  %11734 = vmatpush1.bf16.msra.mxu1 %v16269_v58  ;;  %v16367_v57 = vld [vmem:[%s21645_s1 + $0x2c64] ss:$16 sps:$4 sm:$0xff]   ;;  %v16370_v58 = vld [vmem:[%s21645_s1 + $0x2c6c] ss:$16 sps:$4 sm:$0xff]  }
 0x550   :  { %10660 = vmatprep.subr.bf16.mxu0 %v16274_v59  ;;  %11735 = vmatprep.subr.bf16.mxu1 %v16277_v60  ;;  %v16365_v59 = vld [vmem:[%s21645_s1 + $0x2c60] ss:$16 sps:$4 sm:$0xff]   ;;  %v16368_v60 = vld [vmem:[%s21645_s1 + $0x2c68] ss:$16 sps:$4 sm:$0xff]  }
 0x553   :  { %10661 = vmatpush1.bf16.msra.mxu0 %v16272_v61  ;;  %11736 = vmatpush1.bf16.msra.mxu1 %v16275_v62  ;;  %v16373_v61 = vld [vmem:[%s21645_s1 + $0x2c84] ss:$16 sps:$4 sm:$0xff]   ;;  %v16376_v62 = vld [vmem:[%s21645_s1 + $0x2c8c] ss:$16 sps:$4 sm:$0xff]  }
 0x554   :  { %10662 = vmatprep.subr.bf16.mxu0 %v16280_v63  ;;  %11737 = vmatprep.subr.bf16.mxu1 %v16283_v0  ;;  %v16371_v63 = vld [vmem:[%s21645_s1 + $0x2c80] ss:$16 sps:$4 sm:$0xff]   ;;  %v16374_v0 = vld [vmem:[%s21645_s1 + $0x2c88] ss:$16 sps:$4 sm:$0xff]  }
 0x557   :  { %10663 = vmatpush1.bf16.msra.mxu0 %v16278_v1  ;;  %11738 = vmatpush1.bf16.msra.mxu1 %v16281_v2  ;;  %v16379_v1 = vld [vmem:[%s21645_s1 + $0x2ca4] ss:$16 sps:$4 sm:$0xff]   ;;  %v16382_v2 = vld [vmem:[%s21645_s1 + $0x2cac] ss:$16 sps:$4 sm:$0xff]  }
 0x558   :  { %10664 = vmatprep.subr.bf16.mxu0 %v16286_v3  ;;  %11739 = vmatprep.subr.bf16.mxu1 %v16289_v4  ;;  %v16377_v3 = vld [vmem:[%s21645_s1 + $0x2ca0] ss:$16 sps:$4 sm:$0xff]   ;;  %v16380_v4 = vld [vmem:[%s21645_s1 + $0x2ca8] ss:$16 sps:$4 sm:$0xff]  }
 0x55b   :  { %10665 = vmatpush1.bf16.msra.mxu0 %v16284_v5  ;;  %11740 = vmatpush1.bf16.msra.mxu1 %v16287_v6  ;;  %v16385_v5 = vld [vmem:[%s21645_s1 + $0x2cc4] ss:$16 sps:$4 sm:$0xff]   ;;  %v16388_v6 = vld [vmem:[%s21645_s1 + $0x2ccc] ss:$16 sps:$4 sm:$0xff]  }
 0x55c   :  { %10666 = vmatprep.subr.bf16.mxu0 %v16292_v7  ;;  %11741 = vmatprep.subr.bf16.mxu1 %v16295_v8  ;;  %v16383_v7 = vld [vmem:[%s21645_s1 + $0x2cc0] ss:$16 sps:$4 sm:$0xff]   ;;  %v16386_v8 = vld [vmem:[%s21645_s1 + $0x2cc8] ss:$16 sps:$4 sm:$0xff]  }
 0x55f   :  { %10667 = vmatpush1.bf16.msra.mxu0 %v16290_v9  ;;  %11742 = vmatpush1.bf16.msra.mxu1 %v16293_v10  ;;  %v16391_v9 = vld [vmem:[%s21645_s1 + $0x2ce4] ss:$16 sps:$4 sm:$0xff]   ;;  %v16394_v10 = vld [vmem:[%s21645_s1 + $0x2cec] ss:$16 sps:$4 sm:$0xff]  }
 0x560   :  { %10668 = vmatprep.subr.bf16.mxu0 %v16298_v11  ;;  %11743 = vmatprep.subr.bf16.mxu1 %v16301_v12  ;;  %v16389_v11 = vld [vmem:[%s21645_s1 + $0x2ce0] ss:$16 sps:$4 sm:$0xff]   ;;  %v16392_v12 = vld [vmem:[%s21645_s1 + $0x2ce8] ss:$16 sps:$4 sm:$0xff]  }
 0x563   :  { %10669 = vmatpush1.bf16.msra.mxu0 %v16296_v13  ;;  %11744 = vmatpush1.bf16.msra.mxu1 %v16299_v14  ;;  %v16397_v13 = vld [vmem:[%s21645_s1 + $0x2d04] ss:$16 sps:$4 sm:$0xff]   ;;  %v16400_v14 = vld [vmem:[%s21645_s1 + $0x2d0c] ss:$16 sps:$4 sm:$0xff]  }
 0x564   :  { %10670 = vmatprep.subr.bf16.mxu0 %v16304_v15  ;;  %11745 = vmatprep.subr.bf16.mxu1 %v16307_v16  ;;  %v16395_v15 = vld [vmem:[%s21645_s1 + $0x2d00] ss:$16 sps:$4 sm:$0xff]   ;;  %v16398_v16 = vld [vmem:[%s21645_s1 + $0x2d08] ss:$16 sps:$4 sm:$0xff]  }
 0x567   :  { %10671 = vmatpush1.bf16.msra.mxu0 %v16302_v17  ;;  %11746 = vmatpush1.bf16.msra.mxu1 %v16305_v18  ;;  %v16403_v17 = vld [vmem:[%s21645_s1 + $0x2d24] ss:$16 sps:$4 sm:$0xff]   ;;  %v16406_v18 = vld [vmem:[%s21645_s1 + $0x2d2c] ss:$16 sps:$4 sm:$0xff]  }
 0x568   :  { %10672 = vmatprep.subr.bf16.mxu0 %v16310_v19  ;;  %11747 = vmatprep.subr.bf16.mxu1 %v16313_v20  ;;  %v16401_v19 = vld [vmem:[%s21645_s1 + $0x2d20] ss:$16 sps:$4 sm:$0xff]   ;;  %v16404_v20 = vld [vmem:[%s21645_s1 + $0x2d28] ss:$16 sps:$4 sm:$0xff]  }
 0x56b   :  { %10673 = vmatpush1.bf16.msra.mxu0 %v16308_v21  ;;  %11748 = vmatpush1.bf16.msra.mxu1 %v16311_v22  ;;  %v16409_v21 = vld [vmem:[%s21645_s1 + $0x2d44] ss:$16 sps:$4 sm:$0xff]   ;;  %v16412_v22 = vld [vmem:[%s21645_s1 + $0x2d4c] ss:$16 sps:$4 sm:$0xff]  }
 0x56c   :  { %10674 = vmatprep.subr.bf16.mxu0 %v16316_v23  ;;  %11749 = vmatprep.subr.bf16.mxu1 %v16319_v24  ;;  %v16407_v23 = vld [vmem:[%s21645_s1 + $0x2d40] ss:$16 sps:$4 sm:$0xff]   ;;  %v16410_v24 = vld [vmem:[%s21645_s1 + $0x2d48] ss:$16 sps:$4 sm:$0xff]  }
 0x56f   :  { %10675 = vmatpush1.bf16.msra.mxu0 %v16314_v25  ;;  %11750 = vmatpush1.bf16.msra.mxu1 %v16317_v26  ;;  %v16415_v25 = vld [vmem:[%s21645_s1 + $0x2d64] ss:$16 sps:$4 sm:$0xff]   ;;  %v16418_v26 = vld [vmem:[%s21645_s1 + $0x2d6c] ss:$16 sps:$4 sm:$0xff]  }
 0x570   :  { %10676 = vmatprep.subr.bf16.mxu0 %v16322_v27  ;;  %11751 = vmatprep.subr.bf16.mxu1 %v16325_v28  ;;  %v16413_v27 = vld [vmem:[%s21645_s1 + $0x2d60] ss:$16 sps:$4 sm:$0xff]   ;;  %v16416_v28 = vld [vmem:[%s21645_s1 + $0x2d68] ss:$16 sps:$4 sm:$0xff]  }
 0x573   :  { %10677 = vmatpush1.bf16.msra.mxu0 %v16320_v29  ;;  %11752 = vmatpush1.bf16.msra.mxu1 %v16323_v30  ;;  %v16421_v29 = vld [vmem:[%s21645_s1 + $0x2d84] ss:$16 sps:$4 sm:$0xff]   ;;  %v16424_v30 = vld [vmem:[%s21645_s1 + $0x2d8c] ss:$16 sps:$4 sm:$0xff]  }
 0x574   :  { %10678 = vmatprep.subr.bf16.mxu0 %v16328_v31  ;;  %11753 = vmatprep.subr.bf16.mxu1 %v16331_v32  ;;  %v16419_v31 = vld [vmem:[%s21645_s1 + $0x2d80] ss:$16 sps:$4 sm:$0xff]   ;;  %v16422_v32 = vld [vmem:[%s21645_s1 + $0x2d88] ss:$16 sps:$4 sm:$0xff]  }
 0x577   :  { %10679 = vmatpush1.bf16.msra.mxu0 %v16326_v33  ;;  %11754 = vmatpush1.bf16.msra.mxu1 %v16329_v34  ;;  %v16427_v33 = vld [vmem:[%s21645_s1 + $0x2da4] ss:$16 sps:$4 sm:$0xff]   ;;  %v16430_v34 = vld [vmem:[%s21645_s1 + $0x2dac] ss:$16 sps:$4 sm:$0xff]  }
 0x578   :  { %10680 = vmatprep.subr.bf16.mxu0 %v16334_v35  ;;  %11755 = vmatprep.subr.bf16.mxu1 %v16337_v36  ;;  %v16425_v35 = vld [vmem:[%s21645_s1 + $0x2da0] ss:$16 sps:$4 sm:$0xff]   ;;  %v16428_v36 = vld [vmem:[%s21645_s1 + $0x2da8] ss:$16 sps:$4 sm:$0xff]  }
 0x57b   :  { %10681 = vmatpush1.bf16.msra.mxu0 %v16332_v37  ;;  %11756 = vmatpush1.bf16.msra.mxu1 %v16335_v38  ;;  %v16433_v37 = vld [vmem:[%s21645_s1 + $0x2dc4] ss:$16 sps:$4 sm:$0xff]   ;;  %v16436_v38 = vld [vmem:[%s21645_s1 + $0x2dcc] ss:$16 sps:$4 sm:$0xff]  }
 0x57c   :  { %10682 = vmatprep.subr.bf16.mxu0 %v16340_v39  ;;  %11757 = vmatprep.subr.bf16.mxu1 %v16343_v40  ;;  %v16431_v39 = vld [vmem:[%s21645_s1 + $0x2dc0] ss:$16 sps:$4 sm:$0xff]   ;;  %v16434_v40 = vld [vmem:[%s21645_s1 + $0x2dc8] ss:$16 sps:$4 sm:$0xff]  }
 0x57f   :  { %10683 = vmatpush1.bf16.msra.mxu0 %v16338_v41  ;;  %11758 = vmatpush1.bf16.msra.mxu1 %v16341_v42  ;;  %v16439_v41 = vld [vmem:[%s21645_s1 + $0x2de4] ss:$16 sps:$4 sm:$0xff]   ;;  %v16442_v42 = vld [vmem:[%s21645_s1 + $0x2dec] ss:$16 sps:$4 sm:$0xff]  }
 0x580   :  { %10695 = vmatprep.subr.bf16.mxu0 %v16349_v43  ;;  %11770 = vmatprep.subr.bf16.mxu1 %v16352_v44  ;;  %v16437_v43 = vld [vmem:[%s21645_s1 + $0x2de0] ss:$16 sps:$4 sm:$0xff]   ;;  %v16440_v44 = vld [vmem:[%s21645_s1 + $0x2de8] ss:$16 sps:$4 sm:$0xff]  }
 0x582   :  { %10685 = vmatmul.mubr.bf16.vlgmr.msra.gmra.mrb[0].mxu0 %v16344_v45  ;;  %11760 = vmatmul.mubr.bf16.vlgmr.msra.gmra.mrb[0].mxu1 %v16344_v45  ;;  %v16448_v45 = vld [vmem:[%s21645_s1 + $0x2e04] ss:$16 sps:$4 sm:$0xff]  }
 0x583   :  { %10696 = vmatpush1.bf16.msra.mxu0 %v16347_v46  ;;  %11771 = vmatpush1.bf16.msra.mxu1 %v16350_v47  ;;  %v16451_v46 = vld [vmem:[%s21645_s1 + $0x2e0c] ss:$16 sps:$4 sm:$0xff]   ;;  %v16443_v47 = vld [vmem:[%s21646_s0 + $0xb0] ss:$196 sps:$4 sm:$0xff]  }
 0x584   :  { %10697 = vmatprep.subr.bf16.mxu0 %v16355_v48  ;;  %11772 = vmatprep.subr.bf16.mxu1 %v16358_v49  ;;  %v16446_v48 = vld [vmem:[%s21645_s1 + $0x2e00] ss:$16 sps:$4 sm:$0xff]   ;;  %v16449_v49 = vld [vmem:[%s21645_s1 + $0x2e08] ss:$16 sps:$4 sm:$0xff]  }
 0x585   :  { %10727 = vmatprep.mubr.bf16.mxu0 %v16445_v50  ;;  %11802 = vmatprep.mubr.bf16.mxu1 %v16445_v50  ;;  %v16454_v50 = vld [vmem:[%s21645_s1 + $0x2e24] ss:$16 sps:$4 sm:$0xff]  }
 0x587   :  { %10698 = vmatpush1.bf16.msra.mxu0 %v16353_v51  ;;  %11773 = vmatpush1.bf16.msra.mxu1 %v16356_v52  ;;  %v16457_v51 = vld [vmem:[%s21645_s1 + $0x2e2c] ss:$16 sps:$4 sm:$0xff]  }
 0x588   :  { %10699 = vmatprep.subr.bf16.mxu0 %v16361_v53  ;;  %11774 = vmatprep.subr.bf16.mxu1 %v16364_v54  ;;  %v16544_v52 = vld [vmem:[%s21646_s0 + $0xbc] ss:$196 sps:$4 sm:$0xff]   ;;  %v16455_v54 = vld [vmem:[%s21645_s1 + $0x2e28] ss:$16 sps:$4 sm:$0xff]  }
 0x589   :  { %v16452_v53 = vld [vmem:[%s21645_s1 + $0x2e20] ss:$16 sps:$4 sm:$0xff]  }
 0x58b   :  { %10700 = vmatpush1.bf16.msra.mxu0 %v16359_v55  ;;  %11775 = vmatpush1.bf16.msra.mxu1 %v16362_v56  ;;  %v16460_v55 = vld [vmem:[%s21645_s1 + $0x2e44] ss:$16 sps:$4 sm:$0xff]   ;;  %v16463_v56 = vld [vmem:[%s21645_s1 + $0x2e4c] ss:$16 sps:$4 sm:$0xff]  }
 0x58c   :  { %10701 = vmatprep.subr.bf16.mxu0 %v16367_v57  ;;  %11776 = vmatprep.subr.bf16.mxu1 %v16370_v58  ;;  %v16458_v57 = vld [vmem:[%s21645_s1 + $0x2e40] ss:$16 sps:$4 sm:$0xff]   ;;  %v16461_v58 = vld [vmem:[%s21645_s1 + $0x2e48] ss:$16 sps:$4 sm:$0xff]  }
 0x58f   :  { %10702 = vmatpush1.bf16.msra.mxu0 %v16365_v59  ;;  %11777 = vmatpush1.bf16.msra.mxu1 %v16368_v60  ;;  %v16466_v59 = vld [vmem:[%s21645_s1 + $0x2e64] ss:$16 sps:$4 sm:$0xff]   ;;  %v16469_v60 = vld [vmem:[%s21645_s1 + $0x2e6c] ss:$16 sps:$4 sm:$0xff]  }
 0x590   :  { %10703 = vmatprep.subr.bf16.mxu0 %v16373_v61  ;;  %11778 = vmatprep.subr.bf16.mxu1 %v16376_v62  ;;  %v16464_v61 = vld [vmem:[%s21645_s1 + $0x2e60] ss:$16 sps:$4 sm:$0xff]   ;;  %v16467_v62 = vld [vmem:[%s21645_s1 + $0x2e68] ss:$16 sps:$4 sm:$0xff]  }
 0x593   :  { %10704 = vmatpush1.bf16.msra.mxu0 %v16371_v63  ;;  %11779 = vmatpush1.bf16.msra.mxu1 %v16374_v0  ;;  %v16472_v63 = vld [vmem:[%s21645_s1 + $0x2e84] ss:$16 sps:$4 sm:$0xff]   ;;  %v16475_v0 = vld [vmem:[%s21645_s1 + $0x2e8c] ss:$16 sps:$4 sm:$0xff]  }
 0x594   :  { %10705 = vmatprep.subr.bf16.mxu0 %v16379_v1  ;;  %11780 = vmatprep.subr.bf16.mxu1 %v16382_v2  ;;  %v16470_v1 = vld [vmem:[%s21645_s1 + $0x2e80] ss:$16 sps:$4 sm:$0xff]   ;;  %v16473_v2 = vld [vmem:[%s21645_s1 + $0x2e88] ss:$16 sps:$4 sm:$0xff]  }
 0x597   :  { %10706 = vmatpush1.bf16.msra.mxu0 %v16377_v3  ;;  %11781 = vmatpush1.bf16.msra.mxu1 %v16380_v4  ;;  %v16478_v3 = vld [vmem:[%s21645_s1 + $0x2ea4] ss:$16 sps:$4 sm:$0xff]   ;;  %v16481_v4 = vld [vmem:[%s21645_s1 + $0x2eac] ss:$16 sps:$4 sm:$0xff]  }
 0x598   :  { %10707 = vmatprep.subr.bf16.mxu0 %v16385_v5  ;;  %11782 = vmatprep.subr.bf16.mxu1 %v16388_v6  ;;  %v16476_v5 = vld [vmem:[%s21645_s1 + $0x2ea0] ss:$16 sps:$4 sm:$0xff]   ;;  %v16479_v6 = vld [vmem:[%s21645_s1 + $0x2ea8] ss:$16 sps:$4 sm:$0xff]  }
 0x59b   :  { %10708 = vmatpush1.bf16.msra.mxu0 %v16383_v7  ;;  %11783 = vmatpush1.bf16.msra.mxu1 %v16386_v8  ;;  %v16484_v7 = vld [vmem:[%s21645_s1 + $0x2ec4] ss:$16 sps:$4 sm:$0xff]   ;;  %v16487_v8 = vld [vmem:[%s21645_s1 + $0x2ecc] ss:$16 sps:$4 sm:$0xff]  }
 0x59c   :  { %10709 = vmatprep.subr.bf16.mxu0 %v16391_v9  ;;  %11784 = vmatprep.subr.bf16.mxu1 %v16394_v10  ;;  %v16482_v9 = vld [vmem:[%s21645_s1 + $0x2ec0] ss:$16 sps:$4 sm:$0xff]   ;;  %v16485_v10 = vld [vmem:[%s21645_s1 + $0x2ec8] ss:$16 sps:$4 sm:$0xff]  }
 0x59f   :  { %10710 = vmatpush1.bf16.msra.mxu0 %v16389_v11  ;;  %11785 = vmatpush1.bf16.msra.mxu1 %v16392_v12  ;;  %v16490_v11 = vld [vmem:[%s21645_s1 + $0x2ee4] ss:$16 sps:$4 sm:$0xff]   ;;  %v16493_v12 = vld [vmem:[%s21645_s1 + $0x2eec] ss:$16 sps:$4 sm:$0xff]  }
 0x5a0   :  { %10711 = vmatprep.subr.bf16.mxu0 %v16397_v13  ;;  %11786 = vmatprep.subr.bf16.mxu1 %v16400_v14  ;;  %v16488_v13 = vld [vmem:[%s21645_s1 + $0x2ee0] ss:$16 sps:$4 sm:$0xff]   ;;  %v16491_v14 = vld [vmem:[%s21645_s1 + $0x2ee8] ss:$16 sps:$4 sm:$0xff]  }
 0x5a3   :  { %10712 = vmatpush1.bf16.msra.mxu0 %v16395_v15  ;;  %11787 = vmatpush1.bf16.msra.mxu1 %v16398_v16  ;;  %v16496_v15 = vld [vmem:[%s21645_s1 + $0x2f04] ss:$16 sps:$4 sm:$0xff]   ;;  %v16499_v16 = vld [vmem:[%s21645_s1 + $0x2f0c] ss:$16 sps:$4 sm:$0xff]  }
 0x5a4   :  { %10713 = vmatprep.subr.bf16.mxu0 %v16403_v17  ;;  %11788 = vmatprep.subr.bf16.mxu1 %v16406_v18  ;;  %v16494_v17 = vld [vmem:[%s21645_s1 + $0x2f00] ss:$16 sps:$4 sm:$0xff]   ;;  %v16497_v18 = vld [vmem:[%s21645_s1 + $0x2f08] ss:$16 sps:$4 sm:$0xff]  }
 0x5a7   :  { %10714 = vmatpush1.bf16.msra.mxu0 %v16401_v19  ;;  %11789 = vmatpush1.bf16.msra.mxu1 %v16404_v20  ;;  %v16502_v19 = vld [vmem:[%s21645_s1 + $0x2f24] ss:$16 sps:$4 sm:$0xff]   ;;  %v16505_v20 = vld [vmem:[%s21645_s1 + $0x2f2c] ss:$16 sps:$4 sm:$0xff]  }
 0x5a8   :  { %10715 = vmatprep.subr.bf16.mxu0 %v16409_v21  ;;  %11790 = vmatprep.subr.bf16.mxu1 %v16412_v22  ;;  %v16500_v21 = vld [vmem:[%s21645_s1 + $0x2f20] ss:$16 sps:$4 sm:$0xff]   ;;  %v16503_v22 = vld [vmem:[%s21645_s1 + $0x2f28] ss:$16 sps:$4 sm:$0xff]  }
 0x5ab   :  { %10716 = vmatpush1.bf16.msra.mxu0 %v16407_v23  ;;  %11791 = vmatpush1.bf16.msra.mxu1 %v16410_v24  ;;  %v16508_v23 = vld [vmem:[%s21645_s1 + $0x2f44] ss:$16 sps:$4 sm:$0xff]   ;;  %v16511_v24 = vld [vmem:[%s21645_s1 + $0x2f4c] ss:$16 sps:$4 sm:$0xff]  }
 0x5ac   :  { %10717 = vmatprep.subr.bf16.mxu0 %v16415_v25  ;;  %11792 = vmatprep.subr.bf16.mxu1 %v16418_v26  ;;  %v16506_v25 = vld [vmem:[%s21645_s1 + $0x2f40] ss:$16 sps:$4 sm:$0xff]   ;;  %v16509_v26 = vld [vmem:[%s21645_s1 + $0x2f48] ss:$16 sps:$4 sm:$0xff]  }
 0x5af   :  { %10718 = vmatpush1.bf16.msra.mxu0 %v16413_v27  ;;  %11793 = vmatpush1.bf16.msra.mxu1 %v16416_v28  ;;  %v16514_v27 = vld [vmem:[%s21645_s1 + $0x2f64] ss:$16 sps:$4 sm:$0xff]   ;;  %v16517_v28 = vld [vmem:[%s21645_s1 + $0x2f6c] ss:$16 sps:$4 sm:$0xff]  }
 0x5b0   :  { %10719 = vmatprep.subr.bf16.mxu0 %v16421_v29  ;;  %11794 = vmatprep.subr.bf16.mxu1 %v16424_v30  ;;  %v16512_v29 = vld [vmem:[%s21645_s1 + $0x2f60] ss:$16 sps:$4 sm:$0xff]   ;;  %v16515_v30 = vld [vmem:[%s21645_s1 + $0x2f68] ss:$16 sps:$4 sm:$0xff]  }
 0x5b3   :  { %10720 = vmatpush1.bf16.msra.mxu0 %v16419_v31  ;;  %11795 = vmatpush1.bf16.msra.mxu1 %v16422_v32  ;;  %v16520_v31 = vld [vmem:[%s21645_s1 + $0x2f84] ss:$16 sps:$4 sm:$0xff]   ;;  %v16523_v32 = vld [vmem:[%s21645_s1 + $0x2f8c] ss:$16 sps:$4 sm:$0xff]  }
 0x5b4   :  { %10721 = vmatprep.subr.bf16.mxu0 %v16427_v33  ;;  %11796 = vmatprep.subr.bf16.mxu1 %v16430_v34  ;;  %v16518_v33 = vld [vmem:[%s21645_s1 + $0x2f80] ss:$16 sps:$4 sm:$0xff]   ;;  %v16521_v34 = vld [vmem:[%s21645_s1 + $0x2f88] ss:$16 sps:$4 sm:$0xff]  }
 0x5b7   :  { %10722 = vmatpush1.bf16.msra.mxu0 %v16425_v35  ;;  %11797 = vmatpush1.bf16.msra.mxu1 %v16428_v36  ;;  %v16526_v35 = vld [vmem:[%s21645_s1 + $0x2fa4] ss:$16 sps:$4 sm:$0xff]   ;;  %v16529_v36 = vld [vmem:[%s21645_s1 + $0x2fac] ss:$16 sps:$4 sm:$0xff]  }
 0x5b8   :  { %10723 = vmatprep.subr.bf16.mxu0 %v16433_v37  ;;  %11798 = vmatprep.subr.bf16.mxu1 %v16436_v38  ;;  %v16524_v37 = vld [vmem:[%s21645_s1 + $0x2fa0] ss:$16 sps:$4 sm:$0xff]   ;;  %v16527_v38 = vld [vmem:[%s21645_s1 + $0x2fa8] ss:$16 sps:$4 sm:$0xff]  }
 0x5bb   :  { %10724 = vmatpush1.bf16.msra.mxu0 %v16431_v39  ;;  %11799 = vmatpush1.bf16.msra.mxu1 %v16434_v40  ;;  %v16532_v39 = vld [vmem:[%s21645_s1 + $0x2fc4] ss:$16 sps:$4 sm:$0xff]   ;;  %v16535_v40 = vld [vmem:[%s21645_s1 + $0x2fcc] ss:$16 sps:$4 sm:$0xff]  }
 0x5bc   :  { %10725 = vmatprep.subr.bf16.mxu0 %v16439_v41  ;;  %11800 = vmatprep.subr.bf16.mxu1 %v16442_v42  ;;  %v16530_v41 = vld [vmem:[%s21645_s1 + $0x2fc0] ss:$16 sps:$4 sm:$0xff]   ;;  %v16533_v42 = vld [vmem:[%s21645_s1 + $0x2fc8] ss:$16 sps:$4 sm:$0xff]  }
 0x5bf   :  { %10726 = vmatpush1.bf16.msra.mxu0 %v16437_v43  ;;  %11801 = vmatpush1.bf16.msra.mxu1 %v16440_v44  ;;  %v16538_v43 = vld [vmem:[%s21645_s1 + $0x2fe4] ss:$16 sps:$4 sm:$0xff]   ;;  %v16541_v44 = vld [vmem:[%s21645_s1 + $0x2fec] ss:$16 sps:$4 sm:$0xff]  }
 0x5c0   :  { %10738 = vmatprep.subr.bf16.mxu0 %v16448_v45  ;;  %11813 = vmatprep.subr.bf16.mxu1 %v16451_v46  ;;  %v16536_v45 = vld [vmem:[%s21645_s1 + $0x2fe0] ss:$16 sps:$4 sm:$0xff]   ;;  %v16539_v46 = vld [vmem:[%s21645_s1 + $0x2fe8] ss:$16 sps:$4 sm:$0xff]  }
 0x5c2   :  { %10728 = vmatmul.mubr.bf16.vlgmr.msra.gmra.mrb[0].mxu0 %v16443_v47  ;;  %11803 = vmatmul.mubr.bf16.vlgmr.msra.gmra.mrb[0].mxu1 %v16443_v47  ;;  %v16547_v47 = vld [vmem:[%s21645_s1 + $0x3004] ss:$16 sps:$4 sm:$0xff]  }
 0x5c3   :  { %10739 = vmatpush1.bf16.msra.mxu0 %v16446_v48  ;;  %11814 = vmatpush1.bf16.msra.mxu1 %v16449_v49  ;;  %v16550_v48 = vld [vmem:[%s21645_s1 + $0x300c] ss:$16 sps:$4 sm:$0xff]  }
 0x5c4   :  { %10740 = vmatprep.subr.bf16.mxu0 %v16454_v50  ;;  %11815 = vmatprep.subr.bf16.mxu1 %v16457_v51  ;;  %v16542_v49 = vld [vmem:[%s21646_s0 + $0xb8] ss:$196 sps:$4 sm:$0xff]   ;;  %v16545_v50 = vld [vmem:[%s21645_s1 + $0x3000] ss:$16 sps:$4 sm:$0xff]  }
 0x5c5   :  { %10770 = vmatprep.mubr.bf16.mxu0 %v16544_v52  ;;  %11845 = vmatprep.mubr.bf16.mxu1 %v16544_v52  ;;  %v16548_v51 = vld [vmem:[%s21645_s1 + $0x3008] ss:$16 sps:$4 sm:$0xff]   ;;  %v16553_v52 = vld [vmem:[%s21645_s1 + $0x3024] ss:$16 sps:$4 sm:$0xff]  }
 0x5c7   :  { %10741 = vmatpush1.bf16.msra.mxu0 %v16452_v53  ;;  %11816 = vmatpush1.bf16.msra.mxu1 %v16455_v54  ;;  %v16556_v53 = vld [vmem:[%s21645_s1 + $0x302c] ss:$16 sps:$4 sm:$0xff]   ;;  %v16551_v54 = vld [vmem:[%s21645_s1 + $0x3020] ss:$16 sps:$4 sm:$0xff]  }
 0x5c8   :  { %10742 = vmatprep.subr.bf16.mxu0 %v16460_v55  ;;  %11817 = vmatprep.subr.bf16.mxu1 %v16463_v56  ;;  %v16554_v55 = vld [vmem:[%s21645_s1 + $0x3028] ss:$16 sps:$4 sm:$0xff]   ;;  %v16559_v56 = vld [vmem:[%s21645_s1 + $0x3044] ss:$16 sps:$4 sm:$0xff]  }
 0x5cb   :  { %10743 = vmatpush1.bf16.msra.mxu0 %v16458_v57  ;;  %11818 = vmatpush1.bf16.msra.mxu1 %v16461_v58  ;;  %v16562_v57 = vld [vmem:[%s21645_s1 + $0x304c] ss:$16 sps:$4 sm:$0xff]   ;;  %v16626_v58 = vmov 0  }
 0x5cc   :  { %10744 = vmatprep.subr.bf16.mxu0 %v16466_v59  ;;  %11819 = vmatprep.subr.bf16.mxu1 %v16469_v60  ;;  %v16557_v59 = vld [vmem:[%s21645_s1 + $0x3040] ss:$16 sps:$4 sm:$0xff]   ;;  %v16560_v60 = vld [vmem:[%s21645_s1 + $0x3048] ss:$16 sps:$4 sm:$0xff]  }
 0x5cf   :  { %10745 = vmatpush1.bf16.msra.mxu0 %v16464_v61  ;;  %11820 = vmatpush1.bf16.msra.mxu1 %v16467_v62  ;;  %v16565_v61 = vld [vmem:[%s21645_s1 + $0x3064] ss:$16 sps:$4 sm:$0xff]   ;;  %v16568_v62 = vld [vmem:[%s21645_s1 + $0x306c] ss:$16 sps:$4 sm:$0xff]  }
 0x5d0   :  { %10746 = vmatprep.subr.bf16.mxu0 %v16472_v63  ;;  %11821 = vmatprep.subr.bf16.mxu1 %v16475_v0  ;;  %v16563_v63 = vld [vmem:[%s21645_s1 + $0x3060] ss:$16 sps:$4 sm:$0xff]   ;;  %v16566_v0 = vld [vmem:[%s21645_s1 + $0x3068] ss:$16 sps:$4 sm:$0xff]  }
 0x5d3   :  { %10747 = vmatpush1.bf16.msra.mxu0 %v16470_v1  ;;  %11822 = vmatpush1.bf16.msra.mxu1 %v16473_v2  ;;  %v16571_v1 = vld [vmem:[%s21645_s1 + $0x3084] ss:$16 sps:$4 sm:$0xff]   ;;  %v16574_v2 = vld [vmem:[%s21645_s1 + $0x308c] ss:$16 sps:$4 sm:$0xff]  }
 0x5d4   :  { %10748 = vmatprep.subr.bf16.mxu0 %v16478_v3  ;;  %11823 = vmatprep.subr.bf16.mxu1 %v16481_v4  ;;  %v16569_v3 = vld [vmem:[%s21645_s1 + $0x3080] ss:$16 sps:$4 sm:$0xff]   ;;  %v16572_v4 = vld [vmem:[%s21645_s1 + $0x3088] ss:$16 sps:$4 sm:$0xff]  }
 0x5d7   :  { %10749 = vmatpush1.bf16.msra.mxu0 %v16476_v5  ;;  %11824 = vmatpush1.bf16.msra.mxu1 %v16479_v6  ;;  %v16577_v5 = vld [vmem:[%s21645_s1 + $0x30a4] ss:$16 sps:$4 sm:$0xff]   ;;  %v16580_v6 = vld [vmem:[%s21645_s1 + $0x30ac] ss:$16 sps:$4 sm:$0xff]  }
 0x5d8   :  { %10750 = vmatprep.subr.bf16.mxu0 %v16484_v7  ;;  %11825 = vmatprep.subr.bf16.mxu1 %v16487_v8  ;;  %v16575_v7 = vld [vmem:[%s21645_s1 + $0x30a0] ss:$16 sps:$4 sm:$0xff]   ;;  %v16578_v8 = vld [vmem:[%s21645_s1 + $0x30a8] ss:$16 sps:$4 sm:$0xff]  }
 0x5db   :  { %10751 = vmatpush1.bf16.msra.mxu0 %v16482_v9  ;;  %11826 = vmatpush1.bf16.msra.mxu1 %v16485_v10  ;;  %v16583_v9 = vld [vmem:[%s21645_s1 + $0x30c4] ss:$16 sps:$4 sm:$0xff]   ;;  %v16586_v10 = vld [vmem:[%s21645_s1 + $0x30cc] ss:$16 sps:$4 sm:$0xff]  }
 0x5dc   :  { %10752 = vmatprep.subr.bf16.mxu0 %v16490_v11  ;;  %11827 = vmatprep.subr.bf16.mxu1 %v16493_v12  ;;  %v16581_v11 = vld [vmem:[%s21645_s1 + $0x30c0] ss:$16 sps:$4 sm:$0xff]   ;;  %v16584_v12 = vld [vmem:[%s21645_s1 + $0x30c8] ss:$16 sps:$4 sm:$0xff]  }
 0x5df   :  { %10753 = vmatpush1.bf16.msra.mxu0 %v16488_v13  ;;  %11828 = vmatpush1.bf16.msra.mxu1 %v16491_v14  ;;  %v16589_v13 = vld [vmem:[%s21645_s1 + $0x30e4] ss:$16 sps:$4 sm:$0xff]   ;;  %v16592_v14 = vld [vmem:[%s21645_s1 + $0x30ec] ss:$16 sps:$4 sm:$0xff]  }
 0x5e0   :  { %10754 = vmatprep.subr.bf16.mxu0 %v16496_v15  ;;  %11829 = vmatprep.subr.bf16.mxu1 %v16499_v16  ;;  %v16587_v15 = vld [vmem:[%s21645_s1 + $0x30e0] ss:$16 sps:$4 sm:$0xff]   ;;  %v16590_v16 = vld [vmem:[%s21645_s1 + $0x30e8] ss:$16 sps:$4 sm:$0xff]  }
 0x5e3   :  { %10755 = vmatpush1.bf16.msra.mxu0 %v16494_v17  ;;  %11830 = vmatpush1.bf16.msra.mxu1 %v16497_v18  ;;  %v16594_v17 = vld [vmem:[%s21647_s3 + $0x40] sm:$0xff]  }
 0x5e4   :  { %10756 = vmatprep.subr.bf16.mxu0 %v16502_v19  ;;  %11831 = vmatprep.subr.bf16.mxu1 %v16505_v20  ;;  %v16595_v18 = vld [vmem:[%s21647_s3 + $0xc0] sm:$0xff]  }
 0x5e5   :  { %v16593_v19 = vld [vmem:[%s21646_s0 + $0xc0] ss:$196 sps:$4 sm:$0xff]  }
 0x5e6   :  { %v16596_v20 = vld [vmem:[%s21647_s3] sm:$0xff]  }
 0x5e7   :  { %10757 = vmatpush1.bf16.msra.mxu0 %v16500_v21  ;;  %11832 = vmatpush1.bf16.msra.mxu1 %v16503_v22  ;;  %v16597_v21 = vld [vmem:[%s21647_s3 + $0x80] sm:$0xff]   ;;  %v16598_v22 = vld [vmem:[%s21647_s3 + $0x48] sm:$0xff]  }
 0x5e8   :  { %10758 = vmatprep.subr.bf16.mxu0 %v16508_v23  ;;  %11833 = vmatprep.subr.bf16.mxu1 %v16511_v24  ;;  %v16599_v23 = vld [vmem:[%s21647_s3 + $0xc8] sm:$0xff]  }
 0x5e9   :  { %v16600_v24 = vld [vmem:[%s21647_s3 + $0x8] sm:$0xff]  }
 0x5eb   :  { %10759 = vmatpush1.bf16.msra.mxu0 %v16506_v25  ;;  %11834 = vmatpush1.bf16.msra.mxu1 %v16509_v26  ;;  %v16601_v25 = vld [vmem:[%s21647_s3 + $0x88] sm:$0xff]   ;;  %v16602_v26 = vld [vmem:[%s21647_s3 + $0x50] sm:$0xff]  }
 0x5ec   :  { %10760 = vmatprep.subr.bf16.mxu0 %v16514_v27  ;;  %11835 = vmatprep.subr.bf16.mxu1 %v16517_v28  ;;  %v16603_v27 = vld [vmem:[%s21647_s3 + $0xd0] sm:$0xff]  }
 0x5ed   :  { %v16604_v28 = vld [vmem:[%s21647_s3 + $0x10] sm:$0xff]  }
 0x5ef   :  { %10761 = vmatpush1.bf16.msra.mxu0 %v16512_v29  ;;  %11836 = vmatpush1.bf16.msra.mxu1 %v16515_v30  ;;  %v16605_v29 = vld [vmem:[%s21647_s3 + $0x90] sm:$0xff]   ;;  %v16606_v30 = vld [vmem:[%s21647_s3 + $0x58] sm:$0xff]  }
 0x5f0   :  { %10762 = vmatprep.subr.bf16.mxu0 %v16520_v31  ;;  %11837 = vmatprep.subr.bf16.mxu1 %v16523_v32  ;;  %v16607_v31 = vld [vmem:[%s21647_s3 + $0xd8] sm:$0xff]  }
 0x5f1   :  { %v16608_v32 = vld [vmem:[%s21647_s3 + $0x18] sm:$0xff]  }
 0x5f3   :  { %10763 = vmatpush1.bf16.msra.mxu0 %v16518_v33  ;;  %11838 = vmatpush1.bf16.msra.mxu1 %v16521_v34  ;;  %v16609_v33 = vld [vmem:[%s21647_s3 + $0x98] sm:$0xff]   ;;  %v16610_v34 = vld [vmem:[%s21647_s3 + $0x60] sm:$0xff]  }
 0x5f4   :  { %10764 = vmatprep.subr.bf16.mxu0 %v16526_v35  ;;  %11839 = vmatprep.subr.bf16.mxu1 %v16529_v36  ;;  %v16611_v35 = vld [vmem:[%s21647_s3 + $0xe0] sm:$0xff]  }
 0x5f5   :  { %v16612_v36 = vld [vmem:[%s21647_s3 + $0x20] sm:$0xff]  }
 0x5f7   :  { %10765 = vmatpush1.bf16.msra.mxu0 %v16524_v37  ;;  %11840 = vmatpush1.bf16.msra.mxu1 %v16527_v38  ;;  %v16613_v37 = vld [vmem:[%s21647_s3 + $0xa0] sm:$0xff]   ;;  %v16614_v38 = vld [vmem:[%s21647_s3 + $0x68] sm:$0xff]  }
 0x5f8   :  { %10766 = vmatprep.subr.bf16.mxu0 %v16532_v39  ;;  %11841 = vmatprep.subr.bf16.mxu1 %v16535_v40  ;;  %v16615_v39 = vld [vmem:[%s21647_s3 + $0xe8] sm:$0xff]  }
 0x5f9   :  { %v16616_v40 = vld [vmem:[%s21647_s3 + $0x28] sm:$0xff]  }
 0x5fb   :  { %10767 = vmatpush1.bf16.msra.mxu0 %v16530_v41  ;;  %11842 = vmatpush1.bf16.msra.mxu1 %v16533_v42  ;;  %v16617_v41 = vld [vmem:[%s21647_s3 + $0xa8] sm:$0xff]   ;;  %v16618_v42 = vld [vmem:[%s21647_s3 + $0x70] sm:$0xff]  }
 0x5fc   :  { %10768 = vmatprep.subr.bf16.mxu0 %v16538_v43  ;;  %11843 = vmatprep.subr.bf16.mxu1 %v16541_v44  ;;  %v16619_v43 = vld [vmem:[%s21647_s3 + $0xf0] sm:$0xff]  }
 0x5fd   :  { %v16620_v44 = vld [vmem:[%s21647_s3 + $0x30] sm:$0xff]  }
 0x5ff   :  { %10769 = vmatpush1.bf16.msra.mxu0 %v16536_v45  ;;  %11844 = vmatpush1.bf16.msra.mxu1 %v16539_v46  ;;  %v16621_v45 = vld [vmem:[%s21647_s3 + $0xb0] sm:$0xff]   ;;  %v16622_v46 = vld [vmem:[%s21647_s3 + $0x78] sm:$0xff]  }
 0x600   :  { %10781 = vmatprep.subr.bf16.mxu0 %v16547_v47  ;;  %11856 = vmatprep.subr.bf16.mxu1 %v16550_v48  ;;  %v16623_v47 = vld [vmem:[%s21647_s3 + $0xf8] sm:$0xff]  }
 0x601   :  { %v16624_v48 = vld [vmem:[%s21647_s3 + $0x38] sm:$0xff]  }
 0x602   :  { %10771 = vmatmul.mubr.bf16.vlgmr.msra.gmra.mrb[0].mxu0 %v16542_v49  ;;  %11846 = vmatmul.mubr.bf16.vlgmr.msra.gmra.mrb[0].mxu1 %v16542_v49  ;;  %v16625_v49 = vld [vmem:[%s21647_s3 + $0xb8] sm:$0xff]  }
 0x603   :  { %10782 = vmatpush1.bf16.msra.mxu0 %v16545_v50  ;;  %11857 = vmatpush1.bf16.msra.mxu1 %v16548_v51  ;;  %v1643_v50 = vlaneseq }
 0x604   :  { %10783 = vmatprep.subr.bf16.mxu0 %v16553_v52  ;;  %11858 = vmatprep.subr.bf16.mxu1 %v16556_v53 }
 0x605   :  { %10813 = vmatprep.mubr.bf16.mxu0 %v16626_v58  ;;  %11888 = vmatprep.mubr.bf16.mxu1 %v16626_v58  ;;  %v1644_v51 = vshrl.u32 %v1643_v50, 7 }
 0x607   :  { %10784 = vmatpush1.bf16.msra.mxu0 %v16551_v54  ;;  %11859 = vmatpush1.bf16.msra.mxu1 %v16554_v55  ;;  %v1645_v52 = vsub.s32 0, %v1644_v51  ;;  %v1653_v53 = vsub.s32 2, %v1644_v51  ;;  %v1641_v54 = vld [vmem:[%s21648_s2] sm:$0xf]  ;;  %v1649_v55 = vsub.s32 1, %v1644_v51 }
 0x608   :  { %10785 = vmatprep.subr.bf16.mxu0 %v16559_v56  ;;  %11860 = vmatprep.subr.bf16.mxu1 %v16562_v57  ;;  %v1657_v56 = vsub.s32 3, %v1644_v51 }
 0x609   :  { %v1646_v57 = vrot.slane %v1641_v54, %v1645_v52  ;;  %v1654_v58 = vrot.slane %v1641_v54, %v1653_v53 }
 0x60b   :  { %10786 = vmatpush1.bf16.msra.mxu0 %v16557_v59  ;;  %11861 = vmatpush1.bf16.msra.mxu1 %v16560_v60  ;;  %v1650_v59 = vrot.slane %v1641_v54, %v1649_v55  ;;  %v1658_v60 = vrot.slane %v1641_v54, %v1657_v56 }
 0x60c   :  { %10787 = vmatprep.subr.bf16.mxu0 %v16565_v61  ;;  %11862 = vmatprep.subr.bf16.mxu1 %v16568_v62 }
 0x60f   :  { %10788 = vmatpush1.bf16.msra.mxu0 %v16563_v63  ;;  %11863 = vmatpush1.bf16.msra.mxu1 %v16566_v0 }
 0x610   :  { %10789 = vmatprep.subr.bf16.mxu0 %v16571_v1  ;;  %11864 = vmatprep.subr.bf16.mxu1 %v16574_v2 }
 0x613   :  { %10790 = vmatpush1.bf16.msra.mxu0 %v16569_v3  ;;  %11865 = vmatpush1.bf16.msra.mxu1 %v16572_v4 }
 0x614   :  { %10791 = vmatprep.subr.bf16.mxu0 %v16577_v5  ;;  %11866 = vmatprep.subr.bf16.mxu1 %v16580_v6 }
 0x617   :  { %10792 = vmatpush1.bf16.msra.mxu0 %v16575_v7  ;;  %11867 = vmatpush1.bf16.msra.mxu1 %v16578_v8 }
 0x618   :  { %10793 = vmatprep.subr.bf16.mxu0 %v16583_v9  ;;  %11868 = vmatprep.subr.bf16.mxu1 %v16586_v10 }
 0x61b   :  { %10794 = vmatpush1.bf16.msra.mxu0 %v16581_v11  ;;  %11869 = vmatpush1.bf16.msra.mxu1 %v16584_v12 }
 0x61c   :  { %10795 = vmatprep.subr.bf16.mxu0 %v16589_v13  ;;  %11870 = vmatprep.subr.bf16.mxu1 %v16592_v14 }
 0x61f   :  { %10796 = vmatpush1.bf16.msra.mxu0 %v16587_v15  ;;  %11871 = vmatpush1.bf16.msra.mxu1 %v16590_v16 }
 0x620   :  { %13924 = vmatprep.subr.bf16.mxu0 %v16594_v17  ;;  %13946 = vmatprep.subr.bf16.mxu1 %v16595_v18 }
 0x622   :  { %10814 = vmatmul.mubr.bf16.vlgmr.msra.gmra.mrb[0].mxu0 %v16593_v19  ;;  %11889 = vmatmul.mubr.bf16.vlgmr.msra.gmra.mrb[0].mxu1 %v16593_v19 }
 0x623   :  { %13925 = vmatpush3.bf16.msra.mxu0 %v16596_v20  ;;  %13947 = vmatpush3.bf16.msra.mxu1 %v16597_v21 }
 0x624   :  { %13926 = vmatprep.subr.bf16.mxu0 %v16598_v22  ;;  %13948 = vmatprep.subr.bf16.mxu1 %v16599_v23 }
 0x627   :  { %13927 = vmatpush3.bf16.msra.mxu0 %v16600_v24  ;;  %13949 = vmatpush3.bf16.msra.mxu1 %v16601_v25 }
 0x628   :  { %13928 = vmatprep.subr.bf16.mxu0 %v16602_v26  ;;  %13950 = vmatprep.subr.bf16.mxu1 %v16603_v27  ;;  %v13891_v27 = vld [vmem:[%s21650_s4] ss:$0 sm:$0xff] }
 0x62b   :  { %13929 = vmatpush3.bf16.msra.mxu0 %v16604_v28  ;;  %13951 = vmatpush3.bf16.msra.mxu1 %v16605_v29 }
 0x62c   :  { %13930 = vmatprep.subr.bf16.mxu0 %v16606_v30  ;;  %13952 = vmatprep.subr.bf16.mxu1 %v16607_v31 }
 0x62f   :  { %13931 = vmatpush3.bf16.msra.mxu0 %v16608_v32  ;;  %13953 = vmatpush3.bf16.msra.mxu1 %v16609_v33 }
 0x630   :  { %13932 = vmatprep.subr.bf16.mxu0 %v16610_v34  ;;  %13954 = vmatprep.subr.bf16.mxu1 %v16611_v35 }
 0x633   :  { %13933 = vmatpush3.bf16.msra.mxu0 %v16612_v36  ;;  %13955 = vmatpush3.bf16.msra.mxu1 %v16613_v37 }
 0x634   :  { %13934 = vmatprep.subr.bf16.mxu0 %v16614_v38  ;;  %13956 = vmatprep.subr.bf16.mxu1 %v16615_v39 }
 0x637   :  { %13935 = vmatpush3.bf16.msra.mxu0 %v16616_v40  ;;  %13957 = vmatpush3.bf16.msra.mxu1 %v16617_v41 }
 0x638   :  { %13936 = vmatprep.subr.bf16.mxu0 %v16618_v42  ;;  %13958 = vmatprep.subr.bf16.mxu1 %v16619_v43 }
 0x63b   :  { %13937 = vmatpush3.bf16.msra.mxu0 %v16620_v44  ;;  %13959 = vmatpush3.bf16.msra.mxu1 %v16621_v45 }
 0x63c   :  { %13938 = vmatprep.subr.bf16.mxu0 %v16622_v46  ;;  %13960 = vmatprep.subr.bf16.mxu1 %v16623_v47 }
 0x63f   :  { %13939 = vmatpush3.bf16.msra.mxu0 %v16624_v48  ;;  %13961 = vmatpush3.bf16.msra.mxu1 %v16625_v49 }
 0x6f5   :  { %v10815_v61 = vpop.f32.mrb[0].mxu0  ;;  %v11890_v62 = vpop.f32.mrb[0].mxu1 }
 0x6f6   :  { %v13968_v63 = vadd.f32 %v10815_v61, %v1646_v57  ;;  %v13972_v0 = vadd.f32 %v11890_v62, %v1654_v58  ;;  %v10817_v1 = vpop.f32.mrb[1].mxu0  ;;  %v11892_v2 = vpop.f32.mrb[1].mxu1 }
 0x6f7   :  { %v13969_v3 = vadd.f32 %v10817_v1, %v1650_v59  ;;  %v13973_v4 = vadd.f32 %v11892_v2, %v1658_v60  ;;  %v10819_v5 = vpop.f32.mrb[2].mxu0  ;;  %v11894_v6 = vpop.f32.mrb[2].mxu1 }
 0x6f8   :  { %v11899_v7 = vmax.f32 %v13968_v63, 0.0  ;;  %v11901_v8 = vmax.f32 %v13972_v0, 0.0  ;;  %v13970_v9 = vadd.f32 %v10819_v5, %v1646_v57  ;;  %v13974_v10 = vadd.f32 %v11894_v6, %v1654_v58  ;;  %v10821_v11 = vpop.f32.mrb[3].mxu0  ;;  %v11896_v12 = vpop.f32.mrb[3].mxu1 }
 0x6f9   :  { %v11900_v13 = vmax.f32 %v13969_v3, 0.0  ;;  %v11902_v14 = vmax.f32 %v13973_v4, 0.0  ;;  %v13971_v15 = vadd.f32 %v10821_v11, %v1650_v59  ;;  %v13975_v16 = vadd.f32 %v11896_v12, %v1658_v60 }
 0x6fa   :  { %11907 = vst [vmem:[%s21649_s5] sm:$0xff] %v11899_v7  ;;  %11909 = vst [vmem:[%s21649_s5 + $0x10] sm:$0xff] %v11901_v8  ;;  %v11903_v17 = vmax.f32 %v13970_v9, 0.0  ;;  %v11905_v18 = vmax.f32 %v13974_v10, 0.0 }
 0x6fb   :  { %11908 = vst [vmem:[%s21649_s5 + $0x8] sm:$0xff] %v11900_v13  ;;  %11910 = vst [vmem:[%s21649_s5 + $0x18] sm:$0xff] %v11902_v14  ;;  %v11904_v19 = vmax.f32 %v13971_v15, 0.0  ;;  %v11906_v20 = vmax.f32 %v13975_v16, 0.0 }
 0x6fc   :  { %11911 = vst [vmem:[%s21649_s5 + $0x20] sm:$0xff] %v11903_v17  ;;  %v11915_v21 = vpack.c.bf16 %v11903_v17, %v11899_v7  ;;  %11913 = vst [vmem:[%s21649_s5 + $0x30] sm:$0xff] %v11905_v18  ;;  %v11917_v22 = vpack.c.bf16 %v11905_v18, %v11901_v8 }
 0x6fd   :  { %11912 = vst [vmem:[%s21649_s5 + $0x28] sm:$0xff] %v11904_v19  ;;  %v11916_v23 = vpack.c.bf16 %v11904_v19, %v11900_v13  ;;  %11914 = vst [vmem:[%s21649_s5 + $0x38] sm:$0xff] %v11906_v20  ;;  %v11918_v24 = vpack.c.bf16 %v11906_v20, %v11902_v14 }
 0x6ff   :  { %12214 = vmatprep.mubr.bf16.mxu0 %v11916_v23  ;;  %12255 = vmatprep.mubr.bf16.mxu1 %v11918_v24 }
 0x700   :  { %12215 = vmatmul.mubr.bf16.vlgmr.msra.gmra.mrb[4].mxu0 %v11915_v21  ;;  %12256 = vmatmul.mubr.bf16.vlgmr.msra.gmra.mrb[4].mxu1 %v11917_v22 }
 0x7d3   :  { %v13940_v25 = vpop.f32.mrb[4].mxu0  ;;  %v13962_v26 = vpop.f32.mrb[4].mxu1 }
 0x7d4   :  { %v13941_v28 = vpop.f32.mrb[5].mxu0  ;;  %v13963_v29 = vpop.f32.mrb[5].mxu1 }
 0x7d5   :  { %v13942_v30 = vadd.f32 %v13941_v28, %v13940_v25  ;;  %v13964_v31 = vadd.f32 %v13963_v29, %v13962_v26  ;;  %v13943_v32 = vpop.f32.mrb[6].mxu0  ;;  %v13965_v33 = vpop.f32.mrb[6].mxu1 }
 0x7d6   :  { %v13944_v34 = vpop.f32.mrb[7].mxu0  ;;  %v13966_v35 = vpop.f32.mrb[7].mxu1 }
 0x7d7   :  { %v12217_v36 = vadd.f32 %v13942_v30, %v13891_v27  ;;  %v13945_v37 = vadd.f32 %v13944_v34, %v13943_v32  ;;  %v13967_v38 = vadd.f32 %v13966_v35, %v13965_v33 }
 0x7d9   :  { %v12258_v39 = vadd.f32 %v13964_v31, %v12217_v36  ;;  %v12220_v40 = vadd.f32 %v13945_v37, %v13891_v27 }
 0x7db   :  { %12264 = vst [vmem:[%s21651_s6] sm:$0xff] %v12258_v39  ;;  %v12261_v41 = vadd.f32 %v13967_v38, %v12220_v40 }
 0x7dd   :  { %12265 = vst [vmem:[%s21651_s6 + $0x8] sm:$0xff] %v12261_v41 }

</bundles_post_ra>
